<compile_context>
chip_gen: v5e
topology: v5e:2x2
jax: 0.10.0
libtpu: 0.0.40
codegen_flags: <defaults>
</compile_context>

<pallas_src>
import functools

import jax
import jax.numpy as jnp
from jax.experimental import pallas as pl
from jax.experimental.pallas import tpu as pltpu


# ----------------------------- kernel body ----------------------------------

def sae_kernel(x_ref,
               w1_ref, b1_ref,
               w2_ref, b2_ref,
               w3_ref, b3_ref,
               w4_ref, b4_ref,
               o_ref):
    cdt = w1_ref.dtype  # matmul operand dtype (bf16 on v6e/v7x, f32 for testing/v5e)

    # encoder1: [bb, Fp] @ [Fp, 512] -> f32 accumulate on the MXU
    h = jnp.dot(x_ref[...], w1_ref[...], preferred_element_type=jnp.float32)
    h = jnp.maximum(h + b1_ref[...], 0.0)          # bias + ReLU in f32 (VPU)
    # encoder2: [bb, 512] @ [512, 128]
    h = jnp.dot(h.astype(cdt), w2_ref[...], preferred_element_type=jnp.float32)
    h = jnp.maximum(h + b2_ref[...], 0.0)
    # decoder1: [bb, 128] @ [128, 512]
    h = jnp.dot(h.astype(cdt), w3_ref[...], preferred_element_type=jnp.float32)
    h = jnp.maximum(h + b3_ref[...], 0.0)
    # decoder2: [bb, 512] @ [512, Fp]
    h = jnp.dot(h.astype(cdt), w4_ref[...], preferred_element_type=jnp.float32)
    o_ref[...] = jnp.maximum(h + b4_ref[...], 0.0).astype(o_ref.dtype)


# ----------------------------- helpers ---------------------------------------

def _round_up(x, m):
    return (x + m - 1) // m * m


def _choose_block_b(batch):
    """Pick the batch tile: target 256 rows (good MXU utilization on all gens),
    but keep >= 2 grid steps when the batch allows so both v7x TensorCores run."""
    if batch <= 16:
        return 16
    target = 256
    if batch >= 2 * target:
        return target
    half = (batch + 1) // 2
    return min(target, _round_up(half, 16))


def prepare_params(params, compute_dtype=jnp.bfloat16):
    """One-time parameter prep (hoisted out of the per-call path):
      * transpose PyTorch [out, in] weights -> [in, out] for x @ W,
      * cast matmul operands to compute_dtype (bf16 recommended on v6e/v7x),
      * keep biases in f32 as [1, out] for lane-aligned broadcast,
      * pad the feature dim to a multiple of 128 for lane-dense loads/stores.
    """
    F = params["encoder1_w"].shape[1]
    Fp = max(128, _round_up(F, 128))
    prep = {}
    for name in ("encoder1", "encoder2", "decoder1", "decoder2"):
        w = jnp.asarray(params[f"{name}_w"]).T.astype(compute_dtype)   # [in, out]
        b = jnp.asarray(params[f"{name}_b"], jnp.float32)[None, :]     # [1, out]
        if name == "encoder1" and Fp != F:
            w = jnp.pad(w, ((0, Fp - F), (0, 0)))                      # zero in-rows
        if name == "decoder2" and Fp != F:
            w = jnp.pad(w, ((0, 0), (0, Fp - F)))                      # zero out-cols
            b = jnp.pad(b, ((0, 0), (0, Fp - F)))
        prep[f"{name}_w"] = w
        prep[f"{name}_b"] = b
    return prep


# ----------------------------- forward wrapper --------------------------------

@functools.partial(jax.jit, static_argnames=("block_b", "single_buffer_weights"))
def sae_forward(x, prep, *, block_b=None, single_buffer_weights=True):
    """x: [B, F] float32.  prep: output of prepare_params()."""
    B, F = x.shape
    w1, b1 = prep["encoder1_w"], prep["encoder1_b"]
    w2, b2 = prep["encoder2_w"], prep["encoder2_b"]
    w3, b3 = prep["decoder1_w"], prep["decoder1_b"]
    w4, b4 = prep["decoder2_w"], prep["decoder2_b"]

    Fp = w1.shape[0]                    # padded feature dim (multiple of 128)
    H1, H2 = w1.shape[1], w2.shape[1]   # 512, 128
    compute_dtype = w1.dtype
    out_dtype = x.dtype

    if block_b is None:
        block_b = _choose_block_b(B)

    w_bytes = sum(int(w.size) * w.dtype.itemsize for w in (w1, w2, w3, w4))
    b_bytes = sum(int(b.size) * b.dtype.itemsize for b in (b1, b2, b3, b4))
    w_mult = 1 if single_buffer_weights else 2

    def est_vmem(bb):
        io = 2 * bb * Fp * jnp.dtype(compute_dtype).itemsize \
           + 2 * bb * Fp * jnp.dtype(out_dtype).itemsize        # double-buffered x/out tiles
        acts = 3 * bb * H1 * 4                                   # f32 intermediates
        return w_mult * w_bytes + 2 * b_bytes + io + acts

    # Shrink the batch tile if the working set would not fit comfortably in VMEM
    # (v7x only has 64 MiB; leave room for compiler scratch).
    while block_b > 16 and est_vmem(block_b) > (40 << 20):
        block_b = max(16, _round_up(block_b // 2, 16))

    Bp = _round_up(B, block_b)
    xp = x
    if Bp != B or Fp != F:
        xp = jnp.pad(x, ((0, Bp - B), (0, Fp - F)))
    xp = xp.astype(compute_dtype)

    grid = (Bp // block_b,)

    def rep_spec(shape):
        # Weights/biases are grid-invariant -> single-buffer them to save VMEM.
        if single_buffer_weights:
            return pl.BlockSpec(shape, lambda i: (0, 0), pipeline_mode=pl.Buffered(1))
        return pl.BlockSpec(shape, lambda i: (0, 0))

    flops = 2 * Bp * (Fp * H1 + H1 * H2 + H2 * H1 + H1 * Fp)
    bytes_accessed = (int(xp.size) * xp.dtype.itemsize
                      + Bp * Fp * jnp.dtype(out_dtype).itemsize
                      + w_bytes + b_bytes)
    cost = pl.CostEstimate(flops=int(flops), transcendentals=0,
                           bytes_accessed=int(bytes_accessed))

    vmem_limit = int(min(max(est_vmem(block_b) + (8 << 20), 32 << 20), 64 << 20))

    out = pl.pallas_call(
        sae_kernel,
        out_shape=jax.ShapeDtypeStruct((Bp, Fp), out_dtype),
        grid_spec=pltpu.PrefetchScalarGridSpec(
            num_scalar_prefetch=0,
            grid=grid,
            in_specs=[
                pl.BlockSpec((block_b, Fp), lambda i: (i, 0)),   # streaming x tile
                rep_spec(w1.shape), rep_spec(b1.shape),
                rep_spec(w2.shape), rep_spec(b2.shape),
                rep_spec(w3.shape), rep_spec(b3.shape),
                rep_spec(w4.shape), rep_spec(b4.shape),
            ],
            out_specs=pl.BlockSpec((block_b, Fp), lambda i: (i, 0)),
        ),
        compiler_params=pltpu.CompilerParams(
            dimension_semantics=("parallel",),
            vmem_limit_bytes=vmem_limit),
        cost_estimate=cost,
    )(xp, w1, b1, w2, b2, w3, b3, w4, b4)

    if Bp != B or Fp != F:
        out = out[:B, :F]
    return out


# ----------------------------- reference & init -------------------------------

def init_params(key, input_size):
    """Synthetic init matching nn.Linear shapes: weight [out, in], bias [out]."""
    dims = [
        ("encoder1", input_size, 512),
        ("encoder2", 512, 128),
        ("decoder1", 128, 512),
        ("decoder2", 512, input_size),
    ]
    params = {}
    for name, fan_in, fan_out in dims:
        key, kw, kb = jax.random.split(key, 3)
        bound = 1.0 / jnp.sqrt(fan_in)
        params[f"{name}_w"] = jax.random.uniform(
            kw, (fan_out, fan_in), jnp.float32, -bound, bound)
        params[f"{name}_b"] = jax.random.uniform(
            kb, (fan_out,), jnp.float32, -bound, bound)
    return params


def sae_reference(x, params):
    h = x
    for name in ("encoder1", "encoder2", "decoder1", "decoder2"):
        w = params[f"{name}_w"]
        b = params[f"{name}_b"]
        h = jnp.maximum(h @ w.T + b, 0.0)
    return h


def _run(x, prep):
    # Safety net: if this jax/Mosaic build rejects single-buffered replicated
    # operands (pl.Buffered(1)), fall back to default double buffering.
    try:
        return jax.block_until_ready(sae_forward(x, prep))
    except Exception:
        return jax.block_until_ready(
            sae_forward(x, prep, single_buffer_weights=False))


# ----------------------------- demo / self-test --------------------------------

if __name__ == "__main__":
    input_size = 256
    batch = 500   # not a multiple of the 256-row tile: exercises pad-and-slice,
                  # pads to 512 -> 2 grid steps (both v7x TensorCores busy)

    key = jax.random.PRNGKey(0)
    key, kx = jax.random.split(key)
    x = jax.random.normal(kx, (batch, input_size), jnp.float32)
    params = init_params(key, input_size)
    ref = sae_reference(x, params)

    # bf16 matmul operands (recommended on v6e/v7x), f32 accumulate / bias / ReLU.
    out_bf16 = _run(x, prepare_params(params, jnp.bfloat16))
    assert out_bf16.shape == (batch, input_size)
    assert jnp.allclose(out_bf16, ref, atol=5e-2, rtol=5e-2), \
        "bf16 kernel mismatch vs f32 reference"

    # Pure f32 path (testing / v5e): tight tolerance.
    out_f32 = _run(x, prepare_params(params, jnp.float32))
    assert jnp.allclose(out_f32, ref, atol=1e-4, rtol=1e-4), \
        "f32 kernel mismatch vs reference"

    print("KERNEL_OK")
</pallas_src>

<mosaic_0001>
module attributes {stable_mosaic.version = 11 : i64} {
  func.func @sae_kernel(%arg0: i32, %arg1: memref<256x256xbf16, #tpu.memory_space<vmem>>, %arg2: memref<256x512xbf16, #tpu.memory_space<vmem>>, %arg3: memref<1x512xf32, #tpu.memory_space<vmem>>, %arg4: memref<512x128xbf16, #tpu.memory_space<vmem>>, %arg5: memref<1x128xf32, #tpu.memory_space<vmem>>, %arg6: memref<128x512xbf16, #tpu.memory_space<vmem>>, %arg7: memref<1x512xf32, #tpu.memory_space<vmem>>, %arg8: memref<512x256xbf16, #tpu.memory_space<vmem>>, %arg9: memref<1x256xf32, #tpu.memory_space<vmem>>, %arg10: memref<256x256xf32, #tpu.memory_space<vmem>>) attributes {dimension_semantics = [#tpu.dimension_semantics<parallel>], iteration_bounds = array<i64: 2>, scalar_prefetch = 0 : i64, scratch_operands = 0 : i64, tpu.core_type = #tpu.core_type<tc>, window_params = [{transform_indices = @transform_0, window_bounds = array<i64: 256, 256>}, {pipeline_mode = #tpu.pipeline_mode<synchronous>, transform_indices = @transform_1, window_bounds = array<i64: 256, 512>}, {pipeline_mode = #tpu.pipeline_mode<synchronous>, transform_indices = @transform_2, window_bounds = array<i64: 1, 512>}, {pipeline_mode = #tpu.pipeline_mode<synchronous>, transform_indices = @transform_3, window_bounds = array<i64: 512, 128>}, {pipeline_mode = #tpu.pipeline_mode<synchronous>, transform_indices = @transform_4, window_bounds = array<i64: 1, 128>}, {pipeline_mode = #tpu.pipeline_mode<synchronous>, transform_indices = @transform_5, window_bounds = array<i64: 128, 512>}, {pipeline_mode = #tpu.pipeline_mode<synchronous>, transform_indices = @transform_6, window_bounds = array<i64: 1, 512>}, {pipeline_mode = #tpu.pipeline_mode<synchronous>, transform_indices = @transform_7, window_bounds = array<i64: 512, 256>}, {pipeline_mode = #tpu.pipeline_mode<synchronous>, transform_indices = @transform_8, window_bounds = array<i64: 1, 256>}, {transform_indices = @transform_9, window_bounds = array<i64: 256, 256>}]} {
    %c0 = arith.constant 0 : index
    %c0_0 = arith.constant 0 : index
    %0 = vector.load %arg1[%c0, %c0_0] : memref<256x256xbf16, #tpu.memory_space<vmem>>, vector<256x256xbf16>
    %c0_1 = arith.constant 0 : index
    %c0_2 = arith.constant 0 : index
    %1 = vector.load %arg2[%c0_1, %c0_2] : memref<256x512xbf16, #tpu.memory_space<vmem>>, vector<256x512xbf16>
    %cst = arith.constant dense<0.000000e+00> : vector<256x512xf32>
    %2 = tpu.matmul %0, %1, %cst {dimension_numbers = #tpu.dot_dimension_numbers<[1], [0], [0], [1], [0, 0, 1, 1], [], []>} : vector<256x256xbf16>, vector<256x512xbf16>, vector<256x512xf32> -> vector<256x512xf32>
    %c0_3 = arith.constant 0 : index
    %c0_4 = arith.constant 0 : index
    %3 = vector.load %arg3[%c0_3, %c0_4] : memref<1x512xf32, #tpu.memory_space<vmem>>, vector<1x512xf32>
    %4 = vector.broadcast %3 : vector<1x512xf32> to vector<256x512xf32>
    %5 = arith.addf %2, %4 : vector<256x512xf32>
    %cst_5 = arith.constant 0.000000e+00 : f32
    %6 = vector.broadcast %cst_5 : f32 to vector<256x512xf32>
    %7 = arith.maximumf %5, %6 : vector<256x512xf32>
    %8 = arith.truncf %7 : vector<256x512xf32> to vector<256x512xbf16>
    %c0_6 = arith.constant 0 : index
    %c0_7 = arith.constant 0 : index
    %9 = vector.load %arg4[%c0_6, %c0_7] : memref<512x128xbf16, #tpu.memory_space<vmem>>, vector<512x128xbf16>
    %cst_8 = arith.constant dense<0.000000e+00> : vector<256x128xf32>
    %10 = tpu.matmul %8, %9, %cst_8 {dimension_numbers = #tpu.dot_dimension_numbers<[1], [0], [0], [1], [0, 0, 1, 1], [], []>} : vector<256x512xbf16>, vector<512x128xbf16>, vector<256x128xf32> -> vector<256x128xf32>
    %c0_9 = arith.constant 0 : index
    %c0_10 = arith.constant 0 : index
    %11 = vector.load %arg5[%c0_9, %c0_10] : memref<1x128xf32, #tpu.memory_space<vmem>>, vector<1x128xf32>
    %12 = vector.broadcast %11 : vector<1x128xf32> to vector<256x128xf32>
    %13 = arith.addf %10, %12 : vector<256x128xf32>
    %cst_11 = arith.constant 0.000000e+00 : f32
    %14 = vector.broadcast %cst_11 : f32 to vector<256x128xf32>
    %15 = arith.maximumf %13, %14 : vector<256x128xf32>
    %16 = arith.truncf %15 : vector<256x128xf32> to vector<256x128xbf16>
    %c0_12 = arith.constant 0 : index
    %c0_13 = arith.constant 0 : index
    %17 = vector.load %arg6[%c0_12, %c0_13] : memref<128x512xbf16, #tpu.memory_space<vmem>>, vector<128x512xbf16>
    %cst_14 = arith.constant dense<0.000000e+00> : vector<256x512xf32>
    %18 = tpu.matmul %16, %17, %cst_14 {dimension_numbers = #tpu.dot_dimension_numbers<[1], [0], [0], [1], [0, 0, 1, 1], [], []>} : vector<256x128xbf16>, vector<128x512xbf16>, vector<256x512xf32> -> vector<256x512xf32>
    %c0_15 = arith.constant 0 : index
    %c0_16 = arith.constant 0 : index
    %19 = vector.load %arg7[%c0_15, %c0_16] : memref<1x512xf32, #tpu.memory_space<vmem>>, vector<1x512xf32>
    %20 = vector.broadcast %19 : vector<1x512xf32> to vector<256x512xf32>
    %21 = arith.addf %18, %20 : vector<256x512xf32>
    %cst_17 = arith.constant 0.000000e+00 : f32
    %22 = vector.broadcast %cst_17 : f32 to vector<256x512xf32>
    %23 = arith.maximumf %21, %22 : vector<256x512xf32>
    %24 = arith.truncf %23 : vector<256x512xf32> to vector<256x512xbf16>
    %c0_18 = arith.constant 0 : index
    %c0_19 = arith.constant 0 : index
    %25 = vector.load %arg8[%c0_18, %c0_19] : memref<512x256xbf16, #tpu.memory_space<vmem>>, vector<512x256xbf16>
    %cst_20 = arith.constant dense<0.000000e+00> : vector<256x256xf32>
    %26 = tpu.matmul %24, %25, %cst_20 {dimension_numbers = #tpu.dot_dimension_numbers<[1], [0], [0], [1], [0, 0, 1, 1], [], []>} : vector<256x512xbf16>, vector<512x256xbf16>, vector<256x256xf32> -> vector<256x256xf32>
    %c0_21 = arith.constant 0 : index
    %c0_22 = arith.constant 0 : index
    %27 = vector.load %arg9[%c0_21, %c0_22] : memref<1x256xf32, #tpu.memory_space<vmem>>, vector<1x256xf32>
    %28 = vector.broadcast %27 : vector<1x256xf32> to vector<256x256xf32>
    %29 = arith.addf %26, %28 : vector<256x256xf32>
    %cst_23 = arith.constant 0.000000e+00 : f32
    %30 = vector.broadcast %cst_23 : f32 to vector<256x256xf32>
    %31 = arith.maximumf %29, %30 : vector<256x256xf32>
    %c0_24 = arith.constant 0 : index
    %c0_25 = arith.constant 0 : index
    %32 = vector.load %arg10[%c0_24, %c0_25] : memref<256x256xf32, #tpu.memory_space<vmem>>, vector<256x256xf32>
    tpu.vector_store %arg10[%c0_24, %c0_25], %31 {strides = array<i32>} : memref<256x256xf32, #tpu.memory_space<vmem>>, vector<256x256xf32>,
    return
  }
  func.func @transform_0(%arg0: i32) -> (i32, i32) {
    %c0_i32 = arith.constant 0 : i32
    %c0_i32_0 = arith.constant 0 : i32
    return %arg0, %c0_i32 : i32, i32
  }
  func.func @transform_1(%arg0: i32) -> (i32, i32) {
    %c0_i32 = arith.constant 0 : i32
    %c0_i32_0 = arith.constant 0 : i32
    %c0_i32_1 = arith.constant 0 : i32
    return %c0_i32, %c0_i32_0 : i32, i32
  }
  func.func @transform_2(%arg0: i32) -> (i32, i32) {
    %c0_i32 = arith.constant 0 : i32
    %c0_i32_0 = arith.constant 0 : i32
    %c0_i32_1 = arith.constant 0 : i32
    return %c0_i32, %c0_i32_0 : i32, i32
  }
  func.func @transform_3(%arg0: i32) -> (i32, i32) {
    %c0_i32 = arith.constant 0 : i32
    %c0_i32_0 = arith.constant 0 : i32
    %c0_i32_1 = arith.constant 0 : i32
    return %c0_i32, %c0_i32_0 : i32, i32
  }
  func.func @transform_4(%arg0: i32) -> (i32, i32) {
    %c0_i32 = arith.constant 0 : i32
    %c0_i32_0 = arith.constant 0 : i32
    %c0_i32_1 = arith.constant 0 : i32
    return %c0_i32, %c0_i32_0 : i32, i32
  }
  func.func @transform_5(%arg0: i32) -> (i32, i32) {
    %c0_i32 = arith.constant 0 : i32
    %c0_i32_0 = arith.constant 0 : i32
    %c0_i32_1 = arith.constant 0 : i32
    return %c0_i32, %c0_i32_0 : i32, i32
  }
  func.func @transform_6(%arg0: i32) -> (i32, i32) {
    %c0_i32 = arith.constant 0 : i32
    %c0_i32_0 = arith.constant 0 : i32
    %c0_i32_1 = arith.constant 0 : i32
    return %c0_i32, %c0_i32_0 : i32, i32
  }
  func.func @transform_7(%arg0: i32) -> (i32, i32) {
    %c0_i32 = arith.constant 0 : i32
    %c0_i32_0 = arith.constant 0 : i32
    %c0_i32_1 = arith.constant 0 : i32
    return %c0_i32, %c0_i32_0 : i32, i32
  }
  func.func @transform_8(%arg0: i32) -> (i32, i32) {
    %c0_i32 = arith.constant 0 : i32
    %c0_i32_0 = arith.constant 0 : i32
    %c0_i32_1 = arith.constant 0 : i32
    return %c0_i32, %c0_i32_0 : i32, i32
  }
  func.func @transform_9(%arg0: i32) -> (i32, i32) {
    %c0_i32 = arith.constant 0 : i32
    %c0_i32_0 = arith.constant 0 : i32
    return %arg0, %c0_i32 : i32, i32
  }
}

module attributes {stable_mosaic.version = 11 : i64} {
  func.func @sae_kernel(%arg0: i32, %arg1: memref<256x256xbf16, #tpu.memory_space<vmem>>, %arg2: memref<256x512xbf16, #tpu.memory_space<vmem>>, %arg3: memref<1x512xf32, #tpu.memory_space<vmem>>, %arg4: memref<512x128xbf16, #tpu.memory_space<vmem>>, %arg5: memref<1x128xf32, #tpu.memory_space<vmem>>, %arg6: memref<128x512xbf16, #tpu.memory_space<vmem>>, %arg7: memref<1x512xf32, #tpu.memory_space<vmem>>, %arg8: memref<512x256xbf16, #tpu.memory_space<vmem>>, %arg9: memref<1x256xf32, #tpu.memory_space<vmem>>, %arg10: memref<256x256xf32, #tpu.memory_space<vmem>>) attributes {dimension_semantics = [#tpu.dimension_semantics<parallel>], iteration_bounds = array<i64: 2>, scalar_prefetch = 0 : i64, scratch_operands = 0 : i64, tpu.core_type = #tpu.core_type<tc>, window_params = [{transform_indices = @transform_0, window_bounds = array<i64: 256, 256>}, {pipeline_mode = #tpu.pipeline_mode<synchronous>, transform_indices = @transform_1, window_bounds = array<i64: 256, 512>}, {pipeline_mode = #tpu.pipeline_mode<synchronous>, transform_indices = @transform_2, window_bounds = array<i64: 1, 512>}, {pipeline_mode = #tpu.pipeline_mode<synchronous>, transform_indices = @transform_3, window_bounds = array<i64: 512, 128>}, {pipeline_mode = #tpu.pipeline_mode<synchronous>, transform_indices = @transform_4, window_bounds = array<i64: 1, 128>}, {pipeline_mode = #tpu.pipeline_mode<synchronous>, transform_indices = @transform_5, window_bounds = array<i64: 128, 512>}, {pipeline_mode = #tpu.pipeline_mode<synchronous>, transform_indices = @transform_6, window_bounds = array<i64: 1, 512>}, {pipeline_mode = #tpu.pipeline_mode<synchronous>, transform_indices = @transform_7, window_bounds = array<i64: 512, 256>}, {pipeline_mode = #tpu.pipeline_mode<synchronous>, transform_indices = @transform_8, window_bounds = array<i64: 1, 256>}, {transform_indices = @transform_9, window_bounds = array<i64: 256, 256>}]} {
    %c0 = arith.constant 0 : index
    %c0_0 = arith.constant 0 : index
    %0 = vector.load %arg1[%c0, %c0_0] : memref<256x256xbf16, #tpu.memory_space<vmem>>, vector<256x256xbf16>
    %c0_1 = arith.constant 0 : index
    %c0_2 = arith.constant 0 : index
    %1 = vector.load %arg2[%c0_1, %c0_2] : memref<256x512xbf16, #tpu.memory_space<vmem>>, vector<256x512xbf16>
    %cst = arith.constant dense<0.000000e+00> : vector<256x512xf32>
    %2 = tpu.matmul %0, %1, %cst {dimension_numbers = #tpu.dot_dimension_numbers<[1], [0], [0], [1], [0, 0, 1, 1], [], []>} : vector<256x256xbf16>, vector<256x512xbf16>, vector<256x512xf32> -> vector<256x512xf32>
    %c0_3 = arith.constant 0 : index
    %c0_4 = arith.constant 0 : index
    %3 = vector.load %arg3[%c0_3, %c0_4] : memref<1x512xf32, #tpu.memory_space<vmem>>, vector<1x512xf32>
    %4 = vector.broadcast %3 : vector<1x512xf32> to vector<256x512xf32>
    %5 = arith.addf %2, %4 : vector<256x512xf32>
    %cst_5 = arith.constant 0.000000e+00 : f32
    %6 = vector.broadcast %cst_5 : f32 to vector<256x512xf32>
    %7 = arith.maximumf %5, %6 : vector<256x512xf32>
    %8 = arith.truncf %7 : vector<256x512xf32> to vector<256x512xbf16>
    %c0_6 = arith.constant 0 : index
    %c0_7 = arith.constant 0 : index
    %9 = vector.load %arg4[%c0_6, %c0_7] : memref<512x128xbf16, #tpu.memory_space<vmem>>, vector<512x128xbf16>
    %cst_8 = arith.constant dense<0.000000e+00> : vector<256x128xf32>
    %10 = tpu.matmul %8, %9, %cst_8 {dimension_numbers = #tpu.dot_dimension_numbers<[1], [0], [0], [1], [0, 0, 1, 1], [], []>} : vector<256x512xbf16>, vector<512x128xbf16>, vector<256x128xf32> -> vector<256x128xf32>
    %c0_9 = arith.constant 0 : index
    %c0_10 = arith.constant 0 : index
    %11 = vector.load %arg5[%c0_9, %c0_10] : memref<1x128xf32, #tpu.memory_space<vmem>>, vector<1x128xf32>
    %12 = vector.broadcast %11 : vector<1x128xf32> to vector<256x128xf32>
    %13 = arith.addf %10, %12 : vector<256x128xf32>
    %cst_11 = arith.constant 0.000000e+00 : f32
    %14 = vector.broadcast %cst_11 : f32 to vector<256x128xf32>
    %15 = arith.maximumf %13, %14 : vector<256x128xf32>
    %16 = arith.truncf %15 : vector<256x128xf32> to vector<256x128xbf16>
    %c0_12 = arith.constant 0 : index
    %c0_13 = arith.constant 0 : index
    %17 = vector.load %arg6[%c0_12, %c0_13] : memref<128x512xbf16, #tpu.memory_space<vmem>>, vector<128x512xbf16>
    %cst_14 = arith.constant dense<0.000000e+00> : vector<256x512xf32>
    %18 = tpu.matmul %16, %17, %cst_14 {dimension_numbers = #tpu.dot_dimension_numbers<[1], [0], [0], [1], [0, 0, 1, 1], [], []>} : vector<256x128xbf16>, vector<128x512xbf16>, vector<256x512xf32> -> vector<256x512xf32>
    %c0_15 = arith.constant 0 : index
    %c0_16 = arith.constant 0 : index
    %19 = vector.load %arg7[%c0_15, %c0_16] : memref<1x512xf32, #tpu.memory_space<vmem>>, vector<1x512xf32>
    %20 = vector.broadcast %19 : vector<1x512xf32> to vector<256x512xf32>
    %21 = arith.addf %18, %20 : vector<256x512xf32>
    %cst_17 = arith.constant 0.000000e+00 : f32
    %22 = vector.broadcast %cst_17 : f32 to vector<256x512xf32>
    %23 = arith.maximumf %21, %22 : vector<256x512xf32>
    %24 = arith.truncf %23 : vector<256x512xf32> to vector<256x512xbf16>
    %c0_18 = arith.constant 0 : index
    %c0_19 = arith.constant 0 : index
    %25 = vector.load %arg8[%c0_18, %c0_19] : memref<512x256xbf16, #tpu.memory_space<vmem>>, vector<512x256xbf16>
    %cst_20 = arith.constant dense<0.000000e+00> : vector<256x256xf32>
    %26 = tpu.matmul %24, %25, %cst_20 {dimension_numbers = #tpu.dot_dimension_numbers<[1], [0], [0], [1], [0, 0, 1, 1], [], []>} : vector<256x512xbf16>, vector<512x256xbf16>, vector<256x256xf32> -> vector<256x256xf32>
    %c0_21 = arith.constant 0 : index
    %c0_22 = arith.constant 0 : index
    %27 = vector.load %arg9[%c0_21, %c0_22] : memref<1x256xf32, #tpu.memory_space<vmem>>, vector<1x256xf32>
    %28 = vector.broadcast %27 : vector<1x256xf32> to vector<256x256xf32>
    %29 = arith.addf %26, %28 : vector<256x256xf32>
    %cst_23 = arith.constant 0.000000e+00 : f32
    %30 = vector.broadcast %cst_23 : f32 to vector<256x256xf32>
    %31 = arith.maximumf %29, %30 : vector<256x256xf32>
    %c0_24 = arith.constant 0 : index
    %c0_25 = arith.constant 0 : index
    %32 = vector.load %arg10[%c0_24, %c0_25] : memref<256x256xf32, #tpu.memory_space<vmem>>, vector<256x256xf32>
    tpu.vector_store %arg10[%c0_24, %c0_25], %31 {strides = array<i32>} : memref<256x256xf32, #tpu.memory_space<vmem>>, vector<256x256xf32>,
    return
  }
  func.func @transform_0(%arg0: i32) -> (i32, i32) {
    %c0_i32 = arith.constant 0 : i32
    %c0_i32_0 = arith.constant 0 : i32
    return %arg0, %c0_i32 : i32, i32
  }
  func.func @transform_1(%arg0: i32) -> (i32, i32) {
    %c0_i32 = arith.constant 0 : i32
    %c0_i32_0 = arith.constant 0 : i32
    %c0_i32_1 = arith.constant 0 : i32
    return %c0_i32, %c0_i32_0 : i32, i32
  }
  func.func @transform_2(%arg0: i32) -> (i32, i32) {
    %c0_i32 = arith.constant 0 : i32
    %c0_i32_0 = arith.constant 0 : i32
    %c0_i32_1 = arith.constant 0 : i32
    return %c0_i32, %c0_i32_0 : i32, i32
  }
  func.func @transform_3(%arg0: i32) -> (i32, i32) {
    %c0_i32 = arith.constant 0 : i32
    %c0_i32_0 = arith.constant 0 : i32
    %c0_i32_1 = arith.constant 0 : i32
    return %c0_i32, %c0_i32_0 : i32, i32
  }
  func.func @transform_4(%arg0: i32) -> (i32, i32) {
    %c0_i32 = arith.constant 0 : i32
    %c0_i32_0 = arith.constant 0 : i32
    %c0_i32_1 = arith.constant 0 : i32
    return %c0_i32, %c0_i32_0 : i32, i32
  }
  func.func @transform_5(%arg0: i32) -> (i32, i32) {
    %c0_i32 = arith.constant 0 : i32
    %c0_i32_0 = arith.constant 0 : i32
    %c0_i32_1 = arith.constant 0 : i32
    return %c0_i32, %c0_i32_0 : i32, i32
  }
  func.func @transform_6(%arg0: i32) -> (i32, i32) {
    %c0_i32 = arith.constant 0 : i32
    %c0_i32_0 = arith.constant 0 : i32
    %c0_i32_1 = arith.constant 0 : i32
    return %c0_i32, %c0_i32_0 : i32, i32
  }
  func.func @transform_7(%arg0: i32) -> (i32, i32) {
    %c0_i32 = arith.constant 0 : i32
    %c0_i32_0 = arith.constant 0 : i32
    %c0_i32_1 = arith.constant 0 : i32
    return %c0_i32, %c0_i32_0 : i32, i32
  }
  func.func @transform_8(%arg0: i32) -> (i32, i32) {
    %c0_i32 = arith.constant 0 : i32
    %c0_i32_0 = arith.constant 0 : i32
    %c0_i32_1 = arith.constant 0 : i32
    return %c0_i32, %c0_i32_0 : i32, i32
  }
  func.func @transform_9(%arg0: i32) -> (i32, i32) {
    %c0_i32 = arith.constant 0 : i32
    %c0_i32_0 = arith.constant 0 : i32
    return %arg0, %c0_i32 : i32, i32
  }
}

</mosaic_0001>

<bundles_post_ra>
// kernel: sae_forward.1
= control target key start
LH: loop header
LB: loop body
LE: loop exit
PB: predicated region body
PF: predicated region fallthrough
CT: control target
= control target key end

     0   :  { %s5736_s30 = smov 0   ;;  %s8076_s0 = inlined_call_operand.vmem [shape: bf16[512,256], index: 0, kind: input, shape index: {}]   ;;  %s8077_s1 = inlined_call_operand.vmem [shape: bf16[256,512], index: 1, kind: input, shape index: {}]   ;;  %s8078_s2 = inlined_call_operand.vmem [shape: f32[1,512], index: 2, kind: input, shape index: {}]   ;;  %s8079_s3 = inlined_call_operand.vmem [shape: bf16[512,128], index: 3, kind: input, shape index: {}]   ;;  %s8080_s4 = inlined_call_operand.vmem [shape: f32[1,128], index: 4, kind: input, shape index: {}]   ;;  %s8081_s5 = inlined_call_operand.vmem [shape: bf16[128,512], index: 5, kind: input, shape index: {}]   ;;  %s8082_s6 = inlined_call_operand.vmem [shape: f32[1,512], index: 6, kind: input, shape index: {}]   ;;  %s8083_s7 = inlined_call_operand.vmem [shape: bf16[512,256], index: 7, kind: input, shape index: {}]   ;;  %s8084_s8 = inlined_call_operand.vmem [shape: f32[1,256], index: 8, kind: input, shape index: {}]   ;;  %s8085_s9 = inlined_call_operand.vmem [shape: f32[512,256], index: 9, kind: output, shape index: {}]  }
   0x1 LB: > { %s4533_s10 = sadd.s32 4294967295, %s5684_s30   ;;  %p4537_p0 = scmp.ge.s32.totalorder %s5684_s30, 1  ;;  %s5684_s30 = sphi %s5736_s30, %s19_s30  }
   0x2   : > { %p289_p1 = scmp.lt.s32.totalorder %s5684_s30, 3 }
   0x4   : > { %p290_p2 = pnand %p4537_p0, %p289_p1 }
   0x6   : > { %293 = sbr.rel (%p290_p2) target bundleno = 1713 (0x6b1), region = 56 }
   0xb   : > { %v4786_v0 = vld [vmem:[%s8077_s1 + $0xe0] sm:$0xf]  ;;  %v5506_v1 = vld [vmem:[%s8077_s1 + $0xec] sm:$0xf0]  ;;  %v5504_v5 = vld [vmem:[%s8077_s1 + $0xe4] sm:$0xf] }
   0xc   : > { %v4914_v2 = vld [vmem:[%s8077_s1 + $0x1e0] sm:$0xf]  ;;  %v4787_v3 = vor.u32 %v5506_v1, %v4786_v0  ;;  %v5538_v4 = vld [vmem:[%s8077_s1 + $0x1ec] sm:$0xf0]  ;;  %v4788_v6 = vld [vmem:[%s8077_s1 + $0xf0] sm:$0xf0] }
   0xd   : > { %v4915_v7 = vor.u32 %v5538_v4, %v4914_v2  ;;  %v4791_v8 = vor.u32 %v5504_v5, %v4788_v6  ;;  %v5536_v9 = vld [vmem:[%s8077_s1 + $0x1e4] sm:$0xf]  ;;  %v4916_v10 = vld [vmem:[%s8077_s1 + $0x1f0] sm:$0xf0]  ;;  %v4770_v11 = vld [vmem:[%s8077_s1 + $0xc0] sm:$0xf] }
   0xe   : > { %927 = vmatpush.bf16.msra.mxu0 %v4787_v3  ;;  %v4919_v12 = vor.u32 %v5536_v9, %v4916_v10  ;;  %v5502_v13 = vld [vmem:[%s8077_s1 + $0xcc] sm:$0xf0]  ;;  %v4898_v14 = vld [vmem:[%s8077_s1 + $0x1c0] sm:$0xf]  ;;  %v5500_v18 = vld [vmem:[%s8077_s1 + $0xc4] sm:$0xf] }
   0xf   : > { %v5534_v15 = vld [vmem:[%s8077_s1 + $0x1cc] sm:$0xf0]  ;;  %1016 = vmatpush.bf16.msra.mxu1 %v4915_v7  ;;  %1105 = vmatpush.bf16.msra.mxu2 %v4791_v8  ;;  %v4771_v16 = vor.u32 %v5502_v13, %v4770_v11  ;;  %v4772_v19 = vld [vmem:[%s8077_s1 + $0xd0] sm:$0xf0]  ;;  %v5532_v20 = vld [vmem:[%s8077_s1 + $0x1c4] sm:$0xf] }
  0x10   : > { %v4899_v17 = vor.u32 %v5534_v15, %v4898_v14  ;;  %1194 = vmatpush.bf16.msra.mxu3 %v4919_v12  ;;  %v4775_v21 = vor.u32 %v5500_v18, %v4772_v19  ;;  %v4900_v22 = vld [vmem:[%s8077_s1 + $0x1d0] sm:$0xf0]  ;;  %v4754_v23 = vld [vmem:[%s8077_s1 + $0xa0] sm:$0xf]  ;;  %v5498_v24 = vld [vmem:[%s8077_s1 + $0xac] sm:$0xf0] }
  0x11   : > { %v4903_v25 = vor.u32 %v5532_v20, %v4900_v22  ;;  %v4882_v26 = vld [vmem:[%s8077_s1 + $0x1a0] sm:$0xf]  ;;  %v5530_v27 = vld [vmem:[%s8077_s1 + $0x1ac] sm:$0xf0]  ;;  %v5496_v28 = vld [vmem:[%s8077_s1 + $0xa4] sm:$0xf]  ;;  %v4755_v29 = vor.u32 %v5498_v24, %v4754_v23 }
  0x12   : > { %928 = vmatpush.bf16.msra.mxu0 %v4771_v16  ;;  %v4756_v30 = vld [vmem:[%s8077_s1 + $0xb0] sm:$0xf0]  ;;  %v5528_v31 = vld [vmem:[%s8077_s1 + $0x1a4] sm:$0xf]  ;;  %v4883_v33 = vor.u32 %v5530_v27, %v4882_v26  ;;  %v4738_v35 = vld [vmem:[%s8077_s1 + $0x80] sm:$0xf] }
  0x13   : > { %v4884_v32 = vld [vmem:[%s8077_s1 + $0x1b0] sm:$0xf0]  ;;  %1017 = vmatpush.bf16.msra.mxu1 %v4899_v17  ;;  %1106 = vmatpush.bf16.msra.mxu2 %v4775_v21  ;;  %v4759_v34 = vor.u32 %v5496_v28, %v4756_v30  ;;  %v5494_v36 = vld [vmem:[%s8077_s1 + $0x8c] sm:$0xf0]  ;;  %v4866_v37 = vld [vmem:[%s8077_s1 + $0x180] sm:$0xf] }
  0x14   : > { %1195 = vmatpush.bf16.msra.mxu3 %v4903_v25  ;;  %v4887_v38 = vor.u32 %v5528_v31, %v4884_v32  ;;  %v5526_v39 = vld [vmem:[%s8077_s1 + $0x18c] sm:$0xf0]  ;;  %v5492_v40 = vld [vmem:[%s8077_s1 + $0x84] sm:$0xf]  ;;  %v4740_v41 = vld [vmem:[%s8077_s1 + $0x90] sm:$0xf0]  ;;  %v4739_v44 = vor.u32 %v5494_v36, %v4738_v35 }
  0x15   : > { %v5524_v42 = vld [vmem:[%s8077_s1 + $0x184] sm:$0xf]  ;;  %v4868_v43 = vld [vmem:[%s8077_s1 + $0x190] sm:$0xf0]  ;;  %v4867_v45 = vor.u32 %v5526_v39, %v4866_v37  ;;  %v4743_v46 = vor.u32 %v5492_v40, %v4740_v41  ;;  %v4722_v47 = vld [vmem:[%s8077_s1 + $0x60] sm:$0xf] }
  0x16   : > { %929 = vmatpush.bf16.msra.mxu0 %v4755_v29  ;;  %v5490_v48 = vld [vmem:[%s8077_s1 + $0x6c] sm:$0xf0]  ;;  %v4850_v49 = vld [vmem:[%s8077_s1 + $0x160] sm:$0xf]  ;;  %v4871_v50 = vor.u32 %v5524_v42, %v4868_v43  ;;  %v5488_v52 = vld [vmem:[%s8077_s1 + $0x64] sm:$0xf] }
  0x17   : > { %1018 = vmatpush.bf16.msra.mxu1 %v4883_v33  ;;  %1107 = vmatpush.bf16.msra.mxu2 %v4759_v34  ;;  %v5522_v51 = vld [vmem:[%s8077_s1 + $0x16c] sm:$0xf0]  ;;  %v4724_v53 = vld [vmem:[%s8077_s1 + $0x70] sm:$0xf0]  ;;  %v5520_v54 = vld [vmem:[%s8077_s1 + $0x164] sm:$0xf]  ;;  %v4723_v56 = vor.u32 %v5490_v48, %v4722_v47 }
  0x18   : > { %1196 = vmatpush.bf16.msra.mxu3 %v4887_v38  ;;  %v4852_v55 = vld [vmem:[%s8077_s1 + $0x170] sm:$0xf0]  ;;  %v4851_v57 = vor.u32 %v5522_v51, %v4850_v49  ;;  %v4727_v58 = vor.u32 %v5488_v52, %v4724_v53  ;;  %v4706_v59 = vld [vmem:[%s8077_s1 + $0x40] sm:$0xf]  ;;  %v5486_v60 = vld [vmem:[%s8077_s1 + $0x4c] sm:$0xf0] }
  0x19   : > { %v4834_v61 = vld [vmem:[%s8077_s1 + $0x140] sm:$0xf]  ;;  %v4855_v62 = vor.u32 %v5520_v54, %v4852_v55  ;;  %v5518_v63 = vld [vmem:[%s8077_s1 + $0x14c] sm:$0xf0]  ;;  %v5484_v0 = vld [vmem:[%s8077_s1 + $0x44] sm:$0xf]  ;;  %v4707_v4 = vor.u32 %v5486_v60, %v4706_v59 }
  0x1a   : > { %930 = vmatpush.bf16.msra.mxu0 %v4739_v44  ;;  %v4708_v1 = vld [vmem:[%s8077_s1 + $0x50] sm:$0xf0]  ;;  %v5516_v2 = vld [vmem:[%s8077_s1 + $0x144] sm:$0xf]  ;;  %v4690_v5 = vld [vmem:[%s8077_s1 + $0x20] sm:$0xf]  ;;  %v4835_v7 = vor.u32 %v5518_v63, %v4834_v61 }
  0x1b   : > { %1019 = vmatpush.bf16.msra.mxu1 %v4867_v45  ;;  %1108 = vmatpush.bf16.msra.mxu2 %v4743_v46  ;;  %v4836_v3 = vld [vmem:[%s8077_s1 + $0x150] sm:$0xf0]  ;;  %v5482_v6 = vld [vmem:[%s8077_s1 + $0x2c] sm:$0xf0]  ;;  %v4711_v8 = vor.u32 %v5484_v0, %v4708_v1  ;;  %v4818_v9 = vld [vmem:[%s8077_s1 + $0x120] sm:$0xf] }
  0x1c   : > { %1197 = vmatpush.bf16.msra.mxu3 %v4871_v50  ;;  %v5514_v10 = vld [vmem:[%s8077_s1 + $0x12c] sm:$0xf0]  ;;  %v5480_v11 = vld [vmem:[%s8077_s1 + $0x24] sm:$0xf]  ;;  %v4839_v12 = vor.u32 %v5516_v2, %v4836_v3  ;;  %v4692_v13 = vld [vmem:[%s8077_s1 + $0x30] sm:$0xf0]  ;;  %v4691_v17 = vor.u32 %v5482_v6, %v4690_v5 }
  0x1d   : > { %v5512_v14 = vld [vmem:[%s8077_s1 + $0x124] sm:$0xf]  ;;  %s4538_s26 = sshll.u32 %s4533_s10, 5  ;;  %v4820_v15 = vld [vmem:[%s8077_s1 + $0x130] sm:$0xf0]  ;;  %v4819_v21 = vor.u32 %v5514_v10, %v4818_v9  ;;  %v4695_v22 = vor.u32 %v5480_v11, %v4692_v13 }
  0x1e   : > { %931 = vmatpush.bf16.msra.mxu0 %v4723_v56  ;;  %v4674_v16 = vld [vmem:[%s8077_s1] sm:$0xf]  ;;  %p328_p3 = scmp.lt.s32.totalorder %s4538_s26, 63  ;;  %v5478_v18 = vld [vmem:[%s8077_s1 + $0xc] sm:$0xf0]  ;;  %v4823_v25 = vor.u32 %v5512_v14, %v4820_v15 }
  0x1f   : > { %1020 = vmatpush.bf16.msra.mxu1 %v4851_v57  ;;  %1109 = vmatpush.bf16.msra.mxu2 %v4727_v58  ;;  %v4802_v19 = vld [vmem:[%s8077_s1 + $0x100] sm:$0xf]  ;;  %v5510_v20 = vld [vmem:[%s8077_s1 + $0x10c] sm:$0xf0]  ;;  %v5476_v23 = vld [vmem:[%s8077_s1 + $0x4] sm:$0xf]  ;;  %v4675_v30 = vor.u32 %v5478_v18, %v4674_v16 }
  0x20   : > { %1198 = vmatpush.bf16.msra.mxu3 %v4855_v62  ;;  %v4676_v24 = vld [vmem:[%s8077_s1 + $0x10] sm:$0xf0]  ;;  %s8158_s26 = smov (!%p328_p3, %s4538_s26), 63  ;;  %v5508_v26 = vld [vmem:[%s8077_s1 + $0x104] sm:$0xf]  ;;  %v4803_v33 = vor.u32 %v5510_v20, %v4802_v19 }
  0x21   : > { %v4804_v27 = vld [vmem:[%s8077_s1 + $0x110] sm:$0xf0]  ;;  %s5442_s25 = sshll.u32 %s8158_s26, 3  ;;  %v5505_v28 = vld [vmem:[%s8077_s1 + $0xec] sm:$0xf]  ;;  %v4679_v34 = vor.u32 %v5476_v23, %v4676_v24  ;;  %s5443_s16 = sshll.u32 %s8158_s26, 4 }
  0x22   : > { %932 = vmatpush.bf16.msra.mxu0 %v4707_v4  ;;  %v4796_v29 = vld [vmem:[%s8077_s1 + $0xf8] sm:$0xf0]  ;;  %s5950_s14 = scalar_lea.vmem %s8076_s0, %s5442_s25  ;;  %v5537_v31 = vld [vmem:[%s8077_s1 + $0x1ec] sm:$0xf]  ;;  %v4807_v38 = vor.u32 %v5508_v26, %v4804_v27  ;;  %v4794_v41 = vld [vmem:[%s8077_s1 + $0xe8] sm:$0xf]  ;;  %s7796_s19 = scalar_lea.vmem %s8085_s9, %s5443_s16 }
  0x23   : > { %1021 = vmatpush.bf16.msra.mxu1 %v4835_v7  ;;  %1110 = vmatpush.bf16.msra.mxu2 %v4711_v8  ;;  %v4924_v32 = vld [vmem:[%s8077_s1 + $0x1f8] sm:$0xf0]  ;;  %v4546_v35 = vld [vmem:[%s5950_s14] sm:$0xf]  ;;  %v5445_v36 = vld [vmem:[%s5950_s14 + $0x4] sm:$0xf0]  ;;  %v4799_v40 = vor.u32 %v5505_v28, %v4796_v29 }
  0x24   : > { %1199 = vmatpush.bf16.msra.mxu3 %v4839_v12  ;;  %v5444_v37 = vld [vmem:[%s5950_s14 + $0x4] sm:$0xf]  ;;  %v4548_v39 = vld [vmem:[%s5950_s14 + $0x8] sm:$0xf0]  ;;  %v5507_v42 = vld [vmem:[%s8077_s1 + $0xf4] sm:$0xf0]  ;;  %v5968_v43 = vor.u32 %v5445_v36, %v4546_v35  ;;  %v4927_v44 = vor.u32 %v5537_v31, %v4924_v32 }
  0x25   : > { %v4922_v45 = vld [vmem:[%s8077_s1 + $0x1e8] sm:$0xf]  ;;  %v5539_v46 = vld [vmem:[%s8077_s1 + $0x1f4] sm:$0xf0]  ;;  %v5976_v47 = vor.u32 %v5444_v37, %v4548_v39  ;;  %v4795_v48 = vor.u32 %v5507_v42, %v4794_v41  ;;  %v5501_v50 = vld [vmem:[%s8077_s1 + $0xcc] sm:$0xf] }
  0x26   : > { %933 = vmatpush.bf16.msra.mxu0 %v4691_v17  ;;  %v4923_v49 = vor.u32 %v5539_v46, %v4922_v45  ;;  %v4780_v51 = vld [vmem:[%s8077_s1 + $0xd8] sm:$0xf0]  ;;  %v4778_v52 = vld [vmem:[%s8077_s1 + $0xc8] sm:$0xf]  ;;  %v5503_v54 = vld [vmem:[%s8077_s1 + $0xd4] sm:$0xf0] }
  0x27   : > { %1022 = vmatpush.bf16.msra.mxu1 %v4819_v21  ;;  %1111 = vmatpush.bf16.msra.mxu2 %v4695_v22  ;;  %v4783_v53 = vor.u32 %v5501_v50, %v4780_v51  ;;  %v5533_v55 = vld [vmem:[%s8077_s1 + $0x1cc] sm:$0xf]  ;;  %v4908_v56 = vld [vmem:[%s8077_s1 + $0x1d8] sm:$0xf0]  ;;  %v4779_v57 = vor.u32 %v5503_v54, %v4778_v52  ;;  %v4906_v59 = vld [vmem:[%s8077_s1 + $0x1c8] sm:$0xf] }
  0x28   : > { %1200 = vmatpush.bf16.msra.mxu3 %v4823_v25  ;;  %v4911_v58 = vor.u32 %v5533_v55, %v4908_v56  ;;  %v5535_v60 = vld [vmem:[%s8077_s1 + $0x1d4] sm:$0xf0]  ;;  %v4554_v62 = vld [vmem:[%s5950_s14 + $0x10] sm:$0xf]  ;;  %v5446_v0 = vld [vmem:[%s5950_s14 + $0x14] sm:$0xf] }
  0x29   : > { %v4907_v61 = vor.u32 %v5535_v60, %v4906_v59  ;;  %v5447_v63 = vld [vmem:[%s5950_s14 + $0x14] sm:$0xf0]  ;;  %v4556_v1 = vld [vmem:[%s5950_s14 + $0x18] sm:$0xf0]  ;;  %v4562_v4 = vld [vmem:[%s5950_s14 + $0x20] sm:$0xf] }
  0x2a   : > { %934 = vmatpush.bf16.msra.mxu0 %v4675_v30  ;;  %v6010_v2 = vor.u32 %v5447_v63, %v4554_v62  ;;  %v6012_v3 = vor.u32 %v5446_v0, %v4556_v1  ;;  %v5449_v5 = vld [vmem:[%s5950_s14 + $0x24] sm:$0xf0]  ;;  %v5448_v6 = vld [vmem:[%s5950_s14 + $0x24] sm:$0xf]  ;;  %v4564_v7 = vld [vmem:[%s5950_s14 + $0x28] sm:$0xf0] }
  0x2b   : > { %1023 = vmatpush.bf16.msra.mxu1 %v4803_v33  ;;  %1112 = vmatpush.bf16.msra.mxu2 %v4679_v34  ;;  %v6022_v8 = vor.u32 %v5449_v5, %v4562_v4  ;;  %v6024_v9 = vor.u32 %v5448_v6, %v4564_v7  ;;  %v5497_v10 = vld [vmem:[%s8077_s1 + $0xac] sm:$0xf]  ;;  %v4764_v11 = vld [vmem:[%s8077_s1 + $0xb8] sm:$0xf0]  ;;  %v4762_v12 = vld [vmem:[%s8077_s1 + $0xa8] sm:$0xf] }
  0x2c   : > { %1201 = vmatpush.bf16.msra.mxu3 %v4807_v38  ;;  %v4767_v13 = vor.u32 %v5497_v10, %v4764_v11  ;;  %v5499_v14 = vld [vmem:[%s8077_s1 + $0xb4] sm:$0xf0]  ;;  %v5529_v15 = vld [vmem:[%s8077_s1 + $0x1ac] sm:$0xf]  ;;  %v4892_v16 = vld [vmem:[%s8077_s1 + $0x1b8] sm:$0xf0] }
  0x2d   : > { %935 = vmatmul.bf16.vlgmr.msra.gmra.mxu0 %v5968_v43  ;;  %v4763_v17 = vor.u32 %v5499_v14, %v4762_v12  ;;  %v4895_v18 = vor.u32 %v5529_v15, %v4892_v16  ;;  %v4890_v19 = vld [vmem:[%s8077_s1 + $0x1a8] sm:$0xf]  ;;  %v5531_v20 = vld [vmem:[%s8077_s1 + $0x1b4] sm:$0xf0]  ;;  %v4570_v22 = vld [vmem:[%s5950_s14 + $0x30] sm:$0xf] }
  0x2e   : > { %1024 = vmatmul.bf16.vlgmr.msra.gmra.mxu1 %v5976_v47  ;;  %1113 = vmatmul.bf16.vlgmr.msra.gmra.mxu2 %v5968_v43  ;;  %v4891_v21 = vor.u32 %v5531_v20, %v4890_v19  ;;  %v5451_v23 = vld [vmem:[%s5950_s14 + $0x34] sm:$0xf0]  ;;  %v5450_v24 = vld [vmem:[%s5950_s14 + $0x34] sm:$0xf]  ;;  %v4572_v25 = vld [vmem:[%s5950_s14 + $0x38] sm:$0xf0] }
  0x2f   : > { %1461 = vmatpush.bf16.msrb.mxu2 %v4799_v40  ;;  %1202 = vmatmul.bf16.vlgmr.msra.gmra.mxu3 %v5976_v47  ;;  %v6058_v26 = vor.u32 %v5451_v23, %v4570_v22  ;;  %v6060_v27 = vor.u32 %v5450_v24, %v4572_v25  ;;  %v4578_v28 = vld [vmem:[%s5950_s14 + $0x40] sm:$0xf]  ;;  %v5453_v29 = vld [vmem:[%s5950_s14 + $0x44] sm:$0xf0]  ;;  %v5452_v30 = vld [vmem:[%s5950_s14 + $0x44] sm:$0xf] }
  0x30   : > { %1550 = vmatpush.bf16.msrb.mxu3 %v4927_v44  ;;  %1283 = vmatpush.bf16.msrb.mxu0 %v4795_v48  ;;  %v4580_v31 = vld [vmem:[%s5950_s14 + $0x48] sm:$0xf0]  ;;  %v6070_v32 = vor.u32 %v5453_v29, %v4578_v28  ;;  %v4748_v35 = vld [vmem:[%s8077_s1 + $0x98] sm:$0xf0]  ;;  %v4746_v36 = vld [vmem:[%s8077_s1 + $0x88] sm:$0xf] }
  0x31   : > { %1372 = vmatpush.bf16.msrb.mxu1 %v4923_v49  ;;  %v6072_v33 = vor.u32 %v5452_v30, %v4580_v31  ;;  %v5493_v34 = vld [vmem:[%s8077_s1 + $0x8c] sm:$0xf]  ;;  %v5495_v38 = vld [vmem:[%s8077_s1 + $0x94] sm:$0xf0]  ;;  %v4876_v40 = vld [vmem:[%s8077_s1 + $0x198] sm:$0xf0] }
  0x32   : > { %v4751_v37 = vor.u32 %v5493_v34, %v4748_v35  ;;  %v5525_v39 = vld [vmem:[%s8077_s1 + $0x18c] sm:$0xf]  ;;  %v4747_v41 = vor.u32 %v5495_v38, %v4746_v36  ;;  %v4874_v44 = vld [vmem:[%s8077_s1 + $0x188] sm:$0xf]  ;;  %v5527_v45 = vld [vmem:[%s8077_s1 + $0x194] sm:$0xf0] }
  0x33   : > { %1462 = vmatpush.bf16.msrb.mxu2 %v4783_v53  ;;  %v4879_v42 = vor.u32 %v5525_v39, %v4876_v40  ;;  %v4875_v46 = vor.u32 %v5527_v45, %v4874_v44  ;;  %v4586_v48 = vld [vmem:[%s5950_s14 + $0x50] sm:$0xf]  ;;  %v5455_v49 = vld [vmem:[%s5950_s14 + $0x54] sm:$0xf0]  ;;  %v5454_v50 = vld [vmem:[%s5950_s14 + $0x54] sm:$0xf] }
  0x34   : > { %1284 = vmatpush.bf16.msrb.mxu0 %v4779_v57  ;;  %1551 = vmatpush.bf16.msrb.mxu3 %v4911_v58  ;;  %v4588_v51 = vld [vmem:[%s5950_s14 + $0x58] sm:$0xf0]  ;;  %v6106_v52 = vor.u32 %v5455_v49, %v4586_v48  ;;  %v4594_v54 = vld [vmem:[%s5950_s14 + $0x60] sm:$0xf]  ;;  %v5457_v55 = vld [vmem:[%s5950_s14 + $0x64] sm:$0xf0] }
  0x35   : > { %1373 = vmatpush.bf16.msrb.mxu1 %v4907_v61  ;;  %v6108_v53 = vor.u32 %v5454_v50, %v4588_v51  ;;  %v5456_v56 = vld [vmem:[%s5950_s14 + $0x64] sm:$0xf]  ;;  %v4596_v57 = vld [vmem:[%s5950_s14 + $0x68] sm:$0xf0]  ;;  %v6118_v58 = vor.u32 %v5457_v55, %v4594_v54  ;;  %v4732_v61 = vld [vmem:[%s8077_s1 + $0x78] sm:$0xf0] }
  0x36   : > { %v6120_v59 = vor.u32 %v5456_v56, %v4596_v57  ;;  %v5489_v60 = vld [vmem:[%s8077_s1 + $0x6c] sm:$0xf]  ;;  %v4730_v62 = vld [vmem:[%s8077_s1 + $0x68] sm:$0xf]  ;;  %v5491_v0 = vld [vmem:[%s8077_s1 + $0x74] sm:$0xf0] }
  0x37   : > { %1463 = vmatpush.bf16.msrb.mxu2 %v4767_v13  ;;  %v4735_v63 = vor.u32 %v5489_v60, %v4732_v61  ;;  %v5521_v1 = vld [vmem:[%s8077_s1 + $0x16c] sm:$0xf]  ;;  %v4860_v4 = vld [vmem:[%s8077_s1 + $0x178] sm:$0xf0]  ;;  %v4731_v5 = vor.u32 %v5491_v0, %v4730_v62  ;;  %v4602_v7 = vld [vmem:[%s5950_s14 + $0x70] sm:$0xf] }
  0x38   : > { %1285 = vmatpush.bf16.msrb.mxu0 %v4763_v17  ;;  %1552 = vmatpush.bf16.msrb.mxu3 %v4895_v18  ;;  %v4863_v6 = vor.u32 %v5521_v1, %v4860_v4  ;;  %v5459_v10 = vld [vmem:[%s5950_s14 + $0x74] sm:$0xf0]  ;;  %v4858_v11 = vld [vmem:[%s8077_s1 + $0x168] sm:$0xf]  ;;  %v5458_v13 = vld [vmem:[%s5950_s14 + $0x74] sm:$0xf] }
  0x39   : > { %1374 = vmatpush.bf16.msrb.mxu1 %v4891_v21  ;;  %v5523_v12 = vld [vmem:[%s8077_s1 + $0x174] sm:$0xf0]  ;;  %v4604_v14 = vld [vmem:[%s5950_s14 + $0x78] sm:$0xf0]  ;;  %v6154_v16 = vor.u32 %v5459_v10, %v4602_v7  ;;  %v437_v18 = vld [vmem:[%s8078_s2] sm:$0xf] }
  0x3a   : > { %v4859_v15 = vor.u32 %v5523_v12, %v4858_v11  ;;  %v6156_v17 = vor.u32 %v5458_v13, %v4604_v14  ;;  %v4610_v19 = vld [vmem:[%s5950_s14 + $0x80] sm:$0xf]  ;;  %v5461_v20 = vld [vmem:[%s5950_s14 + $0x84] sm:$0xf0]  ;;  %v6167_v21 = vperm.slane %v437_v18, 0  ;;  %v6179_v34 = vperm.slane %v437_v18, 1 }
  0x3b   : > { %1464 = vmatpush.bf16.msrb.mxu2 %v4751_v37  ;;  %v5460_v22 = vld [vmem:[%s5950_s14 + $0x84] sm:$0xf]  ;;  %v4612_v23 = vld [vmem:[%s5950_s14 + $0x88] sm:$0xf0]  ;;  %v6171_v24 = vor.u32 %v5461_v20, %v4610_v19  ;;  %v4716_v36 = vld [vmem:[%s8077_s1 + $0x58] sm:$0xf0] }
  0x3c   : > { %1286 = vmatpush.bf16.msrb.mxu0 %v4747_v41  ;;  %1553 = vmatpush.bf16.msrb.mxu3 %v4879_v42  ;;  %v6173_v28 = vor.u32 %v5460_v22, %v4612_v23  ;;  %v5485_v35 = vld [vmem:[%s8077_s1 + $0x4c] sm:$0xf]  ;;  %v4714_v38 = vld [vmem:[%s8077_s1 + $0x48] sm:$0xf]  ;;  %v5487_v39 = vld [vmem:[%s8077_s1 + $0x54] sm:$0xf0] }
  0x3d   : > { %940 = vmatmul.bf16.gmra.mxu0 %v6010_v2  ;;  %1375 = vmatpush.bf16.msrb.mxu1 %v4875_v46  ;;  %v4719_v37 = vor.u32 %v5485_v35, %v4716_v36  ;;  %v5517_v40 = vld [vmem:[%s8077_s1 + $0x14c] sm:$0xf]  ;;  %v4715_v42 = vor.u32 %v5487_v39, %v4714_v38  ;;  %v4844_v44 = vld [vmem:[%s8077_s1 + $0x158] sm:$0xf0]  ;;  %v4618_v56 = vld [vmem:[%s5950_s14 + $0x90] sm:$0xf] }
  0x3e   : > { %1029 = vmatmul.bf16.gmra.mxu1 %v6012_v3  ;;  %1118 = vmatmul.bf16.gmra.mxu2 %v6010_v2  ;;  %v4847_v49 = vor.u32 %v5517_v40, %v4844_v44  ;;  %v5463_v57 = vld [vmem:[%s5950_s14 + $0x94] sm:$0xf0]  ;;  %v4842_v60 = vld [vmem:[%s8077_s1 + $0x148] sm:$0xf]  ;;  %v5462_v0 = vld [vmem:[%s5950_s14 + $0x94] sm:$0xf] }
  0x3f   : > { %1207 = vmatmul.bf16.gmra.mxu3 %v6012_v3  ;;  %1465 = vmatpush.bf16.msrb.mxu2 %v4735_v63  ;;  %v5519_v61 = vld [vmem:[%s8077_s1 + $0x154] sm:$0xf0]  ;;  %v4620_v1 = vld [vmem:[%s5950_s14 + $0x98] sm:$0xf0]  ;;  %v6214_v7 = vor.u32 %v5463_v57, %v4618_v56  ;;  %v4626_v39 = vld [vmem:[%s5950_s14 + $0xa0] sm:$0xf] }
  0x40   : > { %1287 = vmatpush.bf16.msrb.mxu0 %v4731_v5  ;;  %1554 = vmatpush.bf16.msrb.mxu3 %v4863_v6  ;;  %v4843_v4 = vor.u32 %v5519_v61, %v4842_v60  ;;  %v6217_v13 = vor.u32 %v5462_v0, %v4620_v1  ;;  %v5465_v40 = vld [vmem:[%s5950_s14 + $0xa4] sm:$0xf0]  ;;  %v5464_v44 = vld [vmem:[%s5950_s14 + $0xa4] sm:$0xf]  ;;  %v5481_v0 = vld [vmem:[%s8077_s1 + $0x2c] sm:$0xf] }
  0x41   : > { %1376 = vmatpush.bf16.msrb.mxu1 %v4859_v15  ;;  %v4700_v1 = vld [vmem:[%s8077_s1 + $0x38] sm:$0xf0] }
  0x43   : > { %1466 = vmatpush.bf16.msrb.mxu2 %v4719_v37 }
  0x44   : > { %1288 = vmatpush.bf16.msrb.mxu0 %v4715_v42  ;;  %1555 = vmatpush.bf16.msrb.mxu3 %v4847_v49 }
  0x45   : > { %1377 = vmatpush.bf16.msrb.mxu1 %v4843_v4  ;;  %v4703_v4 = vor.u32 %v5481_v0, %v4700_v1 }
  0x47   : > { %1467 = vmatpush.bf16.msrb.mxu2 %v4703_v4 }
  0x4d   : > { %945 = vmatmul.bf16.gmra.mxu0 %v6022_v8 }
  0x4e   : > { %1034 = vmatmul.bf16.gmra.mxu1 %v6024_v9  ;;  %1123 = vmatmul.bf16.gmra.mxu2 %v6022_v8 }
  0x4f   : > { %1212 = vmatmul.bf16.gmra.mxu3 %v6024_v9 }
  0x5d   : > { %950 = vmatmul.bf16.gmra.mxu0 %v6058_v26 }
  0x5e   : > { %1039 = vmatmul.bf16.gmra.mxu1 %v6060_v27  ;;  %1128 = vmatmul.bf16.gmra.mxu2 %v6058_v26 }
  0x5f   : > { %1217 = vmatmul.bf16.gmra.mxu3 %v6060_v27 }
  0x6d   : > { %955 = vmatmul.bf16.gmra.mxu0 %v6070_v32 }
  0x6e   : > { %1044 = vmatmul.bf16.gmra.mxu1 %v6072_v33  ;;  %1133 = vmatmul.bf16.gmra.mxu2 %v6070_v32 }
  0x6f   : > { %1222 = vmatmul.bf16.gmra.mxu3 %v6072_v33 }
  0x7d   : > { %960 = vmatmul.bf16.gmra.mxu0 %v6106_v52 }
  0x7e   : > { %1049 = vmatmul.bf16.gmra.mxu1 %v6108_v53  ;;  %1138 = vmatmul.bf16.gmra.mxu2 %v6106_v52 }
  0x7f   : > { %1227 = vmatmul.bf16.gmra.mxu3 %v6108_v53 }
  0x8d   : > { %965 = vmatmul.bf16.gmra.mxu0 %v6118_v58 }
  0x8e   : > { %1054 = vmatmul.bf16.gmra.mxu1 %v6120_v59  ;;  %1143 = vmatmul.bf16.gmra.mxu2 %v6118_v58 }
  0x8f   : > { %1232 = vmatmul.bf16.gmra.mxu3 %v6120_v59 }
  0x9d   : > { %970 = vmatmul.bf16.gmra.mxu0 %v6154_v16 }
  0x9e   : > { %1059 = vmatmul.bf16.gmra.mxu1 %v6156_v17  ;;  %1148 = vmatmul.bf16.gmra.mxu2 %v6154_v16 }
  0x9f   : > { %1237 = vmatmul.bf16.gmra.mxu3 %v6156_v17 }
  0xaa   : > { %v936_v25 = vpop.f32.mrf.mxu0 }
  0xab   : > { %v937_v29 = vadd.f32 %v936_v25, %v6167_v21  ;;  %v1025_v30 = vpop.f32.mrf.mxu1 }
  0xad   : > { %v1026_v31 = vadd.f32 %v1025_v30, %v937_v29  ;;  %975 = vmatmul.bf16.gmra.mxu0 %v6171_v24 }
  0xae   : > { %1064 = vmatmul.bf16.gmra.mxu1 %v6173_v28  ;;  %1153 = vmatmul.bf16.gmra.mxu2 %v6171_v24 }
  0xaf   : > { %1242 = vmatmul.bf16.gmra.mxu3 %v6173_v28  ;;  %v1639_v62 = vmax.f32 %v1026_v31, 0.0 }
  0xb1   : > { %v1114_v41 = vpop.f32.mrf.mxu2 }
  0xb2   : > { %v1115_v45 = vadd.f32 %v1114_v41, %v6179_v34  ;;  %v1203_v46 = vpop.f32.mrf.mxu3  ;;  %v938_v48 = vpop.f32.mrf.mxu0 }
  0xb3   : > { %v939_v50 = vadd.f32 %v938_v48, %v6167_v21  ;;  %v1027_v51 = vpop.f32.mrf.mxu1  ;;  %v6232_v48 = vor.u32 %v5465_v40, %v4626_v39  ;;  %v5515_v39 = vld [vmem:[%s8077_s1 + $0x134] sm:$0xf0] }
  0xb4   : > { %v1204_v54 = vadd.f32 %v1203_v46, %v1115_v45  ;;  %v4628_v45 = vld [vmem:[%s5950_s14 + $0xa8] sm:$0xf0] }
  0xb5   : > { %v1028_v55 = vadd.f32 %v1027_v51, %v939_v50 }
  0xb6   : > { %v1640_v20 = vmax.f32 %v1204_v54, 0.0 }
  0xb7   : > { %v1643_v63 = vmax.f32 %v1028_v55, 0.0  ;;  %v6237_v55 = vor.u32 %v5464_v44, %v4628_v45  ;;  %v4636_v44 = vld [vmem:[%s5950_s14 + $0xb8] sm:$0xf0] }
  0xb9   : > { %v6212_v5 = vpack.c.bf16 %v1643_v63, %v1639_v62  ;;  %v1116_v6 = vpop.f32.mrf.mxu2 }
  0xba   : > { %v1117_v10 = vadd.f32 %v1116_v6, %v6179_v34  ;;  %v1205_v11 = vpop.f32.mrf.mxu3  ;;  %v941_v12 = vpop.f32.mrf.mxu0  ;;  %v4698_v6 = vld [vmem:[%s8077_s1 + $0x28] sm:$0xf] }
  0xbb   : > { %v942_v14 = vadd.f32 %v941_v12, %v6167_v21  ;;  %v1030_v15 = vpop.f32.mrf.mxu1 }
  0xbc   : > { %v1206_v18 = vadd.f32 %v1205_v11, %v1117_v10  ;;  %v5483_v10 = vld [vmem:[%s8077_s1 + $0x34] sm:$0xf0]  ;;  %v5513_v11 = vld [vmem:[%s8077_s1 + $0x12c] sm:$0xf] }
  0xbd   : > { %v1031_v19 = vadd.f32 %v1030_v15, %v942_v14  ;;  %980 = vmatmul.bf16.gmra.mxu0 %v6214_v7  ;;  %v4699_v15 = vor.u32 %v5483_v10, %v4698_v6 }
  0xbe   : > { %v1644_v22 = vmax.f32 %v1206_v18, 0.0  ;;  %1069 = vmatmul.bf16.gmra.mxu1 %v6217_v13  ;;  %1158 = vmatmul.bf16.gmra.mxu2 %v6214_v7  ;;  %v4828_v18 = vld [vmem:[%s8077_s1 + $0x138] sm:$0xf0] }
  0xbf   : > { %1247 = vmatmul.bf16.gmra.mxu3 %v6217_v13  ;;  %v1647_v41 = vmax.f32 %v1031_v19, 0.0  ;;  %1289 = vmatpush.bf16.msrb.mxu0 %v4699_v15 }
  0xc0   : > { %v6224_v23 = vpack.c.bf16 %v1644_v22, %v1640_v20 }
  0xc1   : > { %v1119_v25 = vpop.f32.mrf.mxu2 }
  0xc2   : > { %v1120_v29 = vadd.f32 %v1119_v25, %v6179_v34  ;;  %v1208_v30 = vpop.f32.mrf.mxu3  ;;  %v943_v31 = vpop.f32.mrf.mxu0  ;;  %v4831_v25 = vor.u32 %v5513_v11, %v4828_v18 }
  0xc3   : > { %v944_v35 = vadd.f32 %v943_v31, %v6167_v21  ;;  %v1032_v36 = vpop.f32.mrf.mxu1 }
  0xc4   : > { %v1209_v37 = vadd.f32 %v1208_v30, %v1120_v29  ;;  %1556 = vmatpush.bf16.msrb.mxu3 %v4831_v25  ;;  %v4642_v25 = vld [vmem:[%s5950_s14 + $0xc0] sm:$0xf] }
  0xc5   : > { %v1033_v38 = vadd.f32 %v1032_v36, %v944_v35  ;;  %v4634_v36 = vld [vmem:[%s5950_s14 + $0xb0] sm:$0xf] }
  0xc6   : > { %v1648_v62 = vmax.f32 %v1209_v37, 0.0  ;;  %v5467_v37 = vld [vmem:[%s5950_s14 + $0xb4] sm:$0xf0] }
  0xc7   : > { %v1651_v42 = vmax.f32 %v1033_v38, 0.0  ;;  %v4826_v38 = vld [vmem:[%s8077_s1 + $0x128] sm:$0xf] }
  0xc8   : > { %v4827_v45 = vor.u32 %v5515_v39, %v4826_v38 }
  0xc9   : > { %v1121_v46 = vpop.f32.mrf.mxu2  ;;  %v6234_v49 = vpack.c.bf16 %v1651_v42, %v1647_v41  ;;  %v5466_v42 = vld [vmem:[%s5950_s14 + $0xb4] sm:$0xf] }
  0xca   : > { %v1122_v50 = vadd.f32 %v1121_v46, %v6179_v34  ;;  %v1210_v51 = vpop.f32.mrf.mxu3  ;;  %v946_v54 = vpop.f32.mrf.mxu0  ;;  %1378 = vmatpush.bf16.msrb.mxu1 %v4827_v45 }
  0xcb   : > { %v947_v56 = vadd.f32 %v946_v54, %v6167_v21  ;;  %v1035_v57 = vpop.f32.mrf.mxu1 }
  0xcc   : > { %v1211_v60 = vadd.f32 %v1210_v51, %v1122_v50  ;;  %v6276_v50 = vor.u32 %v5467_v37, %v4634_v36  ;;  %v4644_v36 = vld [vmem:[%s5950_s14 + $0xc8] sm:$0xf0] }
  0xcd   : > { %v1036_v61 = vadd.f32 %v1035_v57, %v947_v56  ;;  %985 = vmatmul.bf16.gmra.mxu0 %v6232_v48 }
  0xce   : > { %v1652_v63 = vmax.f32 %v1211_v60, 0.0  ;;  %1074 = vmatmul.bf16.gmra.mxu1 %v6237_v55  ;;  %1163 = vmatmul.bf16.gmra.mxu2 %v6232_v48  ;;  %v6281_v60 = vor.u32 %v5466_v42, %v4636_v44 }
  0xcf   : > { %1252 = vmatmul.bf16.gmra.mxu3 %v6237_v55  ;;  %v1655_v40 = vmax.f32 %v1036_v61, 0.0 }
  0xd0   : > { %v6259_v12 = vpack.c.bf16 %v1652_v63, %v1648_v62 }
  0xd1   : > { %v1124_v14 = vpop.f32.mrf.mxu2 }
  0xd2   : > { %v1125_v19 = vadd.f32 %v1124_v14, %v6179_v34  ;;  %v1213_v20 = vpop.f32.mrf.mxu3  ;;  %v948_v22 = vpop.f32.mrf.mxu0 }
  0xd3   : > { %v949_v29 = vadd.f32 %v948_v22, %v6167_v21  ;;  %v1037_v30 = vpop.f32.mrf.mxu1 }
  0xd4   : > { %v1214_v31 = vadd.f32 %v1213_v20, %v1125_v19 }
  0xd5   : > { %v1038_v35 = vadd.f32 %v1037_v30, %v949_v29  ;;  %v5469_v29 = vld [vmem:[%s5950_s14 + $0xc4] sm:$0xf0] }
  0xd6   : > { %v1656_v1 = vmax.f32 %v1214_v31, 0.0  ;;  %v6296_v38 = vor.u32 %v5469_v29, %v4642_v25 }
  0xd7   : > { %v1659_v41 = vmax.f32 %v1038_v35, 0.0  ;;  %v5468_v35 = vld [vmem:[%s5950_s14 + $0xc4] sm:$0xf] }
  0xd8   : > { %v6301_v44 = vor.u32 %v5468_v35, %v4644_v36  ;;  %v4650_v36 = vld [vmem:[%s5950_s14 + $0xd0] sm:$0xf] }
  0xd9   : > { %v1126_v46 = vpop.f32.mrf.mxu2  ;;  %v6278_v51 = vpack.c.bf16 %v1659_v41, %v1655_v40 }
  0xda   : > { %v1127_v54 = vadd.f32 %v1126_v46, %v6179_v34  ;;  %v1215_v56 = vpop.f32.mrf.mxu3  ;;  %v951_v57 = vpop.f32.mrf.mxu0 }
  0xdb   : > { %v952_v62 = vadd.f32 %v951_v57, %v6167_v21  ;;  %v1040_v63 = vpop.f32.mrf.mxu1 }
  0xdc   : > { %v1216_v61 = vadd.f32 %v1215_v56, %v1127_v54 }
  0xdd   : > { %v1041_v0 = vadd.f32 %v1040_v63, %v952_v62  ;;  %990 = vmatmul.bf16.gmra.mxu0 %v6276_v50  ;;  %v5477_v63 = vld [vmem:[%s8077_s1 + $0xc] sm:$0xf] }
  0xde   : > { %v1660_v4 = vmax.f32 %v1216_v61, 0.0  ;;  %1079 = vmatmul.bf16.gmra.mxu1 %v6281_v60  ;;  %1168 = vmatmul.bf16.gmra.mxu2 %v6276_v50  ;;  %v4684_v61 = vld [vmem:[%s8077_s1 + $0x18] sm:$0xf0] }
  0xdf   : > { %1257 = vmatmul.bf16.gmra.mxu3 %v6281_v60  ;;  %v1663_v30 = vmax.f32 %v1041_v0, 0.0  ;;  %v4687_v0 = vor.u32 %v5477_v63, %v4684_v61 }
  0xe0   : > { %v6288_v6 = vpack.c.bf16 %v1660_v4, %v1656_v1  ;;  %v4682_v1 = vld [vmem:[%s8077_s1 + $0x8] sm:$0xf]  ;;  %v5479_v4 = vld [vmem:[%s8077_s1 + $0x14] sm:$0xf0] }
  0xe1   : > { %v1129_v10 = vpop.f32.mrf.mxu2  ;;  %1468 = vmatpush.bf16.msrb.mxu2 %v4687_v0 }
  0xe2   : > { %v1130_v11 = vadd.f32 %v1129_v10, %v6179_v34  ;;  %v1218_v14 = vpop.f32.mrf.mxu3  ;;  %v953_v15 = vpop.f32.mrf.mxu0  ;;  %v5509_v10 = vld [vmem:[%s8077_s1 + $0x10c] sm:$0xf] }
  0xe3   : > { %v954_v18 = vadd.f32 %v953_v15, %v6167_v21  ;;  %v1042_v19 = vpop.f32.mrf.mxu1  ;;  %v4683_v15 = vor.u32 %v5479_v4, %v4682_v1 }
  0xe4   : > { %v1219_v20 = vadd.f32 %v1218_v14, %v1130_v11 }
  0xe5   : > { %v1043_v22 = vadd.f32 %v1042_v19, %v954_v18  ;;  %v4812_v18 = vld [vmem:[%s8077_s1 + $0x118] sm:$0xf0]  ;;  %1290 = vmatpush.bf16.msrb.mxu0 %v4683_v15 }
  0xe6   : > { %v1664_v57 = vmax.f32 %v1219_v20, 0.0  ;;  %v4815_v25 = vor.u32 %v5509_v10, %v4812_v18 }
  0xe7   : > { %v1667_v31 = vmax.f32 %v1043_v22, 0.0 }
  0xe8   : > { %1557 = vmatpush.bf16.msrb.mxu3 %v4815_v25 }
  0xe9   : > { %v1131_v37 = vpop.f32.mrf.mxu2  ;;  %v6298_v39 = vpack.c.bf16 %v1667_v31, %v1663_v30 }
  0xea   : > { %v1132_v40 = vadd.f32 %v1131_v37, %v6179_v34  ;;  %v1220_v41 = vpop.f32.mrf.mxu3  ;;  %v956_v42 = vpop.f32.mrf.mxu0  ;;  %v5471_v37 = vld [vmem:[%s5950_s14 + $0xd4] sm:$0xf0] }
  0xeb   : > { %v957_v45 = vadd.f32 %v956_v42, %v6167_v21  ;;  %v1045_v46 = vpop.f32.mrf.mxu1  ;;  %v6340_v63 = vor.u32 %v5471_v37, %v4650_v36 }
  0xec   : > { %v1221_v54 = vadd.f32 %v1220_v41, %v1132_v40  ;;  %v4810_v40 = vld [vmem:[%s8077_s1 + $0x108] sm:$0xf]  ;;  %v5511_v41 = vld [vmem:[%s8077_s1 + $0x114] sm:$0xf0] }
  0xed   : > { %v1046_v56 = vadd.f32 %v1045_v46, %v957_v45  ;;  %995 = vmatmul.bf16.gmra.mxu0 %v6296_v38  ;;  %v5470_v46 = vld [vmem:[%s5950_s14 + $0xd4] sm:$0xf] }
  0xee   : > { %v1668_v62 = vmax.f32 %v1221_v54, 0.0  ;;  %1084 = vmatmul.bf16.gmra.mxu1 %v6301_v44  ;;  %1173 = vmatmul.bf16.gmra.mxu2 %v6296_v38  ;;  %v4652_v54 = vld [vmem:[%s5950_s14 + $0xd8] sm:$0xf0] }
  0xef   : > { %1262 = vmatmul.bf16.gmra.mxu3 %v6301_v44  ;;  %v1671_v42 = vmax.f32 %v1046_v56, 0.0  ;;  %v6345_v10 = vor.u32 %v5470_v46, %v4652_v54  ;;  %v5472_v54 = vld [vmem:[%s5950_s14 + $0xe4] sm:$0xf] }
  0xf0   : > { %v6323_v11 = vpack.c.bf16 %v1668_v62, %v1664_v57  ;;  %v4811_v57 = vor.u32 %v5511_v41, %v4810_v40  ;;  %v4658_v41 = vld [vmem:[%s5950_s14 + $0xe0] sm:$0xf] }
  0xf1   : > { %v1134_v14 = vpop.f32.mrf.mxu2 }
  0xf2   : > { %v1135_v19 = vadd.f32 %v1134_v14, %v6179_v34  ;;  %v1223_v20 = vpop.f32.mrf.mxu3  ;;  %v958_v22 = vpop.f32.mrf.mxu0  ;;  %1379 = vmatpush.bf16.msrb.mxu1 %v4811_v57  ;;  %v4660_v57 = vld [vmem:[%s5950_s14 + $0xe8] sm:$0xf0] }
  0xf3   : > { %v959_v29 = vadd.f32 %v958_v22, %v6167_v21  ;;  %v1047_v30 = vpop.f32.mrf.mxu1 }
  0xf4   : > { %v1224_v31 = vadd.f32 %v1223_v20, %v1135_v19 }
  0xf5   : > { %v1048_v35 = vadd.f32 %v1047_v30, %v959_v29 }
  0xf6   : > { %v1672_v19 = vmax.f32 %v1224_v31, 0.0 }
  0xf7   : > { %v1675_v45 = vmax.f32 %v1048_v35, 0.0 }
  0xf9   : > { %v1136_v62 = vpop.f32.mrf.mxu2  ;;  %v6342_v61 = vpack.c.bf16 %v1675_v45, %v1671_v42  ;;  %v5473_v42 = vld [vmem:[%s5950_s14 + $0xe4] sm:$0xf0] }
  0xfa   : > { %v1137_v0 = vadd.f32 %v1136_v62, %v6179_v34  ;;  %v1225_v1 = vpop.f32.mrf.mxu3  ;;  %v961_v4 = vpop.f32.mrf.mxu0 }
  0xfb   : > { %v962_v14 = vadd.f32 %v961_v4, %v6167_v21  ;;  %v1050_v15 = vpop.f32.mrf.mxu1 }
  0xfc   : > { %v1226_v56 = vadd.f32 %v1225_v1, %v1137_v0  ;;  %v6360_v0 = vor.u32 %v5473_v42, %v4658_v41 }
  0xfd   : > { %v1051_v18 = vadd.f32 %v1050_v15, %v962_v14  ;;  %1000 = vmatmul.bf16.gmra.mxu0 %v6340_v63 }
  0xfe   : > { %v1676_v20 = vmax.f32 %v1226_v56, 0.0  ;;  %1089 = vmatmul.bf16.gmra.mxu1 %v6345_v10  ;;  %1178 = vmatmul.bf16.gmra.mxu2 %v6340_v63  ;;  %v6365_v56 = vor.u32 %v5472_v54, %v4660_v57 }
  0xff   : > { %1267 = vmatmul.bf16.gmra.mxu3 %v6345_v10  ;;  %v1679_v45 = vmax.f32 %v1051_v18, 0.0 }
 0x100   : > { %v6352_v22 = vpack.c.bf16 %v1676_v20, %v1672_v19 }
 0x101   : > { %v1139_v25 = vpop.f32.mrf.mxu2 }
 0x102   : > { %v1140_v29 = vadd.f32 %v1139_v25, %v6179_v34  ;;  %v1228_v30 = vpop.f32.mrf.mxu3  ;;  %v963_v35 = vpop.f32.mrf.mxu0 }
 0x103   : > { %v964_v36 = vadd.f32 %v963_v35, %v6167_v21  ;;  %v1052_v37 = vpop.f32.mrf.mxu1  ;;  %v5563_v35 = vld [vmem:[%s8079_s3 + $0xb8] sm:$0xff] }
 0x104   : > { %v1229_v31 = vadd.f32 %v1228_v30, %v1140_v29  ;;  %2269 = vmatpush.bf16.msra.mxu2 %v5563_v35 }
 0x105   : > { %v1053_v40 = vadd.f32 %v1052_v37, %v964_v36  ;;  %v5547_v36 = vld [vmem:[%s8079_s3 + $0x38] sm:$0xff] }
 0x106   : > { %v1680_v18 = vmax.f32 %v1229_v31, 0.0  ;;  %v5571_v37 = vld [vmem:[%s8079_s3 + $0xf8] sm:$0xff]  ;;  %2091 = vmatpush.bf16.msra.mxu0 %v5547_v36 }
 0x107   : > { %v1683_v46 = vmax.f32 %v1053_v40, 0.0  ;;  %2358 = vmatpush.bf16.msra.mxu3 %v5571_v37 }
 0x109   : > { %v1141_v62 = vpop.f32.mrf.mxu2  ;;  %v6362_v1 = vpack.c.bf16 %v1683_v46, %v1679_v45 }
 0x10a   : > { %v1142_v4 = vadd.f32 %v1141_v62, %v6179_v34  ;;  %v1230_v14 = vpop.f32.mrf.mxu3  ;;  %v966_v15 = vpop.f32.mrf.mxu0 }
 0x10b   : > { %8107 = vst [vmem:[#allocation2_spill] sm:$0xff] %v6362_v1  ;;  %v967_v19 = vadd.f32 %v966_v15, %v6167_v21  ;;  %v1055_v20 = vpop.f32.mrf.mxu1  ;;  %v5555_v15 = vld [vmem:[%s8079_s3 + $0x78] sm:$0xff] }
 0x10c   : > { %v1231_v25 = vadd.f32 %v1230_v14, %v1142_v4  ;;  %v4666_v4 = vld [vmem:[%s5950_s14 + $0xf0] sm:$0xf]  ;;  %v5475_v14 = vld [vmem:[%s5950_s14 + $0xf4] sm:$0xf0]  ;;  %2180 = vmatpush.bf16.msra.mxu1 %v5555_v15 }
 0x10d   : > { %v1056_v29 = vadd.f32 %v1055_v20, %v967_v19  ;;  %1005 = vmatmul.bf16.gmra.mxu0 %v6360_v0  ;;  %v6392_v35 = vor.u32 %v5475_v14, %v4666_v4 }
 0x10e   : > { %v1684_v30 = vmax.f32 %v1231_v25, 0.0  ;;  %1094 = vmatmul.bf16.gmra.mxu1 %v6365_v56  ;;  %1183 = vmatmul.bf16.gmra.mxu2 %v6360_v0  ;;  %v5474_v25 = vld [vmem:[%s5950_s14 + $0xf4] sm:$0xf] }
 0x10f   : > { %1272 = vmatmul.bf16.gmra.mxu3 %v6365_v56  ;;  %v1687_v19 = vmax.f32 %v1056_v29, 0.0 }
 0x110   : > { %v6381_v31 = vpack.c.bf16 %v1684_v30, %v1680_v18  ;;  %v4668_v18 = vld [vmem:[%s5950_s14 + $0xf8] sm:$0xf0] }
 0x111   : > { %v1144_v40 = vpop.f32.mrf.mxu2 }
 0x112   : > { %8108 = vst [vmem:[#allocation3_spill] sm:$0xff] %v6381_v31  ;;  %v1145_v41 = vadd.f32 %v1144_v40, %v6179_v34  ;;  %v1233_v42 = vpop.f32.mrf.mxu3  ;;  %v968_v45 = vpop.f32.mrf.mxu0 }
 0x113   : > { %v969_v46 = vadd.f32 %v968_v45, %v6167_v21  ;;  %v1057_v54 = vpop.f32.mrf.mxu1 }
 0x114   : > { %v1234_v57 = vadd.f32 %v1233_v42, %v1145_v41  ;;  %v6397_v42 = vor.u32 %v5474_v25, %v4668_v18 }
 0x115   : > { %v1058_v62 = vadd.f32 %v1057_v54, %v969_v46 }
 0x117   : > { %v1691_v20 = vmax.f32 %v1058_v62, 0.0  ;;  %v1688_v62 = vmax.f32 %v1234_v57, 0.0 }
 0x119   : > { %v1146_v30 = vpop.f32.mrf.mxu2  ;;  %v6394_v36 = vpack.c.bf16 %v1691_v20, %v1687_v19 }
 0x11a   : > { %v1147_v37 = vadd.f32 %v1146_v30, %v6179_v34  ;;  %v1235_v40 = vpop.f32.mrf.mxu3  ;;  %v971_v41 = vpop.f32.mrf.mxu0 }
 0x11b   : > { %8109 = vst [vmem:[#allocation4_spill] sm:$0xff] %v6394_v36  ;;  %v972_v45 = vadd.f32 %v971_v41, %v6167_v21  ;;  %v1060_v46 = vpop.f32.mrf.mxu1 }
 0x11c   : > { %v1236_v54 = vadd.f32 %v1235_v40, %v1147_v37 }
 0x11d   : > { %v1061_v29 = vadd.f32 %v1060_v46, %v972_v45  ;;  %1010 = vmatmul.bf16.gmra.mxu0 %v6392_v35 }
 0x11e   : > { %v1692_v15 = vmax.f32 %v1236_v54, 0.0  ;;  %1099 = vmatmul.bf16.gmra.mxu1 %v6397_v42  ;;  %1188 = vmatmul.bf16.gmra.mxu2 %v6392_v35 }
 0x11f   : > { %1277 = vmatmul.bf16.gmra.mxu3 %v6397_v42  ;;  %v1695_v57 = vmax.f32 %v1061_v29, 0.0  ;;  %v5562_v29 = vld [vmem:[%s8079_s3 + $0xb0] sm:$0xff] }
 0x120   : > { %v6404_v4 = vpack.c.bf16 %v1692_v15, %v1688_v62  ;;  %2270 = vmatpush.bf16.msra.mxu2 %v5562_v29 }
 0x121   : > { %v1149_v14 = vpop.f32.mrf.mxu2 }
 0x122   : > { %8110 = vst [vmem:[#allocation5_spill] sm:$0xff] %v6404_v4  ;;  %v1150_v19 = vadd.f32 %v1149_v14, %v6179_v34  ;;  %v1238_v20 = vpop.f32.mrf.mxu3  ;;  %v973_v25 = vpop.f32.mrf.mxu0 }
 0x123   : > { %v974_v18 = vadd.f32 %v973_v25, %v6167_v21  ;;  %v1062_v30 = vpop.f32.mrf.mxu1 }
 0x124   : > { %v1239_v37 = vadd.f32 %v1238_v20, %v1150_v19  ;;  %v5546_v19 = vld [vmem:[%s8079_s3 + $0x30] sm:$0xff] }
 0x125   : > { %v1063_v40 = vadd.f32 %v1062_v30, %v974_v18  ;;  %2092 = vmatpush.bf16.msra.mxu0 %v5546_v19 }
 0x126   : > { %v1696_v25 = vmax.f32 %v1239_v37, 0.0 }
 0x127   : > { %v1699_v41 = vmax.f32 %v1063_v40, 0.0 }
 0x129   : > { %v1151_v45 = vpop.f32.mrf.mxu2  ;;  %v6408_v46 = vpack.c.bf16 %v1699_v41, %v1695_v57  ;;  %v5554_v41 = vld [vmem:[%s8079_s3 + $0x70] sm:$0xff] }
 0x12a   : > { %v1152_v54 = vadd.f32 %v1151_v45, %v6179_v34  ;;  %v1240_v36 = vpop.f32.mrf.mxu3  ;;  %v976_v62 = vpop.f32.mrf.mxu0  ;;  %2181 = vmatpush.bf16.msra.mxu1 %v5554_v41 }
 0x12b   : > { %v977_v15 = vadd.f32 %v976_v62, %v6167_v21  ;;  %v1065_v4 = vpop.f32.mrf.mxu1 }
 0x12c   : > { %v1241_v14 = vadd.f32 %v1240_v36, %v1152_v54  ;;  %v5570_v36 = vld [vmem:[%s8079_s3 + $0xf0] sm:$0xff] }
 0x12d   : > { %v1066_v31 = vadd.f32 %v1065_v4, %v977_v15  ;;  %1291 = vmatmul.bf16.vlgmr.msrb.gmra.mxu0 %v5968_v43  ;;  %2359 = vmatpush.bf16.msra.mxu3 %v5570_v36 }
 0x12e   : > { %v1700_v1 = vmax.f32 %v1241_v14, 0.0  ;;  %1380 = vmatmul.bf16.vlgmr.msrb.gmra.mxu1 %v5976_v47  ;;  %1469 = vmatmul.bf16.vlgmr.msrb.gmra.mxu2 %v5968_v43 }
 0x12f   : > { %1558 = vmatmul.bf16.vlgmr.msrb.gmra.mxu3 %v5976_v47  ;;  %v1703_v45 = vmax.f32 %v1066_v31, 0.0 }
 0x130   : > { %v6425_v4 = vpack.c.bf16 %v1700_v1, %v1696_v25 }
 0x131   : > { %v1154_v20 = vpop.f32.mrf.mxu2 }
 0x132   : > { %v1155_v43 = vadd.f32 %v1154_v20, %v6179_v34  ;;  %v1243_v47 = vpop.f32.mrf.mxu3  ;;  %v978_v18 = vpop.f32.mrf.mxu0 }
 0x133   : > { %v979_v30 = vadd.f32 %v978_v18, %v6167_v21  ;;  %v1067_v37 = vpop.f32.mrf.mxu1 }
 0x134   : > { %v1244_v40 = vadd.f32 %v1243_v47, %v1155_v43 }
 0x135   : > { %v1068_v57 = vadd.f32 %v1067_v37, %v979_v30 }
 0x136   : > { %v1704_v43 = vmax.f32 %v1244_v40, 0.0 }
 0x137   : > { %v1707_v1 = vmax.f32 %v1068_v57, 0.0 }
 0x139   : > { %v1156_v54 = vpop.f32.mrf.mxu2  ;;  %v6432_v62 = vpack.c.bf16 %v1707_v1, %v1703_v45 }
 0x13a   : > { %v1157_v15 = vadd.f32 %v1156_v54, %v6179_v34  ;;  %v1245_v14 = vpop.f32.mrf.mxu3  ;;  %v981_v25 = vpop.f32.mrf.mxu0 }
 0x13b   : > { %v982_v29 = vadd.f32 %v981_v25, %v6167_v21  ;;  %v1070_v19 = vpop.f32.mrf.mxu1 }
 0x13c   : > { %v1246_v36 = vadd.f32 %v1245_v14, %v1157_v15 }
 0x13d   : > { %v1071_v20 = vadd.f32 %v1070_v19, %v982_v29  ;;  %1296 = vmatmul.bf16.gmra.mxu0 %v6010_v2 }
 0x13e   : > { %v1708_v47 = vmax.f32 %v1246_v36, 0.0  ;;  %1385 = vmatmul.bf16.gmra.mxu1 %v6012_v3  ;;  %1474 = vmatmul.bf16.gmra.mxu2 %v6010_v2 }
 0x13f   : > { %1563 = vmatmul.bf16.gmra.mxu3 %v6012_v3  ;;  %v1711_v40 = vmax.f32 %v1071_v20, 0.0  ;;  %v5561_v20 = vld [vmem:[%s8079_s3 + $0xa8] sm:$0xff] }
 0x140   : > { %v6440_v31 = vpack.c.bf16 %v1708_v47, %v1704_v43  ;;  %2271 = vmatpush.bf16.msra.mxu2 %v5561_v20 }
 0x141   : > { %v1159_v18 = vpop.f32.mrf.mxu2 }
 0x142   : > { %v1160_v30 = vadd.f32 %v1159_v18, %v6179_v34  ;;  %v1248_v37 = vpop.f32.mrf.mxu3  ;;  %v983_v57 = vpop.f32.mrf.mxu0 }
 0x143   : > { %v984_v41 = vadd.f32 %v983_v57, %v6167_v21  ;;  %v1072_v45 = vpop.f32.mrf.mxu1 }
 0x144   : > { %v1249_v1 = vadd.f32 %v1248_v37, %v1160_v30  ;;  %v5545_v30 = vld [vmem:[%s8079_s3 + $0x28] sm:$0xff] }
 0x145   : > { %v1073_v54 = vadd.f32 %v1072_v45, %v984_v41  ;;  %v5569_v37 = vld [vmem:[%s8079_s3 + $0xe8] sm:$0xff]  ;;  %2093 = vmatpush.bf16.msra.mxu0 %v5545_v30 }
 0x146   : > { %v1712_v18 = vmax.f32 %v1249_v1, 0.0  ;;  %2360 = vmatpush.bf16.msra.mxu3 %v5569_v37 }
 0x147   : > { %v1715_v15 = vmax.f32 %v1073_v54, 0.0 }
 0x149   : > { %v1161_v14 = vpop.f32.mrf.mxu2  ;;  %v6444_v25 = vpack.c.bf16 %v1715_v15, %v1711_v40 }
 0x14a   : > { %v1162_v2 = vadd.f32 %v1161_v14, %v6179_v34  ;;  %v1250_v3 = vpop.f32.mrf.mxu3  ;;  %v986_v29 = vpop.f32.mrf.mxu0 }
 0x14b   : > { %v987_v19 = vadd.f32 %v986_v29, %v6167_v21  ;;  %v1075_v36 = vpop.f32.mrf.mxu1 }
 0x14c   : > { %v1251_v43 = vadd.f32 %v1250_v3, %v1162_v2  ;;  %v5553_v2 = vld [vmem:[%s8079_s3 + $0x68] sm:$0xff] }
 0x14d   : > { %v1076_v47 = vadd.f32 %v1075_v36, %v987_v19  ;;  %1301 = vmatmul.bf16.gmra.mxu0 %v6022_v8  ;;  %2182 = vmatpush.bf16.msra.mxu1 %v5553_v2 }
 0x14e   : > { %v1716_v57 = vmax.f32 %v1251_v43, 0.0  ;;  %1390 = vmatmul.bf16.gmra.mxu1 %v6024_v9  ;;  %1479 = vmatmul.bf16.gmra.mxu2 %v6022_v8 }
 0x14f   : > { %1568 = vmatmul.bf16.gmra.mxu3 %v6024_v9  ;;  %v1719_v3 = vmax.f32 %v1076_v47, 0.0 }
 0x150   : > { %v6461_v41 = vpack.c.bf16 %v1716_v57, %v1712_v18 }
 0x151   : > { %v1164_v45 = vpop.f32.mrf.mxu2 }
 0x152   : > { %v1165_v8 = vadd.f32 %v1164_v45, %v6179_v34  ;;  %v1253_v9 = vpop.f32.mrf.mxu3  ;;  %v988_v1 = vpop.f32.mrf.mxu0 }
 0x153   : > { %v989_v54 = vadd.f32 %v988_v1, %v6167_v21  ;;  %v1077_v40 = vpop.f32.mrf.mxu1 }
 0x154   : > { %v1254_v15 = vadd.f32 %v1253_v9, %v1165_v8 }
 0x155   : > { %v1078_v14 = vadd.f32 %v1077_v40, %v989_v54 }
 0x156   : > { %v1720_v8 = vmax.f32 %v1254_v15, 0.0 }
 0x157   : > { %v1723_v29 = vmax.f32 %v1078_v14, 0.0 }
 0x159   : > { %v1166_v19 = vpop.f32.mrf.mxu2  ;;  %v6468_v36 = vpack.c.bf16 %v1723_v29, %v1719_v3 }
 0x15a   : > { %v1167_v43 = vadd.f32 %v1166_v19, %v6179_v34  ;;  %v1255_v18 = vpop.f32.mrf.mxu3  ;;  %v991_v57 = vpop.f32.mrf.mxu0 }
 0x15b   : > { %v992_v20 = vadd.f32 %v991_v57, %v6167_v21  ;;  %v1080_v30 = vpop.f32.mrf.mxu1 }
 0x15c   : > { %v1256_v37 = vadd.f32 %v1255_v18, %v1167_v43 }
 0x15d   : > { %v1081_v45 = vadd.f32 %v1080_v30, %v992_v20  ;;  %1306 = vmatmul.bf16.gmra.mxu0 %v6058_v26 }
 0x15e   : > { %v1724_v9 = vmax.f32 %v1256_v37, 0.0  ;;  %1395 = vmatmul.bf16.gmra.mxu1 %v6060_v27  ;;  %1484 = vmatmul.bf16.gmra.mxu2 %v6058_v26 }
 0x15f   : > { %1573 = vmatmul.bf16.gmra.mxu3 %v6060_v27  ;;  %v1727_v15 = vmax.f32 %v1081_v45, 0.0  ;;  %v5560_v45 = vld [vmem:[%s8079_s3 + $0xa0] sm:$0xff] }
 0x160   : > { %v6476_v47 = vpack.c.bf16 %v1724_v9, %v1720_v8  ;;  %2272 = vmatpush.bf16.msra.mxu2 %v5560_v45 }
 0x161   : > { %v1169_v1 = vpop.f32.mrf.mxu2 }
 0x162   : > { %v1170_v54 = vadd.f32 %v1169_v1, %v6179_v34  ;;  %v1258_v40 = vpop.f32.mrf.mxu3  ;;  %v993_v14 = vpop.f32.mrf.mxu0 }
 0x163   : > { %v994_v2 = vadd.f32 %v993_v14, %v6167_v21  ;;  %v1082_v3 = vpop.f32.mrf.mxu1 }
 0x164   : > { %v1259_v29 = vadd.f32 %v1258_v40, %v1170_v54  ;;  %v5544_v54 = vld [vmem:[%s8079_s3 + $0x20] sm:$0xff] }
 0x165   : > { %v1083_v19 = vadd.f32 %v1082_v3, %v994_v2  ;;  %v5568_v40 = vld [vmem:[%s8079_s3 + $0xe0] sm:$0xff]  ;;  %2094 = vmatpush.bf16.msra.mxu0 %v5544_v54 }
 0x166   : > { %v1728_v1 = vmax.f32 %v1259_v29, 0.0  ;;  %2361 = vmatpush.bf16.msra.mxu3 %v5568_v40 }
 0x167   : > { %v1731_v43 = vmax.f32 %v1083_v19, 0.0 }
 0x169   : > { %v1171_v18 = vpop.f32.mrf.mxu2  ;;  %v6480_v57 = vpack.c.bf16 %v1731_v43, %v1727_v15 }
 0x16a   : > { %v1172_v26 = vadd.f32 %v1171_v18, %v6179_v34  ;;  %v1260_v27 = vpop.f32.mrf.mxu3  ;;  %v996_v20 = vpop.f32.mrf.mxu0 }
 0x16b   : > { %v997_v30 = vadd.f32 %v996_v20, %v6167_v21  ;;  %v1085_v37 = vpop.f32.mrf.mxu1 }
 0x16c   : > { %v1261_v8 = vadd.f32 %v1260_v27, %v1172_v26  ;;  %v5552_v26 = vld [vmem:[%s8079_s3 + $0x60] sm:$0xff] }
 0x16d   : > { %v1086_v9 = vadd.f32 %v1085_v37, %v997_v30  ;;  %1311 = vmatmul.bf16.gmra.mxu0 %v6070_v32  ;;  %2183 = vmatpush.bf16.msra.mxu1 %v5552_v26 }
 0x16e   : > { %v1732_v14 = vmax.f32 %v1261_v8, 0.0  ;;  %1400 = vmatmul.bf16.gmra.mxu1 %v6072_v33  ;;  %1489 = vmatmul.bf16.gmra.mxu2 %v6070_v32 }
 0x16f   : > { %1578 = vmatmul.bf16.gmra.mxu3 %v6072_v33  ;;  %v1735_v27 = vmax.f32 %v1086_v9, 0.0 }
 0x170   : > { %v6497_v2 = vpack.c.bf16 %v1732_v14, %v1728_v1 }
 0x171   : > { %v1174_v3 = vpop.f32.mrf.mxu2 }
 0x172   : > { %v1175_v32 = vadd.f32 %v1174_v3, %v6179_v34  ;;  %v1263_v33 = vpop.f32.mrf.mxu3  ;;  %v998_v29 = vpop.f32.mrf.mxu0 }
 0x173   : > { %v999_v19 = vadd.f32 %v998_v29, %v6167_v21  ;;  %v1087_v15 = vpop.f32.mrf.mxu1 }
 0x174   : > { %v1264_v43 = vadd.f32 %v1263_v33, %v1175_v32 }
 0x175   : > { %v1088_v18 = vadd.f32 %v1087_v15, %v999_v19 }
 0x176   : > { %v1736_v32 = vmax.f32 %v1264_v43, 0.0 }
 0x177   : > { %v1739_v20 = vmax.f32 %v1088_v18, 0.0 }
 0x179   : > { %v1176_v30 = vpop.f32.mrf.mxu2  ;;  %v6504_v37 = vpack.c.bf16 %v1739_v20, %v1735_v27 }
 0x17a   : > { %v1177_v8 = vadd.f32 %v1176_v30, %v6179_v34  ;;  %v1265_v1 = vpop.f32.mrf.mxu3  ;;  %v1001_v14 = vpop.f32.mrf.mxu0 }
 0x17b   : > { %v1002_v45 = vadd.f32 %v1001_v14, %v6167_v21  ;;  %v1090_v54 = vpop.f32.mrf.mxu1 }
 0x17c   : > { %v1266_v40 = vadd.f32 %v1265_v1, %v1177_v8 }
 0x17d   : > { %v1091_v3 = vadd.f32 %v1090_v54, %v1002_v45  ;;  %1316 = vmatmul.bf16.gmra.mxu0 %v6106_v52 }
 0x17e   : > { %v1740_v33 = vmax.f32 %v1266_v40, 0.0  ;;  %1405 = vmatmul.bf16.gmra.mxu1 %v6108_v53  ;;  %1494 = vmatmul.bf16.gmra.mxu2 %v6106_v52 }
 0x17f   : > { %1583 = vmatmul.bf16.gmra.mxu3 %v6108_v53  ;;  %v1743_v43 = vmax.f32 %v1091_v3, 0.0  ;;  %v5559_v3 = vld [vmem:[%s8079_s3 + $0x98] sm:$0xff] }
 0x180   : > { %v6512_v9 = vpack.c.bf16 %v1740_v33, %v1736_v32  ;;  %2273 = vmatpush.bf16.msra.mxu2 %v5559_v3 }
 0x181   : > { %v1179_v29 = vpop.f32.mrf.mxu2 }
 0x182   : > { %v1180_v19 = vadd.f32 %v1179_v29, %v6179_v34  ;;  %v1268_v15 = vpop.f32.mrf.mxu3  ;;  %v1003_v18 = vpop.f32.mrf.mxu0 }
 0x183   : > { %v1004_v26 = vadd.f32 %v1003_v18, %v6167_v21  ;;  %v1092_v27 = vpop.f32.mrf.mxu1 }
 0x184   : > { %v1269_v20 = vadd.f32 %v1268_v15, %v1180_v19  ;;  %v5543_v19 = vld [vmem:[%s8079_s3 + $0x18] sm:$0xff] }
 0x185   : > { %v1093_v30 = vadd.f32 %v1092_v27, %v1004_v26  ;;  %v5567_v15 = vld [vmem:[%s8079_s3 + $0xd8] sm:$0xff]  ;;  %2095 = vmatpush.bf16.msra.mxu0 %v5543_v19 }
 0x186   : > { %v1744_v29 = vmax.f32 %v1269_v20, 0.0  ;;  %2362 = vmatpush.bf16.msra.mxu3 %v5567_v15 }
 0x187   : > { %v1747_v8 = vmax.f32 %v1093_v30, 0.0 }
 0x189   : > { %v1181_v1 = vpop.f32.mrf.mxu2  ;;  %v6516_v14 = vpack.c.bf16 %v1747_v8, %v1743_v43 }
 0x18a   : > { %v1182_v52 = vadd.f32 %v1181_v1, %v6179_v34  ;;  %v1270_v53 = vpop.f32.mrf.mxu3  ;;  %v1006_v45 = vpop.f32.mrf.mxu0 }
 0x18b   : > { %v1007_v54 = vadd.f32 %v1006_v45, %v6167_v21  ;;  %v1095_v40 = vpop.f32.mrf.mxu1 }
 0x18c   : > { %v1271_v32 = vadd.f32 %v1270_v53, %v1182_v52  ;;  %v5551_v52 = vld [vmem:[%s8079_s3 + $0x58] sm:$0xff] }
 0x18d   : > { %v1096_v33 = vadd.f32 %v1095_v40, %v1007_v54  ;;  %1321 = vmatmul.bf16.gmra.mxu0 %v6118_v58  ;;  %2184 = vmatpush.bf16.msra.mxu1 %v5551_v52 }
 0x18e   : > { %v1748_v18 = vmax.f32 %v1271_v32, 0.0  ;;  %1410 = vmatmul.bf16.gmra.mxu1 %v6120_v59  ;;  %1499 = vmatmul.bf16.gmra.mxu2 %v6118_v58 }
 0x18f   : > { %1588 = vmatmul.bf16.gmra.mxu3 %v6120_v59  ;;  %v1751_v53 = vmax.f32 %v1096_v33, 0.0 }
 0x190   : > { %v6533_v26 = vpack.c.bf16 %v1748_v18, %v1744_v29 }
 0x191   : > { %v1184_v27 = vpop.f32.mrf.mxu2 }
 0x192   : > { %v1185_v58 = vadd.f32 %v1184_v27, %v6179_v34  ;;  %v1273_v59 = vpop.f32.mrf.mxu3  ;;  %v1008_v20 = vpop.f32.mrf.mxu0 }
 0x193   : > { %v1009_v30 = vadd.f32 %v1008_v20, %v6167_v21  ;;  %v1097_v43 = vpop.f32.mrf.mxu1 }
 0x194   : > { %v1274_v8 = vadd.f32 %v1273_v59, %v1185_v58 }
 0x195   : > { %v1098_v1 = vadd.f32 %v1097_v43, %v1009_v30 }
 0x196   : > { %v1752_v58 = vmax.f32 %v1274_v8, 0.0 }
 0x197   : > { %v1755_v45 = vmax.f32 %v1098_v1, 0.0 }
 0x199   : > { %v1186_v54 = vpop.f32.mrf.mxu2  ;;  %v6540_v40 = vpack.c.bf16 %v1755_v45, %v1751_v53 }
 0x19a   : > { %v1187_v32 = vadd.f32 %v1186_v54, %v6179_v34  ;;  %v1275_v29 = vpop.f32.mrf.mxu3  ;;  %v1011_v18 = vpop.f32.mrf.mxu0 }
 0x19b   : > { %v1012_v3 = vadd.f32 %v1011_v18, %v6167_v21  ;;  %v1100_v19 = vpop.f32.mrf.mxu1 }
 0x19c   : > { %v1276_v15 = vadd.f32 %v1275_v29, %v1187_v32 }
 0x19d   : > { %v1101_v27 = vadd.f32 %v1100_v19, %v1012_v3  ;;  %1326 = vmatmul.bf16.gmra.mxu0 %v6154_v16 }
 0x19e   : > { %v1756_v59 = vmax.f32 %v1276_v15, 0.0  ;;  %1415 = vmatmul.bf16.gmra.mxu1 %v6156_v17  ;;  %1504 = vmatmul.bf16.gmra.mxu2 %v6154_v16  ;;  %v5677_v16 = vld [vmem:[%s8078_s2] sm:$0xf] }
 0x19f   : > { %1593 = vmatmul.bf16.gmra.mxu3 %v6156_v17  ;;  %v1759_v8 = vmax.f32 %v1101_v27, 0.0  ;;  %v6555_v29 = vperm.slane %v5677_v16, 2 }
 0x1a0   : > { %v6548_v33 = vpack.c.bf16 %v1756_v59, %v1752_v58 }
 0x1a1   : > { %v1189_v20 = vpop.f32.mrf.mxu2 }
 0x1a2   : > { %v1190_v30 = vadd.f32 %v1189_v20, %v6179_v34  ;;  %v1278_v43 = vpop.f32.mrf.mxu3  ;;  %v1013_v1 = vpop.f32.mrf.mxu0 }
 0x1a3   : > { %v1014_v52 = vadd.f32 %v1013_v1, %v6167_v21  ;;  %v1102_v53 = vpop.f32.mrf.mxu1  ;;  %v5542_v1 = vld [vmem:[%s8079_s3 + $0x10] sm:$0xff] }
 0x1a4   : > { %v1279_v45 = vadd.f32 %v1278_v43, %v1190_v30  ;;  %v6564_v43 = vperm.slane %v5677_v16, 3  ;;  %2096 = vmatpush.bf16.msra.mxu0 %v5542_v1 }
 0x1a5   : > { %v1103_v54 = vadd.f32 %v1102_v53, %v1014_v52  ;;  %v5566_v52 = vld [vmem:[%s8079_s3 + $0xd0] sm:$0xff] }
 0x1a6   : > { %v1760_v27 = vmax.f32 %v1279_v45, 0.0  ;;  %2363 = vmatpush.bf16.msra.mxu3 %v5566_v52 }
 0x1a7   : > { %v1763_v32 = vmax.f32 %v1103_v54, 0.0 }
 0x1a9   : > { %v1191_v17 = vpop.f32.mrf.mxu2  ;;  %v6557_v18 = vpack.c.bf16 %v1763_v32, %v1759_v8 }
 0x1aa   : > { %v1192_v3 = vadd.f32 %v1191_v17, %v6179_v34  ;;  %v1280_v19 = vpop.f32.mrf.mxu3  ;;  %v1292_v15 = vpop.f32.mrf.mxu0  ;;  %v5558_v34 = vld [vmem:[%s8079_s3 + $0x90] sm:$0xff] }
 0x1ab   : > { %v1293_v21 = vadd.f32 %v1292_v15, %v6555_v29  ;;  %v1381_v58 = vpop.f32.mrf.mxu1  ;;  %2274 = vmatpush.bf16.msra.mxu2 %v5558_v34 }
 0x1ac   : > { %v1281_v59 = vadd.f32 %v1280_v19, %v1192_v3  ;;  %v5550_v3 = vld [vmem:[%s8079_s3 + $0x50] sm:$0xff] }
 0x1ad   : > { %v1382_v20 = vadd.f32 %v1381_v58, %v1293_v21  ;;  %1331 = vmatmul.bf16.gmra.mxu0 %v6171_v24  ;;  %2185 = vmatpush.bf16.msra.mxu1 %v5550_v3 }
 0x1ae   : > { %v1764_v30 = vmax.f32 %v1281_v59, 0.0  ;;  %1420 = vmatmul.bf16.gmra.mxu1 %v6173_v28  ;;  %1509 = vmatmul.bf16.gmra.mxu2 %v6171_v24 }
 0x1af   : > { %1598 = vmatmul.bf16.gmra.mxu3 %v6173_v28  ;;  %v1641_v19 = vmax.f32 %v1382_v20, 0.0 }
 0x1b0   : > { %v6576_v53 = vpack.c.bf16 %v1764_v30, %v1760_v27 }
 0x1b1   : > { %v1470_v45 = vpop.f32.mrf.mxu2 }
 0x1b2   : > { %v1471_v24 = vadd.f32 %v1470_v45, %v6564_v43  ;;  %v1559_v28 = vpop.f32.mrf.mxu3  ;;  %v1294_v54 = vpop.f32.mrf.mxu0 }
 0x1b3   : > { %v1295_v8 = vadd.f32 %v1294_v54, %v6555_v29  ;;  %v1383_v32 = vpop.f32.mrf.mxu1 }
 0x1b4   : > { %v1560_v16 = vadd.f32 %v1559_v28, %v1471_v24 }
 0x1b5   : > { %v1384_v17 = vadd.f32 %v1383_v32, %v1295_v8 }
 0x1b6   : > { %v1642_v24 = vmax.f32 %v1560_v16, 0.0 }
 0x1b7   : > { %v1645_v15 = vmax.f32 %v1384_v17, 0.0 }
 0x1b9   : > { %v6583_v21 = vpack.c.bf16 %v1645_v15, %v1641_v19  ;;  %v1472_v58 = vpop.f32.mrf.mxu2 }
 0x1ba   : > { %v1473_v59 = vadd.f32 %v1472_v58, %v6564_v43  ;;  %v1561_v27 = vpop.f32.mrf.mxu3  ;;  %v1297_v30 = vpop.f32.mrf.mxu0 }
 0x1bb   : > { %v1298_v34 = vadd.f32 %v1297_v30, %v6555_v29  ;;  %v1386_v1 = vpop.f32.mrf.mxu1 }
 0x1bc   : > { %v1562_v52 = vadd.f32 %v1561_v27, %v1473_v59 }
 0x1bd   : > { %v1387_v45 = vadd.f32 %v1386_v1, %v1298_v34  ;;  %1336 = vmatmul.bf16.gmra.mxu0 %v6214_v7 }
 0x1be   : > { %v1646_v28 = vmax.f32 %v1562_v52, 0.0  ;;  %1425 = vmatmul.bf16.gmra.mxu1 %v6217_v13  ;;  %1514 = vmatmul.bf16.gmra.mxu2 %v6214_v7 }
 0x1bf   : > { %1603 = vmatmul.bf16.gmra.mxu3 %v6217_v13  ;;  %v1649_v16 = vmax.f32 %v1387_v45, 0.0  ;;  %v5557_v45 = vld [vmem:[%s8079_s3 + $0x88] sm:$0xff] }
 0x1c0   : > { %v6591_v20 = vpack.c.bf16 %v1646_v28, %v1642_v24  ;;  %2275 = vmatpush.bf16.msra.mxu2 %v5557_v45 }
 0x1c1   : > { %v1475_v54 = vpop.f32.mrf.mxu2 }
 0x1c2   : > { %v1476_v8 = vadd.f32 %v1475_v54, %v6564_v43  ;;  %v1564_v32 = vpop.f32.mrf.mxu3  ;;  %v1299_v17 = vpop.f32.mrf.mxu0 }
 0x1c3   : > { %v1300_v3 = vadd.f32 %v1299_v17, %v6555_v29  ;;  %v1388_v19 = vpop.f32.mrf.mxu1 }
 0x1c4   : > { %v1565_v15 = vadd.f32 %v1564_v32, %v1476_v8  ;;  %v5541_v8 = vld [vmem:[%s8079_s3 + $0x8] sm:$0xff] }
 0x1c5   : > { %v1389_v58 = vadd.f32 %v1388_v19, %v1300_v3  ;;  %v5565_v32 = vld [vmem:[%s8079_s3 + $0xc8] sm:$0xff]  ;;  %2097 = vmatpush.bf16.msra.mxu0 %v5541_v8 }
 0x1c6   : > { %v1650_v54 = vmax.f32 %v1565_v15, 0.0  ;;  %2364 = vmatpush.bf16.msra.mxu3 %v5565_v32 }
 0x1c7   : > { %v1653_v59 = vmax.f32 %v1389_v58, 0.0 }
 0x1c9   : > { %v1477_v27 = vpop.f32.mrf.mxu2  ;;  %v6595_v30 = vpack.c.bf16 %v1653_v59, %v1649_v16 }
 0x1ca   : > { %v1478_v7 = vadd.f32 %v1477_v27, %v6564_v43  ;;  %v1566_v13 = vpop.f32.mrf.mxu3  ;;  %v1302_v34 = vpop.f32.mrf.mxu0 }
 0x1cb   : > { %v1303_v1 = vadd.f32 %v1302_v34, %v6555_v29  ;;  %v1391_v52 = vpop.f32.mrf.mxu1 }
 0x1cc   : > { %v1567_v24 = vadd.f32 %v1566_v13, %v1478_v7  ;;  %v5549_v7 = vld [vmem:[%s8079_s3 + $0x48] sm:$0xff] }
 0x1cd   : > { %v1392_v28 = vadd.f32 %v1391_v52, %v1303_v1  ;;  %1341 = vmatmul.bf16.gmra.mxu0 %v6232_v48  ;;  %2186 = vmatpush.bf16.msra.mxu1 %v5549_v7 }
 0x1ce   : > { %v1654_v17 = vmax.f32 %v1567_v24, 0.0  ;;  %1430 = vmatmul.bf16.gmra.mxu1 %v6237_v55  ;;  %1519 = vmatmul.bf16.gmra.mxu2 %v6232_v48 }
 0x1cf   : > { %1608 = vmatmul.bf16.gmra.mxu3 %v6237_v55  ;;  %v1657_v13 = vmax.f32 %v1392_v28, 0.0 }
 0x1d0   : > { %v6612_v3 = vpack.c.bf16 %v1654_v17, %v1650_v54 }
 0x1d1   : > { %v1480_v19 = vpop.f32.mrf.mxu2 }
 0x1d2   : > { %v1481_v48 = vadd.f32 %v1480_v19, %v6564_v43  ;;  %v1569_v55 = vpop.f32.mrf.mxu3  ;;  %v1304_v15 = vpop.f32.mrf.mxu0 }
 0x1d3   : > { %v1305_v58 = vadd.f32 %v1304_v15, %v6555_v29  ;;  %v1393_v16 = vpop.f32.mrf.mxu1 }
 0x1d4   : > { %v1570_v59 = vadd.f32 %v1569_v55, %v1481_v48 }
 0x1d5   : > { %v1394_v27 = vadd.f32 %v1393_v16, %v1305_v58 }
 0x1d6   : > { %v1658_v48 = vmax.f32 %v1570_v59, 0.0 }
 0x1d7   : > { %v1661_v34 = vmax.f32 %v1394_v27, 0.0 }
 0x1d9   : > { %v1482_v1 = vpop.f32.mrf.mxu2  ;;  %v6619_v52 = vpack.c.bf16 %v1661_v34, %v1657_v13 }
 0x1da   : > { %v1483_v24 = vadd.f32 %v1482_v1, %v6564_v43  ;;  %v1571_v54 = vpop.f32.mrf.mxu3  ;;  %v1307_v17 = vpop.f32.mrf.mxu0 }
 0x1db   : > { %v1308_v45 = vadd.f32 %v1307_v17, %v6555_v29  ;;  %v1396_v8 = vpop.f32.mrf.mxu1 }
 0x1dc   : > { %v1572_v32 = vadd.f32 %v1571_v54, %v1483_v24 }
 0x1dd   : > { %v1397_v19 = vadd.f32 %v1396_v8, %v1308_v45  ;;  %1346 = vmatmul.bf16.gmra.mxu0 %v6276_v50 }
 0x1de   : > { %v1662_v55 = vmax.f32 %v1572_v32, 0.0  ;;  %1435 = vmatmul.bf16.gmra.mxu1 %v6281_v60  ;;  %1524 = vmatmul.bf16.gmra.mxu2 %v6276_v50 }
 0x1df   : > { %1613 = vmatmul.bf16.gmra.mxu3 %v6281_v60  ;;  %v1665_v59 = vmax.f32 %v1397_v19, 0.0  ;;  %v5556_v19 = vld [vmem:[%s8079_s3 + $0x80] sm:$0xff] }
 0x1e0   : > { %v6627_v28 = vpack.c.bf16 %v1662_v55, %v1658_v48  ;;  %2276 = vmatpush.bf16.msra.mxu2 %v5556_v19 }
 0x1e1   : > { %v1485_v15 = vpop.f32.mrf.mxu2 }
 0x1e2   : > { %v1486_v58 = vadd.f32 %v1485_v15, %v6564_v43  ;;  %v1574_v16 = vpop.f32.mrf.mxu3  ;;  %v1309_v27 = vpop.f32.mrf.mxu0 }
 0x1e3   : > { %v1310_v7 = vadd.f32 %v1309_v27, %v6555_v29  ;;  %v1398_v13 = vpop.f32.mrf.mxu1 }
 0x1e4   : > { %v1575_v34 = vadd.f32 %v1574_v16, %v1486_v58  ;;  %v5540_v58 = vld [vmem:[%s8079_s3] sm:$0xff] }
 0x1e5   : > { %v1399_v1 = vadd.f32 %v1398_v13, %v1310_v7  ;;  %v5564_v16 = vld [vmem:[%s8079_s3 + $0xc0] sm:$0xff]  ;;  %2098 = vmatpush.bf16.msra.mxu0 %v5540_v58 }
 0x1e6   : > { %v1666_v15 = vmax.f32 %v1575_v34, 0.0  ;;  %2365 = vmatpush.bf16.msra.mxu3 %v5564_v16 }
 0x1e7   : > { %v1669_v24 = vmax.f32 %v1399_v1, 0.0 }
 0x1e9   : > { %v1487_v54 = vpop.f32.mrf.mxu2  ;;  %v6631_v17 = vpack.c.bf16 %v1669_v24, %v1665_v59 }
 0x1ea   : > { %v1488_v50 = vadd.f32 %v1487_v54, %v6564_v43  ;;  %v1576_v60 = vpop.f32.mrf.mxu3  ;;  %v1312_v45 = vpop.f32.mrf.mxu0 }
 0x1eb   : > { %v1313_v8 = vadd.f32 %v1312_v45, %v6555_v29  ;;  %v1401_v32 = vpop.f32.mrf.mxu1 }
 0x1ec   : > { %v1577_v48 = vadd.f32 %v1576_v60, %v1488_v50  ;;  %v5548_v50 = vld [vmem:[%s8079_s3 + $0x40] sm:$0xff] }
 0x1ed   : > { %v1402_v55 = vadd.f32 %v1401_v32, %v1313_v8  ;;  %1351 = vmatmul.bf16.gmra.mxu0 %v6296_v38  ;;  %2187 = vmatpush.bf16.msra.mxu1 %v5548_v50 }
 0x1ee   : > { %v1670_v27 = vmax.f32 %v1577_v48, 0.0  ;;  %1440 = vmatmul.bf16.gmra.mxu1 %v6301_v44  ;;  %1529 = vmatmul.bf16.gmra.mxu2 %v6296_v38 }
 0x1ef   : > { %1618 = vmatmul.bf16.gmra.mxu3 %v6301_v44  ;;  %v1673_v60 = vmax.f32 %v1402_v55, 0.0 }
 0x1f0   : > { %v6648_v7 = vpack.c.bf16 %v1670_v27, %v1666_v15 }
 0x1f1   : > { %v1490_v13 = vpop.f32.mrf.mxu2 }
 0x1f2   : > { %v1491_v38 = vadd.f32 %v1490_v13, %v6564_v43  ;;  %v1579_v44 = vpop.f32.mrf.mxu3  ;;  %v1314_v34 = vpop.f32.mrf.mxu0 }
 0x1f3   : > { %v1315_v1 = vadd.f32 %v1314_v34, %v6555_v29  ;;  %v1403_v59 = vpop.f32.mrf.mxu1 }
 0x1f4   : > { %v1580_v24 = vadd.f32 %v1579_v44, %v1491_v38 }
 0x1f5   : > { %v1404_v54 = vadd.f32 %v1403_v59, %v1315_v1 }
 0x1f6   : > { %v1674_v38 = vmax.f32 %v1580_v24, 0.0 }
 0x1f7   : > { %v1677_v45 = vmax.f32 %v1404_v54, 0.0 }
 0x1f9   : > { %v1492_v8 = vpop.f32.mrf.mxu2  ;;  %v6655_v32 = vpack.c.bf16 %v1677_v45, %v1673_v60 }
 0x1fa   : > { %v1493_v48 = vadd.f32 %v1492_v8, %v6564_v43  ;;  %v1581_v15 = vpop.f32.mrf.mxu3  ;;  %v1317_v27 = vpop.f32.mrf.mxu0 }
 0x1fb   : > { %v1318_v19 = vadd.f32 %v1317_v27, %v6555_v29  ;;  %v1406_v58 = vpop.f32.mrf.mxu1 }
 0x1fc   : > { %v1582_v16 = vadd.f32 %v1581_v15, %v1493_v48 }
 0x1fd   : > { %v1407_v13 = vadd.f32 %v1406_v58, %v1318_v19  ;;  %1356 = vmatmul.bf16.gmra.mxu0 %v6340_v63 }
 0x1fe   : > { %v1678_v44 = vmax.f32 %v1582_v16, 0.0  ;;  %1445 = vmatmul.bf16.gmra.mxu1 %v6345_v10  ;;  %1534 = vmatmul.bf16.gmra.mxu2 %v6340_v63 }
 0x1ff   : > { %1623 = vmatmul.bf16.gmra.mxu3 %v6345_v10  ;;  %v1681_v24 = vmax.f32 %v1407_v13, 0.0  ;;  %v5178_v13 = vld [vmem:[%s8081_s5 + $0xe8] sm:$0xf] }
 0x200   : > { %v6663_v55 = vpack.c.bf16 %v1678_v44, %v1674_v38 }
 0x201   : > { %v1495_v34 = vpop.f32.mrf.mxu2 }
 0x202   : > { %v1496_v1 = vadd.f32 %v1495_v34, %v6564_v43  ;;  %v1584_v59 = vpop.f32.mrf.mxu3  ;;  %v1319_v54 = vpop.f32.mrf.mxu0 }
 0x203   : > { %v1320_v50 = vadd.f32 %v1319_v54, %v6555_v29  ;;  %v1408_v60 = vpop.f32.mrf.mxu1 }
 0x204   : > { %v1585_v45 = vadd.f32 %v1584_v59, %v1496_v1  ;;  %v5603_v1 = vld [vmem:[%s8081_s5 + $0xf4] sm:$0xf0] }
 0x205   : > { %v1409_v8 = vadd.f32 %v1408_v60, %v1320_v50  ;;  %v5179_v59 = vor.u32 %v5603_v1, %v5178_v13  ;;  %v5170_v50 = vld [vmem:[%s8081_s5 + $0xe0] sm:$0xf]  ;;  %v5602_v60 = vld [vmem:[%s8081_s5 + $0xec] sm:$0xf0] }
 0x206   : > { %v1682_v34 = vmax.f32 %v1585_v45, 0.0 }
 0x207   : > { %v1685_v48 = vmax.f32 %v1409_v8, 0.0  ;;  %v5171_v8 = vor.u32 %v5602_v60, %v5170_v50  ;;  %2875 = vmatpush.bf16.msrb.mxu2 %v5179_v59 }
 0x209   : > { %v1497_v15 = vpop.f32.mrf.mxu2  ;;  %v6667_v27 = vpack.c.bf16 %v1685_v48, %v1681_v24  ;;  %v5180_v24 = vld [vmem:[%s8081_s5 + $0xf8] sm:$0xf0]  ;;  %2697 = vmatpush.bf16.msrb.mxu0 %v5171_v8 }
 0x20a   : > { %v1498_v63 = vadd.f32 %v1497_v15, %v6564_v43  ;;  %v1586_v10 = vpop.f32.mrf.mxu3  ;;  %v1322_v19 = vpop.f32.mrf.mxu0 }
 0x20b   : > { %v1323_v58 = vadd.f32 %v1322_v19, %v6555_v29  ;;  %v1411_v16 = vpop.f32.mrf.mxu1 }
 0x20c   : > { %v1587_v38 = vadd.f32 %v1586_v10, %v1498_v63 }
 0x20d   : > { %v1412_v44 = vadd.f32 %v1411_v16, %v1323_v58  ;;  %1361 = vmatmul.bf16.gmra.mxu0 %v6360_v0 }
 0x20e   : > { %v1686_v54 = vmax.f32 %v1587_v38, 0.0  ;;  %1450 = vmatmul.bf16.gmra.mxu1 %v6365_v56  ;;  %1539 = vmatmul.bf16.gmra.mxu2 %v6360_v0  ;;  %v5601_v0 = vld [vmem:[%s8081_s5 + $0xec] sm:$0xf] }
 0x20f   : > { %1628 = vmatmul.bf16.gmra.mxu3 %v6365_v56  ;;  %v5183_v10 = vor.u32 %v5601_v0, %v5180_v24  ;;  %v1689_v13 = vmax.f32 %v1412_v44, 0.0 }
 0x210   : > { %v6690_v56 = vpack.c.bf16 %v1686_v54, %v1682_v34  ;;  %v5600_v34 = vld [vmem:[%s8081_s5 + $0xe4] sm:$0xf]  ;;  %v5172_v54 = vld [vmem:[%s8081_s5 + $0xf0] sm:$0xf0] }
 0x211   : > { %v1500_v45 = vpop.f32.mrf.mxu2  ;;  %2964 = vmatpush.bf16.msrb.mxu3 %v5183_v10  ;;  %v5175_v50 = vor.u32 %v5600_v34, %v5172_v54 }
 0x212   : > { %v1501_v48 = vadd.f32 %v1500_v45, %v6564_v43  ;;  %v1589_v15 = vpop.f32.mrf.mxu3  ;;  %v1324_v63 = vpop.f32.mrf.mxu0 }
 0x213   : > { %v1325_v19 = vadd.f32 %v1324_v63, %v6555_v29  ;;  %v1413_v58 = vpop.f32.mrf.mxu1  ;;  %2786 = vmatpush.bf16.msrb.mxu1 %v5175_v50 }
 0x214   : > { %v1590_v16 = vadd.f32 %v1589_v15, %v1501_v48 }
 0x215   : > { %v1414_v38 = vadd.f32 %v1413_v58, %v1325_v19 }
 0x216   : > { %v1690_v10 = vmax.f32 %v1590_v16, 0.0 }
 0x217   : > { %v1693_v1 = vmax.f32 %v1414_v38, 0.0 }
 0x219   : > { %v1502_v59 = vpop.f32.mrf.mxu2  ;;  %v6703_v60 = vpack.c.bf16 %v1693_v1, %v1689_v13 }
 0x21a   : > { %v1503_v0 = vadd.f32 %v1502_v59, %v6564_v43  ;;  %v1591_v45 = vpop.f32.mrf.mxu3  ;;  %v1327_v8 = vpop.f32.mrf.mxu0 }
 0x21b   : > { %v1328_v24 = vadd.f32 %v1327_v8, %v6555_v29  ;;  %v1416_v48 = vpop.f32.mrf.mxu1 }
 0x21c   : > { %v1592_v15 = vadd.f32 %v1591_v45, %v1503_v0 }
 0x21d   : > { %v1417_v63 = vadd.f32 %v1416_v48, %v1328_v24  ;;  %1366 = vmatmul.bf16.gmra.mxu0 %v6392_v35 }
 0x21e   : > { %v1694_v19 = vmax.f32 %v1592_v15, 0.0  ;;  %1455 = vmatmul.bf16.gmra.mxu1 %v6397_v42  ;;  %1544 = vmatmul.bf16.gmra.mxu2 %v6392_v35 }
 0x21f   : > { %1633 = vmatmul.bf16.gmra.mxu3 %v6397_v42  ;;  %v1697_v16 = vmax.f32 %v1417_v63, 0.0  ;;  %v5162_v63 = vld [vmem:[%s8081_s5 + $0xc8] sm:$0xf] }
 0x220   : > { %v6711_v44 = vpack.c.bf16 %v1694_v19, %v1690_v10 }
 0x221   : > { %v1505_v58 = vpop.f32.mrf.mxu2 }
 0x222   : > { %v1506_v38 = vadd.f32 %v1505_v58, %v6564_v43  ;;  %v1594_v34 = vpop.f32.mrf.mxu3  ;;  %v1329_v54 = vpop.f32.mrf.mxu0 }
 0x223   : > { %v1330_v13 = vadd.f32 %v1329_v54, %v6555_v29  ;;  %v1418_v1 = vpop.f32.mrf.mxu1 }
 0x224   : > { %v1595_v50 = vadd.f32 %v1594_v34, %v1506_v38  ;;  %v5599_v38 = vld [vmem:[%s8081_s5 + $0xd4] sm:$0xf0] }
 0x225   : > { %v1419_v59 = vadd.f32 %v1418_v1, %v1330_v13  ;;  %v5163_v34 = vor.u32 %v5599_v38, %v5162_v63 }
 0x226   : > { %v1698_v58 = vmax.f32 %v1595_v50, 0.0  ;;  %v5164_v50 = vld [vmem:[%s8081_s5 + $0xd8] sm:$0xf0] }
 0x227   : > { %v1701_v0 = vmax.f32 %v1419_v59, 0.0  ;;  %2876 = vmatpush.bf16.msrb.mxu2 %v5163_v34 }
 0x229   : > { %v1507_v45 = vpop.f32.mrf.mxu2  ;;  %v6715_v8 = vpack.c.bf16 %v1701_v0, %v1697_v16 }
 0x22a   : > { %v1508_v35 = vadd.f32 %v1507_v45, %v6564_v43  ;;  %v1596_v42 = vpop.f32.mrf.mxu3  ;;  %v1332_v24 = vpop.f32.mrf.mxu0 }
 0x22b   : > { %v1333_v48 = vadd.f32 %v1332_v24, %v6555_v29  ;;  %v1421_v15 = vpop.f32.mrf.mxu1 }
 0x22c   : > { %v1597_v10 = vadd.f32 %v1596_v42, %v1508_v35 }
 0x22d   : > { %v1422_v19 = vadd.f32 %v1421_v15, %v1333_v48  ;;  %2099 = vmatmul.bf16.vlgmr.msra.gmra.mxu0 %v6212_v5  ;;  %v5154_v5 = vld [vmem:[%s8081_s5 + $0xc0] sm:$0xf]  ;;  %v5596_v15 = vld [vmem:[%s8081_s5 + $0xc4] sm:$0xf] }
 0x22e   : > { %v1702_v54 = vmax.f32 %v1597_v10, 0.0  ;;  %2188 = vmatmul.bf16.vlgmr.msra.gmra.mxu1 %v6224_v23  ;;  %2277 = vmatmul.bf16.vlgmr.msra.gmra.mxu2 %v6583_v21  ;;  %v5598_v23 = vld [vmem:[%s8081_s5 + $0xcc] sm:$0xf0]  ;;  %v5597_v21 = vld [vmem:[%s8081_s5 + $0xcc] sm:$0xf] }
 0x22f   : > { %2366 = vmatmul.bf16.vlgmr.msra.gmra.mxu3 %v6591_v20  ;;  %v5155_v1 = vor.u32 %v5598_v23, %v5154_v5  ;;  %v5167_v45 = vor.u32 %v5597_v21, %v5164_v50  ;;  %v5156_v10 = vld [vmem:[%s8081_s5 + $0xd0] sm:$0xf0] }
 0x230   : > { %v6738_v20 = vpack.c.bf16 %v1702_v54, %v1698_v58  ;;  %v1705_v58 = vmax.f32 %v1422_v19, 0.0  ;;  %v5159_v63 = vor.u32 %v5596_v15, %v5156_v10 }
 0x231   : > { %v1510_v13 = vpop.f32.mrf.mxu2  ;;  %2698 = vmatpush.bf16.msrb.mxu0 %v5155_v1  ;;  %2965 = vmatpush.bf16.msrb.mxu3 %v5167_v45 }
 0x232   : > { %v1511_v59 = vadd.f32 %v1510_v13, %v6564_v43  ;;  %v1599_v16 = vpop.f32.mrf.mxu3  ;;  %v1334_v0 = vpop.f32.mrf.mxu0  ;;  %2787 = vmatpush.bf16.msrb.mxu1 %v5159_v63 }
 0x233   : > { %v1335_v35 = vadd.f32 %v1334_v0, %v6555_v29  ;;  %v1423_v42 = vpop.f32.mrf.mxu1 }
 0x234   : > { %v1600_v24 = vadd.f32 %v1599_v16, %v1511_v59 }
 0x235   : > { %v1424_v48 = vadd.f32 %v1423_v42, %v1335_v35 }
 0x236   : > { %v1706_v16 = vmax.f32 %v1600_v24, 0.0 }
 0x237   : > { %v1709_v54 = vmax.f32 %v1424_v48, 0.0 }
 0x239   : > { %v1512_v38 = vpop.f32.mrf.mxu2  ;;  %v6751_v34 = vpack.c.bf16 %v1709_v54, %v1705_v58 }
 0x23a   : > { %v1513_v5 = vadd.f32 %v1512_v38, %v6564_v43  ;;  %v1601_v23 = vpop.f32.mrf.mxu3  ;;  %v1337_v21 = vpop.f32.mrf.mxu0 }
 0x23b   : > { %v1338_v13 = vadd.f32 %v1337_v21, %v6555_v29  ;;  %v1426_v1 = vpop.f32.mrf.mxu1 }
 0x23c   : > { %v1602_v50 = vadd.f32 %v1601_v23, %v1513_v5 }
 0x23d   : > { %v1427_v59 = vadd.f32 %v1426_v1, %v1338_v13  ;;  %2104 = vmatmul.bf16.gmra.mxu0 %v6234_v49 }
 0x23e   : > { %v1710_v0 = vmax.f32 %v1602_v50, 0.0  ;;  %2193 = vmatmul.bf16.gmra.mxu1 %v6259_v12  ;;  %2282 = vmatmul.bf16.gmra.mxu2 %v6595_v30 }
 0x23f   : > { %2371 = vmatmul.bf16.gmra.mxu3 %v6612_v3  ;;  %v1713_v24 = vmax.f32 %v1427_v59, 0.0  ;;  %v5146_v59 = vld [vmem:[%s8081_s5 + $0xa8] sm:$0xf] }
 0x240   : > { %v6759_v19 = vpack.c.bf16 %v1710_v0, %v1706_v16  ;;  %v5595_v16 = vld [vmem:[%s8081_s5 + $0xb4] sm:$0xf0] }
 0x241   : > { %v1515_v45 = vpop.f32.mrf.mxu2  ;;  %v5147_v0 = vor.u32 %v5595_v16, %v5146_v59 }
 0x242   : > { %v1516_v35 = vadd.f32 %v1515_v45, %v6564_v43  ;;  %v1604_v42 = vpop.f32.mrf.mxu3  ;;  %v1339_v48 = vpop.f32.mrf.mxu0 }
 0x243   : > { %v1340_v15 = vadd.f32 %v1339_v48, %v6555_v29  ;;  %v1428_v10 = vpop.f32.mrf.mxu1  ;;  %2877 = vmatpush.bf16.msrb.mxu2 %v5147_v0 }
 0x244   : > { %v1605_v58 = vadd.f32 %v1604_v42, %v1516_v35  ;;  %v5148_v42 = vld [vmem:[%s8081_s5 + $0xb8] sm:$0xf0] }
 0x245   : > { %v1429_v49 = vadd.f32 %v1428_v10, %v1340_v15 }
 0x246   : > { %v1714_v1 = vmax.f32 %v1605_v58, 0.0 }
 0x247   : > { %v1717_v54 = vmax.f32 %v1429_v49, 0.0 }
 0x249   : > { %v1517_v63 = vpop.f32.mrf.mxu2  ;;  %v6763_v12 = vpack.c.bf16 %v1717_v54, %v1713_v24 }
 0x24a   : > { %v1518_v30 = vadd.f32 %v1517_v63, %v6564_v43  ;;  %v1606_v3 = vpop.f32.mrf.mxu3  ;;  %v1342_v38 = vpop.f32.mrf.mxu0 }
 0x24b   : > { %v1343_v5 = vadd.f32 %v1342_v38, %v6555_v29  ;;  %v1431_v23 = vpop.f32.mrf.mxu1 }
 0x24c   : > { %v1607_v21 = vadd.f32 %v1606_v3, %v1518_v30  ;;  %v5592_v30 = vld [vmem:[%s8081_s5 + $0xa4] sm:$0xf]  ;;  %v5140_v3 = vld [vmem:[%s8081_s5 + $0xb0] sm:$0xf0] }
 0x24d   : > { %v1432_v13 = vadd.f32 %v1431_v23, %v1343_v5  ;;  %2109 = vmatmul.bf16.gmra.mxu0 %v6278_v51  ;;  %v5138_v51 = vld [vmem:[%s8081_s5 + $0xa0] sm:$0xf]  ;;  %v5143_v23 = vor.u32 %v5592_v30, %v5140_v3 }
 0x24e   : > { %v1718_v50 = vmax.f32 %v1607_v21, 0.0  ;;  %2198 = vmatmul.bf16.gmra.mxu1 %v6288_v6  ;;  %2287 = vmatmul.bf16.gmra.mxu2 %v6619_v52  ;;  %v5594_v6 = vld [vmem:[%s8081_s5 + $0xac] sm:$0xf0]  ;;  %v5593_v52 = vld [vmem:[%s8081_s5 + $0xac] sm:$0xf] }
 0x24f   : > { %2376 = vmatmul.bf16.gmra.mxu3 %v6627_v28  ;;  %v5139_v35 = vor.u32 %v5594_v6, %v5138_v51  ;;  %v5151_v58 = vor.u32 %v5593_v52, %v5148_v42  ;;  %v1721_v38 = vmax.f32 %v1432_v13, 0.0  ;;  %2788 = vmatpush.bf16.msrb.mxu1 %v5143_v23 }
 0x250   : > { %v6786_v28 = vpack.c.bf16 %v1718_v50, %v1714_v1 }
 0x251   : > { %v1520_v45 = vpop.f32.mrf.mxu2  ;;  %2699 = vmatpush.bf16.msrb.mxu0 %v5139_v35  ;;  %2966 = vmatpush.bf16.msrb.mxu3 %v5151_v58 }
 0x252   : > { %v1521_v48 = vadd.f32 %v1520_v45, %v6564_v43  ;;  %v1609_v15 = vpop.f32.mrf.mxu3  ;;  %v1344_v10 = vpop.f32.mrf.mxu0 }
 0x253   : > { %v1345_v49 = vadd.f32 %v1344_v10, %v6555_v29  ;;  %v1433_v24 = vpop.f32.mrf.mxu1 }
 0x254   : > { %v1610_v54 = vadd.f32 %v1609_v15, %v1521_v48 }
 0x255   : > { %v1434_v63 = vadd.f32 %v1433_v24, %v1345_v49 }
 0x256   : > { %v1722_v45 = vmax.f32 %v1610_v54, 0.0 }
 0x257   : > { %v1725_v5 = vmax.f32 %v1434_v63, 0.0 }
 0x259   : > { %v1522_v21 = vpop.f32.mrf.mxu2  ;;  %v6799_v1 = vpack.c.bf16 %v1725_v5, %v1721_v38 }
 0x25a   : > { %v1523_v50 = vadd.f32 %v1522_v21, %v6564_v43  ;;  %v1611_v59 = vpop.f32.mrf.mxu3  ;;  %v1347_v16 = vpop.f32.mrf.mxu0 }
 0x25b   : > { %v1348_v0 = vadd.f32 %v1347_v16, %v6555_v29  ;;  %v1436_v51 = vpop.f32.mrf.mxu1  ;;  %v5130_v16 = vld [vmem:[%s8081_s5 + $0x88] sm:$0xf] }
 0x25c   : > { %v1612_v6 = vadd.f32 %v1611_v59, %v1523_v50 }
 0x25d   : > { %v1437_v52 = vadd.f32 %v1436_v51, %v1348_v0  ;;  %2114 = vmatmul.bf16.gmra.mxu0 %v6298_v39  ;;  %v5591_v0 = vld [vmem:[%s8081_s5 + $0x94] sm:$0xf0] }
 0x25e   : > { %v1726_v35 = vmax.f32 %v1612_v6, 0.0  ;;  %2203 = vmatmul.bf16.gmra.mxu1 %v6323_v11  ;;  %2292 = vmatmul.bf16.gmra.mxu2 %v6631_v17  ;;  %v5131_v51 = vor.u32 %v5591_v0, %v5130_v16 }
 0x25f   : > { %2381 = vmatmul.bf16.gmra.mxu3 %v6648_v7  ;;  %v1729_v54 = vmax.f32 %v1437_v52, 0.0 }
 0x260   : > { %v6807_v13 = vpack.c.bf16 %v1726_v35, %v1722_v45  ;;  %v5132_v45 = vld [vmem:[%s8081_s5 + $0x98] sm:$0xf0]  ;;  %2878 = vmatpush.bf16.msrb.mxu2 %v5131_v51  ;;  %v8111_v51 = vld [vmem:[#allocation2_spill] sm:$0xff] }
 0x261   : > { %v1525_v42 = vpop.f32.mrf.mxu2 }
 0x262   : > { %v1526_v48 = vadd.f32 %v1525_v42, %v6564_v43  ;;  %v1614_v15 = vpop.f32.mrf.mxu3  ;;  %v1349_v10 = vpop.f32.mrf.mxu0 }
 0x263   : > { %v1350_v58 = vadd.f32 %v1349_v10, %v6555_v29  ;;  %v1438_v49 = vpop.f32.mrf.mxu1 }
 0x264   : > { %v1615_v24 = vadd.f32 %v1614_v15, %v1526_v48 }
 0x265   : > { %v1439_v39 = vadd.f32 %v1438_v49, %v1350_v58 }
 0x266   : > { %v1730_v50 = vmax.f32 %v1615_v24, 0.0 }
 0x267   : > { %v1733_v63 = vmax.f32 %v1439_v39, 0.0  ;;  %v5588_v39 = vld [vmem:[%s8081_s5 + $0x84] sm:$0xf] }
 0x269   : > { %v1527_v30 = vpop.f32.mrf.mxu2  ;;  %v6811_v11 = vpack.c.bf16 %v1733_v63, %v1729_v54  ;;  %v5124_v54 = vld [vmem:[%s8081_s5 + $0x90] sm:$0xf0] }
 0x26a   : > { %v1528_v17 = vadd.f32 %v1527_v30, %v6564_v43  ;;  %v1616_v7 = vpop.f32.mrf.mxu3  ;;  %v1352_v3 = vpop.f32.mrf.mxu0 }
 0x26b   : > { %v1353_v38 = vadd.f32 %v1352_v3, %v6555_v29  ;;  %v1441_v5 = vpop.f32.mrf.mxu1 }
 0x26c   : > { %v1617_v23 = vadd.f32 %v1616_v7, %v1528_v17  ;;  %v5127_v17 = vor.u32 %v5588_v39, %v5124_v54 }
 0x26d   : > { %v1442_v21 = vadd.f32 %v1441_v5, %v1353_v38  ;;  %2119 = vmatmul.bf16.gmra.mxu0 %v6342_v61  ;;  %v5122_v61 = vld [vmem:[%s8081_s5 + $0x80] sm:$0xf] }
 0x26e   : > { %v1734_v59 = vmax.f32 %v1617_v23, 0.0  ;;  %2208 = vmatmul.bf16.gmra.mxu1 %v6352_v22  ;;  %2297 = vmatmul.bf16.gmra.mxu2 %v6655_v32  ;;  %v5590_v22 = vld [vmem:[%s8081_s5 + $0x8c] sm:$0xf0]  ;;  %v5589_v32 = vld [vmem:[%s8081_s5 + $0x8c] sm:$0xf] }
 0x26f   : > { %2386 = vmatmul.bf16.gmra.mxu3 %v6663_v55  ;;  %v5123_v52 = vor.u32 %v5590_v22, %v5122_v61  ;;  %v5135_v15 = vor.u32 %v5589_v32, %v5132_v45  ;;  %v1737_v63 = vmax.f32 %v1442_v21, 0.0  ;;  %2789 = vmatpush.bf16.msrb.mxu1 %v5127_v17  ;;  %v8112_v21 = vld [vmem:[#allocation3_spill] sm:$0xff] }
 0x270   : > { %v6834_v55 = vpack.c.bf16 %v1734_v59, %v1730_v50 }
 0x271   : > { %v1530_v6 = vpop.f32.mrf.mxu2  ;;  %2700 = vmatpush.bf16.msrb.mxu0 %v5123_v52  ;;  %2967 = vmatpush.bf16.msrb.mxu3 %v5135_v15 }
 0x272   : > { %v1531_v35 = vadd.f32 %v1530_v6, %v6564_v43  ;;  %v1619_v42 = vpop.f32.mrf.mxu3  ;;  %v1354_v48 = vpop.f32.mrf.mxu0 }
 0x273   : > { %v1355_v10 = vadd.f32 %v1354_v48, %v6555_v29  ;;  %v1443_v58 = vpop.f32.mrf.mxu1 }
 0x274   : > { %v1620_v49 = vadd.f32 %v1619_v42, %v1531_v35 }
 0x275   : > { %v1444_v24 = vadd.f32 %v1443_v58, %v1355_v10 }
 0x276   : > { %v1738_v61 = vmax.f32 %v1620_v49, 0.0 }
 0x277   : > { %v1741_v30 = vmax.f32 %v1444_v24, 0.0 }
 0x279   : > { %v1532_v7 = vpop.f32.mrf.mxu2  ;;  %v6847_v3 = vpack.c.bf16 %v1741_v30, %v1737_v63 }
 0x27a   : > { %v1533_v38 = vadd.f32 %v1532_v7, %v6564_v43  ;;  %v1621_v5 = vpop.f32.mrf.mxu3  ;;  %v1357_v23 = vpop.f32.mrf.mxu0 }
 0x27b   : > { %v1358_v50 = vadd.f32 %v1357_v23, %v6555_v29  ;;  %v1446_v59 = vpop.f32.mrf.mxu1 }
 0x27c   : > { %v1622_v16 = vadd.f32 %v1621_v5, %v1533_v38  ;;  %v8113_v38 = vld [vmem:[#allocation4_spill] sm:$0xff] }
 0x27d   : > { %v1447_v0 = vadd.f32 %v1446_v59, %v1358_v50  ;;  %2124 = vmatmul.bf16.gmra.mxu0 %v8111_v51  ;;  %v8114_v50 = vld [vmem:[#allocation5_spill] sm:$0xff]  ;;  %v5114_v59 = vld [vmem:[%s8081_s5 + $0x68] sm:$0xf]  ;;  %v5106_v51 = vld [vmem:[%s8081_s5 + $0x60] sm:$0xf] }
 0x27e   : > { %v1742_v22 = vmax.f32 %v1622_v16, 0.0  ;;  %2213 = vmatmul.bf16.gmra.mxu1 %v8112_v21  ;;  %2302 = vmatmul.bf16.gmra.mxu2 %v6667_v27  ;;  %v5587_v16 = vld [vmem:[%s8081_s5 + $0x74] sm:$0xf0] }
 0x27f   : > { %2391 = vmatmul.bf16.gmra.mxu3 %v6690_v56  ;;  %v1745_v58 = vmax.f32 %v1447_v0, 0.0  ;;  %v5115_v0 = vor.u32 %v5587_v16, %v5114_v59 }
 0x280   : > { %v6855_v32 = vpack.c.bf16 %v1742_v22, %v1738_v61  ;;  %v5586_v61 = vld [vmem:[%s8081_s5 + $0x6c] sm:$0xf0] }
 0x281   : > { %v1535_v6 = vpop.f32.mrf.mxu2  ;;  %v5107_v21 = vor.u32 %v5586_v61, %v5106_v51  ;;  %2879 = vmatpush.bf16.msrb.mxu2 %v5115_v0 }
 0x282   : > { %v1536_v52 = vadd.f32 %v1535_v6, %v6564_v43  ;;  %v1624_v45 = vpop.f32.mrf.mxu3  ;;  %v1359_v35 = vpop.f32.mrf.mxu0  ;;  %v5116_v6 = vld [vmem:[%s8081_s5 + $0x78] sm:$0xf0] }
 0x283   : > { %v1360_v42 = vadd.f32 %v1359_v35, %v6555_v29  ;;  %v1448_v48 = vpop.f32.mrf.mxu1  ;;  %2701 = vmatpush.bf16.msrb.mxu0 %v5107_v21 }
 0x284   : > { %v1625_v15 = vadd.f32 %v1624_v45, %v1536_v52 }
 0x285   : > { %v1449_v10 = vadd.f32 %v1448_v48, %v1360_v42 }
 0x286   : > { %v1746_v5 = vmax.f32 %v1625_v15, 0.0 }
 0x287   : > { %v1749_v49 = vmax.f32 %v1449_v10, 0.0 }
 0x289   : > { %v1537_v24 = vpop.f32.mrf.mxu2  ;;  %v6859_v39 = vpack.c.bf16 %v1749_v49, %v1745_v58  ;;  %v5584_v49 = vld [vmem:[%s8081_s5 + $0x64] sm:$0xf] }
 0x28a   : > { %v1538_v27 = vadd.f32 %v1537_v24, %v6564_v43  ;;  %v1626_v56 = vpop.f32.mrf.mxu3  ;;  %v1362_v54 = vpop.f32.mrf.mxu0  ;;  %v5108_v24 = vld [vmem:[%s8081_s5 + $0x70] sm:$0xf0] }
 0x28b   : > { %v1363_v63 = vadd.f32 %v1362_v54, %v6555_v29  ;;  %v1451_v30 = vpop.f32.mrf.mxu1  ;;  %v5111_v54 = vor.u32 %v5584_v49, %v5108_v24 }
 0x28c   : > { %v1627_v17 = vadd.f32 %v1626_v56, %v1538_v27 }
 0x28d   : > { %v1452_v7 = vadd.f32 %v1451_v30, %v1363_v63  ;;  %2129 = vmatmul.bf16.gmra.mxu0 %v8113_v38  ;;  %2790 = vmatpush.bf16.msrb.mxu1 %v5111_v54  ;;  %v5583_v54 = vld [vmem:[%s8081_s5 + $0x54] sm:$0xf0] }
 0x28e   : > { %v1750_v23 = vmax.f32 %v1627_v17, 0.0  ;;  %2218 = vmatmul.bf16.gmra.mxu1 %v8114_v50  ;;  %2307 = vmatmul.bf16.gmra.mxu2 %v6703_v60  ;;  %v5585_v60 = vld [vmem:[%s8081_s5 + $0x6c] sm:$0xf] }
 0x28f   : > { %2396 = vmatmul.bf16.gmra.mxu3 %v6711_v44  ;;  %v5119_v42 = vor.u32 %v5585_v60, %v5116_v6  ;;  %v1753_v27 = vmax.f32 %v1452_v7, 0.0 }
 0x290   : > { %v6882_v44 = vpack.c.bf16 %v1750_v23, %v1746_v5 }
 0x291   : > { %v1540_v22 = vpop.f32.mrf.mxu2  ;;  %2968 = vmatpush.bf16.msrb.mxu3 %v5119_v42 }
 0x292   : > { %v1541_v52 = vadd.f32 %v1540_v22, %v6564_v43  ;;  %v1629_v45 = vpop.f32.mrf.mxu3  ;;  %v1364_v35 = vpop.f32.mrf.mxu0 }
 0x293   : > { %v1365_v48 = vadd.f32 %v1364_v35, %v6555_v29  ;;  %v1453_v15 = vpop.f32.mrf.mxu1 }
 0x294   : > { %v1630_v10 = vadd.f32 %v1629_v45, %v1541_v52 }
 0x295   : > { %v1454_v58 = vadd.f32 %v1453_v15, %v1365_v48 }
 0x296   : > { %v1754_v0 = vmax.f32 %v1630_v10, 0.0 }
 0x297   : > { %v1757_v56 = vmax.f32 %v1454_v58, 0.0 }
 0x299   : > { %v1542_v63 = vpop.f32.mrf.mxu2  ;;  %v6895_v30 = vpack.c.bf16 %v1757_v56, %v1753_v27 }
 0x29a   : > { %v1543_v17 = vadd.f32 %v1542_v63, %v6564_v43  ;;  %v1631_v38 = vpop.f32.mrf.mxu3  ;;  %v1367_v5 = vpop.f32.mrf.mxu0 }
 0x29b   : > { %v1368_v23 = vadd.f32 %v1367_v5, %v6555_v29  ;;  %v1456_v50 = vpop.f32.mrf.mxu1 }
 0x29c   : > { %v1632_v59 = vadd.f32 %v1631_v38, %v1543_v17  ;;  %v5100_v38 = vld [vmem:[%s8081_s5 + $0x58] sm:$0xf0] }
 0x29d   : > { %v1457_v16 = vadd.f32 %v1456_v50, %v1368_v23  ;;  %2134 = vmatmul.bf16.gmra.mxu0 %v6408_v46 }
 0x29e   : > { %v1758_v51 = vmax.f32 %v1632_v59, 0.0  ;;  %2223 = vmatmul.bf16.gmra.mxu1 %v6425_v4  ;;  %2312 = vmatmul.bf16.gmra.mxu2 %v6715_v8  ;;  %v6910_v4 = vld [vmem:[%s8080_s4] ss:$0 sm:$0xff] }
 0x29f   : > { %2401 = vmatmul.bf16.gmra.mxu3 %v6738_v20  ;;  %v1761_v35 = vmax.f32 %v1457_v16, 0.0 }
 0x2a0   : > { %v6903_v7 = vpack.c.bf16 %v1758_v51, %v1754_v0 }
 0x2a1   : > { %v1545_v61 = vpop.f32.mrf.mxu2 }
 0x2a2   : > { %v1546_v60 = vadd.f32 %v1545_v61, %v6564_v43  ;;  %v1634_v22 = vpop.f32.mrf.mxu3  ;;  %v1369_v21 = vpop.f32.mrf.mxu0 }
 0x2a3   : > { %v1370_v6 = vadd.f32 %v1369_v21, %v6555_v29  ;;  %v1458_v52 = vpop.f32.mrf.mxu1  ;;  %v5092_v21 = vld [vmem:[%s8081_s5 + $0x50] sm:$0xf0] }
 0x2a4   : > { %v1635_v45 = vadd.f32 %v1634_v22, %v1546_v60  ;;  %v5580_v22 = vld [vmem:[%s8081_s5 + $0x44] sm:$0xf] }
 0x2a5   : > { %v1459_v46 = vadd.f32 %v1458_v52, %v1370_v6  ;;  %v5095_v6 = vor.u32 %v5580_v22, %v5092_v21 }
 0x2a6   : > { %v1762_v27 = vmax.f32 %v1635_v45, 0.0 }
 0x2a7   : > { %v1765_v42 = vmax.f32 %v1459_v46, 0.0  ;;  %2791 = vmatpush.bf16.msrb.mxu1 %v5095_v6 }
 0x2a9   : > { %v1547_v8 = vpop.f32.mrf.mxu2  ;;  %v6912_v20 = vpack.c.bf16 %v1765_v42, %v1761_v35 }
 0x2aa   : > { %v1548_v48 = vadd.f32 %v1547_v8, %v6564_v43  ;;  %v1636_v15 = vpop.f32.mrf.mxu3  ;;  %v2100_v10 = vpop.f32.mrf.mxu0  ;;  %v5098_v43 = vld [vmem:[%s8081_s5 + $0x48] sm:$0xf] }
 0x2ab   : > { %v2101_v58 = vadd.f32 %v6910_v4, %v2100_v10  ;;  %v2189_v29 = vpop.f32.mrf.mxu1 }
 0x2ac   : > { %v1637_v49 = vadd.f32 %v1636_v15, %v1548_v48 }
 0x2ad   : > { %v2190_v24 = vadd.f32 %v2189_v29, %v2101_v58  ;;  %2139 = vmatmul.bf16.gmra.mxu0 %v6432_v62  ;;  %v5090_v62 = vld [vmem:[%s8081_s5 + $0x40] sm:$0xf] }
 0x2ae   : > { %v1766_v56 = vmax.f32 %v1637_v49, 0.0  ;;  %2228 = vmatmul.bf16.gmra.mxu1 %v6440_v31  ;;  %2317 = vmatmul.bf16.gmra.mxu2 %v6751_v34  ;;  %v5099_v31 = vor.u32 %v5583_v54, %v5098_v43  ;;  %v5582_v34 = vld [vmem:[%s8081_s5 + $0x4c] sm:$0xf0] }
 0x2af   : > { %2406 = vmatmul.bf16.gmra.mxu3 %v6759_v19  ;;  %v5581_v19 = vld [vmem:[%s8081_s5 + $0x4c] sm:$0xf]  ;;  %v5091_v59 = vor.u32 %v5582_v34, %v5090_v62 }
 0x2b0   : > { %v6929_v63 = vpack.c.bf16 %v1766_v56, %v1762_v27  ;;  %v5103_v16 = vor.u32 %v5581_v19, %v5100_v38  ;;  %2880 = vmatpush.bf16.msrb.mxu2 %v5099_v31 }
 0x2b1   : > { %v2278_v17 = vpop.f32.mrf.mxu2  ;;  %2702 = vmatpush.bf16.msrb.mxu0 %v5091_v59  ;;  %v5082_v59 = vld [vmem:[%s8081_s5 + $0x28] sm:$0xf] }
 0x2b2   : > { %v2279_v5 = vadd.f32 %v2278_v17, %v2190_v24  ;;  %v2367_v23 = vpop.f32.mrf.mxu3  ;;  %v2102_v50 = vpop.f32.mrf.mxu0  ;;  %2969 = vmatpush.bf16.msrb.mxu3 %v5103_v16  ;;  %v5579_v16 = vld [vmem:[%s8081_s5 + $0x34] sm:$0xf0] }
 0x2b3   : > { %v2103_v0 = vadd.f32 %v6910_v4, %v2102_v50  ;;  %v2191_v51 = vpop.f32.mrf.mxu1 }
 0x2b4   : > { %v2368_v61 = vadd.f32 %v2367_v23, %v2279_v5 }
 0x2b5   : > { %v2192_v60 = vadd.f32 %v2191_v51, %v2103_v0  ;;  %v5084_v51 = vld [vmem:[%s8081_s5 + $0x38] sm:$0xf0] }
 0x2b6   : > { %v2447_v10 = vmax.f32 %v2368_v61, 0.0 }
 0x2b9   : > { %v2280_v52 = vpop.f32.mrf.mxu2 }
 0x2ba   : > { %v2281_v45 = vadd.f32 %v2280_v52, %v2192_v60  ;;  %v2369_v46 = vpop.f32.mrf.mxu3  ;;  %v2105_v35 = vpop.f32.mrf.mxu0 }
 0x2bb   : > { %v2106_v42 = vadd.f32 %v6910_v4, %v2105_v35  ;;  %v2194_v8 = vpop.f32.mrf.mxu1 }
 0x2bc   : > { %v2370_v48 = vadd.f32 %v2369_v46, %v2281_v45 }
 0x2bd   : > { %v2195_v15 = vadd.f32 %v2194_v8, %v2106_v42  ;;  %2144 = vmatmul.bf16.gmra.mxu0 %v6444_v25  ;;  %v5576_v42 = vld [vmem:[%s8081_s5 + $0x24] sm:$0xf]  ;;  %v5076_v8 = vld [vmem:[%s8081_s5 + $0x30] sm:$0xf0] }
 0x2be   : > { %v2448_v58 = vmax.f32 %v2370_v48, 0.0  ;;  %2233 = vmatmul.bf16.gmra.mxu1 %v6461_v41  ;;  %2322 = vmatmul.bf16.gmra.mxu2 %v6763_v12  ;;  %v5079_v48 = vor.u32 %v5576_v42, %v5076_v8  ;;  %v5572_v8 = vld [vmem:[%s8081_s5 + $0x4] sm:$0xf] }
 0x2bf   : > { %2411 = vmatmul.bf16.gmra.mxu3 %v6786_v28 }
 0x2c0   : > { %v6952_v29 = vpack.c.bf16 %v2448_v58, %v2447_v10  ;;  %2792 = vmatpush.bf16.msrb.mxu1 %v5079_v48  ;;  %v5060_v48 = vld [vmem:[%s8081_s5 + $0x10] sm:$0xf0] }
 0x2c1   : > { %v2283_v49 = vpop.f32.mrf.mxu2 }
 0x2c2   : > { %v2284_v24 = vadd.f32 %v2283_v49, %v2195_v15  ;;  %v2372_v27 = vpop.f32.mrf.mxu3  ;;  %v2107_v56 = vpop.f32.mrf.mxu0 }
 0x2c3   : > { %v2108_v43 = vadd.f32 %v6910_v4, %v2107_v56  ;;  %v2196_v54 = vpop.f32.mrf.mxu1 }
 0x2c4   : > { %v2373_v62 = vadd.f32 %v2372_v27, %v2284_v24 }
 0x2c5   : > { %v2197_v17 = vadd.f32 %v2196_v54, %v2108_v43 }
 0x2c6   : > { %v2449_v5 = vmax.f32 %v2373_v62, 0.0 }
 0x2c9   : > { %v2285_v25 = vpop.f32.mrf.mxu2 }
 0x2ca   : > { %v2286_v31 = vadd.f32 %v2285_v25, %v2197_v17  ;;  %v2374_v34 = vpop.f32.mrf.mxu3  ;;  %v2110_v19 = vpop.f32.mrf.mxu0 }
 0x2cb   : > { %v2111_v41 = vadd.f32 %v6910_v4, %v2110_v19  ;;  %v2199_v12 = vpop.f32.mrf.mxu1 }
 0x2cc   : > { %v2375_v38 = vadd.f32 %v2374_v34, %v2286_v31 }
 0x2cd   : > { %v2200_v28 = vadd.f32 %v2199_v12, %v2111_v41  ;;  %2149 = vmatmul.bf16.gmra.mxu0 %v6468_v36  ;;  %v5074_v36 = vld [vmem:[%s8081_s5 + $0x20] sm:$0xf] }
 0x2ce   : > { %v2450_v23 = vmax.f32 %v2375_v38, 0.0  ;;  %2238 = vmatmul.bf16.gmra.mxu1 %v6476_v47  ;;  %2327 = vmatmul.bf16.gmra.mxu2 %v6799_v1  ;;  %v5083_v47 = vor.u32 %v5579_v16, %v5082_v59  ;;  %v5578_v1 = vld [vmem:[%s8081_s5 + $0x2c] sm:$0xf0] }
 0x2cf   : > { %2416 = vmatmul.bf16.gmra.mxu3 %v6807_v13  ;;  %v5577_v13 = vld [vmem:[%s8081_s5 + $0x2c] sm:$0xf]  ;;  %v5075_v21 = vor.u32 %v5578_v1, %v5074_v36  ;;  %v5066_v1 = vld [vmem:[%s8081_s5 + $0x8] sm:$0xf] }
 0x2d0   : > { %v6960_v50 = vpack.c.bf16 %v2450_v23, %v2449_v5  ;;  %v5087_v6 = vor.u32 %v5577_v13, %v5084_v51  ;;  %2881 = vmatpush.bf16.msrb.mxu2 %v5083_v47  ;;  %v5575_v13 = vld [vmem:[%s8081_s5 + $0x14] sm:$0xf0] }
 0x2d1   : > { %v2288_v0 = vpop.f32.mrf.mxu2  ;;  %2703 = vmatpush.bf16.msrb.mxu0 %v5075_v21 }
 0x2d2   : > { %v2289_v61 = vadd.f32 %v2288_v0, %v2200_v28  ;;  %v2377_v60 = vpop.f32.mrf.mxu3  ;;  %v2112_v22 = vpop.f32.mrf.mxu0  ;;  %2970 = vmatpush.bf16.msrb.mxu3 %v5087_v6 }
 0x2d3   : > { %v2113_v52 = vadd.f32 %v6910_v4, %v2112_v22  ;;  %v2201_v45 = vpop.f32.mrf.mxu1 }
 0x2d4   : > { %v2378_v46 = vadd.f32 %v2377_v60, %v2289_v61  ;;  %v5068_v61 = vld [vmem:[%s8081_s5 + $0x18] sm:$0xf0] }
 0x2d5   : > { %v2202_v35 = vadd.f32 %v2201_v45, %v2113_v52 }
 0x2d6   : > { %v2451_v54 = vmax.f32 %v2378_v46, 0.0 }
 0x2d9   : > { %v2290_v15 = vpop.f32.mrf.mxu2 }
 0x2da   : > { %v2291_v10 = vadd.f32 %v2290_v15, %v2202_v35  ;;  %v2379_v58 = vpop.f32.mrf.mxu3  ;;  %v2115_v49 = vpop.f32.mrf.mxu0  ;;  %v5063_v15 = vor.u32 %v5572_v8, %v5060_v48 }
 0x2db   : > { %v2116_v24 = vadd.f32 %v6910_v4, %v2115_v49  ;;  %v2204_v27 = vpop.f32.mrf.mxu1 }
 0x2dc   : > { %v2380_v56 = vadd.f32 %v2379_v58, %v2291_v10  ;;  %2793 = vmatpush.bf16.msrb.mxu1 %v5063_v15 }
 0x2dd   : > { %v2205_v43 = vadd.f32 %v2204_v27, %v2116_v24  ;;  %2154 = vmatmul.bf16.gmra.mxu0 %v6480_v57 }
 0x2de   : > { %v2452_v62 = vmax.f32 %v2380_v56, 0.0  ;;  %2243 = vmatmul.bf16.gmra.mxu1 %v6497_v2  ;;  %2332 = vmatmul.bf16.gmra.mxu2 %v6811_v11 }
 0x2df   : > { %2421 = vmatmul.bf16.gmra.mxu3 %v6834_v55 }
 0x2e0   : > { %v6992_v17 = vpack.c.bf16 %v2452_v62, %v2451_v54 }
 0x2e1   : > { %v2293_v25 = vpop.f32.mrf.mxu2 }
 0x2e2   : > { %v2294_v31 = vadd.f32 %v2293_v25, %v2205_v43  ;;  %v2382_v34 = vpop.f32.mrf.mxu3  ;;  %v2117_v19 = vpop.f32.mrf.mxu0 }
 0x2e3   : > { %v2118_v41 = vadd.f32 %v6910_v4, %v2117_v19  ;;  %v2206_v12 = vpop.f32.mrf.mxu1 }
 0x2e4   : > { %v2383_v38 = vadd.f32 %v2382_v34, %v2294_v31 }
 0x2e5   : > { %v2207_v28 = vadd.f32 %v2206_v12, %v2118_v41 }
 0x2e6   : > { %v2453_v36 = vmax.f32 %v2383_v38, 0.0 }
 0x2e9   : > { %v2295_v57 = vpop.f32.mrf.mxu2 }
 0x2ea   : > { %v2296_v5 = vadd.f32 %v2295_v57, %v2207_v28  ;;  %v2384_v23 = vpop.f32.mrf.mxu3  ;;  %v2120_v59 = vpop.f32.mrf.mxu0 }
 0x2eb   : > { %v2121_v2 = vadd.f32 %v6910_v4, %v2120_v59  ;;  %v2209_v11 = vpop.f32.mrf.mxu1 }
 0x2ec   : > { %v2385_v16 = vadd.f32 %v2384_v23, %v2296_v5 }
 0x2ed   : > { %v2210_v55 = vadd.f32 %v2209_v11, %v2121_v2  ;;  %2159 = vmatmul.bf16.gmra.mxu0 %v6504_v37  ;;  %v5058_v37 = vld [vmem:[%s8081_s5] sm:$0xf] }
 0x2ee   : > { %v2454_v0 = vmax.f32 %v2385_v16, 0.0  ;;  %2248 = vmatmul.bf16.gmra.mxu1 %v6512_v9  ;;  %2337 = vmatmul.bf16.gmra.mxu2 %v6847_v3  ;;  %v5067_v9 = vor.u32 %v5575_v13, %v5066_v1  ;;  %v5574_v3 = vld [vmem:[%s8081_s5 + $0xc] sm:$0xf0]  ;;  %v5651_v1 = vld [vmem:[%s8083_s7 + $0x174] sm:$0xf0] }
 0x2ef   : > { %2426 = vmatmul.bf16.gmra.mxu3 %v6855_v32  ;;  %v5573_v32 = vld [vmem:[%s8081_s5 + $0xc] sm:$0xf]  ;;  %v5059_v6 = vor.u32 %v5574_v3, %v5058_v37  ;;  %v5667_v37 = vld [vmem:[%s8083_s7 + $0x1f4] sm:$0xf0] }
 0x2f0   : > { %v7000_v47 = vpack.c.bf16 %v2454_v0, %v2453_v36  ;;  %v5071_v52 = vor.u32 %v5573_v32, %v5068_v61  ;;  %2882 = vmatpush.bf16.msrb.mxu2 %v5067_v9  ;;  %v5370_v0 = vld [vmem:[%s8083_s7 + $0x170] sm:$0xf] }
 0x2f1   : > { %v2298_v51 = vpop.f32.mrf.mxu2  ;;  %2704 = vmatpush.bf16.msrb.mxu0 %v5059_v6 }
 0x2f2   : > { %v2299_v60 = vadd.f32 %v2298_v51, %v2210_v55  ;;  %v2387_v22 = vpop.f32.mrf.mxu3  ;;  %v2122_v21 = vpop.f32.mrf.mxu0  ;;  %2971 = vmatpush.bf16.msrb.mxu3 %v5071_v52  ;;  %v5306_v52 = vld [vmem:[%s8083_s7 + $0xf0] sm:$0xf] }
 0x2f3   : > { %v2123_v45 = vadd.f32 %v6910_v4, %v2122_v21  ;;  %v2211_v46 = vpop.f32.mrf.mxu1 }
 0x2f4   : > { %v2388_v35 = vadd.f32 %v2387_v22, %v2299_v60 }
 0x2f5   : > { %v2212_v42 = vadd.f32 %v2211_v46, %v2123_v45  ;;  %v5635_v45 = vld [vmem:[%s8083_s7 + $0xf4] sm:$0xf0] }
 0x2f6   : > { %v2455_v62 = vmax.f32 %v2388_v35, 0.0  ;;  %v5307_v46 = vor.u32 %v5635_v45, %v5306_v52 }
 0x2f8   : > { %3724 = vmatpush.bf16.msra.mxu1 %v5307_v46 }
 0x2f9   : > { %v2300_v10 = vpop.f32.mrf.mxu2 }
 0x2fa   : > { %v2301_v58 = vadd.f32 %v2300_v10, %v2212_v42  ;;  %v2389_v49 = vpop.f32.mrf.mxu3  ;;  %v2125_v24 = vpop.f32.mrf.mxu0 }
 0x2fb   : > { %v2126_v27 = vadd.f32 %v6910_v4, %v2125_v24  ;;  %v2214_v56 = vpop.f32.mrf.mxu1 }
 0x2fc   : > { %v2390_v43 = vadd.f32 %v2389_v49, %v2301_v58 }
 0x2fd   : > { %v2215_v54 = vadd.f32 %v2214_v56, %v2126_v27  ;;  %2164 = vmatmul.bf16.gmra.mxu0 %v6516_v14 }
 0x2fe   : > { %v2456_v25 = vmax.f32 %v2390_v43, 0.0  ;;  %2253 = vmatmul.bf16.gmra.mxu1 %v6533_v26  ;;  %2342 = vmatmul.bf16.gmra.mxu2 %v6859_v39 }
 0x2ff   : > { %2431 = vmatmul.bf16.gmra.mxu3 %v6882_v44 }
 0x300   : > { %v7032_v31 = vpack.c.bf16 %v2456_v25, %v2455_v62 }
 0x301   : > { %v2303_v34 = vpop.f32.mrf.mxu2 }
 0x302   : > { %v2304_v19 = vadd.f32 %v2303_v34, %v2215_v54  ;;  %v2392_v41 = vpop.f32.mrf.mxu3  ;;  %v2127_v12 = vpop.f32.mrf.mxu0 }
 0x303   : > { %v2128_v38 = vadd.f32 %v6910_v4, %v2127_v12  ;;  %v2216_v28 = vpop.f32.mrf.mxu1 }
 0x304   : > { %v2393_v57 = vadd.f32 %v2392_v41, %v2304_v19 }
 0x305   : > { %v2217_v5 = vadd.f32 %v2216_v28, %v2128_v38 }
 0x306   : > { %v2457_v16 = vmax.f32 %v2393_v57, 0.0 }
 0x309   : > { %v2305_v14 = vpop.f32.mrf.mxu2 }
 0x30a   : > { %v2306_v23 = vadd.f32 %v2305_v14, %v2217_v5  ;;  %v2394_v59 = vpop.f32.mrf.mxu3  ;;  %v2130_v2 = vpop.f32.mrf.mxu0 }
 0x30b   : > { %v2131_v26 = vadd.f32 %v6910_v4, %v2130_v2  ;;  %v2219_v39 = vpop.f32.mrf.mxu1  ;;  %v5362_v2 = vld [vmem:[%s8083_s7 + $0x160] sm:$0xf] }
 0x30c   : > { %v2395_v11 = vadd.f32 %v2394_v59, %v2306_v23 }
 0x30d   : > { %v2220_v44 = vadd.f32 %v2219_v39, %v2131_v26  ;;  %2169 = vmatmul.bf16.gmra.mxu0 %v6540_v40  ;;  %v5242_v40 = vld [vmem:[%s8083_s7 + $0x70] sm:$0xf]  ;;  %v5649_v26 = vld [vmem:[%s8083_s7 + $0x164] sm:$0xf0]  ;;  %v5234_v39 = vld [vmem:[%s8083_s7 + $0x60] sm:$0xf] }
 0x30e   : > { %v2458_v55 = vmax.f32 %v2395_v11, 0.0  ;;  %2258 = vmatmul.bf16.gmra.mxu1 %v6548_v33  ;;  %2347 = vmatmul.bf16.gmra.mxu2 %v6895_v30  ;;  %v5371_v33 = vor.u32 %v5651_v1, %v5370_v0  ;;  %v5619_v30 = vld [vmem:[%s8083_s7 + $0x74] sm:$0xf0] }
 0x30f   : > { %2436 = vmatmul.bf16.gmra.mxu3 %v6903_v7  ;;  %v5434_v7 = vld [vmem:[%s8083_s7 + $0x1f0] sm:$0xf]  ;;  %v5243_v32 = vor.u32 %v5619_v30, %v5242_v40 }
 0x310   : > { %v7040_v36 = vpack.c.bf16 %v2458_v55, %v2457_v16  ;;  %v5435_v61 = vor.u32 %v5667_v37, %v5434_v7  ;;  %3813 = vmatpush.bf16.msra.mxu2 %v5371_v33  ;;  %v5426_v16 = vld [vmem:[%s8083_s7 + $0x1e0] sm:$0xf]  ;;  %v5665_v55 = vld [vmem:[%s8083_s7 + $0x1e4] sm:$0xf0] }
 0x311   : > { %v2308_v13 = vpop.f32.mrf.mxu2  ;;  %3635 = vmatpush.bf16.msra.mxu0 %v5243_v32  ;;  %v5427_v33 = vor.u32 %v5665_v55, %v5426_v16 }
 0x312   : > { %v2309_v51 = vadd.f32 %v2308_v13, %v2220_v44  ;;  %v2397_v9 = vpop.f32.mrf.mxu3  ;;  %v2132_v3 = vpop.f32.mrf.mxu0  ;;  %3902 = vmatpush.bf16.msra.mxu3 %v5435_v61  ;;  %v5363_v44 = vor.u32 %v5649_v26, %v5362_v2 }
 0x313   : > { %v2133_v60 = vadd.f32 %v6910_v4, %v2132_v3  ;;  %v2221_v22 = vpop.f32.mrf.mxu1  ;;  %v5633_v3 = vld [vmem:[%s8083_s7 + $0xe4] sm:$0xf0] }
 0x314   : > { %v2398_v21 = vadd.f32 %v2397_v9, %v2309_v51  ;;  %3814 = vmatpush.bf16.msra.mxu2 %v5363_v44  ;;  %v5298_v9 = vld [vmem:[%s8083_s7 + $0xe0] sm:$0xf] }
 0x315   : > { %v2222_v6 = vadd.f32 %v2221_v22, %v2133_v60  ;;  %v5299_v32 = vor.u32 %v5633_v3, %v5298_v9 }
 0x316   : > { %v2459_v24 = vmax.f32 %v2398_v21, 0.0  ;;  %3903 = vmatpush.bf16.msra.mxu3 %v5427_v33 }
 0x317   : > { %3725 = vmatpush.bf16.msra.mxu1 %v5299_v32 }
 0x319   : > { %v2310_v35 = vpop.f32.mrf.mxu2 }
 0x31a   : > { %v2311_v42 = vadd.f32 %v2310_v35, %v2222_v6  ;;  %v2399_v8 = vpop.f32.mrf.mxu3  ;;  %v2135_v48 = vpop.f32.mrf.mxu0 }
 0x31b   : > { %v2136_v15 = vadd.f32 %v6910_v4, %v2135_v48  ;;  %v2224_v10 = vpop.f32.mrf.mxu1 }
 0x31c   : > { %v2400_v58 = vadd.f32 %v2399_v8, %v2311_v42 }
 0x31d   : > { %v2225_v49 = vadd.f32 %v2224_v10, %v2136_v15  ;;  %2174 = vmatmul.bf16.gmra.mxu0 %v6557_v18 }
 0x31e   : > { %v2460_v27 = vmax.f32 %v2400_v58, 0.0  ;;  %2263 = vmatmul.bf16.gmra.mxu1 %v6576_v53  ;;  %2352 = vmatmul.bf16.gmra.mxu2 %v6912_v20 }
 0x31f   : > { %2441 = vmatmul.bf16.gmra.mxu3 %v6929_v63 }
 0x320   : > { %v7072_v56 = vpack.c.bf16 %v2460_v27, %v2459_v24 }
 0x321   : > { %v2313_v43 = vpop.f32.mrf.mxu2 }
 0x322   : > { %v2314_v54 = vadd.f32 %v2313_v43, %v2225_v49  ;;  %v2402_v62 = vpop.f32.mrf.mxu3  ;;  %v2137_v25 = vpop.f32.mrf.mxu0 }
 0x323   : > { %v2138_v34 = vadd.f32 %v6910_v4, %v2137_v25  ;;  %v2226_v19 = vpop.f32.mrf.mxu1 }
 0x324   : > { %v2403_v41 = vadd.f32 %v2402_v62, %v2314_v54 }
 0x325   : > { %v2227_v12 = vadd.f32 %v2226_v19, %v2138_v34 }
 0x326   : > { %v2461_v14 = vmax.f32 %v2403_v41, 0.0 }
 0x329   : > { %v2315_v18 = vpop.f32.mrf.mxu2 }
 0x32a   : > { %v2316_v38 = vadd.f32 %v2315_v18, %v2227_v12  ;;  %v2404_v28 = vpop.f32.mrf.mxu3  ;;  %v2140_v57 = vpop.f32.mrf.mxu0 }
 0x32b   : > { %v2141_v53 = vadd.f32 %v6910_v4, %v2140_v57  ;;  %v2229_v20 = vpop.f32.mrf.mxu1  ;;  %v5354_v57 = vld [vmem:[%s8083_s7 + $0x150] sm:$0xf] }
 0x32c   : > { %v2405_v5 = vadd.f32 %v2404_v28, %v2316_v38 }
 0x32d   : > { %v2230_v63 = vadd.f32 %v2229_v20, %v2141_v53  ;;  %2705 = vmatmul.bf16.vlgmr.msrb.gmra.mxu0 %v6952_v29  ;;  %v5647_v53 = vld [vmem:[%s8083_s7 + $0x154] sm:$0xf0]  ;;  %v5226_v20 = vld [vmem:[%s8083_s7 + $0x50] sm:$0xf] }
 0x32e   : > { %v2462_v23 = vmax.f32 %v2405_v5, 0.0  ;;  %2794 = vmatmul.bf16.vlgmr.msrb.gmra.mxu1 %v6952_v29  ;;  %2883 = vmatmul.bf16.vlgmr.msrb.gmra.mxu2 %v6952_v29 }
 0x32f   : > { %2972 = vmatmul.bf16.vlgmr.msrb.gmra.mxu3 %v6952_v29  ;;  %v5617_v29 = vld [vmem:[%s8083_s7 + $0x64] sm:$0xf0] }
 0x330   : > { %v7080_v59 = vpack.c.bf16 %v2462_v23, %v2461_v14  ;;  %v5235_v13 = vor.u32 %v5617_v29, %v5234_v39  ;;  %v5418_v14 = vld [vmem:[%s8083_s7 + $0x1d0] sm:$0xf]  ;;  %v5663_v23 = vld [vmem:[%s8083_s7 + $0x1d4] sm:$0xf0] }
 0x331   : > { %v2318_v11 = vpop.f32.mrf.mxu2  ;;  %v5419_v44 = vor.u32 %v5663_v23, %v5418_v14 }
 0x332   : > { %v2319_v0 = vadd.f32 %v2318_v11, %v2230_v63  ;;  %v2407_v1 = vpop.f32.mrf.mxu3  ;;  %v2142_v40 = vpop.f32.mrf.mxu0  ;;  %3636 = vmatpush.bf16.msra.mxu0 %v5235_v13  ;;  %v5355_v63 = vor.u32 %v5647_v53, %v5354_v57 }
 0x333   : > { %v2143_v30 = vadd.f32 %v6910_v4, %v2142_v40  ;;  %v2231_v7 = vpop.f32.mrf.mxu1  ;;  %3904 = vmatpush.bf16.msra.mxu3 %v5419_v44  ;;  %v5631_v40 = vld [vmem:[%s8083_s7 + $0xd4] sm:$0xf0] }
 0x334   : > { %v2408_v37 = vadd.f32 %v2407_v1, %v2319_v0  ;;  %3815 = vmatpush.bf16.msra.mxu2 %v5355_v63  ;;  %v5290_v1 = vld [vmem:[%s8083_s7 + $0xd0] sm:$0xf] }
 0x335   : > { %v2232_v51 = vadd.f32 %v2231_v7, %v2143_v30  ;;  %v5291_v13 = vor.u32 %v5631_v40, %v5290_v1 }
 0x336   : > { %v2463_v35 = vmax.f32 %v2408_v37, 0.0 }
 0x337   : > { %3726 = vmatpush.bf16.msra.mxu1 %v5291_v13 }
 0x339   : > { %v2320_v61 = vpop.f32.mrf.mxu2 }
 0x33a   : > { %v2321_v60 = vadd.f32 %v2320_v61, %v2232_v51  ;;  %v2409_v22 = vpop.f32.mrf.mxu3  ;;  %v2145_v21 = vpop.f32.mrf.mxu0 }
 0x33b   : > { %v2146_v6 = vadd.f32 %v6910_v4, %v2145_v21  ;;  %v2234_v52 = vpop.f32.mrf.mxu1 }
 0x33c   : > { %v2410_v45 = vadd.f32 %v2409_v22, %v2321_v60 }
 0x33d   : > { %v2235_v46 = vadd.f32 %v2234_v52, %v2146_v6  ;;  %2710 = vmatmul.bf16.gmra.mxu0 %v6960_v50 }
 0x33e   : > { %v2464_v42 = vmax.f32 %v2410_v45, 0.0  ;;  %2799 = vmatmul.bf16.gmra.mxu1 %v6960_v50  ;;  %2888 = vmatmul.bf16.gmra.mxu2 %v6960_v50 }
 0x33f   : > { %2977 = vmatmul.bf16.gmra.mxu3 %v6960_v50 }
 0x340   : > { %v7112_v8 = vpack.c.bf16 %v2464_v42, %v2463_v35 }
 0x341   : > { %v2323_v48 = vpop.f32.mrf.mxu2 }
 0x342   : > { %v2324_v15 = vadd.f32 %v2323_v48, %v2235_v46  ;;  %v2412_v10 = vpop.f32.mrf.mxu3  ;;  %v2147_v58 = vpop.f32.mrf.mxu0 }
 0x343   : > { %v2148_v49 = vadd.f32 %v6910_v4, %v2147_v58  ;;  %v2236_v24 = vpop.f32.mrf.mxu1 }
 0x344   : > { %v2413_v27 = vadd.f32 %v2412_v10, %v2324_v15 }
 0x345   : > { %v2237_v43 = vadd.f32 %v2236_v24, %v2148_v49 }
 0x346   : > { %v2465_v18 = vmax.f32 %v2413_v27, 0.0 }
 0x349   : > { %v2325_v54 = vpop.f32.mrf.mxu2 }
 0x34a   : > { %v2326_v62 = vadd.f32 %v2325_v54, %v2237_v43  ;;  %v2414_v25 = vpop.f32.mrf.mxu3  ;;  %v2150_v34 = vpop.f32.mrf.mxu0 }
 0x34b   : > { %v2151_v19 = vadd.f32 %v6910_v4, %v2150_v34  ;;  %v2239_v41 = vpop.f32.mrf.mxu1  ;;  %v5346_v34 = vld [vmem:[%s8083_s7 + $0x140] sm:$0xf] }
 0x34c   : > { %v2415_v12 = vadd.f32 %v2414_v25, %v2326_v62 }
 0x34d   : > { %v2240_v50 = vadd.f32 %v2239_v41, %v2151_v19  ;;  %2715 = vmatmul.bf16.gmra.mxu0 %v6992_v17  ;;  %v5645_v19 = vld [vmem:[%s8083_s7 + $0x144] sm:$0xf0]  ;;  %v5218_v41 = vld [vmem:[%s8083_s7 + $0x40] sm:$0xf] }
 0x34e   : > { %v2466_v38 = vmax.f32 %v2415_v12, 0.0  ;;  %2804 = vmatmul.bf16.gmra.mxu1 %v6992_v17  ;;  %2893 = vmatmul.bf16.gmra.mxu2 %v6992_v17 }
 0x34f   : > { %2982 = vmatmul.bf16.gmra.mxu3 %v6992_v17  ;;  %v5615_v17 = vld [vmem:[%s8083_s7 + $0x54] sm:$0xf0] }
 0x350   : > { %v7120_v28 = vpack.c.bf16 %v2466_v38, %v2465_v18  ;;  %v5227_v11 = vor.u32 %v5615_v17, %v5226_v20  ;;  %v5410_v18 = vld [vmem:[%s8083_s7 + $0x1c0] sm:$0xf]  ;;  %v5661_v38 = vld [vmem:[%s8083_s7 + $0x1c4] sm:$0xf0] }
 0x351   : > { %v2328_v5 = vpop.f32.mrf.mxu2  ;;  %v5411_v63 = vor.u32 %v5661_v38, %v5410_v18 }
 0x352   : > { %v2329_v2 = vadd.f32 %v2328_v5, %v2240_v50  ;;  %v2417_v26 = vpop.f32.mrf.mxu3  ;;  %v2152_v39 = vpop.f32.mrf.mxu0  ;;  %3637 = vmatpush.bf16.msra.mxu0 %v5227_v11  ;;  %v5347_v50 = vor.u32 %v5645_v19, %v5346_v34 }
 0x353   : > { %v2153_v29 = vadd.f32 %v6910_v4, %v2152_v39  ;;  %v2241_v16 = vpop.f32.mrf.mxu1  ;;  %3905 = vmatpush.bf16.msra.mxu3 %v5411_v63  ;;  %v5629_v39 = vld [vmem:[%s8083_s7 + $0xc4] sm:$0xf0] }
 0x354   : > { %v2418_v55 = vadd.f32 %v2417_v26, %v2329_v2  ;;  %3816 = vmatpush.bf16.msra.mxu2 %v5347_v50  ;;  %v5282_v26 = vld [vmem:[%s8083_s7 + $0xc0] sm:$0xf] }
 0x355   : > { %v2242_v0 = vadd.f32 %v2241_v16, %v2153_v29  ;;  %v5283_v11 = vor.u32 %v5629_v39, %v5282_v26 }
 0x356   : > { %v2467_v61 = vmax.f32 %v2418_v55, 0.0 }
 0x357   : > { %3727 = vmatpush.bf16.msra.mxu1 %v5283_v11 }
 0x359   : > { %v2330_v33 = vpop.f32.mrf.mxu2 }
 0x35a   : > { %v2331_v30 = vadd.f32 %v2330_v33, %v2242_v0  ;;  %v2419_v7 = vpop.f32.mrf.mxu3  ;;  %v2155_v37 = vpop.f32.mrf.mxu0 }
 0x35b   : > { %v2156_v51 = vadd.f32 %v6910_v4, %v2155_v37  ;;  %v2244_v9 = vpop.f32.mrf.mxu1 }
 0x35c   : > { %v2420_v3 = vadd.f32 %v2419_v7, %v2331_v30 }
 0x35d   : > { %v2245_v32 = vadd.f32 %v2244_v9, %v2156_v51  ;;  %2720 = vmatmul.bf16.gmra.mxu0 %v7000_v47 }
 0x35e   : > { %v2468_v60 = vmax.f32 %v2420_v3, 0.0  ;;  %2809 = vmatmul.bf16.gmra.mxu1 %v7000_v47  ;;  %2898 = vmatmul.bf16.gmra.mxu2 %v7000_v47 }
 0x35f   : > { %2987 = vmatmul.bf16.gmra.mxu3 %v7000_v47 }
 0x360   : > { %v7152_v22 = vpack.c.bf16 %v2468_v60, %v2467_v61 }
 0x361   : > { %v2333_v21 = vpop.f32.mrf.mxu2 }
 0x362   : > { %v2334_v6 = vadd.f32 %v2333_v21, %v2245_v32  ;;  %v2422_v52 = vpop.f32.mrf.mxu3  ;;  %v2157_v45 = vpop.f32.mrf.mxu0 }
 0x363   : > { %v2158_v46 = vadd.f32 %v6910_v4, %v2157_v45  ;;  %v2246_v35 = vpop.f32.mrf.mxu1 }
 0x364   : > { %v2423_v42 = vadd.f32 %v2422_v52, %v2334_v6 }
 0x365   : > { %v2247_v48 = vadd.f32 %v2246_v35, %v2158_v46 }
 0x366   : > { %v2469_v54 = vmax.f32 %v2423_v42, 0.0 }
 0x369   : > { %v2335_v15 = vpop.f32.mrf.mxu2 }
 0x36a   : > { %v2336_v10 = vadd.f32 %v2335_v15, %v2247_v48  ;;  %v2424_v58 = vpop.f32.mrf.mxu3  ;;  %v2160_v49 = vpop.f32.mrf.mxu0 }
 0x36b   : > { %v2161_v24 = vadd.f32 %v6910_v4, %v2160_v49  ;;  %v2249_v27 = vpop.f32.mrf.mxu1  ;;  %v5338_v49 = vld [vmem:[%s8083_s7 + $0x130] sm:$0xf] }
 0x36c   : > { %v2425_v43 = vadd.f32 %v2424_v58, %v2336_v10 }
 0x36d   : > { %v2250_v47 = vadd.f32 %v2249_v27, %v2161_v24  ;;  %2725 = vmatmul.bf16.gmra.mxu0 %v7032_v31  ;;  %v5643_v24 = vld [vmem:[%s8083_s7 + $0x134] sm:$0xf0]  ;;  %v5210_v27 = vld [vmem:[%s8083_s7 + $0x30] sm:$0xf] }
 0x36e   : > { %v2470_v62 = vmax.f32 %v2425_v43, 0.0  ;;  %2814 = vmatmul.bf16.gmra.mxu1 %v7032_v31  ;;  %2903 = vmatmul.bf16.gmra.mxu2 %v7032_v31 }
 0x36f   : > { %2992 = vmatmul.bf16.gmra.mxu3 %v7032_v31  ;;  %v5613_v31 = vld [vmem:[%s8083_s7 + $0x44] sm:$0xf0] }
 0x370   : > { %v7160_v25 = vpack.c.bf16 %v2470_v62, %v2469_v54  ;;  %v5219_v5 = vor.u32 %v5613_v31, %v5218_v41  ;;  %v5402_v54 = vld [vmem:[%s8083_s7 + $0x1b0] sm:$0xf]  ;;  %v5659_v62 = vld [vmem:[%s8083_s7 + $0x1b4] sm:$0xf0] }
 0x371   : > { %v2338_v12 = vpop.f32.mrf.mxu2  ;;  %v5403_v50 = vor.u32 %v5659_v62, %v5402_v54 }
 0x372   : > { %v2339_v57 = vadd.f32 %v2338_v12, %v2250_v47  ;;  %v2427_v53 = vpop.f32.mrf.mxu3  ;;  %v2162_v20 = vpop.f32.mrf.mxu0  ;;  %3638 = vmatpush.bf16.msra.mxu0 %v5219_v5  ;;  %v5339_v47 = vor.u32 %v5643_v24, %v5338_v49 }
 0x373   : > { %v2163_v17 = vadd.f32 %v6910_v4, %v2162_v20  ;;  %v2251_v14 = vpop.f32.mrf.mxu1  ;;  %3906 = vmatpush.bf16.msra.mxu3 %v5403_v50  ;;  %v5627_v20 = vld [vmem:[%s8083_s7 + $0xb4] sm:$0xf0] }
 0x374   : > { %v2428_v23 = vadd.f32 %v2427_v53, %v2339_v57  ;;  %3817 = vmatpush.bf16.msra.mxu2 %v5339_v47  ;;  %v5274_v53 = vld [vmem:[%s8083_s7 + $0xb0] sm:$0xf] }
 0x375   : > { %v2252_v2 = vadd.f32 %v2251_v14, %v2163_v17  ;;  %v5275_v5 = vor.u32 %v5627_v20, %v5274_v53 }
 0x376   : > { %v2471_v33 = vmax.f32 %v2428_v23, 0.0 }
 0x377   : > { %3728 = vmatpush.bf16.msra.mxu1 %v5275_v5 }
 0x379   : > { %v2340_v44 = vpop.f32.mrf.mxu2 }
 0x37a   : > { %v2341_v29 = vadd.f32 %v2340_v44, %v2252_v2  ;;  %v2429_v16 = vpop.f32.mrf.mxu3  ;;  %v2165_v55 = vpop.f32.mrf.mxu0 }
 0x37b   : > { %v2166_v0 = vadd.f32 %v6910_v4, %v2165_v55  ;;  %v2254_v1 = vpop.f32.mrf.mxu1 }
 0x37c   : > { %v2430_v40 = vadd.f32 %v2429_v16, %v2341_v29 }
 0x37d   : > { %v2255_v13 = vadd.f32 %v2254_v1, %v2166_v0  ;;  %2730 = vmatmul.bf16.gmra.mxu0 %v7040_v36 }
 0x37e   : > { %v2472_v30 = vmax.f32 %v2430_v40, 0.0  ;;  %2819 = vmatmul.bf16.gmra.mxu1 %v7040_v36  ;;  %2908 = vmatmul.bf16.gmra.mxu2 %v7040_v36 }
 0x37f   : > { %2997 = vmatmul.bf16.gmra.mxu3 %v7040_v36 }
 0x380   : > { %v7192_v7 = vpack.c.bf16 %v2472_v30, %v2471_v33 }
 0x381   : > { %v2343_v37 = vpop.f32.mrf.mxu2 }
 0x382   : > { %v2344_v51 = vadd.f32 %v2343_v37, %v2255_v13  ;;  %v2432_v9 = vpop.f32.mrf.mxu3  ;;  %v2167_v3 = vpop.f32.mrf.mxu0 }
 0x383   : > { %v2168_v32 = vadd.f32 %v6910_v4, %v2167_v3  ;;  %v2256_v61 = vpop.f32.mrf.mxu1 }
 0x384   : > { %v2433_v60 = vadd.f32 %v2432_v9, %v2344_v51 }
 0x385   : > { %v2257_v21 = vadd.f32 %v2256_v61, %v2168_v32  ;;  %v2527_v32 = vld [vmem:[%s8082_s6] sm:$0xf] }
 0x386   : > { %v2473_v15 = vmax.f32 %v2433_v60, 0.0 }
 0x389   : > { %v2345_v6 = vpop.f32.mrf.mxu2 }
 0x38a   : > { %v2346_v52 = vadd.f32 %v2345_v6, %v2257_v21  ;;  %v2434_v45 = vpop.f32.mrf.mxu3  ;;  %v2170_v46 = vpop.f32.mrf.mxu0  ;;  %v7238_v21 = vperm.slane %v2527_v32, 0 }
 0x38b   : > { %v2171_v35 = vadd.f32 %v6910_v4, %v2170_v46  ;;  %v2259_v42 = vpop.f32.mrf.mxu1  ;;  %v5641_v46 = vld [vmem:[%s8083_s7 + $0x124] sm:$0xf0] }
 0x38c   : > { %v2435_v48 = vadd.f32 %v2434_v45, %v2346_v52  ;;  %v5330_v45 = vld [vmem:[%s8083_s7 + $0x120] sm:$0xf] }
 0x38d   : > { %v2260_v36 = vadd.f32 %v2259_v42, %v2171_v35  ;;  %2735 = vmatmul.bf16.gmra.mxu0 %v7072_v56  ;;  %v5202_v35 = vld [vmem:[%s8083_s7 + $0x20] sm:$0xf] }
 0x38e   : > { %v2474_v10 = vmax.f32 %v2435_v48, 0.0  ;;  %2824 = vmatmul.bf16.gmra.mxu1 %v7072_v56  ;;  %2913 = vmatmul.bf16.gmra.mxu2 %v7072_v56  ;;  %v5331_v48 = vor.u32 %v5641_v46, %v5330_v45 }
 0x38f   : > { %3002 = vmatmul.bf16.gmra.mxu3 %v7072_v56  ;;  %v5611_v56 = vld [vmem:[%s8083_s7 + $0x34] sm:$0xf0] }
 0x390   : > { %v7200_v58 = vpack.c.bf16 %v2474_v10, %v2473_v15  ;;  %v5211_v12 = vor.u32 %v5611_v56, %v5210_v27  ;;  %v5657_v15 = vld [vmem:[%s8083_s7 + $0x1a4] sm:$0xf0]  ;;  %3818 = vmatpush.bf16.msra.mxu2 %v5331_v48 }
 0x391   : > { %v2348_v43 = vpop.f32.mrf.mxu2 }
 0x392   : > { %v2349_v34 = vadd.f32 %v2348_v43, %v2260_v36  ;;  %v2437_v19 = vpop.f32.mrf.mxu3  ;;  %v2172_v41 = vpop.f32.mrf.mxu0  ;;  %3639 = vmatpush.bf16.msra.mxu0 %v5211_v12  ;;  %v5609_v36 = vld [vmem:[%s8083_s7 + $0x24] sm:$0xf0] }
 0x393   : > { %v2173_v31 = vadd.f32 %v6910_v4, %v2172_v41  ;;  %v2261_v18 = vpop.f32.mrf.mxu1  ;;  %v5203_v24 = vor.u32 %v5609_v36, %v5202_v35 }
 0x394   : > { %v2438_v38 = vadd.f32 %v2437_v19, %v2349_v34  ;;  %v7269_v34 = vperm.slane %v2527_v32, 2  ;;  %v7271_v19 = vperm.slane %v2527_v32, 3 }
 0x395   : > { %v2262_v57 = vadd.f32 %v2261_v18, %v2173_v31  ;;  %v5266_v31 = vld [vmem:[%s8083_s7 + $0xa0] sm:$0xf]  ;;  %v5625_v18 = vld [vmem:[%s8083_s7 + $0xa4] sm:$0xf0] }
 0x396   : > { %v2475_v44 = vmax.f32 %v2438_v38, 0.0  ;;  %3640 = vmatpush.bf16.msra.mxu0 %v5203_v24  ;;  %v5267_v53 = vor.u32 %v5625_v18, %v5266_v31  ;;  %v5655_v31 = vld [vmem:[%s8083_s7 + $0x194] sm:$0xf0] }
 0x398   : > { %3729 = vmatpush.bf16.msra.mxu1 %v5267_v53 }
 0x399   : > { %v2350_v63 = vpop.f32.mrf.mxu2 }
 0x39a   : > { %v2351_v17 = vadd.f32 %v2350_v63, %v2262_v57  ;;  %v2439_v14 = vpop.f32.mrf.mxu3  ;;  %v2175_v23 = vpop.f32.mrf.mxu0 }
 0x39b   : > { %v2176_v2 = vadd.f32 %v6910_v4, %v2175_v23  ;;  %v2264_v26 = vpop.f32.mrf.mxu1 }
 0x39c   : > { %v2440_v39 = vadd.f32 %v2439_v14, %v2351_v17 }
 0x39d   : > { %v2265_v11 = vadd.f32 %v2264_v26, %v2176_v2  ;;  %2740 = vmatmul.bf16.gmra.mxu0 %v7080_v59 }
 0x39e   : > { %v2476_v29 = vmax.f32 %v2440_v39, 0.0  ;;  %2829 = vmatmul.bf16.gmra.mxu1 %v7080_v59  ;;  %2918 = vmatmul.bf16.gmra.mxu2 %v7080_v59 }
 0x39f   : > { %3007 = vmatmul.bf16.gmra.mxu3 %v7080_v59 }
 0x3a0   : > { %v7232_v16 = vpack.c.bf16 %v2476_v29, %v2475_v44 }
 0x3a1   : > { %v2353_v55 = vpop.f32.mrf.mxu2 }
 0x3a2   : > { %v2354_v0 = vadd.f32 %v2353_v55, %v2265_v11  ;;  %v2442_v1 = vpop.f32.mrf.mxu3  ;;  %v2177_v40 = vpop.f32.mrf.mxu0 }
 0x3a3   : > { %v2178_v13 = vadd.f32 %v6910_v4, %v2177_v40  ;;  %v2266_v33 = vpop.f32.mrf.mxu1  ;;  %v7241_v4 = vperm.slane %v2527_v32, 1 }
 0x3a4   : > { %v2443_v30 = vadd.f32 %v2442_v1, %v2354_v0 }
 0x3a5   : > { %v2267_v37 = vadd.f32 %v2266_v33, %v2178_v13 }
 0x3a6   : > { %v2477_v6 = vmax.f32 %v2443_v30, 0.0 }
 0x3a9   : > { %v2355_v51 = vpop.f32.mrf.mxu2 }
 0x3aa   : > { %v2356_v9 = vadd.f32 %v2355_v51, %v2267_v37  ;;  %v2444_v3 = vpop.f32.mrf.mxu3  ;;  %v2706_v61 = vpop.f32.mrf.mxu0 }
 0x3ab   : > { %v2795_v59 = vpop.f32.mrf.mxu1  ;;  %v2707_v10 = vadd.f32 %v2706_v61, %v7238_v21 }
 0x3ac   : > { %v2445_v60 = vadd.f32 %v2444_v3, %v2356_v9  ;;  %v2796_v43 = vadd.f32 %v2795_v59, %v7241_v4 }
 0x3ad   : > { %2745 = vmatmul.bf16.gmra.mxu0 %v7112_v8  ;;  %v3053_v12 = vmax.f32 %v2707_v10, 0.0 }
 0x3ae   : > { %v2478_v52 = vmax.f32 %v2445_v60, 0.0  ;;  %2834 = vmatmul.bf16.gmra.mxu1 %v7112_v8  ;;  %2923 = vmatmul.bf16.gmra.mxu2 %v7112_v8  ;;  %v3054_v38 = vmax.f32 %v2796_v43, 0.0 }
 0x3af   : > { %3012 = vmatmul.bf16.gmra.mxu3 %v7112_v8  ;;  %v5394_v8 = vld [vmem:[%s8083_s7 + $0x1a0] sm:$0xf] }
 0x3b0   : > { %v7255_v42 = vpack.c.bf16 %v2478_v52, %v2477_v6  ;;  %v5395_v27 = vor.u32 %v5657_v15, %v5394_v8 }
 0x3b1   : > { %v2884_v49 = vpop.f32.mrf.mxu2 }
 0x3b2   : > { %v2973_v47 = vpop.f32.mrf.mxu3  ;;  %v2708_v56 = vpop.f32.mrf.mxu0  ;;  %3907 = vmatpush.bf16.msra.mxu3 %v5395_v27  ;;  %v2885_v5 = vadd.f32 %v2884_v49, %v7269_v34 }
 0x3b3   : > { %v2709_v54 = vadd.f32 %v2708_v56, %v7238_v21  ;;  %v2797_v62 = vpop.f32.mrf.mxu1  ;;  %v2974_v17 = vadd.f32 %v2973_v47, %v7271_v19  ;;  %v5322_v56 = vld [vmem:[%s8083_s7 + $0x110] sm:$0xf] }
 0x3b4   : > { %v2798_v41 = vadd.f32 %v2797_v62, %v7241_v4  ;;  %v3055_v44 = vmax.f32 %v2885_v5, 0.0  ;;  %v5194_v62 = vld [vmem:[%s8083_s7 + $0x10] sm:$0xf] }
 0x3b5   : > { %v3057_v50 = vmax.f32 %v2709_v54, 0.0  ;;  %v3056_v55 = vmax.f32 %v2974_v17, 0.0  ;;  %v5639_v54 = vld [vmem:[%s8083_s7 + $0x114] sm:$0xf0] }
 0x3b6   : > { %v3058_v57 = vmax.f32 %v2798_v41, 0.0 }
 0x3b7   : > { %v7280_v20 = vpack.c.bf16 %v3057_v50, %v3053_v12  ;;  %v5323_v12 = vor.u32 %v5639_v54, %v5322_v56  ;;  %v5607_v50 = vld [vmem:[%s8083_s7 + $0x14] sm:$0xf0] }
 0x3b8   : > { %v7283_v63 = vpack.c.bf16 %v3058_v57, %v3054_v38  ;;  %v5195_v57 = vor.u32 %v5607_v50, %v5194_v62 }
 0x3b9   : > { %v2886_v14 = vpop.f32.mrf.mxu2  ;;  %3819 = vmatpush.bf16.msra.mxu2 %v5323_v12 }
 0x3ba   : > { %v2887_v23 = vadd.f32 %v2886_v14, %v7269_v34  ;;  %v2975_v2 = vpop.f32.mrf.mxu3  ;;  %v2711_v26 = vpop.f32.mrf.mxu0  ;;  %3641 = vmatpush.bf16.msra.mxu0 %v5195_v57 }
 0x3bb   : > { %v2976_v39 = vadd.f32 %v2975_v2, %v7271_v19  ;;  %v2800_v11 = vpop.f32.mrf.mxu1  ;;  %v2712_v13 = vadd.f32 %v2711_v26, %v7238_v21 }
 0x3bc   : > { %v3059_v29 = vmax.f32 %v2887_v23, 0.0  ;;  %v2801_v30 = vadd.f32 %v2800_v11, %v7241_v4 }
 0x3bd   : > { %v3060_v0 = vmax.f32 %v2976_v39, 0.0  ;;  %2750 = vmatmul.bf16.gmra.mxu0 %v7120_v28  ;;  %v3061_v61 = vmax.f32 %v2712_v13, 0.0 }
 0x3be   : > { %v7289_v1 = vpack.c.bf16 %v3059_v29, %v3055_v44  ;;  %2839 = vmatmul.bf16.gmra.mxu1 %v7120_v28  ;;  %2928 = vmatmul.bf16.gmra.mxu2 %v7120_v28  ;;  %v3062_v60 = vmax.f32 %v2801_v30, 0.0  ;;  %v5258_v44 = vld [vmem:[%s8083_s7 + $0x90] sm:$0xf]  ;;  %v5623_v29 = vld [vmem:[%s8083_s7 + $0x94] sm:$0xf0] }
 0x3bf   : > { %v7293_v40 = vpack.c.bf16 %v3060_v0, %v3056_v55  ;;  %3017 = vmatmul.bf16.gmra.mxu3 %v7120_v28  ;;  %v5259_v13 = vor.u32 %v5623_v29, %v5258_v44  ;;  %v5314_v44 = vld [vmem:[%s8083_s7 + $0x100] sm:$0xf]  ;;  %v5637_v29 = vld [vmem:[%s8083_s7 + $0x104] sm:$0xf0] }
 0x3c1   : > { %v2889_v33 = vpop.f32.mrf.mxu2  ;;  %3730 = vmatpush.bf16.msra.mxu1 %v5259_v13  ;;  %v5315_v13 = vor.u32 %v5637_v29, %v5314_v44 }
 0x3c2   : > { %v2978_v37 = vpop.f32.mrf.mxu3  ;;  %v2713_v51 = vpop.f32.mrf.mxu0  ;;  %v2890_v28 = vadd.f32 %v2889_v33, %v7269_v34 }
 0x3c3   : > { %v2714_v9 = vadd.f32 %v2713_v51, %v7238_v21  ;;  %v2802_v3 = vpop.f32.mrf.mxu1  ;;  %v2979_v46 = vadd.f32 %v2978_v37, %v7271_v19  ;;  %3820 = vmatpush.bf16.msra.mxu2 %v5315_v13 }
 0x3c4   : > { %v2803_v32 = vadd.f32 %v2802_v3, %v7241_v4  ;;  %v3063_v49 = vmax.f32 %v2890_v28, 0.0 }
 0x3c5   : > { %v3065_v59 = vmax.f32 %v2714_v9, 0.0  ;;  %v3064_v27 = vmax.f32 %v2979_v46, 0.0 }
 0x3c6   : > { %v3066_v6 = vmax.f32 %v2803_v32, 0.0 }
 0x3c7   : > { %v7300_v52 = vpack.c.bf16 %v3065_v59, %v3061_v61 }
 0x3c8   : > { %v7303_v45 = vpack.c.bf16 %v3066_v6, %v3062_v60 }
 0x3c9   : > { %v2891_v35 = vpop.f32.mrf.mxu2 }
 0x3ca   : > { %v2892_v48 = vadd.f32 %v2891_v35, %v7269_v34  ;;  %v2980_v36 = vpop.f32.mrf.mxu3  ;;  %v2716_v8 = vpop.f32.mrf.mxu0 }
 0x3cb   : > { %v2981_v15 = vadd.f32 %v2980_v36, %v7271_v19  ;;  %v2805_v10 = vpop.f32.mrf.mxu1  ;;  %v2717_v18 = vadd.f32 %v2716_v8, %v7238_v21 }
 0x3cc   : > { %v3067_v24 = vmax.f32 %v2892_v48, 0.0  ;;  %v2806_v5 = vadd.f32 %v2805_v10, %v7241_v4 }
 0x3cd   : > { %v3068_v43 = vmax.f32 %v2981_v15, 0.0  ;;  %2755 = vmatmul.bf16.gmra.mxu0 %v7152_v22  ;;  %v3069_v39 = vmax.f32 %v2717_v18, 0.0 }
 0x3ce   : > { %2844 = vmatmul.bf16.gmra.mxu1 %v7152_v22  ;;  %2933 = vmatmul.bf16.gmra.mxu2 %v7152_v22  ;;  %v7311_v47 = vpack.c.bf16 %v3067_v24, %v3063_v49  ;;  %v3070_v55 = vmax.f32 %v2806_v5, 0.0 }
 0x3cf   : > { %3022 = vmatmul.bf16.gmra.mxu3 %v7152_v22  ;;  %v7323_v41 = vpack.c.bf16 %v3068_v43, %v3064_v27  ;;  %v5386_v22 = vld [vmem:[%s8083_s7 + $0x190] sm:$0xf] }
 0x3d0   : > { %v5387_v53 = vor.u32 %v5655_v31, %v5386_v22 }
 0x3d1   : > { %v2894_v38 = vpop.f32.mrf.mxu2 }
 0x3d2   : > { %v2983_v17 = vpop.f32.mrf.mxu3  ;;  %v2718_v14 = vpop.f32.mrf.mxu0  ;;  %3908 = vmatpush.bf16.msra.mxu3 %v5387_v53  ;;  %v2895_v30 = vadd.f32 %v2894_v38, %v7269_v34 }
 0x3d3   : > { %v2719_v23 = vadd.f32 %v2718_v14, %v7238_v21  ;;  %v2807_v2 = vpop.f32.mrf.mxu1  ;;  %v2984_v51 = vadd.f32 %v2983_v17, %v7271_v19 }
 0x3d4   : > { %v2808_v26 = vadd.f32 %v2807_v2, %v7241_v4  ;;  %v3071_v6 = vmax.f32 %v2895_v30, 0.0  ;;  %v5605_v30 = vld [vmem:[%s8083_s7 + $0x4] sm:$0xf0] }
 0x3d5   : > { %v3073_v11 = vmax.f32 %v2719_v23, 0.0  ;;  %v3072_v46 = vmax.f32 %v2984_v51, 0.0  ;;  %v5653_v51 = vld [vmem:[%s8083_s7 + $0x184] sm:$0xf0] }
 0x3d6   : > { %v3074_v0 = vmax.f32 %v2808_v26, 0.0 }
 0x3d7   : > { %v7344_v33 = vpack.c.bf16 %v3073_v11, %v3069_v39 }
 0x3d8   : > { %v7347_v37 = vpack.c.bf16 %v3074_v0, %v3070_v55  ;;  %v5186_v55 = vld [vmem:[%s8083_s7] sm:$0xf] }
 0x3d9   : > { %v2896_v9 = vpop.f32.mrf.mxu2 }
 0x3da   : > { %v2897_v3 = vadd.f32 %v2896_v9, %v7269_v34  ;;  %v2985_v32 = vpop.f32.mrf.mxu3  ;;  %v2721_v61 = vpop.f32.mrf.mxu0 }
 0x3db   : > { %v2986_v59 = vadd.f32 %v2985_v32, %v7271_v19  ;;  %v2810_v60 = vpop.f32.mrf.mxu1  ;;  %v2722_v8 = vadd.f32 %v2721_v61, %v7238_v21  ;;  %v5187_v32 = vor.u32 %v5605_v30, %v5186_v55 }
 0x3dc   : > { %v3075_v28 = vmax.f32 %v2897_v3, 0.0  ;;  %v2811_v10 = vadd.f32 %v2810_v60, %v7241_v4 }
 0x3dd   : > { %v3076_v35 = vmax.f32 %v2986_v59, 0.0  ;;  %2760 = vmatmul.bf16.gmra.mxu0 %v7160_v25  ;;  %v3077_v54 = vmax.f32 %v2722_v8, 0.0 }
 0x3de   : > { %2849 = vmatmul.bf16.gmra.mxu1 %v7160_v25  ;;  %2938 = vmatmul.bf16.gmra.mxu2 %v7160_v25  ;;  %v7355_v48 = vpack.c.bf16 %v3075_v28, %v3071_v6  ;;  %v3078_v12 = vmax.f32 %v2811_v10, 0.0  ;;  %v5250_v10 = vld [vmem:[%s8083_s7 + $0x80] sm:$0xf] }
 0x3df   : > { %3027 = vmatmul.bf16.gmra.mxu3 %v7160_v25  ;;  %v7358_v36 = vpack.c.bf16 %v3076_v35, %v3072_v46  ;;  %3642 = vmatpush.bf16.msra.mxu0 %v5187_v32 }
 0x3e1   : > { %8115 = vst [vmem:[#allocation2_spill] sm:$0xff] %v7358_v36  ;;  %v2899_v15 = vpop.f32.mrf.mxu2 }
 0x3e2   : > { %v2988_v49 = vpop.f32.mrf.mxu3  ;;  %v2723_v24 = vpop.f32.mrf.mxu0  ;;  %v2900_v25 = vadd.f32 %v2899_v15, %v7269_v34 }
 0x3e3   : > { %v2724_v27 = vadd.f32 %v2723_v24, %v7238_v21  ;;  %v2812_v43 = vpop.f32.mrf.mxu1  ;;  %v2989_v18 = vadd.f32 %v2988_v49, %v7271_v19  ;;  %v5621_v49 = vld [vmem:[%s8083_s7 + $0x84] sm:$0xf0] }
 0x3e4   : > { %v2813_v56 = vadd.f32 %v2812_v43, %v7241_v4  ;;  %v3079_v23 = vmax.f32 %v2900_v25, 0.0  ;;  %v5251_v43 = vor.u32 %v5621_v49, %v5250_v10 }
 0x3e5   : > { %v3081_v62 = vmax.f32 %v2724_v27, 0.0  ;;  %v3080_v26 = vmax.f32 %v2989_v18, 0.0 }
 0x3e6   : > { %v3082_v50 = vmax.f32 %v2813_v56, 0.0  ;;  %3731 = vmatpush.bf16.msra.mxu1 %v5251_v43 }
 0x3e7   : > { %v7364_v22 = vpack.c.bf16 %v3081_v62, %v3077_v54 }
 0x3e8   : > { %v7367_v31 = vpack.c.bf16 %v3082_v50, %v3078_v12 }
 0x3e9   : > { %8116 = vst [vmem:[#allocation3_spill] sm:$0xff] %v7364_v22  ;;  %v2901_v38 = vpop.f32.mrf.mxu2 }
 0x3ea   : > { %8117 = vst [vmem:[#allocation4_spill] sm:$0xff] %v7367_v31  ;;  %v2902_v57 = vadd.f32 %v2901_v38, %v7269_v34  ;;  %v2990_v53 = vpop.f32.mrf.mxu3  ;;  %v2726_v5 = vpop.f32.mrf.mxu0 }
 0x3eb   : > { %v2991_v17 = vadd.f32 %v2990_v53, %v7271_v19  ;;  %v2815_v14 = vpop.f32.mrf.mxu1  ;;  %v2727_v9 = vadd.f32 %v2726_v5, %v7238_v21 }
 0x3ec   : > { %v3083_v2 = vmax.f32 %v2902_v57, 0.0  ;;  %v2816_v59 = vadd.f32 %v2815_v14, %v7241_v4 }
 0x3ed   : > { %v3084_v39 = vmax.f32 %v2991_v17, 0.0  ;;  %2765 = vmatmul.bf16.gmra.mxu0 %v7192_v7  ;;  %v3085_v8 = vmax.f32 %v2727_v9, 0.0 }
 0x3ee   : > { %2854 = vmatmul.bf16.gmra.mxu1 %v7192_v7  ;;  %2943 = vmatmul.bf16.gmra.mxu2 %v7192_v7  ;;  %v7375_v11 = vpack.c.bf16 %v3083_v2, %v3079_v23  ;;  %v3086_v24 = vmax.f32 %v2816_v59, 0.0 }
 0x3ef   : > { %3032 = vmatmul.bf16.gmra.mxu3 %v7192_v7  ;;  %v7387_v0 = vpack.c.bf16 %v3084_v39, %v3080_v26  ;;  %v5378_v7 = vld [vmem:[%s8083_s7 + $0x180] sm:$0xf] }
 0x3f0   : > { %8118 = vst [vmem:[#allocation5_spill] sm:$0xff] %v7375_v11  ;;  %v5379_v61 = vor.u32 %v5653_v51, %v5378_v7 }
 0x3f1   : > { %8119 = vst [vmem:[#allocation6_spill] sm:$0xff] %v7387_v0  ;;  %v2904_v3 = vpop.f32.mrf.mxu2 }
 0x3f2   : > { %v2993_v60 = vpop.f32.mrf.mxu3  ;;  %v2728_v6 = vpop.f32.mrf.mxu0  ;;  %3909 = vmatpush.bf16.msra.mxu3 %v5379_v61  ;;  %v2905_v54 = vadd.f32 %v2904_v3, %v7269_v34 }
 0x3f3   : > { %v2729_v28 = vadd.f32 %v2728_v6, %v7238_v21  ;;  %v2817_v46 = vpop.f32.mrf.mxu1  ;;  %v2994_v12 = vadd.f32 %v2993_v60, %v7271_v19 }
 0x3f4   : > { %v2818_v35 = vadd.f32 %v2817_v46, %v7241_v4  ;;  %v3087_v5 = vmax.f32 %v2905_v54, 0.0 }
 0x3f5   : > { %v3089_v15 = vmax.f32 %v2729_v28, 0.0  ;;  %v3088_v14 = vmax.f32 %v2994_v12, 0.0  ;;  %v5650_v12 = vld [vmem:[%s8083_s7 + $0x174] sm:$0xf] }
 0x3f6   : > { %v3090_v27 = vmax.f32 %v2818_v35, 0.0 }
 0x3f7   : > { %v7408_v56 = vpack.c.bf16 %v3089_v15, %v3085_v8 }
 0x3f8   : > { %v7411_v62 = vpack.c.bf16 %v3090_v27, %v3086_v24 }
 0x3f9   : > { %8120 = vst [vmem:[#allocation7_spill] sm:$0xff] %v7408_v56  ;;  %v2906_v50 = vpop.f32.mrf.mxu2 }
 0x3fa   : > { %8121 = vst [vmem:[#allocation8_spill] sm:$0xff] %v7411_v62  ;;  %v2907_v25 = vadd.f32 %v2906_v50, %v7269_v34  ;;  %v2995_v18 = vpop.f32.mrf.mxu3  ;;  %v2731_v38 = vpop.f32.mrf.mxu0  ;;  %v5372_v50 = vld [vmem:[%s8083_s7 + $0x178] sm:$0xf0] }
 0x3fb   : > { %v2996_v57 = vadd.f32 %v2995_v18, %v7271_v19  ;;  %v2820_v53 = vpop.f32.mrf.mxu1  ;;  %v2732_v39 = vadd.f32 %v2731_v38, %v7238_v21  ;;  %v5375_v38 = vor.u32 %v5650_v12, %v5372_v50 }
 0x3fc   : > { %v3091_v17 = vmax.f32 %v2907_v25, 0.0  ;;  %v2821_v29 = vadd.f32 %v2820_v53, %v7241_v4  ;;  %v5618_v25 = vld [vmem:[%s8083_s7 + $0x74] sm:$0xf]  ;;  %v5436_v53 = vld [vmem:[%s8083_s7 + $0x1f8] sm:$0xf0] }
 0x3fd   : > { %v3092_v23 = vmax.f32 %v2996_v57, 0.0  ;;  %2770 = vmatmul.bf16.gmra.mxu0 %v7200_v58  ;;  %v3093_v9 = vmax.f32 %v2732_v39, 0.0  ;;  %v5244_v57 = vld [vmem:[%s8083_s7 + $0x78] sm:$0xf0]  ;;  %4169 = vmatpush.bf16.msrb.mxu2 %v5375_v38 }
 0x3fe   : > { %2859 = vmatmul.bf16.gmra.mxu1 %v7200_v58  ;;  %2948 = vmatmul.bf16.gmra.mxu2 %v7200_v58  ;;  %v7419_v2 = vpack.c.bf16 %v3091_v17, %v3087_v5  ;;  %v3094_v32 = vmax.f32 %v2821_v29, 0.0 }
 0x3ff   : > { %3037 = vmatmul.bf16.gmra.mxu3 %v7200_v58  ;;  %v7422_v26 = vpack.c.bf16 %v3092_v23, %v3088_v14  ;;  %v5247_v14 = vor.u32 %v5618_v25, %v5244_v57 }
 0x400   : > { %8122 = vst [vmem:[#allocation9_spill] sm:$0xff] %v7419_v2 }
 0x401   : > { %8123 = vst [vmem:[#allocation10_spill] sm:$0xff] %v7422_v26  ;;  %v2909_v44 = vpop.f32.mrf.mxu2  ;;  %3991 = vmatpush.bf16.msrb.mxu0 %v5247_v14 }
 0x402   : > { %v2998_v55 = vpop.f32.mrf.mxu3  ;;  %v2733_v13 = vpop.f32.mrf.mxu0  ;;  %v2910_v58 = vadd.f32 %v2909_v44, %v7269_v34 }
 0x403   : > { %v2734_v30 = vadd.f32 %v2733_v13, %v7238_v21  ;;  %v2822_v7 = vpop.f32.mrf.mxu1  ;;  %v2999_v6 = vadd.f32 %v2998_v55, %v7271_v19 }
 0x404   : > { %v2823_v51 = vadd.f32 %v2822_v7, %v7241_v4  ;;  %v3095_v49 = vmax.f32 %v2910_v58, 0.0 }
 0x405   : > { %v3097_v3 = vmax.f32 %v2734_v30, 0.0  ;;  %v3096_v27 = vmax.f32 %v2999_v6, 0.0 }
 0x406   : > { %v3098_v61 = vmax.f32 %v2823_v51, 0.0 }
 0x407   : > { %v7428_v59 = vpack.c.bf16 %v3097_v3, %v3093_v9  ;;  %v5634_v9 = vld [vmem:[%s8083_s7 + $0xf4] sm:$0xf]  ;;  %v5308_v3 = vld [vmem:[%s8083_s7 + $0xf8] sm:$0xf0] }
 0x408   : > { %v7431_v60 = vpack.c.bf16 %v3098_v61, %v3094_v32  ;;  %v5311_v58 = vor.u32 %v5634_v9, %v5308_v3 }
 0x409   : > { %8124 = vst [vmem:[#allocation11_spill] sm:$0xff] %v7428_v59  ;;  %v2911_v28 = vpop.f32.mrf.mxu2 }
 0x40a   : > { %8125 = vst [vmem:[#allocation12_spill] sm:$0xff] %v7431_v60  ;;  %v2912_v46 = vadd.f32 %v2911_v28, %v7269_v34  ;;  %v3000_v35 = vpop.f32.mrf.mxu3  ;;  %v2736_v8 = vpop.f32.mrf.mxu0  ;;  %4080 = vmatpush.bf16.msrb.mxu1 %v5311_v58 }
 0x40b   : > { %v3001_v15 = vadd.f32 %v3000_v35, %v7271_v19  ;;  %v2825_v10 = vpop.f32.mrf.mxu1  ;;  %v2737_v5 = vadd.f32 %v2736_v8, %v7238_v21 }
 0x40c   : > { %v3099_v24 = vmax.f32 %v2912_v46, 0.0  ;;  %v2826_v39 = vadd.f32 %v2825_v10, %v7241_v4 }
 0x40d   : > { %v3100_v43 = vmax.f32 %v3001_v15, 0.0  ;;  %2775 = vmatmul.bf16.gmra.mxu0 %v7232_v16  ;;  %v3101_v7 = vmax.f32 %v2737_v5, 0.0 }
 0x40e   : > { %2864 = vmatmul.bf16.gmra.mxu1 %v7232_v16  ;;  %2953 = vmatmul.bf16.gmra.mxu2 %v7232_v16  ;;  %v7439_v54 = vpack.c.bf16 %v3099_v24, %v3095_v49  ;;  %v3102_v32 = vmax.f32 %v2826_v39, 0.0 }
 0x40f   : > { %3042 = vmatmul.bf16.gmra.mxu3 %v7232_v16  ;;  %v7451_v18 = vpack.c.bf16 %v3100_v43, %v3096_v27  ;;  %v5666_v16 = vld [vmem:[%s8083_s7 + $0x1f4] sm:$0xf] }
 0x410   : > { %8126 = vst [vmem:[#allocation13_spill] sm:$0xff] %v7439_v54  ;;  %v5439_v23 = vor.u32 %v5666_v16, %v5436_v53 }
 0x411   : > { %8127 = vst [vmem:[#allocation14_spill] sm:$0xff] %v7451_v18  ;;  %v2914_v17 = vpop.f32.mrf.mxu2 }
 0x412   : > { %v3003_v44 = vpop.f32.mrf.mxu3  ;;  %v2738_v29 = vpop.f32.mrf.mxu0  ;;  %4258 = vmatpush.bf16.msrb.mxu3 %v5439_v23  ;;  %v2915_v28 = vadd.f32 %v2914_v17, %v7269_v34 }
 0x413   : > { %v2739_v55 = vadd.f32 %v2738_v29, %v7238_v21  ;;  %v2827_v13 = vpop.f32.mrf.mxu1  ;;  %v3004_v35 = vadd.f32 %v3003_v44, %v7271_v19 }
 0x414   : > { %v2828_v30 = vadd.f32 %v2827_v13, %v7241_v4  ;;  %v3103_v43 = vmax.f32 %v2915_v28, 0.0 }
 0x415   : > { %v3105_v51 = vmax.f32 %v2739_v55, 0.0  ;;  %v3104_v50 = vmax.f32 %v3004_v35, 0.0 }
 0x416   : > { %v3106_v61 = vmax.f32 %v2828_v30, 0.0 }
 0x417   : > { %v7472_v6 = vpack.c.bf16 %v3105_v51, %v3101_v7 }
 0x418   : > { %v7475_v46 = vpack.c.bf16 %v3106_v61, %v3102_v32 }
 0x419   : > { %8128 = vst [vmem:[#allocation15_spill] sm:$0xff] %v7472_v6  ;;  %v2916_v8 = vpop.f32.mrf.mxu2 }
 0x41a   : > { %8129 = vst [vmem:[#allocation16_spill] sm:$0xff] %v7475_v46  ;;  %v2917_v15 = vadd.f32 %v2916_v8, %v7269_v34  ;;  %v3005_v10 = vpop.f32.mrf.mxu3  ;;  %v2741_v49 = vpop.f32.mrf.mxu0 }
 0x41b   : > { %v3006_v24 = vadd.f32 %v3005_v10, %v7271_v19  ;;  %v2830_v27 = vpop.f32.mrf.mxu1  ;;  %v2742_v16 = vadd.f32 %v2741_v49, %v7238_v21 }
 0x41c   : > { %v3107_v12 = vmax.f32 %v2917_v15, 0.0  ;;  %v2831_v5 = vadd.f32 %v2830_v27, %v7241_v4  ;;  %v5648_v27 = vld [vmem:[%s8083_s7 + $0x164] sm:$0xf] }
 0x41d   : > { %v3108_v25 = vmax.f32 %v3006_v24, 0.0  ;;  %2780 = vmatmul.bf16.gmra.mxu0 %v7255_v42  ;;  %v3109_v29 = vmax.f32 %v2742_v16, 0.0  ;;  %v5236_v16 = vld [vmem:[%s8083_s7 + $0x68] sm:$0xf0] }
 0x41e   : > { %2869 = vmatmul.bf16.gmra.mxu1 %v7255_v42  ;;  %2958 = vmatmul.bf16.gmra.mxu2 %v7255_v42  ;;  %v7483_v38 = vpack.c.bf16 %v3107_v12, %v3103_v43  ;;  %v3110_v13 = vmax.f32 %v2831_v5, 0.0  ;;  %v5364_v43 = vld [vmem:[%s8083_s7 + $0x168] sm:$0xf0]  ;;  %v5616_v12 = vld [vmem:[%s8083_s7 + $0x64] sm:$0xf] }
 0x41f   : > { %3047 = vmatmul.bf16.gmra.mxu3 %v7255_v42  ;;  %v7486_v57 = vpack.c.bf16 %v3108_v25, %v3104_v50  ;;  %v5367_v25 = vor.u32 %v5648_v27, %v5364_v43  ;;  %v5428_v5 = vld [vmem:[%s8083_s7 + $0x1e8] sm:$0xf0] }
 0x420   : > { %8130 = vst [vmem:[#allocation17_spill] sm:$0xff] %v7483_v38 }
 0x421   : > { %8131 = vst [vmem:[#allocation18_spill] sm:$0xff] %v7486_v57  ;;  %v2919_v53 = vpop.f32.mrf.mxu2  ;;  %4170 = vmatpush.bf16.msrb.mxu2 %v5367_v25 }
 0x422   : > { %v3008_v17 = vpop.f32.mrf.mxu3  ;;  %v2743_v14 = vpop.f32.mrf.mxu0  ;;  %v2920_v42 = vadd.f32 %v2919_v53, %v7269_v34  ;;  %v5664_v53 = vld [vmem:[%s8083_s7 + $0x1e4] sm:$0xf] }
 0x423   : > { %v2744_v23 = vadd.f32 %v2743_v14, %v7238_v21  ;;  %v2832_v39 = vpop.f32.mrf.mxu1  ;;  %v3009_v9 = vadd.f32 %v3008_v17, %v7271_v19 }
 0x424   : > { %v2833_v44 = vadd.f32 %v2832_v39, %v7241_v4  ;;  %v3111_v8 = vmax.f32 %v2920_v42, 0.0  ;;  %v5431_v39 = vor.u32 %v5664_v53, %v5428_v5 }
 0x425   : > { %v3113_v55 = vmax.f32 %v2744_v23, 0.0  ;;  %v3112_v10 = vmax.f32 %v3009_v9, 0.0  ;;  %v5239_v23 = vor.u32 %v5616_v12, %v5236_v16 }
 0x426   : > { %v3114_v30 = vmax.f32 %v2833_v44, 0.0  ;;  %4259 = vmatpush.bf16.msrb.mxu3 %v5431_v39 }
 0x427   : > { %v7492_v7 = vpack.c.bf16 %v3113_v55, %v3109_v29  ;;  %3992 = vmatpush.bf16.msrb.mxu0 %v5239_v23 }
 0x428   : > { %v7495_v51 = vpack.c.bf16 %v3114_v30, %v3110_v13 }
 0x429   : > { %v2921_v3 = vpop.f32.mrf.mxu2 }
 0x42a   : > { %v2922_v32 = vadd.f32 %v2921_v3, %v7269_v34  ;;  %v3010_v61 = vpop.f32.mrf.mxu3  ;;  %v2746_v58 = vpop.f32.mrf.mxu0 }
 0x42b   : > { %v3011_v28 = vadd.f32 %v3010_v61, %v7271_v19  ;;  %v2835_v35 = vpop.f32.mrf.mxu1  ;;  %v2747_v17 = vadd.f32 %v2746_v58, %v7238_v21  ;;  %v5300_v61 = vld [vmem:[%s8083_s7 + $0xe8] sm:$0xf0] }
 0x42c   : > { %v3115_v15 = vmax.f32 %v2922_v32, 0.0  ;;  %v2836_v44 = vadd.f32 %v2835_v35, %v7241_v4  ;;  %v5632_v32 = vld [vmem:[%s8083_s7 + $0xe4] sm:$0xf] }
 0x42d   : > { %v3116_v49 = vmax.f32 %v3011_v28, 0.0  ;;  %3643 = vmatmul.bf16.vlgmr.msra.gmra.mxu0 %v7280_v20  ;;  %v3117_v9 = vmax.f32 %v2747_v17, 0.0  ;;  %v5303_v35 = vor.u32 %v5632_v32, %v5300_v61 }
 0x42e   : > { %3732 = vmatmul.bf16.vlgmr.msra.gmra.mxu1 %v7283_v63  ;;  %3821 = vmatmul.bf16.vlgmr.msra.gmra.mxu2 %v7289_v1  ;;  %v7503_v24 = vpack.c.bf16 %v3115_v15, %v3111_v8  ;;  %v3118_v58 = vmax.f32 %v2836_v44, 0.0 }
 0x42f   : > { %3910 = vmatmul.bf16.vlgmr.msra.gmra.mxu3 %v7293_v40  ;;  %v7515_v50 = vpack.c.bf16 %v3116_v49, %v3112_v10  ;;  %4081 = vmatpush.bf16.msrb.mxu1 %v5303_v35 }
 0x431   : > { %8132 = vst [vmem:[#allocation19_spill] sm:$0xff] %v7515_v50  ;;  %v2924_v14 = vpop.f32.mrf.mxu2 }
 0x432   : > { %v3013_v29 = vpop.f32.mrf.mxu3  ;;  %v2748_v55 = vpop.f32.mrf.mxu0  ;;  %v2925_v15 = vadd.f32 %v2924_v14, %v7269_v34 }
 0x433   : > { %v2749_v13 = vadd.f32 %v2748_v55, %v7238_v21  ;;  %v2837_v30 = vpop.f32.mrf.mxu1  ;;  %v3014_v49 = vadd.f32 %v3013_v29, %v7271_v19 }
 0x434   : > { %v2838_v42 = vadd.f32 %v2837_v30, %v7241_v4  ;;  %v3119_v5 = vmax.f32 %v2925_v15, 0.0 }
 0x435   : > { %v3121_v3 = vmax.f32 %v2749_v13, 0.0  ;;  %v3120_v23 = vmax.f32 %v3014_v49, 0.0 }
 0x436   : > { %v3122_v28 = vmax.f32 %v2838_v42, 0.0 }
 0x437   : > { %v7536_v8 = vpack.c.bf16 %v3121_v3, %v3117_v9 }
 0x438   : > { %v7539_v10 = vpack.c.bf16 %v3122_v28, %v3118_v58 }
 0x439   : > { %v2926_v27 = vpop.f32.mrf.mxu2 }
 0x43a   : > { %v2927_v43 = vadd.f32 %v2926_v27, %v7269_v34  ;;  %v3015_v12 = vpop.f32.mrf.mxu3  ;;  %v2751_v25 = vpop.f32.mrf.mxu0 }
 0x43b   : > { %v3016_v16 = vadd.f32 %v3015_v12, %v7271_v19  ;;  %v2840_v53 = vpop.f32.mrf.mxu1  ;;  %v2752_v29 = vadd.f32 %v2751_v25, %v7238_v21 }
 0x43c   : > { %v3123_v17 = vmax.f32 %v2927_v43, 0.0  ;;  %v2841_v13 = vadd.f32 %v2840_v53, %v7241_v4 }
 0x43d   : > { %v3124_v39 = vmax.f32 %v3016_v16, 0.0  ;;  %3648 = vmatmul.bf16.gmra.mxu0 %v7300_v52  ;;  %v3125_v61 = vmax.f32 %v2752_v29, 0.0 }
 0x43e   : > { %3737 = vmatmul.bf16.gmra.mxu1 %v7303_v45  ;;  %3826 = vmatmul.bf16.gmra.mxu2 %v7311_v47  ;;  %v7547_v14 = vpack.c.bf16 %v3123_v17, %v3119_v5  ;;  %v3126_v28 = vmax.f32 %v2841_v13, 0.0 }
 0x43f   : > { %3915 = vmatmul.bf16.gmra.mxu3 %v7323_v41  ;;  %v7550_v44 = vpack.c.bf16 %v3124_v39, %v3120_v23 }
 0x441   : > { %v2929_v55 = vpop.f32.mrf.mxu2 }
 0x442   : > { %v3018_v30 = vpop.f32.mrf.mxu3  ;;  %v2753_v42 = vpop.f32.mrf.mxu0  ;;  %v2930_v49 = vadd.f32 %v2929_v55, %v7269_v34 }
 0x443   : > { %v2754_v9 = vadd.f32 %v2753_v42, %v7238_v21  ;;  %v2842_v3 = vpop.f32.mrf.mxu1  ;;  %v3019_v43 = vadd.f32 %v3018_v30, %v7271_v19  ;;  %v5646_v30 = vld [vmem:[%s8083_s7 + $0x154] sm:$0xf]  ;;  %v5356_v42 = vld [vmem:[%s8083_s7 + $0x158] sm:$0xf0] }
 0x444   : > { %v2843_v32 = vadd.f32 %v2842_v3, %v7241_v4  ;;  %v3127_v23 = vmax.f32 %v2930_v49, 0.0 }
 0x445   : > { %v3129_v58 = vmax.f32 %v2754_v9, 0.0  ;;  %v3128_v29 = vmax.f32 %v3019_v43, 0.0  ;;  %v5614_v9 = vld [vmem:[%s8083_s7 + $0x54] sm:$0xf] }
 0x446   : > { %v3130_v35 = vmax.f32 %v2843_v32, 0.0  ;;  %v5359_v32 = vor.u32 %v5646_v30, %v5356_v42 }
 0x447   : > { %v7556_v15 = vpack.c.bf16 %v3129_v58, %v3125_v61  ;;  %v5228_v61 = vld [vmem:[%s8083_s7 + $0x58] sm:$0xf0]  ;;  %v5662_v58 = vld [vmem:[%s8083_s7 + $0x1d4] sm:$0xf] }
 0x448   : > { %v7559_v27 = vpack.c.bf16 %v3130_v35, %v3126_v28  ;;  %v5420_v28 = vld [vmem:[%s8083_s7 + $0x1d8] sm:$0xf0]  ;;  %v5231_v43 = vor.u32 %v5614_v9, %v5228_v61  ;;  %4171 = vmatpush.bf16.msrb.mxu2 %v5359_v32 }
 0x449   : > { %v2931_v12 = vpop.f32.mrf.mxu2 }
 0x44a   : > { %8133 = vst [vmem:[#allocation20_spill] sm:$0xff] %v7559_v27  ;;  %v2932_v25 = vadd.f32 %v2931_v12, %v7269_v34  ;;  %v3020_v16 = vpop.f32.mrf.mxu3  ;;  %v2756_v53 = vpop.f32.mrf.mxu0  ;;  %v5423_v12 = vor.u32 %v5662_v58, %v5420_v28  ;;  %3993 = vmatpush.bf16.msrb.mxu0 %v5231_v43 }
 0x44b   : > { %v3021_v5 = vadd.f32 %v3020_v16, %v7271_v19  ;;  %v2845_v17 = vpop.f32.mrf.mxu1  ;;  %v2757_v35 = vadd.f32 %v2756_v53, %v7238_v21  ;;  %v5630_v53 = vld [vmem:[%s8083_s7 + $0xd4] sm:$0xf] }
 0x44c   : > { %v3131_v39 = vmax.f32 %v2932_v25, 0.0  ;;  %v2846_v25 = vadd.f32 %v2845_v17, %v7241_v4  ;;  %4260 = vmatpush.bf16.msrb.mxu3 %v5423_v12  ;;  %v5292_v17 = vld [vmem:[%s8083_s7 + $0xd8] sm:$0xf0] }
 0x44d   : > { %v3132_v13 = vmax.f32 %v3021_v5, 0.0  ;;  %3653 = vmatmul.bf16.gmra.mxu0 %v7344_v33  ;;  %v5295_v32 = vor.u32 %v5630_v53, %v5292_v17 }
 0x44e   : > { %3742 = vmatmul.bf16.gmra.mxu1 %v7347_v37  ;;  %3831 = vmatmul.bf16.gmra.mxu2 %v7355_v48  ;;  %v7567_v55 = vpack.c.bf16 %v3131_v39, %v3127_v23  ;;  %v3134_v42 = vmax.f32 %v2846_v25, 0.0 }
 0x44f   : > { %3920 = vmatmul.bf16.gmra.mxu3 %v7358_v36  ;;  %v7579_v3 = vpack.c.bf16 %v3132_v13, %v3128_v29  ;;  %v3133_v13 = vmax.f32 %v2757_v35, 0.0  ;;  %4082 = vmatpush.bf16.msrb.mxu1 %v5295_v32 }
 0x450   : > { %8134 = vst [vmem:[#allocation21_spill] sm:$0xff] %v7567_v55 }
 0x451   : > { %8135 = vst [vmem:[#allocation22_spill] sm:$0xff] %v7579_v3  ;;  %v2934_v49 = vpop.f32.mrf.mxu2 }
 0x452   : > { %v3023_v16 = vpop.f32.mrf.mxu3  ;;  %v2758_v5 = vpop.f32.mrf.mxu0  ;;  %v2935_v58 = vadd.f32 %v2934_v49, %v7269_v34 }
 0x453   : > { %v2759_v23 = vadd.f32 %v2758_v5, %v7238_v21  ;;  %v2847_v39 = vpop.f32.mrf.mxu1  ;;  %v3024_v35 = vadd.f32 %v3023_v16, %v7271_v19 }
 0x454   : > { %v2848_v29 = vadd.f32 %v2847_v39, %v7241_v4  ;;  %v3135_v25 = vmax.f32 %v2935_v58, 0.0 }
 0x455   : > { %v3137_v30 = vmax.f32 %v2759_v23, 0.0  ;;  %v3136_v53 = vmax.f32 %v3024_v35, 0.0 }
 0x456   : > { %v3138_v9 = vmax.f32 %v2848_v29, 0.0 }
 0x457   : > { %v7600_v61 = vpack.c.bf16 %v3137_v30, %v3133_v13 }
 0x458   : > { %v7603_v28 = vpack.c.bf16 %v3138_v9, %v3134_v42 }
 0x459   : > { %v2936_v43 = vpop.f32.mrf.mxu2 }
 0x45a   : > { %v2937_v12 = vadd.f32 %v2936_v43, %v7269_v34  ;;  %v3025_v5 = vpop.f32.mrf.mxu3  ;;  %v2761_v23 = vpop.f32.mrf.mxu0 }
 0x45b   : > { %v3026_v39 = vadd.f32 %v3025_v5, %v7271_v19  ;;  %v2850_v36 = vpop.f32.mrf.mxu1  ;;  %v2762_v30 = vadd.f32 %v2761_v23, %v7238_v21 }
 0x45c   : > { %v3139_v29 = vmax.f32 %v2937_v12, 0.0  ;;  %v2851_v42 = vadd.f32 %v2850_v36, %v7241_v4 }
 0x45d   : > { %v3140_v13 = vmax.f32 %v3026_v39, 0.0  ;;  %3658 = vmatmul.bf16.gmra.mxu0 %v7364_v22  ;;  %v3141_v12 = vmax.f32 %v2762_v30, 0.0 }
 0x45e   : > { %3747 = vmatmul.bf16.gmra.mxu1 %v7367_v31  ;;  %3836 = vmatmul.bf16.gmra.mxu2 %v7375_v11  ;;  %v7611_v49 = vpack.c.bf16 %v3139_v29, %v3135_v25  ;;  %v3142_v39 = vmax.f32 %v2851_v42, 0.0 }
 0x45f   : > { %3925 = vmatmul.bf16.gmra.mxu3 %v7387_v0  ;;  %v7614_v16 = vpack.c.bf16 %v3140_v13, %v3136_v53 }
 0x461   : > { %v2939_v17 = vpop.f32.mrf.mxu2 }
 0x462   : > { %v3028_v9 = vpop.f32.mrf.mxu3  ;;  %v2763_v32 = vpop.f32.mrf.mxu0  ;;  %v2940_v53 = vadd.f32 %v2939_v17, %v7269_v34 }
 0x463   : > { %v2764_v58 = vadd.f32 %v2763_v32, %v7238_v21  ;;  %v2852_v35 = vpop.f32.mrf.mxu1  ;;  %v3029_v23 = vadd.f32 %v3028_v9, %v7271_v19  ;;  %v5644_v9 = vld [vmem:[%s8083_s7 + $0x144] sm:$0xf] }
 0x464   : > { %v2853_v43 = vadd.f32 %v2852_v35, %v7241_v4  ;;  %v3143_v30 = vmax.f32 %v2940_v53, 0.0 }
 0x465   : > { %v3145_v5 = vmax.f32 %v2764_v58, 0.0  ;;  %v3144_v42 = vmax.f32 %v3029_v23, 0.0 }
 0x466   : > { %v3146_v25 = vmax.f32 %v2853_v43, 0.0 }
 0x467   : > { %v7620_v29 = vpack.c.bf16 %v3145_v5, %v3141_v12  ;;  %v5220_v5 = vld [vmem:[%s8083_s7 + $0x48] sm:$0xf0] }
 0x468   : > { %v7623_v13 = vpack.c.bf16 %v3146_v25, %v3142_v39  ;;  %v5660_v39 = vld [vmem:[%s8083_s7 + $0x1c4] sm:$0xf]  ;;  %v5412_v25 = vld [vmem:[%s8083_s7 + $0x1c8] sm:$0xf0] }
 0x469   : > { %v2941_v36 = vpop.f32.mrf.mxu2 }
 0x46a   : > { %v2942_v0 = vadd.f32 %v2941_v36, %v7269_v34  ;;  %v3030_v11 = vpop.f32.mrf.mxu3  ;;  %v2766_v32 = vpop.f32.mrf.mxu0 }
 0x46b   : > { %v3031_v31 = vadd.f32 %v3030_v11, %v7271_v19  ;;  %v2855_v35 = vpop.f32.mrf.mxu1  ;;  %v5348_v11 = vld [vmem:[%s8083_s7 + $0x148] sm:$0xf0]  ;;  %v2767_v53 = vadd.f32 %v2766_v32, %v7238_v21  ;;  %v5628_v32 = vld [vmem:[%s8083_s7 + $0xc4] sm:$0xf] }
 0x46c   : > { %v3147_v58 = vmax.f32 %v2942_v0, 0.0  ;;  %v5351_v12 = vor.u32 %v5644_v9, %v5348_v11 }
 0x46d   : > { %v3148_v43 = vmax.f32 %v3031_v31, 0.0  ;;  %3663 = vmatmul.bf16.gmra.mxu0 %v7408_v56  ;;  %v5612_v31 = vld [vmem:[%s8083_s7 + $0x44] sm:$0xf] }
 0x46e   : > { %3752 = vmatmul.bf16.gmra.mxu1 %v7411_v62  ;;  %3841 = vmatmul.bf16.gmra.mxu2 %v7419_v2  ;;  %v7631_v17 = vpack.c.bf16 %v3147_v58, %v3143_v30  ;;  %v5223_v36 = vor.u32 %v5612_v31, %v5220_v5  ;;  %v5415_v30 = vor.u32 %v5660_v39, %v5412_v25  ;;  %v3149_v2 = vmax.f32 %v2767_v53, 0.0 }
 0x46f   : > { %3930 = vmatmul.bf16.gmra.mxu3 %v7422_v26  ;;  %v7643_v0 = vpack.c.bf16 %v3148_v43, %v3144_v42  ;;  %v2856_v58 = vadd.f32 %v2855_v35, %v7241_v4  ;;  %4172 = vmatpush.bf16.msrb.mxu2 %v5351_v12  ;;  %v5284_v35 = vld [vmem:[%s8083_s7 + $0xc8] sm:$0xf0] }
 0x470   : > { %3994 = vmatpush.bf16.msrb.mxu0 %v5223_v36  ;;  %4261 = vmatpush.bf16.msrb.mxu3 %v5415_v30  ;;  %v5287_v12 = vor.u32 %v5628_v32, %v5284_v35 }
 0x471   : > { %v2944_v23 = vpop.f32.mrf.mxu2  ;;  %v3150_v31 = vmax.f32 %v2856_v58, 0.0 }
 0x472   : > { %v3033_v42 = vpop.f32.mrf.mxu3  ;;  %v2768_v43 = vpop.f32.mrf.mxu0  ;;  %v2945_v25 = vadd.f32 %v2944_v23, %v7269_v34  ;;  %4083 = vmatpush.bf16.msrb.mxu1 %v5287_v12 }
 0x473   : > { %v2769_v9 = vadd.f32 %v2768_v43, %v7238_v21  ;;  %v2857_v11 = vpop.f32.mrf.mxu1  ;;  %v3034_v53 = vadd.f32 %v3033_v42, %v7271_v19 }
 0x474   : > { %v2858_v26 = vadd.f32 %v2857_v11, %v7241_v4  ;;  %v3151_v58 = vmax.f32 %v2945_v25, 0.0 }
 0x475   : > { %v3153_v62 = vmax.f32 %v2769_v9, 0.0  ;;  %v3152_v32 = vmax.f32 %v3034_v53, 0.0 }
 0x476   : > { %v3154_v5 = vmax.f32 %v2858_v26, 0.0 }
 0x477   : > { %v7664_v39 = vpack.c.bf16 %v3153_v62, %v3149_v2 }
 0x478   : > { %v7667_v36 = vpack.c.bf16 %v3154_v5, %v3150_v31 }
 0x479   : > { %v2946_v30 = vpop.f32.mrf.mxu2 }
 0x47a   : > { %v2947_v43 = vadd.f32 %v2946_v30, %v7269_v34  ;;  %v3035_v9 = vpop.f32.mrf.mxu3  ;;  %v2771_v11 = vpop.f32.mrf.mxu0 }
 0x47b   : > { %v3036_v56 = vadd.f32 %v3035_v9, %v7271_v19  ;;  %v2860_v22 = vpop.f32.mrf.mxu1  ;;  %v2772_v42 = vadd.f32 %v2771_v11, %v7238_v21 }
 0x47c   : > { %v3155_v26 = vmax.f32 %v2947_v43, 0.0  ;;  %v2861_v31 = vadd.f32 %v2860_v22, %v7241_v4 }
 0x47d   : > { %v3156_v62 = vmax.f32 %v3036_v56, 0.0  ;;  %3668 = vmatmul.bf16.gmra.mxu0 %v7428_v59  ;;  %v3157_v30 = vmax.f32 %v2772_v42, 0.0 }
 0x47e   : > { %3757 = vmatmul.bf16.gmra.mxu1 %v7431_v60  ;;  %3846 = vmatmul.bf16.gmra.mxu2 %v7439_v54  ;;  %v7675_v2 = vpack.c.bf16 %v3155_v26, %v3151_v58  ;;  %v3158_v9 = vmax.f32 %v2861_v31, 0.0 }
 0x47f   : > { %3935 = vmatmul.bf16.gmra.mxu3 %v7451_v18  ;;  %v7678_v23 = vpack.c.bf16 %v3156_v62, %v3152_v32 }
 0x481   : > { %v2949_v35 = vpop.f32.mrf.mxu2 }
 0x482   : > { %v3038_v5 = vpop.f32.mrf.mxu3  ;;  %v2773_v12 = vpop.f32.mrf.mxu0  ;;  %v2950_v32 = vadd.f32 %v2949_v35, %v7269_v34 }
 0x483   : > { %v2774_v56 = vadd.f32 %v2773_v12, %v7238_v21  ;;  %v2862_v25 = vpop.f32.mrf.mxu1  ;;  %v3039_v11 = vadd.f32 %v3038_v5, %v7271_v19  ;;  %v5642_v5 = vld [vmem:[%s8083_s7 + $0x134] sm:$0xf] }
 0x484   : > { %v2863_v53 = vadd.f32 %v2862_v25, %v7241_v4  ;;  %v3159_v42 = vmax.f32 %v2950_v32, 0.0 }
 0x485   : > { %v3161_v43 = vmax.f32 %v2774_v56, 0.0  ;;  %v3160_v31 = vmax.f32 %v3039_v11, 0.0 }
 0x486   : > { %v3162_v58 = vmax.f32 %v2863_v53, 0.0 }
 0x487   : > { %v7684_v26 = vpack.c.bf16 %v3161_v43, %v3157_v30  ;;  %v5212_v43 = vld [vmem:[%s8083_s7 + $0x38] sm:$0xf0] }
 0x488   : > { %v7687_v62 = vpack.c.bf16 %v3162_v58, %v3158_v9  ;;  %v5658_v9 = vld [vmem:[%s8083_s7 + $0x1b4] sm:$0xf]  ;;  %v5404_v58 = vld [vmem:[%s8083_s7 + $0x1b8] sm:$0xf0] }
 0x489   : > { %v2951_v22 = vpop.f32.mrf.mxu2 }
 0x48a   : > { %v2952_v18 = vadd.f32 %v2951_v22, %v7269_v34  ;;  %v3040_v54 = vpop.f32.mrf.mxu3  ;;  %v2776_v12 = vpop.f32.mrf.mxu0 }
 0x48b   : > { %v3041_v60 = vadd.f32 %v3040_v54, %v7271_v19  ;;  %v2865_v25 = vpop.f32.mrf.mxu1  ;;  %v5340_v54 = vld [vmem:[%s8083_s7 + $0x138] sm:$0xf0]  ;;  %v2777_v32 = vadd.f32 %v2776_v12, %v7238_v21 }
 0x48c   : > { %v3163_v56 = vmax.f32 %v2952_v18, 0.0  ;;  %v5343_v30 = vor.u32 %v5642_v5, %v5340_v54 }
 0x48d   : > { %v3164_v53 = vmax.f32 %v3041_v60, 0.0  ;;  %3673 = vmatmul.bf16.gmra.mxu0 %v7472_v6  ;;  %v5610_v60 = vld [vmem:[%s8083_s7 + $0x34] sm:$0xf] }
 0x48e   : > { %3762 = vmatmul.bf16.gmra.mxu1 %v7475_v46  ;;  %3851 = vmatmul.bf16.gmra.mxu2 %v7483_v38  ;;  %v7695_v35 = vpack.c.bf16 %v3163_v56, %v3159_v42  ;;  %v5215_v22 = vor.u32 %v5610_v60, %v5212_v43  ;;  %v5407_v42 = vor.u32 %v5658_v9, %v5404_v58  ;;  %v3165_v38 = vmax.f32 %v2777_v32, 0.0 }
 0x48f   : > { %3940 = vmatmul.bf16.gmra.mxu3 %v7486_v57  ;;  %v7707_v18 = vpack.c.bf16 %v3164_v53, %v3160_v31  ;;  %v2866_v56 = vadd.f32 %v2865_v25, %v7241_v4  ;;  %4173 = vmatpush.bf16.msrb.mxu2 %v5343_v30  ;;  %v5626_v25 = vld [vmem:[%s8083_s7 + $0xb4] sm:$0xf]  ;;  %v5276_v30 = vld [vmem:[%s8083_s7 + $0xb8] sm:$0xf0] }
 0x490   : > { %3995 = vmatpush.bf16.msrb.mxu0 %v5215_v22  ;;  %4262 = vmatpush.bf16.msrb.mxu3 %v5407_v42  ;;  %v5279_v32 = vor.u32 %v5626_v25, %v5276_v30 }
 0x491   : > { %v2954_v11 = vpop.f32.mrf.mxu2  ;;  %v3166_v6 = vmax.f32 %v2866_v56, 0.0 }
 0x492   : > { %v3043_v31 = vpop.f32.mrf.mxu3  ;;  %v2778_v53 = vpop.f32.mrf.mxu0  ;;  %v2955_v60 = vadd.f32 %v2954_v11, %v7269_v34  ;;  %4084 = vmatpush.bf16.msrb.mxu1 %v5279_v32 }
 0x493   : > { %v2779_v5 = vadd.f32 %v2778_v53, %v7238_v21  ;;  %v2867_v54 = vpop.f32.mrf.mxu1  ;;  %v3044_v9 = vadd.f32 %v3043_v31, %v7271_v19 }
 0x494   : > { %v2868_v57 = vadd.f32 %v2867_v54, %v7241_v4  ;;  %v3167_v42 = vmax.f32 %v2955_v60, 0.0 }
 0x495   : > { %v3169_v46 = vmax.f32 %v2779_v5, 0.0  ;;  %v3168_v53 = vmax.f32 %v3044_v9, 0.0 }
 0x496   : > { %v3170_v59 = vmax.f32 %v2868_v57, 0.0 }
 0x497   : > { %v7722_v12 = vpack.c.bf16 %v3169_v46, %v3165_v38 }
 0x498   : > { %v7731_v43 = vpack.c.bf16 %v3170_v59, %v3166_v6 }
 0x499   : > { %v2956_v58 = vpop.f32.mrf.mxu2 }
 0x49a   : > { %v2957_v57 = vadd.f32 %v2956_v58, %v7269_v34  ;;  %v3045_v46 = vpop.f32.mrf.mxu3  ;;  %v2781_v38 = vpop.f32.mrf.mxu0 }
 0x49b   : > { %v3046_v11 = vadd.f32 %v3045_v46, %v7271_v19  ;;  %v2870_v22 = vpop.f32.mrf.mxu1  ;;  %v2782_v31 = vadd.f32 %v2781_v38, %v7238_v21 }
 0x49c   : > { %v3171_v56 = vmax.f32 %v2957_v57, 0.0  ;;  %v2871_v60 = vadd.f32 %v2870_v22, %v7241_v4 }
 0x49d   : > { %v3172_v5 = vmax.f32 %v3046_v11, 0.0  ;;  %3678 = vmatmul.bf16.gmra.mxu0 %v7492_v7  ;;  %v3173_v57 = vmax.f32 %v2782_v31, 0.0  ;;  %v7751_v11 = vld [vmem:[%s8084_s8] sm:$0x3] }
 0x49e   : > { %3767 = vmatmul.bf16.gmra.mxu1 %v7495_v51  ;;  %3856 = vmatmul.bf16.gmra.mxu2 %v7503_v24  ;;  %v7739_v59 = vpack.c.bf16 %v3171_v56, %v3167_v42  ;;  %v3174_v42 = vmax.f32 %v2871_v60, 0.0 }
 0x49f   : > { %3945 = vmatmul.bf16.gmra.mxu3 %v7515_v50  ;;  %v7742_v6 = vpack.c.bf16 %v3172_v5, %v3168_v53  ;;  %v7757_v53 = vperm.slane %v7751_v11, 0 }
 0x4a1   : > { %v2959_v54 = vpop.f32.mrf.mxu2 }
 0x4a2   : > { %v3048_v25 = vpop.f32.mrf.mxu3  ;;  %v2783_v30 = vpop.f32.mrf.mxu0  ;;  %v2960_v22 = vadd.f32 %v2959_v54, %v7269_v34 }
 0x4a3   : > { %v2784_v9 = vadd.f32 %v2783_v30, %v7238_v21  ;;  %v2872_v58 = vpop.f32.mrf.mxu1 }
 0x4a4   : > { %v2873_v32 = vadd.f32 %v2872_v58, %v7241_v4  ;;  %v3049_v4 = vadd.f32 %v3048_v25, %v7271_v19 }
 0x4a5   : > { %v3177_v46 = vmax.f32 %v2784_v9, 0.0 }
 0x4a6   : > { %v3178_v56 = vmax.f32 %v2873_v32, 0.0  ;;  %v3175_v32 = vmax.f32 %v2960_v22, 0.0  ;;  %v3176_v54 = vmax.f32 %v3049_v4, 0.0  ;;  %v5608_v22 = vld [vmem:[%s8083_s7 + $0x24] sm:$0xf] }
 0x4a7   : > { %v7753_v38 = vpack.c.bf16 %v3177_v46, %v3173_v57 }
 0x4a8   : > { %v7759_v21 = vpack.c.bf16 %v3178_v56, %v3174_v42  ;;  %v5640_v42 = vld [vmem:[%s8083_s7 + $0x124] sm:$0xf]  ;;  %v5332_v56 = vld [vmem:[%s8083_s7 + $0x128] sm:$0xf0] }
 0x4a9   : > { %v2961_v5 = vpop.f32.mrf.mxu2 }
 0x4aa   : > { %v2962_v31 = vadd.f32 %v2961_v5, %v7269_v34  ;;  %v3050_v30 = vpop.f32.mrf.mxu3  ;;  %v3644_v9 = vpop.f32.mrf.mxu0  ;;  %v5335_v5 = vor.u32 %v5640_v42, %v5332_v56 }
 0x4ab   : > { %v3051_v58 = vadd.f32 %v3050_v30, %v7271_v19  ;;  %v3733_v60 = vpop.f32.mrf.mxu1  ;;  %v3645_v46 = vadd.f32 %v3644_v9, %v7757_v53  ;;  %v5396_v30 = vld [vmem:[%s8083_s7 + $0x1a8] sm:$0xf0] }
 0x4ac   : > { %v3179_v57 = vmax.f32 %v2962_v31, 0.0  ;;  %v5656_v31 = vld [vmem:[%s8083_s7 + $0x1a4] sm:$0xf]  ;;  %4174 = vmatpush.bf16.msrb.mxu2 %v5335_v5 }
 0x4ad   : > { %v3180_v50 = vmax.f32 %v3051_v58, 0.0  ;;  %3683 = vmatmul.bf16.gmra.mxu0 %v7536_v8  ;;  %v3734_v19 = vadd.f32 %v3733_v60, %v3645_v46 }
 0x4ae   : > { %3772 = vmatmul.bf16.gmra.mxu1 %v7539_v10  ;;  %3861 = vmatmul.bf16.gmra.mxu2 %v7547_v14  ;;  %v7768_v25 = vpack.c.bf16 %v3179_v57, %v3175_v32  ;;  %v5399_v57 = vor.u32 %v5656_v31, %v5396_v30 }
 0x4af   : > { %3950 = vmatmul.bf16.gmra.mxu3 %v7550_v44  ;;  %v7771_v34 = vpack.c.bf16 %v3180_v50, %v3176_v54  ;;  %v5204_v50 = vld [vmem:[%s8083_s7 + $0x28] sm:$0xf0] }
 0x4b0   : > { %v5207_v32 = vor.u32 %v5608_v22, %v5204_v50  ;;  %4263 = vmatpush.bf16.msrb.mxu3 %v5399_v57  ;;  %v5624_v22 = vld [vmem:[%s8083_s7 + $0xa4] sm:$0xf] }
 0x4b1   : > { %v3822_v4 = vpop.f32.mrf.mxu2 }
 0x4b2   : > { %v3823_v9 = vadd.f32 %v3822_v4, %v3734_v19  ;;  %v3911_v58 = vpop.f32.mrf.mxu3  ;;  %v3646_v60 = vpop.f32.mrf.mxu0  ;;  %3996 = vmatpush.bf16.msrb.mxu0 %v5207_v32  ;;  %v5268_v4 = vld [vmem:[%s8083_s7 + $0xa8] sm:$0xf0] }
 0x4b3   : > { %v3735_v46 = vpop.f32.mrf.mxu1  ;;  %v3647_v42 = vadd.f32 %v3646_v60, %v7757_v53  ;;  %v5271_v50 = vor.u32 %v5624_v22, %v5268_v4 }
 0x4b4   : > { %v3912_v54 = vadd.f32 %v3911_v58, %v3823_v9 }
 0x4b5   : > { %v3736_v19 = vadd.f32 %v3735_v46, %v3647_v42  ;;  %4085 = vmatpush.bf16.msrb.mxu1 %v5271_v50 }
 0x4b6   : > { %v4347_v56 = vmax.f32 %v3912_v54, 0.0 }
 0x4b8   : > { %4411 = vst [vmem:[%s7796_s19] sm:$0xff] %v4347_v56 }
 0x4b9   : > { %v3824_v5 = vpop.f32.mrf.mxu2 }
 0x4ba   : > { %v3825_v31 = vadd.f32 %v3824_v5, %v3736_v19  ;;  %v3913_v30 = vpop.f32.mrf.mxu3  ;;  %v3649_v9 = vpop.f32.mrf.mxu0 }
 0x4bb   : > { %v3738_v58 = vpop.f32.mrf.mxu1  ;;  %v3650_v32 = vadd.f32 %v3649_v9, %v7757_v53 }
 0x4bc   : > { %v3914_v60 = vadd.f32 %v3913_v30, %v3825_v31 }
 0x4bd   : > { %3688 = vmatmul.bf16.gmra.mxu0 %v7556_v15  ;;  %v3739_v46 = vadd.f32 %v3738_v58, %v3650_v32 }
 0x4be   : > { %v4349_v57 = vmax.f32 %v3914_v60, 0.0  ;;  %3777 = vmatmul.bf16.gmra.mxu1 %v7559_v27  ;;  %3866 = vmatmul.bf16.gmra.mxu2 %v7567_v55 }
 0x4bf   : > { %3955 = vmatmul.bf16.gmra.mxu3 %v7579_v3 }
 0x4c0   : > { %4413 = vst [vmem:[%s7796_s19 + $0x10] sm:$0xff] %v4349_v57 }
 0x4c1   : > { %v3827_v54 = vpop.f32.mrf.mxu2 }
 0x4c2   : > { %v3828_v42 = vadd.f32 %v3827_v54, %v3739_v46  ;;  %v3916_v56 = vpop.f32.mrf.mxu3  ;;  %v3651_v19 = vpop.f32.mrf.mxu0  ;;  %v5638_v46 = vld [vmem:[%s8083_s7 + $0x114] sm:$0xf]  ;;  %v5324_v54 = vld [vmem:[%s8083_s7 + $0x118] sm:$0xf0] }
 0x4c3   : > { %v3740_v22 = vpop.f32.mrf.mxu1  ;;  %v3652_v5 = vadd.f32 %v3651_v19, %v7757_v53 }
 0x4c4   : > { %v3917_v4 = vadd.f32 %v3916_v56, %v3828_v42  ;;  %v5327_v42 = vor.u32 %v5638_v46, %v5324_v54  ;;  %v5196_v56 = vld [vmem:[%s8083_s7 + $0x18] sm:$0xf0] }
 0x4c5   : > { %v3741_v31 = vadd.f32 %v3740_v22, %v3652_v5  ;;  %v5260_v46 = vld [vmem:[%s8083_s7 + $0x98] sm:$0xf0] }
 0x4c6   : > { %v4351_v50 = vmax.f32 %v3917_v4, 0.0  ;;  %4175 = vmatpush.bf16.msrb.mxu2 %v5327_v42 }
 0x4c8   : > { %4415 = vst [vmem:[%s7796_s19 + $0x20] sm:$0xff] %v4351_v50  ;;  %v5388_v50 = vld [vmem:[%s8083_s7 + $0x198] sm:$0xf0] }
 0x4c9   : > { %v3829_v30 = vpop.f32.mrf.mxu2 }
 0x4ca   : > { %v3830_v9 = vadd.f32 %v3829_v30, %v3741_v31  ;;  %v3918_v60 = vpop.f32.mrf.mxu3  ;;  %v3654_v55 = vpop.f32.mrf.mxu0 }
 0x4cb   : > { %v3743_v27 = vpop.f32.mrf.mxu1  ;;  %v3655_v58 = vadd.f32 %v3654_v55, %v7757_v53 }
 0x4cc   : > { %v3919_v3 = vadd.f32 %v3918_v60, %v3830_v9 }
 0x4cd   : > { %3693 = vmatmul.bf16.gmra.mxu0 %v7600_v61  ;;  %v3744_v57 = vadd.f32 %v3743_v27, %v3655_v58  ;;  %v5654_v27 = vld [vmem:[%s8083_s7 + $0x194] sm:$0xf] }
 0x4ce   : > { %v4353_v32 = vmax.f32 %v3919_v3, 0.0  ;;  %3782 = vmatmul.bf16.gmra.mxu1 %v7603_v28  ;;  %3871 = vmatmul.bf16.gmra.mxu2 %v7611_v49  ;;  %v5606_v3 = vld [vmem:[%s8083_s7 + $0x14] sm:$0xf]  ;;  %v5391_v30 = vor.u32 %v5654_v27, %v5388_v50 }
 0x4cf   : > { %3960 = vmatmul.bf16.gmra.mxu3 %v7614_v16  ;;  %v5199_v5 = vor.u32 %v5606_v3, %v5196_v56 }
 0x4d0   : > { %4417 = vst [vmem:[%s7796_s19 + $0x30] sm:$0xff] %v4353_v32  ;;  %4264 = vmatpush.bf16.msrb.mxu3 %v5391_v30 }
 0x4d1   : > { %v3832_v55 = vpop.f32.mrf.mxu2  ;;  %3997 = vmatpush.bf16.msrb.mxu0 %v5199_v5 }
 0x4d2   : > { %v3833_v19 = vadd.f32 %v3832_v55, %v3744_v57  ;;  %v3921_v22 = vpop.f32.mrf.mxu3  ;;  %v3656_v4 = vpop.f32.mrf.mxu0  ;;  %v5622_v57 = vld [vmem:[%s8083_s7 + $0x94] sm:$0xf] }
 0x4d3   : > { %v3745_v31 = vpop.f32.mrf.mxu1  ;;  %v3657_v60 = vadd.f32 %v3656_v4, %v7757_v53  ;;  %v5263_v55 = vor.u32 %v5622_v57, %v5260_v46 }
 0x4d4   : > { %v3922_v9 = vadd.f32 %v3921_v22, %v3833_v19 }
 0x4d5   : > { %v3746_v32 = vadd.f32 %v3745_v31, %v3657_v60  ;;  %4086 = vmatpush.bf16.msrb.mxu1 %v5263_v55 }
 0x4d6   : > { %v4355_v58 = vmax.f32 %v3922_v9, 0.0 }
 0x4d8   : > { %4419 = vst [vmem:[%s7796_s19 + $0x40] sm:$0xff] %v4355_v58 }
 0x4d9   : > { %v3834_v54 = vpop.f32.mrf.mxu2 }
 0x4da   : > { %v3835_v42 = vadd.f32 %v3834_v54, %v3746_v32  ;;  %v3923_v3 = vpop.f32.mrf.mxu3  ;;  %v3659_v56 = vpop.f32.mrf.mxu0 }
 0x4db   : > { %v3748_v27 = vpop.f32.mrf.mxu1  ;;  %v3660_v22 = vadd.f32 %v3659_v56, %v7757_v53 }
 0x4dc   : > { %v3924_v19 = vadd.f32 %v3923_v3, %v3835_v42 }
 0x4dd   : > { %3698 = vmatmul.bf16.gmra.mxu0 %v7620_v29  ;;  %v3749_v5 = vadd.f32 %v3748_v27, %v3660_v22 }
 0x4de   : > { %v4357_v4 = vmax.f32 %v3924_v19, 0.0  ;;  %3787 = vmatmul.bf16.gmra.mxu1 %v7623_v13  ;;  %3876 = vmatmul.bf16.gmra.mxu2 %v7631_v17 }
 0x4df   : > { %3965 = vmatmul.bf16.gmra.mxu3 %v7643_v0 }
 0x4e0   : > { %4421 = vst [vmem:[%s7796_s19 + $0x50] sm:$0xff] %v4357_v4 }
 0x4e1   : > { %v3837_v50 = vpop.f32.mrf.mxu2 }
 0x4e2   : > { %v3838_v31 = vadd.f32 %v3837_v50, %v3749_v5  ;;  %v3926_v30 = vpop.f32.mrf.mxu3  ;;  %v3661_v9 = vpop.f32.mrf.mxu0  ;;  %v5636_v5 = vld [vmem:[%s8083_s7 + $0x104] sm:$0xf]  ;;  %v5316_v50 = vld [vmem:[%s8083_s7 + $0x108] sm:$0xf0] }
 0x4e3   : > { %v3750_v60 = vpop.f32.mrf.mxu1  ;;  %v3662_v32 = vadd.f32 %v3661_v9, %v7757_v53  ;;  %v5604_v9 = vld [vmem:[%s8083_s7 + $0x4] sm:$0xf] }
 0x4e4   : > { %v3927_v58 = vadd.f32 %v3926_v30, %v3838_v31  ;;  %v5319_v30 = vor.u32 %v5636_v5, %v5316_v50  ;;  %v5252_v5 = vld [vmem:[%s8083_s7 + $0x88] sm:$0xf0] }
 0x4e5   : > { %v3751_v46 = vadd.f32 %v3750_v60, %v3662_v32  ;;  %v5188_v60 = vld [vmem:[%s8083_s7 + $0x8] sm:$0xf0] }
 0x4e6   : > { %v4359_v57 = vmax.f32 %v3927_v58, 0.0  ;;  %v5652_v58 = vld [vmem:[%s8083_s7 + $0x184] sm:$0xf]  ;;  %4176 = vmatpush.bf16.msrb.mxu2 %v5319_v30 }
 0x4e8   : > { %4423 = vst [vmem:[%s7796_s19 + $0x60] sm:$0xff] %v4359_v57 }
 0x4e9   : > { %v3839_v54 = vpop.f32.mrf.mxu2 }
 0x4ea   : > { %v3840_v55 = vadd.f32 %v3839_v54, %v3751_v46  ;;  %v3928_v42 = vpop.f32.mrf.mxu3  ;;  %v3664_v3 = vpop.f32.mrf.mxu0  ;;  %v5191_v54 = vor.u32 %v5604_v9, %v5188_v60 }
 0x4eb   : > { %v3753_v56 = vpop.f32.mrf.mxu1  ;;  %v3665_v27 = vadd.f32 %v3664_v3, %v7757_v53 }
 0x4ec   : > { %v3929_v19 = vadd.f32 %v3928_v42, %v3840_v55  ;;  %v5380_v55 = vld [vmem:[%s8083_s7 + $0x188] sm:$0xf0]  ;;  %3998 = vmatpush.bf16.msrb.mxu0 %v5191_v54 }
 0x4ed   : > { %3703 = vmatmul.bf16.gmra.mxu0 %v7664_v39  ;;  %v3754_v4 = vadd.f32 %v3753_v56, %v3665_v27  ;;  %v5383_v3 = vor.u32 %v5652_v58, %v5380_v55 }
 0x4ee   : > { %v4361_v22 = vmax.f32 %v3929_v19, 0.0  ;;  %3792 = vmatmul.bf16.gmra.mxu1 %v7667_v36  ;;  %3881 = vmatmul.bf16.gmra.mxu2 %v7675_v2 }
 0x4ef   : > { %3970 = vmatmul.bf16.gmra.mxu3 %v7678_v23 }
 0x4f0   : > { %4425 = vst [vmem:[%s7796_s19 + $0x70] sm:$0xff] %v4361_v22  ;;  %4265 = vmatpush.bf16.msrb.mxu3 %v5383_v3 }
 0x4f1   : > { %v3842_v31 = vpop.f32.mrf.mxu2 }
 0x4f2   : > { %v3843_v32 = vadd.f32 %v3842_v31, %v3754_v4  ;;  %v3931_v57 = vpop.f32.mrf.mxu3  ;;  %v3666_v46 = vpop.f32.mrf.mxu0  ;;  %v5620_v4 = vld [vmem:[%s8083_s7 + $0x84] sm:$0xf] }
 0x4f3   : > { %v3755_v42 = vpop.f32.mrf.mxu1  ;;  %v3667_v19 = vadd.f32 %v3666_v46, %v7757_v53  ;;  %v5255_v31 = vor.u32 %v5620_v4, %v5252_v5 }
 0x4f4   : > { %v3932_v56 = vadd.f32 %v3931_v57, %v3843_v32 }
 0x4f5   : > { %v3756_v22 = vadd.f32 %v3755_v42, %v3667_v19  ;;  %4087 = vmatpush.bf16.msrb.mxu1 %v5255_v31 }
 0x4f6   : > { %v4363_v27 = vmax.f32 %v3932_v56, 0.0 }
 0x4f8   : > { %4427 = vst [vmem:[%s7796_s19 + $0x80] sm:$0xff] %v4363_v27 }
 0x4f9   : > { %v3844_v50 = vpop.f32.mrf.mxu2 }
 0x4fa   : > { %v3845_v30 = vadd.f32 %v3844_v50, %v3756_v22  ;;  %v3933_v9 = vpop.f32.mrf.mxu3  ;;  %v3669_v60 = vpop.f32.mrf.mxu0 }
 0x4fb   : > { %v3758_v58 = vpop.f32.mrf.mxu1  ;;  %v3670_v57 = vadd.f32 %v3669_v60, %v7757_v53 }
 0x4fc   : > { %v3934_v32 = vadd.f32 %v3933_v9, %v3845_v30 }
 0x4fd   : > { %3708 = vmatmul.bf16.gmra.mxu0 %v7684_v26  ;;  %v3759_v54 = vadd.f32 %v3758_v58, %v3670_v57 }
 0x4fe   : > { %v4365_v46 = vmax.f32 %v3934_v32, 0.0  ;;  %3797 = vmatmul.bf16.gmra.mxu1 %v7687_v62  ;;  %3886 = vmatmul.bf16.gmra.mxu2 %v7695_v35 }
 0x4ff   : > { %3975 = vmatmul.bf16.gmra.mxu3 %v7707_v18 }
 0x500   : > { %4429 = vst [vmem:[%s7796_s19 + $0x90] sm:$0xff] %v4365_v46 }
 0x501   : > { %v3847_v55 = vpop.f32.mrf.mxu2 }
 0x502   : > { %v3848_v42 = vadd.f32 %v3847_v55, %v3759_v54  ;;  %v3936_v3 = vpop.f32.mrf.mxu3  ;;  %v3671_v56 = vpop.f32.mrf.mxu0 }
 0x503   : > { %v3760_v19 = vpop.f32.mrf.mxu1  ;;  %v3672_v22 = vadd.f32 %v3671_v56, %v7757_v53 }
 0x504   : > { %v3937_v27 = vadd.f32 %v3936_v3, %v3848_v42 }
 0x505   : > { %v3761_v5 = vadd.f32 %v3760_v19, %v3672_v22 }
 0x506   : > { %v4367_v4 = vmax.f32 %v3937_v27, 0.0 }
 0x508   : > { %4431 = vst [vmem:[%s7796_s19 + $0xa0] sm:$0xff] %v4367_v4 }
 0x509   : > { %v3849_v50 = vpop.f32.mrf.mxu2 }
 0x50a   : > { %v3850_v31 = vadd.f32 %v3849_v50, %v3761_v5  ;;  %v3938_v30 = vpop.f32.mrf.mxu3  ;;  %v3674_v9 = vpop.f32.mrf.mxu0 }
 0x50b   : > { %v3763_v60 = vpop.f32.mrf.mxu1  ;;  %v3675_v58 = vadd.f32 %v3674_v9, %v7757_v53 }
 0x50c   : > { %v3939_v32 = vadd.f32 %v3938_v30, %v3850_v31 }
 0x50d   : > { %3713 = vmatmul.bf16.gmra.mxu0 %v7722_v12  ;;  %v3764_v46 = vadd.f32 %v3763_v60, %v3675_v58 }
 0x50e   : > { %v4369_v57 = vmax.f32 %v3939_v32, 0.0  ;;  %3802 = vmatmul.bf16.gmra.mxu1 %v7731_v43  ;;  %3891 = vmatmul.bf16.gmra.mxu2 %v7739_v59 }
 0x50f   : > { %3980 = vmatmul.bf16.gmra.mxu3 %v7742_v6 }
 0x510   : > { %4433 = vst [vmem:[%s7796_s19 + $0xb0] sm:$0xff] %v4369_v57 }
 0x511   : > { %v3852_v54 = vpop.f32.mrf.mxu2 }
 0x512   : > { %v3853_v55 = vadd.f32 %v3852_v54, %v3764_v46  ;;  %v3941_v42 = vpop.f32.mrf.mxu3  ;;  %v3676_v3 = vpop.f32.mrf.mxu0 }
 0x513   : > { %v3765_v56 = vpop.f32.mrf.mxu1  ;;  %v3677_v27 = vadd.f32 %v3676_v3, %v7757_v53 }
 0x514   : > { %v3942_v19 = vadd.f32 %v3941_v42, %v3853_v55 }
 0x515   : > { %v3766_v4 = vadd.f32 %v3765_v56, %v3677_v27 }
 0x516   : > { %v4371_v22 = vmax.f32 %v3942_v19, 0.0 }
 0x518   : > { %4435 = vst [vmem:[%s7796_s19 + $0xc0] sm:$0xff] %v4371_v22 }
 0x519   : > { %v3854_v5 = vpop.f32.mrf.mxu2 }
 0x51a   : > { %v3855_v50 = vadd.f32 %v3854_v5, %v3766_v4  ;;  %v3943_v31 = vpop.f32.mrf.mxu3  ;;  %v3679_v30 = vpop.f32.mrf.mxu0 }
 0x51b   : > { %v3768_v9 = vpop.f32.mrf.mxu1  ;;  %v3680_v60 = vadd.f32 %v3679_v30, %v7757_v53 }
 0x51c   : > { %v3944_v32 = vadd.f32 %v3943_v31, %v3855_v50 }
 0x51d   : > { %3718 = vmatmul.bf16.gmra.mxu0 %v7753_v38  ;;  %v3769_v57 = vadd.f32 %v3768_v9, %v3680_v60 }
 0x51e   : > { %v4373_v58 = vmax.f32 %v3944_v32, 0.0  ;;  %3807 = vmatmul.bf16.gmra.mxu1 %v7759_v21  ;;  %3896 = vmatmul.bf16.gmra.mxu2 %v7768_v25 }
 0x51f   : > { %3985 = vmatmul.bf16.gmra.mxu3 %v7771_v34 }
 0x520   : > { %4437 = vst [vmem:[%s7796_s19 + $0xd0] sm:$0xff] %v4373_v58 }
 0x521   : > { %v3857_v46 = vpop.f32.mrf.mxu2 }
 0x522   : > { %v3858_v54 = vadd.f32 %v3857_v46, %v3769_v57  ;;  %v3946_v55 = vpop.f32.mrf.mxu3  ;;  %v3681_v42 = vpop.f32.mrf.mxu0 }
 0x523   : > { %v3770_v3 = vpop.f32.mrf.mxu1  ;;  %v3682_v19 = vadd.f32 %v3681_v42, %v7757_v53 }
 0x524   : > { %v3947_v56 = vadd.f32 %v3946_v55, %v3858_v54 }
 0x525   : > { %v3771_v22 = vadd.f32 %v3770_v3, %v3682_v19 }
 0x526   : > { %v4375_v27 = vmax.f32 %v3947_v56, 0.0 }
 0x528   : > { %4439 = vst [vmem:[%s7796_s19 + $0xe0] sm:$0xff] %v4375_v27 }
 0x529   : > { %v3859_v4 = vpop.f32.mrf.mxu2 }
 0x52a   : > { %v3860_v5 = vadd.f32 %v3859_v4, %v3771_v22  ;;  %v3948_v50 = vpop.f32.mrf.mxu3  ;;  %v3684_v31 = vpop.f32.mrf.mxu0 }
 0x52b   : > { %v3773_v30 = vpop.f32.mrf.mxu1  ;;  %v3685_v9 = vadd.f32 %v3684_v31, %v7757_v53 }
 0x52c   : > { %v3949_v32 = vadd.f32 %v3948_v50, %v3860_v5 }
 0x52d   : > { %3999 = vmatmul.bf16.vlgmr.msrb.gmra.mxu0 %v7280_v20  ;;  %v3774_v58 = vadd.f32 %v3773_v30, %v3685_v9 }
 0x52e   : > { %v4377_v60 = vmax.f32 %v3949_v32, 0.0  ;;  %4088 = vmatmul.bf16.vlgmr.msrb.gmra.mxu1 %v7283_v63  ;;  %4177 = vmatmul.bf16.vlgmr.msrb.gmra.mxu2 %v7289_v1 }
 0x52f   : > { %4266 = vmatmul.bf16.vlgmr.msrb.gmra.mxu3 %v7293_v40 }
 0x530   : > { %4441 = vst [vmem:[%s7796_s19 + $0xf0] sm:$0xff] %v4377_v60 }
 0x531   : > { %v3862_v57 = vpop.f32.mrf.mxu2 }
 0x532   : > { %v3863_v46 = vadd.f32 %v3862_v57, %v3774_v58  ;;  %v3951_v54 = vpop.f32.mrf.mxu3  ;;  %v3686_v55 = vpop.f32.mrf.mxu0 }
 0x533   : > { %v3775_v42 = vpop.f32.mrf.mxu1  ;;  %v3687_v56 = vadd.f32 %v3686_v55, %v7757_v53 }
 0x534   : > { %v3952_v3 = vadd.f32 %v3951_v54, %v3863_v46 }
 0x535   : > { %v3776_v20 = vadd.f32 %v3775_v42, %v3687_v56 }
 0x536   : > { %v4379_v19 = vmax.f32 %v3952_v3, 0.0 }
 0x538   : > { %4443 = vst [vmem:[%s7796_s19 + $0x100] sm:$0xff] %v4379_v19 }
 0x539   : > { %v3864_v27 = vpop.f32.mrf.mxu2 }
 0x53a   : > { %v3865_v63 = vadd.f32 %v3864_v27, %v3776_v20  ;;  %v3953_v22 = vpop.f32.mrf.mxu3  ;;  %v3689_v1 = vpop.f32.mrf.mxu0  ;;  %v8136_v20 = vld [vmem:[#allocation2_spill] sm:$0xff] }
 0x53b   : > { %v3778_v4 = vpop.f32.mrf.mxu1  ;;  %v3690_v5 = vadd.f32 %v3689_v1, %v7757_v53 }
 0x53c   : > { %v3954_v40 = vadd.f32 %v3953_v22, %v3865_v63 }
 0x53d   : > { %4004 = vmatmul.bf16.gmra.mxu0 %v7300_v52  ;;  %v3779_v31 = vadd.f32 %v3778_v4, %v3690_v5 }
 0x53e   : > { %v4381_v50 = vmax.f32 %v3954_v40, 0.0  ;;  %4093 = vmatmul.bf16.gmra.mxu1 %v7303_v45  ;;  %4182 = vmatmul.bf16.gmra.mxu2 %v7311_v47 }
 0x53f   : > { %4271 = vmatmul.bf16.gmra.mxu3 %v7323_v41 }
 0x540   : > { %4445 = vst [vmem:[%s7796_s19 + $0x110] sm:$0xff] %v4381_v50 }
 0x541   : > { %v3867_v30 = vpop.f32.mrf.mxu2 }
 0x542   : > { %v3868_v32 = vadd.f32 %v3867_v30, %v3779_v31  ;;  %v3956_v9 = vpop.f32.mrf.mxu3  ;;  %v3691_v60 = vpop.f32.mrf.mxu0 }
 0x543   : > { %v3780_v58 = vpop.f32.mrf.mxu1  ;;  %v3692_v46 = vadd.f32 %v3691_v60, %v7757_v53 }
 0x544   : > { %v3957_v57 = vadd.f32 %v3956_v9, %v3868_v32 }
 0x545   : > { %v3781_v52 = vadd.f32 %v3780_v58, %v3692_v46 }
 0x546   : > { %v4383_v54 = vmax.f32 %v3957_v57, 0.0  ;;  %v8137_v57 = vld [vmem:[#allocation3_spill] sm:$0xff] }
 0x548   : > { %4447 = vst [vmem:[%s7796_s19 + $0x120] sm:$0xff] %v4383_v54  ;;  %v8138_v54 = vld [vmem:[#allocation4_spill] sm:$0xff] }
 0x549   : > { %v3869_v55 = vpop.f32.mrf.mxu2 }
 0x54a   : > { %v3870_v45 = vadd.f32 %v3869_v55, %v3781_v52  ;;  %v3958_v42 = vpop.f32.mrf.mxu3  ;;  %v3694_v47 = vpop.f32.mrf.mxu0  ;;  %v8139_v52 = vld [vmem:[#allocation5_spill] sm:$0xff]  ;;  %v8140_v55 = vld [vmem:[#allocation6_spill] sm:$0xff] }
 0x54b   : > { %v3783_v3 = vpop.f32.mrf.mxu1  ;;  %v3695_v56 = vadd.f32 %v3694_v47, %v7757_v53 }
 0x54c   : > { %v3959_v41 = vadd.f32 %v3958_v42, %v3870_v45 }
 0x54d   : > { %4009 = vmatmul.bf16.gmra.mxu0 %v7344_v33  ;;  %v3784_v27 = vadd.f32 %v3783_v3, %v3695_v56 }
 0x54e   : > { %v4385_v19 = vmax.f32 %v3959_v41, 0.0  ;;  %4098 = vmatmul.bf16.gmra.mxu1 %v7347_v37  ;;  %4187 = vmatmul.bf16.gmra.mxu2 %v7355_v48 }
 0x54f   : > { %4276 = vmatmul.bf16.gmra.mxu3 %v8136_v20 }
 0x550   : > { %4449 = vst [vmem:[%s7796_s19 + $0x130] sm:$0xff] %v4385_v19 }
 0x551   : > { %v3872_v63 = vpop.f32.mrf.mxu2 }
 0x552   : > { %v3873_v22 = vadd.f32 %v3872_v63, %v3784_v27  ;;  %v3961_v1 = vpop.f32.mrf.mxu3  ;;  %v3696_v4 = vpop.f32.mrf.mxu0 }
 0x553   : > { %v3785_v40 = vpop.f32.mrf.mxu1  ;;  %v3697_v50 = vadd.f32 %v3696_v4, %v7757_v53 }
 0x554   : > { %v3962_v5 = vadd.f32 %v3961_v1, %v3873_v22 }
 0x555   : > { %v3786_v33 = vadd.f32 %v3785_v40, %v3697_v50 }
 0x556   : > { %v4387_v31 = vmax.f32 %v3962_v5, 0.0 }
 0x558   : > { %4451 = vst [vmem:[%s7796_s19 + $0x140] sm:$0xff] %v4387_v31 }
 0x559   : > { %v3874_v30 = vpop.f32.mrf.mxu2 }
 0x55a   : > { %v3875_v37 = vadd.f32 %v3874_v30, %v3786_v33  ;;  %v3963_v32 = vpop.f32.mrf.mxu3  ;;  %v3699_v48 = vpop.f32.mrf.mxu0  ;;  %v8141_v33 = vld [vmem:[#allocation7_spill] sm:$0xff] }
 0x55b   : > { %v3788_v9 = vpop.f32.mrf.mxu1  ;;  %v3700_v58 = vadd.f32 %v3699_v48, %v7757_v53  ;;  %v8144_v48 = vld [vmem:[#allocation10_spill] sm:$0xff] }
 0x55c   : > { %v3964_v60 = vadd.f32 %v3963_v32, %v3875_v37  ;;  %v8142_v37 = vld [vmem:[#allocation8_spill] sm:$0xff]  ;;  %v8143_v32 = vld [vmem:[#allocation9_spill] sm:$0xff] }
 0x55d   : > { %4014 = vmatmul.bf16.gmra.mxu0 %v8137_v57  ;;  %v3789_v45 = vadd.f32 %v3788_v9, %v3700_v58 }
 0x55e   : > { %v4389_v46 = vmax.f32 %v3964_v60, 0.0  ;;  %4103 = vmatmul.bf16.gmra.mxu1 %v8138_v54  ;;  %4192 = vmatmul.bf16.gmra.mxu2 %v8139_v52 }
 0x55f   : > { %4281 = vmatmul.bf16.gmra.mxu3 %v8140_v55 }
 0x560   : > { %4453 = vst [vmem:[%s7796_s19 + $0x150] sm:$0xff] %v4389_v46 }
 0x561   : > { %v3877_v42 = vpop.f32.mrf.mxu2 }
 0x562   : > { %v3878_v47 = vadd.f32 %v3877_v42, %v3789_v45  ;;  %v3966_v3 = vpop.f32.mrf.mxu3  ;;  %v3701_v41 = vpop.f32.mrf.mxu0 }
 0x563   : > { %v3790_v56 = vpop.f32.mrf.mxu1  ;;  %v3702_v20 = vadd.f32 %v3701_v41, %v7757_v53 }
 0x564   : > { %v3967_v19 = vadd.f32 %v3966_v3, %v3878_v47 }
 0x565   : > { %v3791_v63 = vadd.f32 %v3790_v56, %v3702_v20 }
 0x566   : > { %v4391_v27 = vmax.f32 %v3967_v19, 0.0 }
 0x568   : > { %4455 = vst [vmem:[%s7796_s19 + $0x160] sm:$0xff] %v4391_v27 }
 0x569   : > { %v3879_v22 = vpop.f32.mrf.mxu2 }
 0x56a   : > { %v3880_v1 = vadd.f32 %v3879_v22, %v3791_v63  ;;  %v3968_v4 = vpop.f32.mrf.mxu3  ;;  %v3704_v40 = vpop.f32.mrf.mxu0  ;;  %v8145_v63 = vld [vmem:[#allocation11_spill] sm:$0xff] }
 0x56b   : > { %v3793_v5 = vpop.f32.mrf.mxu1  ;;  %v3705_v31 = vadd.f32 %v3704_v40, %v7757_v53  ;;  %v8148_v40 = vld [vmem:[#allocation14_spill] sm:$0xff] }
 0x56c   : > { %v3969_v50 = vadd.f32 %v3968_v4, %v3880_v1  ;;  %v8146_v1 = vld [vmem:[#allocation12_spill] sm:$0xff]  ;;  %v8147_v4 = vld [vmem:[#allocation13_spill] sm:$0xff] }
 0x56d   : > { %4019 = vmatmul.bf16.gmra.mxu0 %v8141_v33  ;;  %v3794_v9 = vadd.f32 %v3793_v5, %v3705_v31 }
 0x56e   : > { %v4393_v30 = vmax.f32 %v3969_v50, 0.0  ;;  %4108 = vmatmul.bf16.gmra.mxu1 %v8142_v37  ;;  %4197 = vmatmul.bf16.gmra.mxu2 %v8143_v32 }
 0x56f   : > { %4286 = vmatmul.bf16.gmra.mxu3 %v8144_v48 }
 0x570   : > { %4457 = vst [vmem:[%s7796_s19 + $0x170] sm:$0xff] %v4393_v30 }
 0x571   : > { %v3882_v60 = vpop.f32.mrf.mxu2 }
 0x572   : > { %v3883_v58 = vadd.f32 %v3882_v60, %v3794_v9  ;;  %v3971_v57 = vpop.f32.mrf.mxu3  ;;  %v3706_v46 = vpop.f32.mrf.mxu0 }
 0x573   : > { %v3795_v54 = vpop.f32.mrf.mxu1  ;;  %v3707_v55 = vadd.f32 %v3706_v46, %v7757_v53 }
 0x574   : > { %v3972_v52 = vadd.f32 %v3971_v57, %v3883_v58 }
 0x575   : > { %v3796_v42 = vadd.f32 %v3795_v54, %v3707_v55 }
 0x576   : > { %v4395_v45 = vmax.f32 %v3972_v52, 0.0 }
 0x578   : > { %4459 = vst [vmem:[%s7796_s19 + $0x180] sm:$0xff] %v4395_v45 }
 0x579   : > { %v3884_v47 = vpop.f32.mrf.mxu2 }
 0x57a   : > { %v3885_v3 = vadd.f32 %v3884_v47, %v3796_v42  ;;  %v3973_v41 = vpop.f32.mrf.mxu3  ;;  %v3709_v56 = vpop.f32.mrf.mxu0  ;;  %v8149_v42 = vld [vmem:[#allocation15_spill] sm:$0xff] }
 0x57b   : > { %v3798_v19 = vpop.f32.mrf.mxu1  ;;  %v3710_v27 = vadd.f32 %v3709_v56, %v7757_v53  ;;  %v8152_v56 = vld [vmem:[#allocation18_spill] sm:$0xff] }
 0x57c   : > { %v3974_v20 = vadd.f32 %v3973_v41, %v3885_v3  ;;  %v8150_v3 = vld [vmem:[#allocation16_spill] sm:$0xff]  ;;  %v8151_v41 = vld [vmem:[#allocation17_spill] sm:$0xff] }
 0x57d   : > { %4024 = vmatmul.bf16.gmra.mxu0 %v8145_v63  ;;  %v3799_v5 = vadd.f32 %v3798_v19, %v3710_v27 }
 0x57e   : > { %v4397_v22 = vmax.f32 %v3974_v20, 0.0  ;;  %4113 = vmatmul.bf16.gmra.mxu1 %v8146_v1  ;;  %4202 = vmatmul.bf16.gmra.mxu2 %v8147_v4 }
 0x57f   : > { %4291 = vmatmul.bf16.gmra.mxu3 %v8148_v40 }
 0x580   : > { %4461 = vst [vmem:[%s7796_s19 + $0x190] sm:$0xff] %v4397_v22 }
 0x581   : > { %v3887_v50 = vpop.f32.mrf.mxu2 }
 0x582   : > { %v3888_v31 = vadd.f32 %v3887_v50, %v3799_v5  ;;  %v3976_v33 = vpop.f32.mrf.mxu3  ;;  %v3711_v30 = vpop.f32.mrf.mxu0 }
 0x583   : > { %v3800_v37 = vpop.f32.mrf.mxu1  ;;  %v3712_v48 = vadd.f32 %v3711_v30, %v7757_v53 }
 0x584   : > { %v3977_v32 = vadd.f32 %v3976_v33, %v3888_v31 }
 0x585   : > { %v3801_v60 = vadd.f32 %v3800_v37, %v3712_v48 }
 0x586   : > { %v4399_v9 = vmax.f32 %v3977_v32, 0.0 }
 0x588   : > { %4463 = vst [vmem:[%s7796_s19 + $0x1a0] sm:$0xff] %v4399_v9 }
 0x589   : > { %v3889_v58 = vpop.f32.mrf.mxu2 }
 0x58a   : > { %v3890_v57 = vadd.f32 %v3889_v58, %v3801_v60  ;;  %v3978_v46 = vpop.f32.mrf.mxu3  ;;  %v3714_v54 = vpop.f32.mrf.mxu0  ;;  %v8153_v58 = vld [vmem:[#allocation19_spill] sm:$0xff] }
 0x58b   : > { %v3803_v52 = vpop.f32.mrf.mxu1  ;;  %v3715_v45 = vadd.f32 %v3714_v54, %v7757_v53 }
 0x58c   : > { %v3979_v55 = vadd.f32 %v3978_v46, %v3890_v57 }
 0x58d   : > { %4029 = vmatmul.bf16.gmra.mxu0 %v8149_v42  ;;  %v3804_v19 = vadd.f32 %v3803_v52, %v3715_v45 }
 0x58e   : > { %v4401_v47 = vmax.f32 %v3979_v55, 0.0  ;;  %4118 = vmatmul.bf16.gmra.mxu1 %v8150_v3  ;;  %4207 = vmatmul.bf16.gmra.mxu2 %v8151_v41 }
 0x58f   : > { %4296 = vmatmul.bf16.gmra.mxu3 %v8152_v56 }
 0x590   : > { %4465 = vst [vmem:[%s7796_s19 + $0x1b0] sm:$0xff] %v4401_v47 }
 0x591   : > { %v3892_v20 = vpop.f32.mrf.mxu2 }
 0x592   : > { %v3893_v27 = vadd.f32 %v3892_v20, %v3804_v19  ;;  %v3981_v63 = vpop.f32.mrf.mxu3  ;;  %v3716_v22 = vpop.f32.mrf.mxu0 }
 0x593   : > { %v3805_v1 = vpop.f32.mrf.mxu1  ;;  %v3717_v40 = vadd.f32 %v3716_v22, %v7757_v53 }
 0x594   : > { %v3982_v4 = vadd.f32 %v3981_v63, %v3893_v27 }
 0x595   : > { %v3806_v50 = vadd.f32 %v3805_v1, %v3717_v40 }
 0x596   : > { %v4403_v5 = vmax.f32 %v3982_v4, 0.0 }
 0x598   : > { %4467 = vst [vmem:[%s7796_s19 + $0x1c0] sm:$0xff] %v4403_v5 }
 0x599   : > { %v3894_v31 = vpop.f32.mrf.mxu2 }
 0x59a   : > { %v3895_v33 = vadd.f32 %v3894_v31, %v3806_v50  ;;  %v3983_v30 = vpop.f32.mrf.mxu3  ;;  %v3719_v37 = vpop.f32.mrf.mxu0 }
 0x59b   : > { %v3808_v32 = vpop.f32.mrf.mxu1  ;;  %v3720_v9 = vadd.f32 %v3719_v37, %v7757_v53 }
 0x59c   : > { %v3984_v48 = vadd.f32 %v3983_v30, %v3895_v33 }
 0x59d   : > { %4034 = vmatmul.bf16.gmra.mxu0 %v7492_v7  ;;  %v3809_v57 = vadd.f32 %v3808_v32, %v3720_v9 }
 0x59e   : > { %v4405_v60 = vmax.f32 %v3984_v48, 0.0  ;;  %4123 = vmatmul.bf16.gmra.mxu1 %v7495_v51  ;;  %4212 = vmatmul.bf16.gmra.mxu2 %v7503_v24  ;;  %v7974_v51 = vperm.slane %v7751_v11, 1 }
 0x59f   : > { %4301 = vmatmul.bf16.gmra.mxu3 %v8153_v58  ;;  %v8155_v58 = vld [vmem:[#allocation21_spill] sm:$0xff] }
 0x5a0   : > { %4469 = vst [vmem:[%s7796_s19 + $0x1d0] sm:$0xff] %v4405_v60  ;;  %v8154_v60 = vld [vmem:[#allocation20_spill] sm:$0xff] }
 0x5a1   : > { %v3897_v46 = vpop.f32.mrf.mxu2 }
 0x5a2   : > { %v3898_v54 = vadd.f32 %v3897_v46, %v3809_v57  ;;  %v3986_v52 = vpop.f32.mrf.mxu3  ;;  %v3721_v55 = vpop.f32.mrf.mxu0  ;;  %v8156_v57 = vld [vmem:[#allocation22_spill] sm:$0xff] }
 0x5a3   : > { %v3810_v45 = vpop.f32.mrf.mxu1  ;;  %v3722_v47 = vadd.f32 %v3721_v55, %v7757_v53 }
 0x5a4   : > { %v3987_v42 = vadd.f32 %v3986_v52, %v3898_v54 }
 0x5a5   : > { %v3811_v7 = vadd.f32 %v3810_v45, %v3722_v47 }
 0x5a6   : > { %v4407_v3 = vmax.f32 %v3987_v42, 0.0 }
 0x5a8   : > { %4471 = vst [vmem:[%s7796_s19 + $0x1e0] sm:$0xff] %v4407_v3 }
 0x5a9   : > { %v3899_v24 = vpop.f32.mrf.mxu2 }
 0x5aa   : > { %v3900_v41 = vadd.f32 %v3899_v24, %v3811_v7  ;;  %v3988_v56 = vpop.f32.mrf.mxu3  ;;  %v4000_v19 = vpop.f32.mrf.mxu0 }
 0x5ab   : > { %v4089_v20 = vpop.f32.mrf.mxu1  ;;  %v4001_v63 = vadd.f32 %v4000_v19, %v7974_v51 }
 0x5ac   : > { %v3989_v27 = vadd.f32 %v3988_v56, %v3900_v41 }
 0x5ad   : > { %4039 = vmatmul.bf16.gmra.mxu0 %v7536_v8  ;;  %v4090_v11 = vadd.f32 %v4089_v20, %v4001_v63 }
 0x5ae   : > { %v4409_v22 = vmax.f32 %v3989_v27, 0.0  ;;  %4128 = vmatmul.bf16.gmra.mxu1 %v7539_v10  ;;  %4217 = vmatmul.bf16.gmra.mxu2 %v7547_v14 }
 0x5af   : > { %4306 = vmatmul.bf16.gmra.mxu3 %v7550_v44 }
 0x5b0   : > { %4473 = vst [vmem:[%s7796_s19 + $0x1f0] sm:$0xff] %v4409_v22 }
 0x5b1   : > { %v4178_v53 = vpop.f32.mrf.mxu2 }
 0x5b2   : > { %v4179_v1 = vadd.f32 %v4178_v53, %v4090_v11  ;;  %v4267_v4 = vpop.f32.mrf.mxu3  ;;  %v4002_v40 = vpop.f32.mrf.mxu0 }
 0x5b3   : > { %v4091_v5 = vpop.f32.mrf.mxu1  ;;  %v4003_v31 = vadd.f32 %v4002_v40, %v7974_v51 }
 0x5b4   : > { %v4268_v50 = vadd.f32 %v4267_v4, %v4179_v1 }
 0x5b5   : > { %v4092_v8 = vadd.f32 %v4091_v5, %v4003_v31 }
 0x5b6   : > { %v4348_v33 = vmax.f32 %v4268_v50, 0.0 }
 0x5b8   : > { %4412 = vst [vmem:[%s7796_s19 + $0x8] sm:$0xff] %v4348_v33 }
 0x5b9   : > { %v4180_v30 = vpop.f32.mrf.mxu2 }
 0x5ba   : > { %v4181_v10 = vadd.f32 %v4180_v30, %v4092_v8  ;;  %v4269_v37 = vpop.f32.mrf.mxu3  ;;  %v4005_v14 = vpop.f32.mrf.mxu0 }
 0x5bb   : > { %v4094_v32 = vpop.f32.mrf.mxu1  ;;  %v4006_v48 = vadd.f32 %v4005_v14, %v7974_v51 }
 0x5bc   : > { %v4270_v44 = vadd.f32 %v4269_v37, %v4181_v10 }
 0x5bd   : > { %4044 = vmatmul.bf16.gmra.mxu0 %v7556_v15  ;;  %v4095_v46 = vadd.f32 %v4094_v32, %v4006_v48 }
 0x5be   : > { %v4350_v9 = vmax.f32 %v4270_v44, 0.0  ;;  %4133 = vmatmul.bf16.gmra.mxu1 %v8154_v60  ;;  %4222 = vmatmul.bf16.gmra.mxu2 %v8155_v58 }
 0x5bf   : > { %4311 = vmatmul.bf16.gmra.mxu3 %v8156_v57 }
 0x5c0   : > { %4414 = vst [vmem:[%s7796_s19 + $0x18] sm:$0xff] %v4350_v9 }
 0x5c1   : > { %v4183_v54 = vpop.f32.mrf.mxu2 }
 0x5c2   : > { %v4184_v52 = vadd.f32 %v4183_v54, %v4095_v46  ;;  %v4272_v55 = vpop.f32.mrf.mxu3  ;;  %v4007_v45 = vpop.f32.mrf.mxu0 }
 0x5c3   : > { %v4096_v42 = vpop.f32.mrf.mxu1  ;;  %v4008_v3 = vadd.f32 %v4007_v45, %v7974_v51 }
 0x5c4   : > { %v4273_v47 = vadd.f32 %v4272_v55, %v4184_v52 }
 0x5c5   : > { %v4097_v15 = vadd.f32 %v4096_v42, %v4008_v3 }
 0x5c6   : > { %v4352_v7 = vmax.f32 %v4273_v47, 0.0 }
 0x5c8   : > { %4416 = vst [vmem:[%s7796_s19 + $0x28] sm:$0xff] %v4352_v7 }
 0x5c9   : > { %v4185_v24 = vpop.f32.mrf.mxu2 }
 0x5ca   : > { %v4186_v41 = vadd.f32 %v4185_v24, %v4097_v15  ;;  %v4274_v56 = vpop.f32.mrf.mxu3  ;;  %v4010_v19 = vpop.f32.mrf.mxu0 }
 0x5cb   : > { %v4099_v20 = vpop.f32.mrf.mxu1  ;;  %v4011_v63 = vadd.f32 %v4010_v19, %v7974_v51 }
 0x5cc   : > { %v4275_v27 = vadd.f32 %v4274_v56, %v4186_v41 }
 0x5cd   : > { %4049 = vmatmul.bf16.gmra.mxu0 %v7600_v61  ;;  %v4100_v11 = vadd.f32 %v4099_v20, %v4011_v63 }
 0x5ce   : > { %v4354_v22 = vmax.f32 %v4275_v27, 0.0  ;;  %4138 = vmatmul.bf16.gmra.mxu1 %v7603_v28  ;;  %4227 = vmatmul.bf16.gmra.mxu2 %v7611_v49 }
 0x5cf   : > { %4316 = vmatmul.bf16.gmra.mxu3 %v7614_v16 }
 0x5d0   : > { %4418 = vst [vmem:[%s7796_s19 + $0x38] sm:$0xff] %v4354_v22 }
 0x5d1   : > { %v4188_v53 = vpop.f32.mrf.mxu2 }
 0x5d2   : > { %v4189_v1 = vadd.f32 %v4188_v53, %v4100_v11  ;;  %v4277_v4 = vpop.f32.mrf.mxu3  ;;  %v4012_v40 = vpop.f32.mrf.mxu0 }
 0x5d3   : > { %v4101_v5 = vpop.f32.mrf.mxu1  ;;  %v4013_v31 = vadd.f32 %v4012_v40, %v7974_v51 }
 0x5d4   : > { %v4278_v50 = vadd.f32 %v4277_v4, %v4189_v1 }
 0x5d5   : > { %v4102_v61 = vadd.f32 %v4101_v5, %v4013_v31 }
 0x5d6   : > { %v4356_v33 = vmax.f32 %v4278_v50, 0.0 }
 0x5d8   : > { %4420 = vst [vmem:[%s7796_s19 + $0x48] sm:$0xff] %v4356_v33 }
 0x5d9   : > { %v4190_v8 = vpop.f32.mrf.mxu2 }
 0x5da   : > { %v4191_v28 = vadd.f32 %v4190_v8, %v4102_v61  ;;  %v4279_v30 = vpop.f32.mrf.mxu3  ;;  %v4015_v49 = vpop.f32.mrf.mxu0 }
 0x5db   : > { %v4104_v10 = vpop.f32.mrf.mxu1  ;;  %v4016_v37 = vadd.f32 %v4015_v49, %v7974_v51 }
 0x5dc   : > { %v4280_v16 = vadd.f32 %v4279_v30, %v4191_v28 }
 0x5dd   : > { %4054 = vmatmul.bf16.gmra.mxu0 %v7620_v29  ;;  %v4105_v32 = vadd.f32 %v4104_v10, %v4016_v37 }
 0x5de   : > { %v4358_v14 = vmax.f32 %v4280_v16, 0.0  ;;  %4143 = vmatmul.bf16.gmra.mxu1 %v7623_v13  ;;  %4232 = vmatmul.bf16.gmra.mxu2 %v7631_v17 }
 0x5df   : > { %4321 = vmatmul.bf16.gmra.mxu3 %v7643_v0 }
 0x5e0   : > { %4422 = vst [vmem:[%s7796_s19 + $0x58] sm:$0xff] %v4358_v14 }
 0x5e1   : > { %v4193_v44 = vpop.f32.mrf.mxu2 }
 0x5e2   : > { %v4194_v48 = vadd.f32 %v4193_v44, %v4105_v32  ;;  %v4282_v9 = vpop.f32.mrf.mxu3  ;;  %v4017_v60 = vpop.f32.mrf.mxu0 }
 0x5e3   : > { %v4106_v58 = vpop.f32.mrf.mxu1  ;;  %v4018_v46 = vadd.f32 %v4017_v60, %v7974_v51 }
 0x5e4   : > { %v4283_v57 = vadd.f32 %v4282_v9, %v4194_v48 }
 0x5e5   : > { %v4107_v29 = vadd.f32 %v4106_v58, %v4018_v46 }
 0x5e6   : > { %v4360_v54 = vmax.f32 %v4283_v57, 0.0 }
 0x5e8   : > { %4424 = vst [vmem:[%s7796_s19 + $0x68] sm:$0xff] %v4360_v54 }
 0x5e9   : > { %v4195_v52 = vpop.f32.mrf.mxu2 }
 0x5ea   : > { %v4196_v13 = vadd.f32 %v4195_v52, %v4107_v29  ;;  %v4284_v55 = vpop.f32.mrf.mxu3  ;;  %v4020_v17 = vpop.f32.mrf.mxu0 }
 0x5eb   : > { %v4109_v45 = vpop.f32.mrf.mxu1  ;;  %v4021_v42 = vadd.f32 %v4020_v17, %v7974_v51 }
 0x5ec   : > { %v4285_v0 = vadd.f32 %v4284_v55, %v4196_v13 }
 0x5ed   : > { %4059 = vmatmul.bf16.gmra.mxu0 %v7664_v39  ;;  %v4110_v3 = vadd.f32 %v4109_v45, %v4021_v42 }
 0x5ee   : > { %v4362_v47 = vmax.f32 %v4285_v0, 0.0  ;;  %4148 = vmatmul.bf16.gmra.mxu1 %v7667_v36  ;;  %4237 = vmatmul.bf16.gmra.mxu2 %v7675_v2 }
 0x5ef   : > { %4326 = vmatmul.bf16.gmra.mxu3 %v7678_v23 }
 0x5f0   : > { %4426 = vst [vmem:[%s7796_s19 + $0x78] sm:$0xff] %v4362_v47 }
 0x5f1   : > { %v4198_v7 = vpop.f32.mrf.mxu2 }
 0x5f2   : > { %v4199_v15 = vadd.f32 %v4198_v7, %v4110_v3  ;;  %v4287_v24 = vpop.f32.mrf.mxu3  ;;  %v4022_v41 = vpop.f32.mrf.mxu0 }
 0x5f3   : > { %v4111_v56 = vpop.f32.mrf.mxu1  ;;  %v4023_v20 = vadd.f32 %v4022_v41, %v7974_v51 }
 0x5f4   : > { %v4288_v19 = vadd.f32 %v4287_v24, %v4199_v15 }
 0x5f5   : > { %v4112_v39 = vadd.f32 %v4111_v56, %v4023_v20 }
 0x5f6   : > { %v4364_v27 = vmax.f32 %v4288_v19, 0.0 }
 0x5f8   : > { %4428 = vst [vmem:[%s7796_s19 + $0x88] sm:$0xff] %v4364_v27 }
 0x5f9   : > { %v4200_v63 = vpop.f32.mrf.mxu2 }
 0x5fa   : > { %v4201_v36 = vadd.f32 %v4200_v63, %v4112_v39  ;;  %v4289_v22 = vpop.f32.mrf.mxu3  ;;  %v4025_v2 = vpop.f32.mrf.mxu0 }
 0x5fb   : > { %v4114_v11 = vpop.f32.mrf.mxu1  ;;  %v4026_v53 = vadd.f32 %v4025_v2, %v7974_v51 }
 0x5fc   : > { %v4290_v23 = vadd.f32 %v4289_v22, %v4201_v36 }
 0x5fd   : > { %4064 = vmatmul.bf16.gmra.mxu0 %v7684_v26  ;;  %v4115_v4 = vadd.f32 %v4114_v11, %v4026_v53 }
 0x5fe   : > { %v4366_v1 = vmax.f32 %v4290_v23, 0.0  ;;  %4153 = vmatmul.bf16.gmra.mxu1 %v7687_v62  ;;  %4242 = vmatmul.bf16.gmra.mxu2 %v7695_v35 }
 0x5ff   : > { %4331 = vmatmul.bf16.gmra.mxu3 %v7707_v18 }
 0x600   : > { %4430 = vst [vmem:[%s7796_s19 + $0x98] sm:$0xff] %v4366_v1 }
 0x601   : > { %v4203_v40 = vpop.f32.mrf.mxu2 }
 0x602   : > { %v4204_v5 = vadd.f32 %v4203_v40, %v4115_v4  ;;  %v4292_v50 = vpop.f32.mrf.mxu3  ;;  %v4027_v31 = vpop.f32.mrf.mxu0 }
 0x603   : > { %v4116_v33 = vpop.f32.mrf.mxu1  ;;  %v4028_v8 = vadd.f32 %v4027_v31, %v7974_v51 }
 0x604   : > { %v4293_v61 = vadd.f32 %v4292_v50, %v4204_v5 }
 0x605   : > { %v4117_v26 = vadd.f32 %v4116_v33, %v4028_v8 }
 0x606   : > { %v4368_v28 = vmax.f32 %v4293_v61, 0.0 }
 0x608   : > { %4432 = vst [vmem:[%s7796_s19 + $0xa8] sm:$0xff] %v4368_v28 }
 0x609   : > { %v4205_v30 = vpop.f32.mrf.mxu2 }
 0x60a   : > { %v4206_v62 = vadd.f32 %v4205_v30, %v4117_v26  ;;  %v4294_v49 = vpop.f32.mrf.mxu3  ;;  %v4030_v35 = vpop.f32.mrf.mxu0 }
 0x60b   : > { %v4119_v10 = vpop.f32.mrf.mxu1  ;;  %v4031_v16 = vadd.f32 %v4030_v35, %v7974_v51 }
 0x60c   : > { %v4295_v18 = vadd.f32 %v4294_v49, %v4206_v62 }
 0x60d   : > { %4069 = vmatmul.bf16.gmra.mxu0 %v7722_v12  ;;  %v4120_v14 = vadd.f32 %v4119_v10, %v4031_v16 }
 0x60e   : > { %v4370_v37 = vmax.f32 %v4295_v18, 0.0  ;;  %4158 = vmatmul.bf16.gmra.mxu1 %v7731_v43  ;;  %4247 = vmatmul.bf16.gmra.mxu2 %v7739_v59 }
 0x60f   : > { %4336 = vmatmul.bf16.gmra.mxu3 %v7742_v6 }
 0x610   : > { %4434 = vst [vmem:[%s7796_s19 + $0xb8] sm:$0xff] %v4370_v37 }
 0x611   : > { %v4208_v32 = vpop.f32.mrf.mxu2 }
 0x612   : > { %v4209_v44 = vadd.f32 %v4208_v32, %v4120_v14  ;;  %v4297_v48 = vpop.f32.mrf.mxu3  ;;  %v4032_v9 = vpop.f32.mrf.mxu0 }
 0x613   : > { %v4121_v60 = vpop.f32.mrf.mxu1  ;;  %v4033_v57 = vadd.f32 %v4032_v9, %v7974_v51 }
 0x614   : > { %v4298_v58 = vadd.f32 %v4297_v48, %v4209_v44 }
 0x615   : > { %v4122_v12 = vadd.f32 %v4121_v60, %v4033_v57 }
 0x616   : > { %v4372_v46 = vmax.f32 %v4298_v58, 0.0 }
 0x618   : > { %4436 = vst [vmem:[%s7796_s19 + $0xc8] sm:$0xff] %v4372_v46 }
 0x619   : > { %v4210_v54 = vpop.f32.mrf.mxu2 }
 0x61a   : > { %v4211_v43 = vadd.f32 %v4210_v54, %v4122_v12  ;;  %v4299_v29 = vpop.f32.mrf.mxu3  ;;  %v4035_v59 = vpop.f32.mrf.mxu0 }
 0x61b   : > { %v4124_v52 = vpop.f32.mrf.mxu1  ;;  %v4036_v13 = vadd.f32 %v4035_v59, %v7974_v51 }
 0x61c   : > { %v4300_v6 = vadd.f32 %v4299_v29, %v4211_v43 }
 0x61d   : > { %4074 = vmatmul.bf16.gmra.mxu0 %v7753_v38  ;;  %v4125_v17 = vadd.f32 %v4124_v52, %v4036_v13 }
 0x61e   : > { %v4374_v55 = vmax.f32 %v4300_v6, 0.0  ;;  %4163 = vmatmul.bf16.gmra.mxu1 %v7759_v21  ;;  %4252 = vmatmul.bf16.gmra.mxu2 %v7768_v25 }
 0x61f   : > { %4341 = vmatmul.bf16.gmra.mxu3 %v7771_v34 }
 0x620   : > { %4438 = vst [vmem:[%s7796_s19 + $0xd8] sm:$0xff] %v4374_v55 }
 0x621   : > { %v4213_v45 = vpop.f32.mrf.mxu2 }
 0x622   : > { %v4214_v0 = vadd.f32 %v4213_v45, %v4125_v17  ;;  %v4302_v42 = vpop.f32.mrf.mxu3  ;;  %v4037_v47 = vpop.f32.mrf.mxu0 }
 0x623   : > { %v4126_v3 = vpop.f32.mrf.mxu1  ;;  %v4038_v15 = vadd.f32 %v4037_v47, %v7974_v51 }
 0x624   : > { %v4303_v7 = vadd.f32 %v4302_v42, %v4214_v0 }
 0x625   : > { %v4127_v38 = vadd.f32 %v4126_v3, %v4038_v15 }
 0x626   : > { %v4376_v24 = vmax.f32 %v4303_v7, 0.0 }
 0x628   : > { %4440 = vst [vmem:[%s7796_s19 + $0xe8] sm:$0xff] %v4376_v24 }
 0x629   : > { %v4215_v41 = vpop.f32.mrf.mxu2 }
 0x62a   : > { %v4216_v21 = vadd.f32 %v4215_v41, %v4127_v38  ;;  %v4304_v56 = vpop.f32.mrf.mxu3  ;;  %v4040_v25 = vpop.f32.mrf.mxu0 }
 0x62b   : > { %v4129_v34 = vpop.f32.mrf.mxu1  ;;  %v4041_v20 = vadd.f32 %v4040_v25, %v7974_v51 }
 0x62c   : > { %v4305_v19 = vadd.f32 %v4304_v56, %v4216_v21 }
 0x62d   : > { %v4130_v39 = vadd.f32 %v4129_v34, %v4041_v20 }
 0x62e   : > { %v4378_v27 = vmax.f32 %v4305_v19, 0.0 }
 0x630   : > { %4442 = vst [vmem:[%s7796_s19 + $0xf8] sm:$0xff] %v4378_v27 }
 0x631   : > { %v4218_v63 = vpop.f32.mrf.mxu2 }
 0x632   : > { %v4219_v36 = vadd.f32 %v4218_v63, %v4130_v39  ;;  %v4307_v22 = vpop.f32.mrf.mxu3  ;;  %v4042_v2 = vpop.f32.mrf.mxu0 }
 0x633   : > { %v4131_v11 = vpop.f32.mrf.mxu1  ;;  %v4043_v53 = vadd.f32 %v4042_v2, %v7974_v51 }
 0x634   : > { %v4308_v23 = vadd.f32 %v4307_v22, %v4219_v36 }
 0x635   : > { %v4132_v4 = vadd.f32 %v4131_v11, %v4043_v53 }
 0x636   : > { %v4380_v1 = vmax.f32 %v4308_v23, 0.0 }
 0x638   : > { %4444 = vst [vmem:[%s7796_s19 + $0x108] sm:$0xff] %v4380_v1 }
 0x639   : > { %v4220_v40 = vpop.f32.mrf.mxu2 }
 0x63a   : > { %v4221_v5 = vadd.f32 %v4220_v40, %v4132_v4  ;;  %v4309_v50 = vpop.f32.mrf.mxu3  ;;  %v4045_v31 = vpop.f32.mrf.mxu0 }
 0x63b   : > { %v4134_v33 = vpop.f32.mrf.mxu1  ;;  %v4046_v8 = vadd.f32 %v4045_v31, %v7974_v51 }
 0x63c   : > { %v4310_v61 = vadd.f32 %v4309_v50, %v4221_v5 }
 0x63d   : > { %v4135_v26 = vadd.f32 %v4134_v33, %v4046_v8 }
 0x63e   : > { %v4382_v28 = vmax.f32 %v4310_v61, 0.0 }
 0x640   : > { %4446 = vst [vmem:[%s7796_s19 + $0x118] sm:$0xff] %v4382_v28 }
 0x641   : > { %v4223_v30 = vpop.f32.mrf.mxu2 }
 0x642   : > { %v4224_v62 = vadd.f32 %v4223_v30, %v4135_v26  ;;  %v4312_v49 = vpop.f32.mrf.mxu3  ;;  %v4047_v35 = vpop.f32.mrf.mxu0 }
 0x643   : > { %v4136_v10 = vpop.f32.mrf.mxu1  ;;  %v4048_v16 = vadd.f32 %v4047_v35, %v7974_v51 }
 0x644   : > { %v4313_v18 = vadd.f32 %v4312_v49, %v4224_v62 }
 0x645   : > { %v4137_v14 = vadd.f32 %v4136_v10, %v4048_v16 }
 0x646   : > { %v4384_v37 = vmax.f32 %v4313_v18, 0.0 }
 0x648   : > { %4448 = vst [vmem:[%s7796_s19 + $0x128] sm:$0xff] %v4384_v37 }
 0x649   : > { %v4225_v32 = vpop.f32.mrf.mxu2 }
 0x64a   : > { %v4226_v44 = vadd.f32 %v4225_v32, %v4137_v14  ;;  %v4314_v48 = vpop.f32.mrf.mxu3  ;;  %v4050_v9 = vpop.f32.mrf.mxu0 }
 0x64b   : > { %v4139_v60 = vpop.f32.mrf.mxu1  ;;  %v4051_v57 = vadd.f32 %v4050_v9, %v7974_v51 }
 0x64c   : > { %v4315_v58 = vadd.f32 %v4314_v48, %v4226_v44 }
 0x64d   : > { %v4140_v12 = vadd.f32 %v4139_v60, %v4051_v57 }
 0x64e   : > { %v4386_v46 = vmax.f32 %v4315_v58, 0.0 }
 0x650   : > { %4450 = vst [vmem:[%s7796_s19 + $0x138] sm:$0xff] %v4386_v46 }
 0x651   : > { %v4228_v54 = vpop.f32.mrf.mxu2 }
 0x652   : > { %v4229_v43 = vadd.f32 %v4228_v54, %v4140_v12  ;;  %v4317_v29 = vpop.f32.mrf.mxu3  ;;  %v4052_v59 = vpop.f32.mrf.mxu0 }
 0x653   : > { %v4141_v52 = vpop.f32.mrf.mxu1  ;;  %v4053_v13 = vadd.f32 %v4052_v59, %v7974_v51 }
 0x654   : > { %v4318_v6 = vadd.f32 %v4317_v29, %v4229_v43 }
 0x655   : > { %v4142_v17 = vadd.f32 %v4141_v52, %v4053_v13 }
 0x656   : > { %v4388_v55 = vmax.f32 %v4318_v6, 0.0 }
 0x658   : > { %4452 = vst [vmem:[%s7796_s19 + $0x148] sm:$0xff] %v4388_v55 }
 0x659   : > { %v4230_v45 = vpop.f32.mrf.mxu2 }
 0x65a   : > { %v4231_v0 = vadd.f32 %v4230_v45, %v4142_v17  ;;  %v4319_v42 = vpop.f32.mrf.mxu3  ;;  %v4055_v47 = vpop.f32.mrf.mxu0 }
 0x65b   : > { %v4144_v3 = vpop.f32.mrf.mxu1  ;;  %v4056_v15 = vadd.f32 %v4055_v47, %v7974_v51 }
 0x65c   : > { %v4320_v7 = vadd.f32 %v4319_v42, %v4231_v0 }
 0x65d   : > { %v4145_v38 = vadd.f32 %v4144_v3, %v4056_v15 }
 0x65e   : > { %v4390_v24 = vmax.f32 %v4320_v7, 0.0 }
 0x660   : > { %4454 = vst [vmem:[%s7796_s19 + $0x158] sm:$0xff] %v4390_v24 }
 0x661   : > { %v4233_v41 = vpop.f32.mrf.mxu2 }
 0x662   : > { %v4234_v21 = vadd.f32 %v4233_v41, %v4145_v38  ;;  %v4322_v56 = vpop.f32.mrf.mxu3  ;;  %v4057_v25 = vpop.f32.mrf.mxu0 }
 0x663   : > { %v4146_v34 = vpop.f32.mrf.mxu1  ;;  %v4058_v20 = vadd.f32 %v4057_v25, %v7974_v51 }
 0x664   : > { %v4323_v19 = vadd.f32 %v4322_v56, %v4234_v21 }
 0x665   : > { %v4147_v39 = vadd.f32 %v4146_v34, %v4058_v20 }
 0x666   : > { %v4392_v27 = vmax.f32 %v4323_v19, 0.0 }
 0x668   : > { %4456 = vst [vmem:[%s7796_s19 + $0x168] sm:$0xff] %v4392_v27 }
 0x669   : > { %v4235_v63 = vpop.f32.mrf.mxu2 }
 0x66a   : > { %v4236_v36 = vadd.f32 %v4235_v63, %v4147_v39  ;;  %v4324_v22 = vpop.f32.mrf.mxu3  ;;  %v4060_v2 = vpop.f32.mrf.mxu0 }
 0x66b   : > { %v4149_v11 = vpop.f32.mrf.mxu1  ;;  %v4061_v53 = vadd.f32 %v4060_v2, %v7974_v51 }
 0x66c   : > { %v4325_v23 = vadd.f32 %v4324_v22, %v4236_v36 }
 0x66d   : > { %v4150_v4 = vadd.f32 %v4149_v11, %v4061_v53 }
 0x66e   : > { %v4394_v1 = vmax.f32 %v4325_v23, 0.0 }
 0x670   : > { %4458 = vst [vmem:[%s7796_s19 + $0x178] sm:$0xff] %v4394_v1 }
 0x671   : > { %v4238_v40 = vpop.f32.mrf.mxu2 }
 0x672   : > { %v4239_v5 = vadd.f32 %v4238_v40, %v4150_v4  ;;  %v4327_v50 = vpop.f32.mrf.mxu3  ;;  %v4062_v31 = vpop.f32.mrf.mxu0 }
 0x673   : > { %v4151_v33 = vpop.f32.mrf.mxu1  ;;  %v4063_v8 = vadd.f32 %v4062_v31, %v7974_v51 }
 0x674   : > { %v4328_v61 = vadd.f32 %v4327_v50, %v4239_v5 }
 0x675   : > { %v4152_v26 = vadd.f32 %v4151_v33, %v4063_v8 }
 0x676   : > { %v4396_v28 = vmax.f32 %v4328_v61, 0.0 }
 0x678   : > { %4460 = vst [vmem:[%s7796_s19 + $0x188] sm:$0xff] %v4396_v28 }
 0x679   : > { %v4240_v30 = vpop.f32.mrf.mxu2 }
 0x67a   : > { %v4241_v62 = vadd.f32 %v4240_v30, %v4152_v26  ;;  %v4329_v49 = vpop.f32.mrf.mxu3  ;;  %v4065_v35 = vpop.f32.mrf.mxu0 }
 0x67b   : > { %v4154_v10 = vpop.f32.mrf.mxu1  ;;  %v4066_v16 = vadd.f32 %v4065_v35, %v7974_v51 }
 0x67c   : > { %v4330_v18 = vadd.f32 %v4329_v49, %v4241_v62 }
 0x67d   : > { %v4155_v14 = vadd.f32 %v4154_v10, %v4066_v16 }
 0x67e   : > { %v4398_v37 = vmax.f32 %v4330_v18, 0.0 }
 0x680   : > { %4462 = vst [vmem:[%s7796_s19 + $0x198] sm:$0xff] %v4398_v37 }
 0x681   : > { %v4243_v32 = vpop.f32.mrf.mxu2 }
 0x682   : > { %v4244_v44 = vadd.f32 %v4243_v32, %v4155_v14  ;;  %v4332_v48 = vpop.f32.mrf.mxu3  ;;  %v4067_v9 = vpop.f32.mrf.mxu0 }
 0x683   : > { %v4156_v60 = vpop.f32.mrf.mxu1  ;;  %v4068_v57 = vadd.f32 %v4067_v9, %v7974_v51 }
 0x684   : > { %v4333_v58 = vadd.f32 %v4332_v48, %v4244_v44 }
 0x685   : > { %v4157_v12 = vadd.f32 %v4156_v60, %v4068_v57 }
 0x686   : > { %v4400_v46 = vmax.f32 %v4333_v58, 0.0 }
 0x688   : > { %4464 = vst [vmem:[%s7796_s19 + $0x1a8] sm:$0xff] %v4400_v46 }
 0x689   : > { %v4245_v54 = vpop.f32.mrf.mxu2 }
 0x68a   : > { %v4246_v43 = vadd.f32 %v4245_v54, %v4157_v12  ;;  %v4334_v29 = vpop.f32.mrf.mxu3  ;;  %v4070_v59 = vpop.f32.mrf.mxu0 }
 0x68b   : > { %v4159_v52 = vpop.f32.mrf.mxu1  ;;  %v4071_v13 = vadd.f32 %v4070_v59, %v7974_v51 }
 0x68c   : > { %v4335_v6 = vadd.f32 %v4334_v29, %v4246_v43 }
 0x68d   : > { %v4160_v17 = vadd.f32 %v4159_v52, %v4071_v13 }
 0x68e   : > { %v4402_v55 = vmax.f32 %v4335_v6, 0.0 }
 0x690   : > { %4466 = vst [vmem:[%s7796_s19 + $0x1b8] sm:$0xff] %v4402_v55 }
 0x691   : > { %v4248_v45 = vpop.f32.mrf.mxu2 }
 0x692   : > { %v4249_v0 = vadd.f32 %v4248_v45, %v4160_v17  ;;  %v4337_v42 = vpop.f32.mrf.mxu3  ;;  %v4072_v47 = vpop.f32.mrf.mxu0 }
 0x693   : > { %v4161_v3 = vpop.f32.mrf.mxu1  ;;  %v4073_v15 = vadd.f32 %v4072_v47, %v7974_v51 }
 0x694   : > { %v4338_v7 = vadd.f32 %v4337_v42, %v4249_v0 }
 0x695   : > { %v4162_v38 = vadd.f32 %v4161_v3, %v4073_v15 }
 0x696   : > { %v4404_v24 = vmax.f32 %v4338_v7, 0.0 }
 0x698   : > { %4468 = vst [vmem:[%s7796_s19 + $0x1c8] sm:$0xff] %v4404_v24 }
 0x699   : > { %v4250_v41 = vpop.f32.mrf.mxu2 }
 0x69a   : > { %v4251_v21 = vadd.f32 %v4250_v41, %v4162_v38  ;;  %v4339_v56 = vpop.f32.mrf.mxu3  ;;  %v4075_v25 = vpop.f32.mrf.mxu0 }
 0x69b   : > { %v4076_v19 = vadd.f32 %v4075_v25, %v7974_v51  ;;  %v4164_v20 = vpop.f32.mrf.mxu1 }
 0x69c   : > { %v4340_v34 = vadd.f32 %v4339_v56, %v4251_v21 }
 0x69d   : > { %v4165_v39 = vadd.f32 %v4164_v20, %v4076_v19 }
 0x69e   : > { %v4406_v27 = vmax.f32 %v4340_v34, 0.0 }
 0x6a0   : > { %4470 = vst [vmem:[%s7796_s19 + $0x1d8] sm:$0xff] %v4406_v27 }
 0x6a1   : > { %v4253_v63 = vpop.f32.mrf.mxu2 }
 0x6a2   : > { %v4254_v36 = vadd.f32 %v4253_v63, %v4165_v39  ;;  %v4342_v22 = vpop.f32.mrf.mxu3  ;;  %v4077_v2 = vpop.f32.mrf.mxu0 }
 0x6a3   : > { %v4078_v23 = vadd.f32 %v4077_v2, %v7974_v51  ;;  %v4166_v1 = vpop.f32.mrf.mxu1 }
 0x6a4   : > { %v4343_v11 = vadd.f32 %v4342_v22, %v4254_v36 }
 0x6a5   : > { %v4167_v4 = vadd.f32 %v4166_v1, %v4078_v23 }
 0x6a6   : > { %v4408_v53 = vmax.f32 %v4343_v11, 0.0 }
 0x6a8   : > { %4472 = vst [vmem:[%s7796_s19 + $0x1e8] sm:$0xff] %v4408_v53 }
 0x6a9   : > { %v4255_v40 = vpop.f32.mrf.mxu2 }
 0x6aa   : > { %v4256_v5 = vadd.f32 %v4255_v40, %v4167_v4  ;;  %v4344_v50 = vpop.f32.mrf.mxu3 }
 0x6ac   : > { %v4345_v31 = vadd.f32 %v4344_v50, %v4256_v5 }
 0x6ae   : > { %v4410_v33 = vmax.f32 %v4345_v31, 0.0 }
 0x6b0   : > { %4474 = vst [vmem:[%s7796_s19 + $0x1f8] sm:$0xff] %v4410_v33 }
 0x6b1 PF: > { %s19_s30 = sadd.s32 1, %s5684_s30  }
 0x6b2   : > { %p16_p4 = scmp.ge.s32.totalorder %s19_s30, 4  }
 0x6b4   :  { %18 = sbr.rel (!%p16_p4) target bundleno = 1 (0x1), region = 86 }

// kernel: sae_forward.1
= control target key start
LH: loop header
LB: loop body
LE: loop exit
PB: predicated region body
PF: predicated region fallthrough
CT: control target
= control target key end

     0   :  { %s5736_s30 = smov 0   ;;  %s8076_s0 = inlined_call_operand.vmem [shape: bf16[512,256], index: 0, kind: input, shape index: {}]   ;;  %s8077_s1 = inlined_call_operand.vmem [shape: bf16[256,512], index: 1, kind: input, shape index: {}]   ;;  %s8078_s2 = inlined_call_operand.vmem [shape: f32[1,512], index: 2, kind: input, shape index: {}]   ;;  %s8079_s3 = inlined_call_operand.vmem [shape: bf16[512,128], index: 3, kind: input, shape index: {}]   ;;  %s8080_s4 = inlined_call_operand.vmem [shape: f32[1,128], index: 4, kind: input, shape index: {}]   ;;  %s8081_s5 = inlined_call_operand.vmem [shape: bf16[128,512], index: 5, kind: input, shape index: {}]   ;;  %s8082_s6 = inlined_call_operand.vmem [shape: f32[1,512], index: 6, kind: input, shape index: {}]   ;;  %s8083_s7 = inlined_call_operand.vmem [shape: bf16[512,256], index: 7, kind: input, shape index: {}]   ;;  %s8084_s8 = inlined_call_operand.vmem [shape: f32[1,256], index: 8, kind: input, shape index: {}]   ;;  %s8085_s9 = inlined_call_operand.vmem [shape: f32[512,256], index: 9, kind: output, shape index: {}]  }
   0x1 LB: > { %s4533_s10 = sadd.s32 4294967295, %s5684_s30   ;;  %p4537_p0 = scmp.ge.s32.totalorder %s5684_s30, 1  ;;  %s5684_s30 = sphi %s5736_s30, %s19_s30  }
   0x2   : > { %p289_p1 = scmp.lt.s32.totalorder %s5684_s30, 3 }
   0x4   : > { %p290_p2 = pnand %p4537_p0, %p289_p1 }
   0x6   : > { %293 = sbr.rel (%p290_p2) target bundleno = 1713 (0x6b1), region = 56 }
   0xb   : > { %v4786_v0 = vld [vmem:[%s8077_s1 + $0xe0] sm:$0xf]  ;;  %v5506_v1 = vld [vmem:[%s8077_s1 + $0xec] sm:$0xf0]  ;;  %v5504_v5 = vld [vmem:[%s8077_s1 + $0xe4] sm:$0xf] }
   0xc   : > { %v4914_v2 = vld [vmem:[%s8077_s1 + $0x1e0] sm:$0xf]  ;;  %v4787_v3 = vor.u32 %v5506_v1, %v4786_v0  ;;  %v5538_v4 = vld [vmem:[%s8077_s1 + $0x1ec] sm:$0xf0]  ;;  %v4788_v6 = vld [vmem:[%s8077_s1 + $0xf0] sm:$0xf0] }
   0xd   : > { %v4915_v7 = vor.u32 %v5538_v4, %v4914_v2  ;;  %v4791_v8 = vor.u32 %v5504_v5, %v4788_v6  ;;  %v5536_v9 = vld [vmem:[%s8077_s1 + $0x1e4] sm:$0xf]  ;;  %v4916_v10 = vld [vmem:[%s8077_s1 + $0x1f0] sm:$0xf0]  ;;  %v4770_v11 = vld [vmem:[%s8077_s1 + $0xc0] sm:$0xf] }
   0xe   : > { %927 = vmatpush.bf16.msra.mxu0 %v4787_v3  ;;  %v4919_v12 = vor.u32 %v5536_v9, %v4916_v10  ;;  %v5502_v13 = vld [vmem:[%s8077_s1 + $0xcc] sm:$0xf0]  ;;  %v4898_v14 = vld [vmem:[%s8077_s1 + $0x1c0] sm:$0xf]  ;;  %v5500_v18 = vld [vmem:[%s8077_s1 + $0xc4] sm:$0xf] }
   0xf   : > { %v5534_v15 = vld [vmem:[%s8077_s1 + $0x1cc] sm:$0xf0]  ;;  %1016 = vmatpush.bf16.msra.mxu1 %v4915_v7  ;;  %1105 = vmatpush.bf16.msra.mxu2 %v4791_v8  ;;  %v4771_v16 = vor.u32 %v5502_v13, %v4770_v11  ;;  %v4772_v19 = vld [vmem:[%s8077_s1 + $0xd0] sm:$0xf0]  ;;  %v5532_v20 = vld [vmem:[%s8077_s1 + $0x1c4] sm:$0xf] }
  0x10   : > { %v4899_v17 = vor.u32 %v5534_v15, %v4898_v14  ;;  %1194 = vmatpush.bf16.msra.mxu3 %v4919_v12  ;;  %v4775_v21 = vor.u32 %v5500_v18, %v4772_v19  ;;  %v4900_v22 = vld [vmem:[%s8077_s1 + $0x1d0] sm:$0xf0]  ;;  %v4754_v23 = vld [vmem:[%s8077_s1 + $0xa0] sm:$0xf]  ;;  %v5498_v24 = vld [vmem:[%s8077_s1 + $0xac] sm:$0xf0] }
  0x11   : > { %v4903_v25 = vor.u32 %v5532_v20, %v4900_v22  ;;  %v4882_v26 = vld [vmem:[%s8077_s1 + $0x1a0] sm:$0xf]  ;;  %v5530_v27 = vld [vmem:[%s8077_s1 + $0x1ac] sm:$0xf0]  ;;  %v5496_v28 = vld [vmem:[%s8077_s1 + $0xa4] sm:$0xf]  ;;  %v4755_v29 = vor.u32 %v5498_v24, %v4754_v23 }
  0x12   : > { %928 = vmatpush.bf16.msra.mxu0 %v4771_v16  ;;  %v4756_v30 = vld [vmem:[%s8077_s1 + $0xb0] sm:$0xf0]  ;;  %v5528_v31 = vld [vmem:[%s8077_s1 + $0x1a4] sm:$0xf]  ;;  %v4883_v33 = vor.u32 %v5530_v27, %v4882_v26  ;;  %v4738_v35 = vld [vmem:[%s8077_s1 + $0x80] sm:$0xf] }
  0x13   : > { %v4884_v32 = vld [vmem:[%s8077_s1 + $0x1b0] sm:$0xf0]  ;;  %1017 = vmatpush.bf16.msra.mxu1 %v4899_v17  ;;  %1106 = vmatpush.bf16.msra.mxu2 %v4775_v21  ;;  %v4759_v34 = vor.u32 %v5496_v28, %v4756_v30  ;;  %v5494_v36 = vld [vmem:[%s8077_s1 + $0x8c] sm:$0xf0]  ;;  %v4866_v37 = vld [vmem:[%s8077_s1 + $0x180] sm:$0xf] }
  0x14   : > { %1195 = vmatpush.bf16.msra.mxu3 %v4903_v25  ;;  %v4887_v38 = vor.u32 %v5528_v31, %v4884_v32  ;;  %v5526_v39 = vld [vmem:[%s8077_s1 + $0x18c] sm:$0xf0]  ;;  %v5492_v40 = vld [vmem:[%s8077_s1 + $0x84] sm:$0xf]  ;;  %v4740_v41 = vld [vmem:[%s8077_s1 + $0x90] sm:$0xf0]  ;;  %v4739_v44 = vor.u32 %v5494_v36, %v4738_v35 }
  0x15   : > { %v5524_v42 = vld [vmem:[%s8077_s1 + $0x184] sm:$0xf]  ;;  %v4868_v43 = vld [vmem:[%s8077_s1 + $0x190] sm:$0xf0]  ;;  %v4867_v45 = vor.u32 %v5526_v39, %v4866_v37  ;;  %v4743_v46 = vor.u32 %v5492_v40, %v4740_v41  ;;  %v4722_v47 = vld [vmem:[%s8077_s1 + $0x60] sm:$0xf] }
  0x16   : > { %929 = vmatpush.bf16.msra.mxu0 %v4755_v29  ;;  %v5490_v48 = vld [vmem:[%s8077_s1 + $0x6c] sm:$0xf0]  ;;  %v4850_v49 = vld [vmem:[%s8077_s1 + $0x160] sm:$0xf]  ;;  %v4871_v50 = vor.u32 %v5524_v42, %v4868_v43  ;;  %v5488_v52 = vld [vmem:[%s8077_s1 + $0x64] sm:$0xf] }
  0x17   : > { %1018 = vmatpush.bf16.msra.mxu1 %v4883_v33  ;;  %1107 = vmatpush.bf16.msra.mxu2 %v4759_v34  ;;  %v5522_v51 = vld [vmem:[%s8077_s1 + $0x16c] sm:$0xf0]  ;;  %v4724_v53 = vld [vmem:[%s8077_s1 + $0x70] sm:$0xf0]  ;;  %v5520_v54 = vld [vmem:[%s8077_s1 + $0x164] sm:$0xf]  ;;  %v4723_v56 = vor.u32 %v5490_v48, %v4722_v47 }
  0x18   : > { %1196 = vmatpush.bf16.msra.mxu3 %v4887_v38  ;;  %v4852_v55 = vld [vmem:[%s8077_s1 + $0x170] sm:$0xf0]  ;;  %v4851_v57 = vor.u32 %v5522_v51, %v4850_v49  ;;  %v4727_v58 = vor.u32 %v5488_v52, %v4724_v53  ;;  %v4706_v59 = vld [vmem:[%s8077_s1 + $0x40] sm:$0xf]  ;;  %v5486_v60 = vld [vmem:[%s8077_s1 + $0x4c] sm:$0xf0] }
  0x19   : > { %v4834_v61 = vld [vmem:[%s8077_s1 + $0x140] sm:$0xf]  ;;  %v4855_v62 = vor.u32 %v5520_v54, %v4852_v55  ;;  %v5518_v63 = vld [vmem:[%s8077_s1 + $0x14c] sm:$0xf0]  ;;  %v5484_v0 = vld [vmem:[%s8077_s1 + $0x44] sm:$0xf]  ;;  %v4707_v4 = vor.u32 %v5486_v60, %v4706_v59 }
  0x1a   : > { %930 = vmatpush.bf16.msra.mxu0 %v4739_v44  ;;  %v4708_v1 = vld [vmem:[%s8077_s1 + $0x50] sm:$0xf0]  ;;  %v5516_v2 = vld [vmem:[%s8077_s1 + $0x144] sm:$0xf]  ;;  %v4690_v5 = vld [vmem:[%s8077_s1 + $0x20] sm:$0xf]  ;;  %v4835_v7 = vor.u32 %v5518_v63, %v4834_v61 }
  0x1b   : > { %1019 = vmatpush.bf16.msra.mxu1 %v4867_v45  ;;  %1108 = vmatpush.bf16.msra.mxu2 %v4743_v46  ;;  %v4836_v3 = vld [vmem:[%s8077_s1 + $0x150] sm:$0xf0]  ;;  %v5482_v6 = vld [vmem:[%s8077_s1 + $0x2c] sm:$0xf0]  ;;  %v4711_v8 = vor.u32 %v5484_v0, %v4708_v1  ;;  %v4818_v9 = vld [vmem:[%s8077_s1 + $0x120] sm:$0xf] }
  0x1c   : > { %1197 = vmatpush.bf16.msra.mxu3 %v4871_v50  ;;  %v5514_v10 = vld [vmem:[%s8077_s1 + $0x12c] sm:$0xf0]  ;;  %v5480_v11 = vld [vmem:[%s8077_s1 + $0x24] sm:$0xf]  ;;  %v4839_v12 = vor.u32 %v5516_v2, %v4836_v3  ;;  %v4692_v13 = vld [vmem:[%s8077_s1 + $0x30] sm:$0xf0]  ;;  %v4691_v17 = vor.u32 %v5482_v6, %v4690_v5 }
  0x1d   : > { %v5512_v14 = vld [vmem:[%s8077_s1 + $0x124] sm:$0xf]  ;;  %s4538_s26 = sshll.u32 %s4533_s10, 5  ;;  %v4820_v15 = vld [vmem:[%s8077_s1 + $0x130] sm:$0xf0]  ;;  %v4819_v21 = vor.u32 %v5514_v10, %v4818_v9  ;;  %v4695_v22 = vor.u32 %v5480_v11, %v4692_v13 }
  0x1e   : > { %931 = vmatpush.bf16.msra.mxu0 %v4723_v56  ;;  %v4674_v16 = vld [vmem:[%s8077_s1] sm:$0xf]  ;;  %p328_p3 = scmp.lt.s32.totalorder %s4538_s26, 63  ;;  %v5478_v18 = vld [vmem:[%s8077_s1 + $0xc] sm:$0xf0]  ;;  %v4823_v25 = vor.u32 %v5512_v14, %v4820_v15 }
  0x1f   : > { %1020 = vmatpush.bf16.msra.mxu1 %v4851_v57  ;;  %1109 = vmatpush.bf16.msra.mxu2 %v4727_v58  ;;  %v4802_v19 = vld [vmem:[%s8077_s1 + $0x100] sm:$0xf]  ;;  %v5510_v20 = vld [vmem:[%s8077_s1 + $0x10c] sm:$0xf0]  ;;  %v5476_v23 = vld [vmem:[%s8077_s1 + $0x4] sm:$0xf]  ;;  %v4675_v30 = vor.u32 %v5478_v18, %v4674_v16 }
  0x20   : > { %1198 = vmatpush.bf16.msra.mxu3 %v4855_v62  ;;  %v4676_v24 = vld [vmem:[%s8077_s1 + $0x10] sm:$0xf0]  ;;  %s8158_s26 = smov (!%p328_p3, %s4538_s26), 63  ;;  %v5508_v26 = vld [vmem:[%s8077_s1 + $0x104] sm:$0xf]  ;;  %v4803_v33 = vor.u32 %v5510_v20, %v4802_v19 }
  0x21   : > { %v4804_v27 = vld [vmem:[%s8077_s1 + $0x110] sm:$0xf0]  ;;  %s5442_s25 = sshll.u32 %s8158_s26, 3  ;;  %v5505_v28 = vld [vmem:[%s8077_s1 + $0xec] sm:$0xf]  ;;  %v4679_v34 = vor.u32 %v5476_v23, %v4676_v24  ;;  %s5443_s16 = sshll.u32 %s8158_s26, 4 }
  0x22   : > { %932 = vmatpush.bf16.msra.mxu0 %v4707_v4  ;;  %v4796_v29 = vld [vmem:[%s8077_s1 + $0xf8] sm:$0xf0]  ;;  %s5950_s14 = scalar_lea.vmem %s8076_s0, %s5442_s25  ;;  %v5537_v31 = vld [vmem:[%s8077_s1 + $0x1ec] sm:$0xf]  ;;  %v4807_v38 = vor.u32 %v5508_v26, %v4804_v27  ;;  %v4794_v41 = vld [vmem:[%s8077_s1 + $0xe8] sm:$0xf]  ;;  %s7796_s19 = scalar_lea.vmem %s8085_s9, %s5443_s16 }
  0x23   : > { %1021 = vmatpush.bf16.msra.mxu1 %v4835_v7  ;;  %1110 = vmatpush.bf16.msra.mxu2 %v4711_v8  ;;  %v4924_v32 = vld [vmem:[%s8077_s1 + $0x1f8] sm:$0xf0]  ;;  %v4546_v35 = vld [vmem:[%s5950_s14] sm:$0xf]  ;;  %v5445_v36 = vld [vmem:[%s5950_s14 + $0x4] sm:$0xf0]  ;;  %v4799_v40 = vor.u32 %v5505_v28, %v4796_v29 }
  0x24   : > { %1199 = vmatpush.bf16.msra.mxu3 %v4839_v12  ;;  %v5444_v37 = vld [vmem:[%s5950_s14 + $0x4] sm:$0xf]  ;;  %v4548_v39 = vld [vmem:[%s5950_s14 + $0x8] sm:$0xf0]  ;;  %v5507_v42 = vld [vmem:[%s8077_s1 + $0xf4] sm:$0xf0]  ;;  %v5968_v43 = vor.u32 %v5445_v36, %v4546_v35  ;;  %v4927_v44 = vor.u32 %v5537_v31, %v4924_v32 }
  0x25   : > { %v4922_v45 = vld [vmem:[%s8077_s1 + $0x1e8] sm:$0xf]  ;;  %v5539_v46 = vld [vmem:[%s8077_s1 + $0x1f4] sm:$0xf0]  ;;  %v5976_v47 = vor.u32 %v5444_v37, %v4548_v39  ;;  %v4795_v48 = vor.u32 %v5507_v42, %v4794_v41  ;;  %v5501_v50 = vld [vmem:[%s8077_s1 + $0xcc] sm:$0xf] }
  0x26   : > { %933 = vmatpush.bf16.msra.mxu0 %v4691_v17  ;;  %v4923_v49 = vor.u32 %v5539_v46, %v4922_v45  ;;  %v4780_v51 = vld [vmem:[%s8077_s1 + $0xd8] sm:$0xf0]  ;;  %v4778_v52 = vld [vmem:[%s8077_s1 + $0xc8] sm:$0xf]  ;;  %v5503_v54 = vld [vmem:[%s8077_s1 + $0xd4] sm:$0xf0] }
  0x27   : > { %1022 = vmatpush.bf16.msra.mxu1 %v4819_v21  ;;  %1111 = vmatpush.bf16.msra.mxu2 %v4695_v22  ;;  %v4783_v53 = vor.u32 %v5501_v50, %v4780_v51  ;;  %v5533_v55 = vld [vmem:[%s8077_s1 + $0x1cc] sm:$0xf]  ;;  %v4908_v56 = vld [vmem:[%s8077_s1 + $0x1d8] sm:$0xf0]  ;;  %v4779_v57 = vor.u32 %v5503_v54, %v4778_v52  ;;  %v4906_v59 = vld [vmem:[%s8077_s1 + $0x1c8] sm:$0xf] }
  0x28   : > { %1200 = vmatpush.bf16.msra.mxu3 %v4823_v25  ;;  %v4911_v58 = vor.u32 %v5533_v55, %v4908_v56  ;;  %v5535_v60 = vld [vmem:[%s8077_s1 + $0x1d4] sm:$0xf0]  ;;  %v4554_v62 = vld [vmem:[%s5950_s14 + $0x10] sm:$0xf]  ;;  %v5446_v0 = vld [vmem:[%s5950_s14 + $0x14] sm:$0xf] }
  0x29   : > { %v4907_v61 = vor.u32 %v5535_v60, %v4906_v59  ;;  %v5447_v63 = vld [vmem:[%s5950_s14 + $0x14] sm:$0xf0]  ;;  %v4556_v1 = vld [vmem:[%s5950_s14 + $0x18] sm:$0xf0]  ;;  %v4562_v4 = vld [vmem:[%s5950_s14 + $0x20] sm:$0xf] }
  0x2a   : > { %934 = vmatpush.bf16.msra.mxu0 %v4675_v30  ;;  %v6010_v2 = vor.u32 %v5447_v63, %v4554_v62  ;;  %v6012_v3 = vor.u32 %v5446_v0, %v4556_v1  ;;  %v5449_v5 = vld [vmem:[%s5950_s14 + $0x24] sm:$0xf0]  ;;  %v5448_v6 = vld [vmem:[%s5950_s14 + $0x24] sm:$0xf]  ;;  %v4564_v7 = vld [vmem:[%s5950_s14 + $0x28] sm:$0xf0] }
  0x2b   : > { %1023 = vmatpush.bf16.msra.mxu1 %v4803_v33  ;;  %1112 = vmatpush.bf16.msra.mxu2 %v4679_v34  ;;  %v6022_v8 = vor.u32 %v5449_v5, %v4562_v4  ;;  %v6024_v9 = vor.u32 %v5448_v6, %v4564_v7  ;;  %v5497_v10 = vld [vmem:[%s8077_s1 + $0xac] sm:$0xf]  ;;  %v4764_v11 = vld [vmem:[%s8077_s1 + $0xb8] sm:$0xf0]  ;;  %v4762_v12 = vld [vmem:[%s8077_s1 + $0xa8] sm:$0xf] }
  0x2c   : > { %1201 = vmatpush.bf16.msra.mxu3 %v4807_v38  ;;  %v4767_v13 = vor.u32 %v5497_v10, %v4764_v11  ;;  %v5499_v14 = vld [vmem:[%s8077_s1 + $0xb4] sm:$0xf0]  ;;  %v5529_v15 = vld [vmem:[%s8077_s1 + $0x1ac] sm:$0xf]  ;;  %v4892_v16 = vld [vmem:[%s8077_s1 + $0x1b8] sm:$0xf0] }
  0x2d   : > { %935 = vmatmul.bf16.vlgmr.msra.gmra.mxu0 %v5968_v43  ;;  %v4763_v17 = vor.u32 %v5499_v14, %v4762_v12  ;;  %v4895_v18 = vor.u32 %v5529_v15, %v4892_v16  ;;  %v4890_v19 = vld [vmem:[%s8077_s1 + $0x1a8] sm:$0xf]  ;;  %v5531_v20 = vld [vmem:[%s8077_s1 + $0x1b4] sm:$0xf0]  ;;  %v4570_v22 = vld [vmem:[%s5950_s14 + $0x30] sm:$0xf] }
  0x2e   : > { %1024 = vmatmul.bf16.vlgmr.msra.gmra.mxu1 %v5976_v47  ;;  %1113 = vmatmul.bf16.vlgmr.msra.gmra.mxu2 %v5968_v43  ;;  %v4891_v21 = vor.u32 %v5531_v20, %v4890_v19  ;;  %v5451_v23 = vld [vmem:[%s5950_s14 + $0x34] sm:$0xf0]  ;;  %v5450_v24 = vld [vmem:[%s5950_s14 + $0x34] sm:$0xf]  ;;  %v4572_v25 = vld [vmem:[%s5950_s14 + $0x38] sm:$0xf0] }
  0x2f   : > { %1461 = vmatpush.bf16.msrb.mxu2 %v4799_v40  ;;  %1202 = vmatmul.bf16.vlgmr.msra.gmra.mxu3 %v5976_v47  ;;  %v6058_v26 = vor.u32 %v5451_v23, %v4570_v22  ;;  %v6060_v27 = vor.u32 %v5450_v24, %v4572_v25  ;;  %v4578_v28 = vld [vmem:[%s5950_s14 + $0x40] sm:$0xf]  ;;  %v5453_v29 = vld [vmem:[%s5950_s14 + $0x44] sm:$0xf0]  ;;  %v5452_v30 = vld [vmem:[%s5950_s14 + $0x44] sm:$0xf] }
  0x30   : > { %1550 = vmatpush.bf16.msrb.mxu3 %v4927_v44  ;;  %1283 = vmatpush.bf16.msrb.mxu0 %v4795_v48  ;;  %v4580_v31 = vld [vmem:[%s5950_s14 + $0x48] sm:$0xf0]  ;;  %v6070_v32 = vor.u32 %v5453_v29, %v4578_v28  ;;  %v4748_v35 = vld [vmem:[%s8077_s1 + $0x98] sm:$0xf0]  ;;  %v4746_v36 = vld [vmem:[%s8077_s1 + $0x88] sm:$0xf] }
  0x31   : > { %1372 = vmatpush.bf16.msrb.mxu1 %v4923_v49  ;;  %v6072_v33 = vor.u32 %v5452_v30, %v4580_v31  ;;  %v5493_v34 = vld [vmem:[%s8077_s1 + $0x8c] sm:$0xf]  ;;  %v5495_v38 = vld [vmem:[%s8077_s1 + $0x94] sm:$0xf0]  ;;  %v4876_v40 = vld [vmem:[%s8077_s1 + $0x198] sm:$0xf0] }
  0x32   : > { %v4751_v37 = vor.u32 %v5493_v34, %v4748_v35  ;;  %v5525_v39 = vld [vmem:[%s8077_s1 + $0x18c] sm:$0xf]  ;;  %v4747_v41 = vor.u32 %v5495_v38, %v4746_v36  ;;  %v4874_v44 = vld [vmem:[%s8077_s1 + $0x188] sm:$0xf]  ;;  %v5527_v45 = vld [vmem:[%s8077_s1 + $0x194] sm:$0xf0] }
  0x33   : > { %1462 = vmatpush.bf16.msrb.mxu2 %v4783_v53  ;;  %v4879_v42 = vor.u32 %v5525_v39, %v4876_v40  ;;  %v4875_v46 = vor.u32 %v5527_v45, %v4874_v44  ;;  %v4586_v48 = vld [vmem:[%s5950_s14 + $0x50] sm:$0xf]  ;;  %v5455_v49 = vld [vmem:[%s5950_s14 + $0x54] sm:$0xf0]  ;;  %v5454_v50 = vld [vmem:[%s5950_s14 + $0x54] sm:$0xf] }
  0x34   : > { %1284 = vmatpush.bf16.msrb.mxu0 %v4779_v57  ;;  %1551 = vmatpush.bf16.msrb.mxu3 %v4911_v58  ;;  %v4588_v51 = vld [vmem:[%s5950_s14 + $0x58] sm:$0xf0]  ;;  %v6106_v52 = vor.u32 %v5455_v49, %v4586_v48  ;;  %v4594_v54 = vld [vmem:[%s5950_s14 + $0x60] sm:$0xf]  ;;  %v5457_v55 = vld [vmem:[%s5950_s14 + $0x64] sm:$0xf0] }
  0x35   : > { %1373 = vmatpush.bf16.msrb.mxu1 %v4907_v61  ;;  %v6108_v53 = vor.u32 %v5454_v50, %v4588_v51  ;;  %v5456_v56 = vld [vmem:[%s5950_s14 + $0x64] sm:$0xf]  ;;  %v4596_v57 = vld [vmem:[%s5950_s14 + $0x68] sm:$0xf0]  ;;  %v6118_v58 = vor.u32 %v5457_v55, %v4594_v54  ;;  %v4732_v61 = vld [vmem:[%s8077_s1 + $0x78] sm:$0xf0] }
  0x36   : > { %v6120_v59 = vor.u32 %v5456_v56, %v4596_v57  ;;  %v5489_v60 = vld [vmem:[%s8077_s1 + $0x6c] sm:$0xf]  ;;  %v4730_v62 = vld [vmem:[%s8077_s1 + $0x68] sm:$0xf]  ;;  %v5491_v0 = vld [vmem:[%s8077_s1 + $0x74] sm:$0xf0] }
  0x37   : > { %1463 = vmatpush.bf16.msrb.mxu2 %v4767_v13  ;;  %v4735_v63 = vor.u32 %v5489_v60, %v4732_v61  ;;  %v5521_v1 = vld [vmem:[%s8077_s1 + $0x16c] sm:$0xf]  ;;  %v4860_v4 = vld [vmem:[%s8077_s1 + $0x178] sm:$0xf0]  ;;  %v4731_v5 = vor.u32 %v5491_v0, %v4730_v62  ;;  %v4602_v7 = vld [vmem:[%s5950_s14 + $0x70] sm:$0xf] }
  0x38   : > { %1285 = vmatpush.bf16.msrb.mxu0 %v4763_v17  ;;  %1552 = vmatpush.bf16.msrb.mxu3 %v4895_v18  ;;  %v4863_v6 = vor.u32 %v5521_v1, %v4860_v4  ;;  %v5459_v10 = vld [vmem:[%s5950_s14 + $0x74] sm:$0xf0]  ;;  %v4858_v11 = vld [vmem:[%s8077_s1 + $0x168] sm:$0xf]  ;;  %v5458_v13 = vld [vmem:[%s5950_s14 + $0x74] sm:$0xf] }
  0x39   : > { %1374 = vmatpush.bf16.msrb.mxu1 %v4891_v21  ;;  %v5523_v12 = vld [vmem:[%s8077_s1 + $0x174] sm:$0xf0]  ;;  %v4604_v14 = vld [vmem:[%s5950_s14 + $0x78] sm:$0xf0]  ;;  %v6154_v16 = vor.u32 %v5459_v10, %v4602_v7  ;;  %v437_v18 = vld [vmem:[%s8078_s2] sm:$0xf] }
  0x3a   : > { %v4859_v15 = vor.u32 %v5523_v12, %v4858_v11  ;;  %v6156_v17 = vor.u32 %v5458_v13, %v4604_v14  ;;  %v4610_v19 = vld [vmem:[%s5950_s14 + $0x80] sm:$0xf]  ;;  %v5461_v20 = vld [vmem:[%s5950_s14 + $0x84] sm:$0xf0]  ;;  %v6167_v21 = vperm.slane %v437_v18, 0  ;;  %v6179_v34 = vperm.slane %v437_v18, 1 }
  0x3b   : > { %1464 = vmatpush.bf16.msrb.mxu2 %v4751_v37  ;;  %v5460_v22 = vld [vmem:[%s5950_s14 + $0x84] sm:$0xf]  ;;  %v4612_v23 = vld [vmem:[%s5950_s14 + $0x88] sm:$0xf0]  ;;  %v6171_v24 = vor.u32 %v5461_v20, %v4610_v19  ;;  %v4716_v36 = vld [vmem:[%s8077_s1 + $0x58] sm:$0xf0] }
  0x3c   : > { %1286 = vmatpush.bf16.msrb.mxu0 %v4747_v41  ;;  %1553 = vmatpush.bf16.msrb.mxu3 %v4879_v42  ;;  %v6173_v28 = vor.u32 %v5460_v22, %v4612_v23  ;;  %v5485_v35 = vld [vmem:[%s8077_s1 + $0x4c] sm:$0xf]  ;;  %v4714_v38 = vld [vmem:[%s8077_s1 + $0x48] sm:$0xf]  ;;  %v5487_v39 = vld [vmem:[%s8077_s1 + $0x54] sm:$0xf0] }
  0x3d   : > { %940 = vmatmul.bf16.gmra.mxu0 %v6010_v2  ;;  %1375 = vmatpush.bf16.msrb.mxu1 %v4875_v46  ;;  %v4719_v37 = vor.u32 %v5485_v35, %v4716_v36  ;;  %v5517_v40 = vld [vmem:[%s8077_s1 + $0x14c] sm:$0xf]  ;;  %v4715_v42 = vor.u32 %v5487_v39, %v4714_v38  ;;  %v4844_v44 = vld [vmem:[%s8077_s1 + $0x158] sm:$0xf0]  ;;  %v4618_v56 = vld [vmem:[%s5950_s14 + $0x90] sm:$0xf] }
  0x3e   : > { %1029 = vmatmul.bf16.gmra.mxu1 %v6012_v3  ;;  %1118 = vmatmul.bf16.gmra.mxu2 %v6010_v2  ;;  %v4847_v49 = vor.u32 %v5517_v40, %v4844_v44  ;;  %v5463_v57 = vld [vmem:[%s5950_s14 + $0x94] sm:$0xf0]  ;;  %v4842_v60 = vld [vmem:[%s8077_s1 + $0x148] sm:$0xf]  ;;  %v5462_v0 = vld [vmem:[%s5950_s14 + $0x94] sm:$0xf] }
  0x3f   : > { %1207 = vmatmul.bf16.gmra.mxu3 %v6012_v3  ;;  %1465 = vmatpush.bf16.msrb.mxu2 %v4735_v63  ;;  %v5519_v61 = vld [vmem:[%s8077_s1 + $0x154] sm:$0xf0]  ;;  %v4620_v1 = vld [vmem:[%s5950_s14 + $0x98] sm:$0xf0]  ;;  %v6214_v7 = vor.u32 %v5463_v57, %v4618_v56  ;;  %v4626_v39 = vld [vmem:[%s5950_s14 + $0xa0] sm:$0xf] }
  0x40   : > { %1287 = vmatpush.bf16.msrb.mxu0 %v4731_v5  ;;  %1554 = vmatpush.bf16.msrb.mxu3 %v4863_v6  ;;  %v4843_v4 = vor.u32 %v5519_v61, %v4842_v60  ;;  %v6217_v13 = vor.u32 %v5462_v0, %v4620_v1  ;;  %v5465_v40 = vld [vmem:[%s5950_s14 + $0xa4] sm:$0xf0]  ;;  %v5464_v44 = vld [vmem:[%s5950_s14 + $0xa4] sm:$0xf]  ;;  %v5481_v0 = vld [vmem:[%s8077_s1 + $0x2c] sm:$0xf] }
  0x41   : > { %1376 = vmatpush.bf16.msrb.mxu1 %v4859_v15  ;;  %v4700_v1 = vld [vmem:[%s8077_s1 + $0x38] sm:$0xf0] }
  0x43   : > { %1466 = vmatpush.bf16.msrb.mxu2 %v4719_v37 }
  0x44   : > { %1288 = vmatpush.bf16.msrb.mxu0 %v4715_v42  ;;  %1555 = vmatpush.bf16.msrb.mxu3 %v4847_v49 }
  0x45   : > { %1377 = vmatpush.bf16.msrb.mxu1 %v4843_v4  ;;  %v4703_v4 = vor.u32 %v5481_v0, %v4700_v1 }
  0x47   : > { %1467 = vmatpush.bf16.msrb.mxu2 %v4703_v4 }
  0x4d   : > { %945 = vmatmul.bf16.gmra.mxu0 %v6022_v8 }
  0x4e   : > { %1034 = vmatmul.bf16.gmra.mxu1 %v6024_v9  ;;  %1123 = vmatmul.bf16.gmra.mxu2 %v6022_v8 }
  0x4f   : > { %1212 = vmatmul.bf16.gmra.mxu3 %v6024_v9 }
  0x5d   : > { %950 = vmatmul.bf16.gmra.mxu0 %v6058_v26 }
  0x5e   : > { %1039 = vmatmul.bf16.gmra.mxu1 %v6060_v27  ;;  %1128 = vmatmul.bf16.gmra.mxu2 %v6058_v26 }
  0x5f   : > { %1217 = vmatmul.bf16.gmra.mxu3 %v6060_v27 }
  0x6d   : > { %955 = vmatmul.bf16.gmra.mxu0 %v6070_v32 }
  0x6e   : > { %1044 = vmatmul.bf16.gmra.mxu1 %v6072_v33  ;;  %1133 = vmatmul.bf16.gmra.mxu2 %v6070_v32 }
  0x6f   : > { %1222 = vmatmul.bf16.gmra.mxu3 %v6072_v33 }
  0x7d   : > { %960 = vmatmul.bf16.gmra.mxu0 %v6106_v52 }
  0x7e   : > { %1049 = vmatmul.bf16.gmra.mxu1 %v6108_v53  ;;  %1138 = vmatmul.bf16.gmra.mxu2 %v6106_v52 }
  0x7f   : > { %1227 = vmatmul.bf16.gmra.mxu3 %v6108_v53 }
  0x8d   : > { %965 = vmatmul.bf16.gmra.mxu0 %v6118_v58 }
  0x8e   : > { %1054 = vmatmul.bf16.gmra.mxu1 %v6120_v59  ;;  %1143 = vmatmul.bf16.gmra.mxu2 %v6118_v58 }
  0x8f   : > { %1232 = vmatmul.bf16.gmra.mxu3 %v6120_v59 }
  0x9d   : > { %970 = vmatmul.bf16.gmra.mxu0 %v6154_v16 }
  0x9e   : > { %1059 = vmatmul.bf16.gmra.mxu1 %v6156_v17  ;;  %1148 = vmatmul.bf16.gmra.mxu2 %v6154_v16 }
  0x9f   : > { %1237 = vmatmul.bf16.gmra.mxu3 %v6156_v17 }
  0xaa   : > { %v936_v25 = vpop.f32.mrf.mxu0 }
  0xab   : > { %v937_v29 = vadd.f32 %v936_v25, %v6167_v21  ;;  %v1025_v30 = vpop.f32.mrf.mxu1 }
  0xad   : > { %v1026_v31 = vadd.f32 %v1025_v30, %v937_v29  ;;  %975 = vmatmul.bf16.gmra.mxu0 %v6171_v24 }
  0xae   : > { %1064 = vmatmul.bf16.gmra.mxu1 %v6173_v28  ;;  %1153 = vmatmul.bf16.gmra.mxu2 %v6171_v24 }
  0xaf   : > { %1242 = vmatmul.bf16.gmra.mxu3 %v6173_v28  ;;  %v1639_v62 = vmax.f32 %v1026_v31, 0.0 }
  0xb1   : > { %v1114_v41 = vpop.f32.mrf.mxu2 }
  0xb2   : > { %v1115_v45 = vadd.f32 %v1114_v41, %v6179_v34  ;;  %v1203_v46 = vpop.f32.mrf.mxu3  ;;  %v938_v48 = vpop.f32.mrf.mxu0 }
  0xb3   : > { %v939_v50 = vadd.f32 %v938_v48, %v6167_v21  ;;  %v1027_v51 = vpop.f32.mrf.mxu1  ;;  %v6232_v48 = vor.u32 %v5465_v40, %v4626_v39  ;;  %v5515_v39 = vld [vmem:[%s8077_s1 + $0x134] sm:$0xf0] }
  0xb4   : > { %v1204_v54 = vadd.f32 %v1203_v46, %v1115_v45  ;;  %v4628_v45 = vld [vmem:[%s5950_s14 + $0xa8] sm:$0xf0] }
  0xb5   : > { %v1028_v55 = vadd.f32 %v1027_v51, %v939_v50 }
  0xb6   : > { %v1640_v20 = vmax.f32 %v1204_v54, 0.0 }
  0xb7   : > { %v1643_v63 = vmax.f32 %v1028_v55, 0.0  ;;  %v6237_v55 = vor.u32 %v5464_v44, %v4628_v45  ;;  %v4636_v44 = vld [vmem:[%s5950_s14 + $0xb8] sm:$0xf0] }
  0xb9   : > { %v6212_v5 = vpack.c.bf16 %v1643_v63, %v1639_v62  ;;  %v1116_v6 = vpop.f32.mrf.mxu2 }
  0xba   : > { %v1117_v10 = vadd.f32 %v1116_v6, %v6179_v34  ;;  %v1205_v11 = vpop.f32.mrf.mxu3  ;;  %v941_v12 = vpop.f32.mrf.mxu0  ;;  %v4698_v6 = vld [vmem:[%s8077_s1 + $0x28] sm:$0xf] }
  0xbb   : > { %v942_v14 = vadd.f32 %v941_v12, %v6167_v21  ;;  %v1030_v15 = vpop.f32.mrf.mxu1 }
  0xbc   : > { %v1206_v18 = vadd.f32 %v1205_v11, %v1117_v10  ;;  %v5483_v10 = vld [vmem:[%s8077_s1 + $0x34] sm:$0xf0]  ;;  %v5513_v11 = vld [vmem:[%s8077_s1 + $0x12c] sm:$0xf] }
  0xbd   : > { %v1031_v19 = vadd.f32 %v1030_v15, %v942_v14  ;;  %980 = vmatmul.bf16.gmra.mxu0 %v6214_v7  ;;  %v4699_v15 = vor.u32 %v5483_v10, %v4698_v6 }
  0xbe   : > { %v1644_v22 = vmax.f32 %v1206_v18, 0.0  ;;  %1069 = vmatmul.bf16.gmra.mxu1 %v6217_v13  ;;  %1158 = vmatmul.bf16.gmra.mxu2 %v6214_v7  ;;  %v4828_v18 = vld [vmem:[%s8077_s1 + $0x138] sm:$0xf0] }
  0xbf   : > { %1247 = vmatmul.bf16.gmra.mxu3 %v6217_v13  ;;  %v1647_v41 = vmax.f32 %v1031_v19, 0.0  ;;  %1289 = vmatpush.bf16.msrb.mxu0 %v4699_v15 }
  0xc0   : > { %v6224_v23 = vpack.c.bf16 %v1644_v22, %v1640_v20 }
  0xc1   : > { %v1119_v25 = vpop.f32.mrf.mxu2 }
  0xc2   : > { %v1120_v29 = vadd.f32 %v1119_v25, %v6179_v34  ;;  %v1208_v30 = vpop.f32.mrf.mxu3  ;;  %v943_v31 = vpop.f32.mrf.mxu0  ;;  %v4831_v25 = vor.u32 %v5513_v11, %v4828_v18 }
  0xc3   : > { %v944_v35 = vadd.f32 %v943_v31, %v6167_v21  ;;  %v1032_v36 = vpop.f32.mrf.mxu1 }
  0xc4   : > { %v1209_v37 = vadd.f32 %v1208_v30, %v1120_v29  ;;  %1556 = vmatpush.bf16.msrb.mxu3 %v4831_v25  ;;  %v4642_v25 = vld [vmem:[%s5950_s14 + $0xc0] sm:$0xf] }
  0xc5   : > { %v1033_v38 = vadd.f32 %v1032_v36, %v944_v35  ;;  %v4634_v36 = vld [vmem:[%s5950_s14 + $0xb0] sm:$0xf] }
  0xc6   : > { %v1648_v62 = vmax.f32 %v1209_v37, 0.0  ;;  %v5467_v37 = vld [vmem:[%s5950_s14 + $0xb4] sm:$0xf0] }
  0xc7   : > { %v1651_v42 = vmax.f32 %v1033_v38, 0.0  ;;  %v4826_v38 = vld [vmem:[%s8077_s1 + $0x128] sm:$0xf] }
  0xc8   : > { %v4827_v45 = vor.u32 %v5515_v39, %v4826_v38 }
  0xc9   : > { %v1121_v46 = vpop.f32.mrf.mxu2  ;;  %v6234_v49 = vpack.c.bf16 %v1651_v42, %v1647_v41  ;;  %v5466_v42 = vld [vmem:[%s5950_s14 + $0xb4] sm:$0xf] }
  0xca   : > { %v1122_v50 = vadd.f32 %v1121_v46, %v6179_v34  ;;  %v1210_v51 = vpop.f32.mrf.mxu3  ;;  %v946_v54 = vpop.f32.mrf.mxu0  ;;  %1378 = vmatpush.bf16.msrb.mxu1 %v4827_v45 }
  0xcb   : > { %v947_v56 = vadd.f32 %v946_v54, %v6167_v21  ;;  %v1035_v57 = vpop.f32.mrf.mxu1 }
  0xcc   : > { %v1211_v60 = vadd.f32 %v1210_v51, %v1122_v50  ;;  %v6276_v50 = vor.u32 %v5467_v37, %v4634_v36  ;;  %v4644_v36 = vld [vmem:[%s5950_s14 + $0xc8] sm:$0xf0] }
  0xcd   : > { %v1036_v61 = vadd.f32 %v1035_v57, %v947_v56  ;;  %985 = vmatmul.bf16.gmra.mxu0 %v6232_v48 }
  0xce   : > { %v1652_v63 = vmax.f32 %v1211_v60, 0.0  ;;  %1074 = vmatmul.bf16.gmra.mxu1 %v6237_v55  ;;  %1163 = vmatmul.bf16.gmra.mxu2 %v6232_v48  ;;  %v6281_v60 = vor.u32 %v5466_v42, %v4636_v44 }
  0xcf   : > { %1252 = vmatmul.bf16.gmra.mxu3 %v6237_v55  ;;  %v1655_v40 = vmax.f32 %v1036_v61, 0.0 }
  0xd0   : > { %v6259_v12 = vpack.c.bf16 %v1652_v63, %v1648_v62 }
  0xd1   : > { %v1124_v14 = vpop.f32.mrf.mxu2 }
  0xd2   : > { %v1125_v19 = vadd.f32 %v1124_v14, %v6179_v34  ;;  %v1213_v20 = vpop.f32.mrf.mxu3  ;;  %v948_v22 = vpop.f32.mrf.mxu0 }
  0xd3   : > { %v949_v29 = vadd.f32 %v948_v22, %v6167_v21  ;;  %v1037_v30 = vpop.f32.mrf.mxu1 }
  0xd4   : > { %v1214_v31 = vadd.f32 %v1213_v20, %v1125_v19 }
  0xd5   : > { %v1038_v35 = vadd.f32 %v1037_v30, %v949_v29  ;;  %v5469_v29 = vld [vmem:[%s5950_s14 + $0xc4] sm:$0xf0] }
  0xd6   : > { %v1656_v1 = vmax.f32 %v1214_v31, 0.0  ;;  %v6296_v38 = vor.u32 %v5469_v29, %v4642_v25 }
  0xd7   : > { %v1659_v41 = vmax.f32 %v1038_v35, 0.0  ;;  %v5468_v35 = vld [vmem:[%s5950_s14 + $0xc4] sm:$0xf] }
  0xd8   : > { %v6301_v44 = vor.u32 %v5468_v35, %v4644_v36  ;;  %v4650_v36 = vld [vmem:[%s5950_s14 + $0xd0] sm:$0xf] }
  0xd9   : > { %v1126_v46 = vpop.f32.mrf.mxu2  ;;  %v6278_v51 = vpack.c.bf16 %v1659_v41, %v1655_v40 }
  0xda   : > { %v1127_v54 = vadd.f32 %v1126_v46, %v6179_v34  ;;  %v1215_v56 = vpop.f32.mrf.mxu3  ;;  %v951_v57 = vpop.f32.mrf.mxu0 }
  0xdb   : > { %v952_v62 = vadd.f32 %v951_v57, %v6167_v21  ;;  %v1040_v63 = vpop.f32.mrf.mxu1 }
  0xdc   : > { %v1216_v61 = vadd.f32 %v1215_v56, %v1127_v54 }
  0xdd   : > { %v1041_v0 = vadd.f32 %v1040_v63, %v952_v62  ;;  %990 = vmatmul.bf16.gmra.mxu0 %v6276_v50  ;;  %v5477_v63 = vld [vmem:[%s8077_s1 + $0xc] sm:$0xf] }
  0xde   : > { %v1660_v4 = vmax.f32 %v1216_v61, 0.0  ;;  %1079 = vmatmul.bf16.gmra.mxu1 %v6281_v60  ;;  %1168 = vmatmul.bf16.gmra.mxu2 %v6276_v50  ;;  %v4684_v61 = vld [vmem:[%s8077_s1 + $0x18] sm:$0xf0] }
  0xdf   : > { %1257 = vmatmul.bf16.gmra.mxu3 %v6281_v60  ;;  %v1663_v30 = vmax.f32 %v1041_v0, 0.0  ;;  %v4687_v0 = vor.u32 %v5477_v63, %v4684_v61 }
  0xe0   : > { %v6288_v6 = vpack.c.bf16 %v1660_v4, %v1656_v1  ;;  %v4682_v1 = vld [vmem:[%s8077_s1 + $0x8] sm:$0xf]  ;;  %v5479_v4 = vld [vmem:[%s8077_s1 + $0x14] sm:$0xf0] }
  0xe1   : > { %v1129_v10 = vpop.f32.mrf.mxu2  ;;  %1468 = vmatpush.bf16.msrb.mxu2 %v4687_v0 }
  0xe2   : > { %v1130_v11 = vadd.f32 %v1129_v10, %v6179_v34  ;;  %v1218_v14 = vpop.f32.mrf.mxu3  ;;  %v953_v15 = vpop.f32.mrf.mxu0  ;;  %v5509_v10 = vld [vmem:[%s8077_s1 + $0x10c] sm:$0xf] }
  0xe3   : > { %v954_v18 = vadd.f32 %v953_v15, %v6167_v21  ;;  %v1042_v19 = vpop.f32.mrf.mxu1  ;;  %v4683_v15 = vor.u32 %v5479_v4, %v4682_v1 }
  0xe4   : > { %v1219_v20 = vadd.f32 %v1218_v14, %v1130_v11 }
  0xe5   : > { %v1043_v22 = vadd.f32 %v1042_v19, %v954_v18  ;;  %v4812_v18 = vld [vmem:[%s8077_s1 + $0x118] sm:$0xf0]  ;;  %1290 = vmatpush.bf16.msrb.mxu0 %v4683_v15 }
  0xe6   : > { %v1664_v57 = vmax.f32 %v1219_v20, 0.0  ;;  %v4815_v25 = vor.u32 %v5509_v10, %v4812_v18 }
  0xe7   : > { %v1667_v31 = vmax.f32 %v1043_v22, 0.0 }
  0xe8   : > { %1557 = vmatpush.bf16.msrb.mxu3 %v4815_v25 }
  0xe9   : > { %v1131_v37 = vpop.f32.mrf.mxu2  ;;  %v6298_v39 = vpack.c.bf16 %v1667_v31, %v1663_v30 }
  0xea   : > { %v1132_v40 = vadd.f32 %v1131_v37, %v6179_v34  ;;  %v1220_v41 = vpop.f32.mrf.mxu3  ;;  %v956_v42 = vpop.f32.mrf.mxu0  ;;  %v5471_v37 = vld [vmem:[%s5950_s14 + $0xd4] sm:$0xf0] }
  0xeb   : > { %v957_v45 = vadd.f32 %v956_v42, %v6167_v21  ;;  %v1045_v46 = vpop.f32.mrf.mxu1  ;;  %v6340_v63 = vor.u32 %v5471_v37, %v4650_v36 }
  0xec   : > { %v1221_v54 = vadd.f32 %v1220_v41, %v1132_v40  ;;  %v4810_v40 = vld [vmem:[%s8077_s1 + $0x108] sm:$0xf]  ;;  %v5511_v41 = vld [vmem:[%s8077_s1 + $0x114] sm:$0xf0] }
  0xed   : > { %v1046_v56 = vadd.f32 %v1045_v46, %v957_v45  ;;  %995 = vmatmul.bf16.gmra.mxu0 %v6296_v38  ;;  %v5470_v46 = vld [vmem:[%s5950_s14 + $0xd4] sm:$0xf] }
  0xee   : > { %v1668_v62 = vmax.f32 %v1221_v54, 0.0  ;;  %1084 = vmatmul.bf16.gmra.mxu1 %v6301_v44  ;;  %1173 = vmatmul.bf16.gmra.mxu2 %v6296_v38  ;;  %v4652_v54 = vld [vmem:[%s5950_s14 + $0xd8] sm:$0xf0] }
  0xef   : > { %1262 = vmatmul.bf16.gmra.mxu3 %v6301_v44  ;;  %v1671_v42 = vmax.f32 %v1046_v56, 0.0  ;;  %v6345_v10 = vor.u32 %v5470_v46, %v4652_v54  ;;  %v5472_v54 = vld [vmem:[%s5950_s14 + $0xe4] sm:$0xf] }
  0xf0   : > { %v6323_v11 = vpack.c.bf16 %v1668_v62, %v1664_v57  ;;  %v4811_v57 = vor.u32 %v5511_v41, %v4810_v40  ;;  %v4658_v41 = vld [vmem:[%s5950_s14 + $0xe0] sm:$0xf] }
  0xf1   : > { %v1134_v14 = vpop.f32.mrf.mxu2 }
  0xf2   : > { %v1135_v19 = vadd.f32 %v1134_v14, %v6179_v34  ;;  %v1223_v20 = vpop.f32.mrf.mxu3  ;;  %v958_v22 = vpop.f32.mrf.mxu0  ;;  %1379 = vmatpush.bf16.msrb.mxu1 %v4811_v57  ;;  %v4660_v57 = vld [vmem:[%s5950_s14 + $0xe8] sm:$0xf0] }
  0xf3   : > { %v959_v29 = vadd.f32 %v958_v22, %v6167_v21  ;;  %v1047_v30 = vpop.f32.mrf.mxu1 }
  0xf4   : > { %v1224_v31 = vadd.f32 %v1223_v20, %v1135_v19 }
  0xf5   : > { %v1048_v35 = vadd.f32 %v1047_v30, %v959_v29 }
  0xf6   : > { %v1672_v19 = vmax.f32 %v1224_v31, 0.0 }
  0xf7   : > { %v1675_v45 = vmax.f32 %v1048_v35, 0.0 }
  0xf9   : > { %v1136_v62 = vpop.f32.mrf.mxu2  ;;  %v6342_v61 = vpack.c.bf16 %v1675_v45, %v1671_v42  ;;  %v5473_v42 = vld [vmem:[%s5950_s14 + $0xe4] sm:$0xf0] }
  0xfa   : > { %v1137_v0 = vadd.f32 %v1136_v62, %v6179_v34  ;;  %v1225_v1 = vpop.f32.mrf.mxu3  ;;  %v961_v4 = vpop.f32.mrf.mxu0 }
  0xfb   : > { %v962_v14 = vadd.f32 %v961_v4, %v6167_v21  ;;  %v1050_v15 = vpop.f32.mrf.mxu1 }
  0xfc   : > { %v1226_v56 = vadd.f32 %v1225_v1, %v1137_v0  ;;  %v6360_v0 = vor.u32 %v5473_v42, %v4658_v41 }
  0xfd   : > { %v1051_v18 = vadd.f32 %v1050_v15, %v962_v14  ;;  %1000 = vmatmul.bf16.gmra.mxu0 %v6340_v63 }
  0xfe   : > { %v1676_v20 = vmax.f32 %v1226_v56, 0.0  ;;  %1089 = vmatmul.bf16.gmra.mxu1 %v6345_v10  ;;  %1178 = vmatmul.bf16.gmra.mxu2 %v6340_v63  ;;  %v6365_v56 = vor.u32 %v5472_v54, %v4660_v57 }
  0xff   : > { %1267 = vmatmul.bf16.gmra.mxu3 %v6345_v10  ;;  %v1679_v45 = vmax.f32 %v1051_v18, 0.0 }
 0x100   : > { %v6352_v22 = vpack.c.bf16 %v1676_v20, %v1672_v19 }
 0x101   : > { %v1139_v25 = vpop.f32.mrf.mxu2 }
 0x102   : > { %v1140_v29 = vadd.f32 %v1139_v25, %v6179_v34  ;;  %v1228_v30 = vpop.f32.mrf.mxu3  ;;  %v963_v35 = vpop.f32.mrf.mxu0 }
 0x103   : > { %v964_v36 = vadd.f32 %v963_v35, %v6167_v21  ;;  %v1052_v37 = vpop.f32.mrf.mxu1  ;;  %v5563_v35 = vld [vmem:[%s8079_s3 + $0xb8] sm:$0xff] }
 0x104   : > { %v1229_v31 = vadd.f32 %v1228_v30, %v1140_v29  ;;  %2269 = vmatpush.bf16.msra.mxu2 %v5563_v35 }
 0x105   : > { %v1053_v40 = vadd.f32 %v1052_v37, %v964_v36  ;;  %v5547_v36 = vld [vmem:[%s8079_s3 + $0x38] sm:$0xff] }
 0x106   : > { %v1680_v18 = vmax.f32 %v1229_v31, 0.0  ;;  %v5571_v37 = vld [vmem:[%s8079_s3 + $0xf8] sm:$0xff]  ;;  %2091 = vmatpush.bf16.msra.mxu0 %v5547_v36 }
 0x107   : > { %v1683_v46 = vmax.f32 %v1053_v40, 0.0  ;;  %2358 = vmatpush.bf16.msra.mxu3 %v5571_v37 }
 0x109   : > { %v1141_v62 = vpop.f32.mrf.mxu2  ;;  %v6362_v1 = vpack.c.bf16 %v1683_v46, %v1679_v45 }
 0x10a   : > { %v1142_v4 = vadd.f32 %v1141_v62, %v6179_v34  ;;  %v1230_v14 = vpop.f32.mrf.mxu3  ;;  %v966_v15 = vpop.f32.mrf.mxu0 }
 0x10b   : > { %8107 = vst [vmem:[#allocation2_spill] sm:$0xff] %v6362_v1  ;;  %v967_v19 = vadd.f32 %v966_v15, %v6167_v21  ;;  %v1055_v20 = vpop.f32.mrf.mxu1  ;;  %v5555_v15 = vld [vmem:[%s8079_s3 + $0x78] sm:$0xff] }
 0x10c   : > { %v1231_v25 = vadd.f32 %v1230_v14, %v1142_v4  ;;  %v4666_v4 = vld [vmem:[%s5950_s14 + $0xf0] sm:$0xf]  ;;  %v5475_v14 = vld [vmem:[%s5950_s14 + $0xf4] sm:$0xf0]  ;;  %2180 = vmatpush.bf16.msra.mxu1 %v5555_v15 }
 0x10d   : > { %v1056_v29 = vadd.f32 %v1055_v20, %v967_v19  ;;  %1005 = vmatmul.bf16.gmra.mxu0 %v6360_v0  ;;  %v6392_v35 = vor.u32 %v5475_v14, %v4666_v4 }
 0x10e   : > { %v1684_v30 = vmax.f32 %v1231_v25, 0.0  ;;  %1094 = vmatmul.bf16.gmra.mxu1 %v6365_v56  ;;  %1183 = vmatmul.bf16.gmra.mxu2 %v6360_v0  ;;  %v5474_v25 = vld [vmem:[%s5950_s14 + $0xf4] sm:$0xf] }
 0x10f   : > { %1272 = vmatmul.bf16.gmra.mxu3 %v6365_v56  ;;  %v1687_v19 = vmax.f32 %v1056_v29, 0.0 }
 0x110   : > { %v6381_v31 = vpack.c.bf16 %v1684_v30, %v1680_v18  ;;  %v4668_v18 = vld [vmem:[%s5950_s14 + $0xf8] sm:$0xf0] }
 0x111   : > { %v1144_v40 = vpop.f32.mrf.mxu2 }
 0x112   : > { %8108 = vst [vmem:[#allocation3_spill] sm:$0xff] %v6381_v31  ;;  %v1145_v41 = vadd.f32 %v1144_v40, %v6179_v34  ;;  %v1233_v42 = vpop.f32.mrf.mxu3  ;;  %v968_v45 = vpop.f32.mrf.mxu0 }
 0x113   : > { %v969_v46 = vadd.f32 %v968_v45, %v6167_v21  ;;  %v1057_v54 = vpop.f32.mrf.mxu1 }
 0x114   : > { %v1234_v57 = vadd.f32 %v1233_v42, %v1145_v41  ;;  %v6397_v42 = vor.u32 %v5474_v25, %v4668_v18 }
 0x115   : > { %v1058_v62 = vadd.f32 %v1057_v54, %v969_v46 }
 0x117   : > { %v1691_v20 = vmax.f32 %v1058_v62, 0.0  ;;  %v1688_v62 = vmax.f32 %v1234_v57, 0.0 }
 0x119   : > { %v1146_v30 = vpop.f32.mrf.mxu2  ;;  %v6394_v36 = vpack.c.bf16 %v1691_v20, %v1687_v19 }
 0x11a   : > { %v1147_v37 = vadd.f32 %v1146_v30, %v6179_v34  ;;  %v1235_v40 = vpop.f32.mrf.mxu3  ;;  %v971_v41 = vpop.f32.mrf.mxu0 }
 0x11b   : > { %8109 = vst [vmem:[#allocation4_spill] sm:$0xff] %v6394_v36  ;;  %v972_v45 = vadd.f32 %v971_v41, %v6167_v21  ;;  %v1060_v46 = vpop.f32.mrf.mxu1 }
 0x11c   : > { %v1236_v54 = vadd.f32 %v1235_v40, %v1147_v37 }
 0x11d   : > { %v1061_v29 = vadd.f32 %v1060_v46, %v972_v45  ;;  %1010 = vmatmul.bf16.gmra.mxu0 %v6392_v35 }
 0x11e   : > { %v1692_v15 = vmax.f32 %v1236_v54, 0.0  ;;  %1099 = vmatmul.bf16.gmra.mxu1 %v6397_v42  ;;  %1188 = vmatmul.bf16.gmra.mxu2 %v6392_v35 }
 0x11f   : > { %1277 = vmatmul.bf16.gmra.mxu3 %v6397_v42  ;;  %v1695_v57 = vmax.f32 %v1061_v29, 0.0  ;;  %v5562_v29 = vld [vmem:[%s8079_s3 + $0xb0] sm:$0xff] }
 0x120   : > { %v6404_v4 = vpack.c.bf16 %v1692_v15, %v1688_v62  ;;  %2270 = vmatpush.bf16.msra.mxu2 %v5562_v29 }
 0x121   : > { %v1149_v14 = vpop.f32.mrf.mxu2 }
 0x122   : > { %8110 = vst [vmem:[#allocation5_spill] sm:$0xff] %v6404_v4  ;;  %v1150_v19 = vadd.f32 %v1149_v14, %v6179_v34  ;;  %v1238_v20 = vpop.f32.mrf.mxu3  ;;  %v973_v25 = vpop.f32.mrf.mxu0 }
 0x123   : > { %v974_v18 = vadd.f32 %v973_v25, %v6167_v21  ;;  %v1062_v30 = vpop.f32.mrf.mxu1 }
 0x124   : > { %v1239_v37 = vadd.f32 %v1238_v20, %v1150_v19  ;;  %v5546_v19 = vld [vmem:[%s8079_s3 + $0x30] sm:$0xff] }
 0x125   : > { %v1063_v40 = vadd.f32 %v1062_v30, %v974_v18  ;;  %2092 = vmatpush.bf16.msra.mxu0 %v5546_v19 }
 0x126   : > { %v1696_v25 = vmax.f32 %v1239_v37, 0.0 }
 0x127   : > { %v1699_v41 = vmax.f32 %v1063_v40, 0.0 }
 0x129   : > { %v1151_v45 = vpop.f32.mrf.mxu2  ;;  %v6408_v46 = vpack.c.bf16 %v1699_v41, %v1695_v57  ;;  %v5554_v41 = vld [vmem:[%s8079_s3 + $0x70] sm:$0xff] }
 0x12a   : > { %v1152_v54 = vadd.f32 %v1151_v45, %v6179_v34  ;;  %v1240_v36 = vpop.f32.mrf.mxu3  ;;  %v976_v62 = vpop.f32.mrf.mxu0  ;;  %2181 = vmatpush.bf16.msra.mxu1 %v5554_v41 }
 0x12b   : > { %v977_v15 = vadd.f32 %v976_v62, %v6167_v21  ;;  %v1065_v4 = vpop.f32.mrf.mxu1 }
 0x12c   : > { %v1241_v14 = vadd.f32 %v1240_v36, %v1152_v54  ;;  %v5570_v36 = vld [vmem:[%s8079_s3 + $0xf0] sm:$0xff] }
 0x12d   : > { %v1066_v31 = vadd.f32 %v1065_v4, %v977_v15  ;;  %1291 = vmatmul.bf16.vlgmr.msrb.gmra.mxu0 %v5968_v43  ;;  %2359 = vmatpush.bf16.msra.mxu3 %v5570_v36 }
 0x12e   : > { %v1700_v1 = vmax.f32 %v1241_v14, 0.0  ;;  %1380 = vmatmul.bf16.vlgmr.msrb.gmra.mxu1 %v5976_v47  ;;  %1469 = vmatmul.bf16.vlgmr.msrb.gmra.mxu2 %v5968_v43 }
 0x12f   : > { %1558 = vmatmul.bf16.vlgmr.msrb.gmra.mxu3 %v5976_v47  ;;  %v1703_v45 = vmax.f32 %v1066_v31, 0.0 }
 0x130   : > { %v6425_v4 = vpack.c.bf16 %v1700_v1, %v1696_v25 }
 0x131   : > { %v1154_v20 = vpop.f32.mrf.mxu2 }
 0x132   : > { %v1155_v43 = vadd.f32 %v1154_v20, %v6179_v34  ;;  %v1243_v47 = vpop.f32.mrf.mxu3  ;;  %v978_v18 = vpop.f32.mrf.mxu0 }
 0x133   : > { %v979_v30 = vadd.f32 %v978_v18, %v6167_v21  ;;  %v1067_v37 = vpop.f32.mrf.mxu1 }
 0x134   : > { %v1244_v40 = vadd.f32 %v1243_v47, %v1155_v43 }
 0x135   : > { %v1068_v57 = vadd.f32 %v1067_v37, %v979_v30 }
 0x136   : > { %v1704_v43 = vmax.f32 %v1244_v40, 0.0 }
 0x137   : > { %v1707_v1 = vmax.f32 %v1068_v57, 0.0 }
 0x139   : > { %v1156_v54 = vpop.f32.mrf.mxu2  ;;  %v6432_v62 = vpack.c.bf16 %v1707_v1, %v1703_v45 }
 0x13a   : > { %v1157_v15 = vadd.f32 %v1156_v54, %v6179_v34  ;;  %v1245_v14 = vpop.f32.mrf.mxu3  ;;  %v981_v25 = vpop.f32.mrf.mxu0 }
 0x13b   : > { %v982_v29 = vadd.f32 %v981_v25, %v6167_v21  ;;  %v1070_v19 = vpop.f32.mrf.mxu1 }
 0x13c   : > { %v1246_v36 = vadd.f32 %v1245_v14, %v1157_v15 }
 0x13d   : > { %v1071_v20 = vadd.f32 %v1070_v19, %v982_v29  ;;  %1296 = vmatmul.bf16.gmra.mxu0 %v6010_v2 }
 0x13e   : > { %v1708_v47 = vmax.f32 %v1246_v36, 0.0  ;;  %1385 = vmatmul.bf16.gmra.mxu1 %v6012_v3  ;;  %1474 = vmatmul.bf16.gmra.mxu2 %v6010_v2 }
 0x13f   : > { %1563 = vmatmul.bf16.gmra.mxu3 %v6012_v3  ;;  %v1711_v40 = vmax.f32 %v1071_v20, 0.0  ;;  %v5561_v20 = vld [vmem:[%s8079_s3 + $0xa8] sm:$0xff] }
 0x140   : > { %v6440_v31 = vpack.c.bf16 %v1708_v47, %v1704_v43  ;;  %2271 = vmatpush.bf16.msra.mxu2 %v5561_v20 }
 0x141   : > { %v1159_v18 = vpop.f32.mrf.mxu2 }
 0x142   : > { %v1160_v30 = vadd.f32 %v1159_v18, %v6179_v34  ;;  %v1248_v37 = vpop.f32.mrf.mxu3  ;;  %v983_v57 = vpop.f32.mrf.mxu0 }
 0x143   : > { %v984_v41 = vadd.f32 %v983_v57, %v6167_v21  ;;  %v1072_v45 = vpop.f32.mrf.mxu1 }
 0x144   : > { %v1249_v1 = vadd.f32 %v1248_v37, %v1160_v30  ;;  %v5545_v30 = vld [vmem:[%s8079_s3 + $0x28] sm:$0xff] }
 0x145   : > { %v1073_v54 = vadd.f32 %v1072_v45, %v984_v41  ;;  %v5569_v37 = vld [vmem:[%s8079_s3 + $0xe8] sm:$0xff]  ;;  %2093 = vmatpush.bf16.msra.mxu0 %v5545_v30 }
 0x146   : > { %v1712_v18 = vmax.f32 %v1249_v1, 0.0  ;;  %2360 = vmatpush.bf16.msra.mxu3 %v5569_v37 }
 0x147   : > { %v1715_v15 = vmax.f32 %v1073_v54, 0.0 }
 0x149   : > { %v1161_v14 = vpop.f32.mrf.mxu2  ;;  %v6444_v25 = vpack.c.bf16 %v1715_v15, %v1711_v40 }
 0x14a   : > { %v1162_v2 = vadd.f32 %v1161_v14, %v6179_v34  ;;  %v1250_v3 = vpop.f32.mrf.mxu3  ;;  %v986_v29 = vpop.f32.mrf.mxu0 }
 0x14b   : > { %v987_v19 = vadd.f32 %v986_v29, %v6167_v21  ;;  %v1075_v36 = vpop.f32.mrf.mxu1 }
 0x14c   : > { %v1251_v43 = vadd.f32 %v1250_v3, %v1162_v2  ;;  %v5553_v2 = vld [vmem:[%s8079_s3 + $0x68] sm:$0xff] }
 0x14d   : > { %v1076_v47 = vadd.f32 %v1075_v36, %v987_v19  ;;  %1301 = vmatmul.bf16.gmra.mxu0 %v6022_v8  ;;  %2182 = vmatpush.bf16.msra.mxu1 %v5553_v2 }
 0x14e   : > { %v1716_v57 = vmax.f32 %v1251_v43, 0.0  ;;  %1390 = vmatmul.bf16.gmra.mxu1 %v6024_v9  ;;  %1479 = vmatmul.bf16.gmra.mxu2 %v6022_v8 }
 0x14f   : > { %1568 = vmatmul.bf16.gmra.mxu3 %v6024_v9  ;;  %v1719_v3 = vmax.f32 %v1076_v47, 0.0 }
 0x150   : > { %v6461_v41 = vpack.c.bf16 %v1716_v57, %v1712_v18 }
 0x151   : > { %v1164_v45 = vpop.f32.mrf.mxu2 }
 0x152   : > { %v1165_v8 = vadd.f32 %v1164_v45, %v6179_v34  ;;  %v1253_v9 = vpop.f32.mrf.mxu3  ;;  %v988_v1 = vpop.f32.mrf.mxu0 }
 0x153   : > { %v989_v54 = vadd.f32 %v988_v1, %v6167_v21  ;;  %v1077_v40 = vpop.f32.mrf.mxu1 }
 0x154   : > { %v1254_v15 = vadd.f32 %v1253_v9, %v1165_v8 }
 0x155   : > { %v1078_v14 = vadd.f32 %v1077_v40, %v989_v54 }
 0x156   : > { %v1720_v8 = vmax.f32 %v1254_v15, 0.0 }
 0x157   : > { %v1723_v29 = vmax.f32 %v1078_v14, 0.0 }
 0x159   : > { %v1166_v19 = vpop.f32.mrf.mxu2  ;;  %v6468_v36 = vpack.c.bf16 %v1723_v29, %v1719_v3 }
 0x15a   : > { %v1167_v43 = vadd.f32 %v1166_v19, %v6179_v34  ;;  %v1255_v18 = vpop.f32.mrf.mxu3  ;;  %v991_v57 = vpop.f32.mrf.mxu0 }
 0x15b   : > { %v992_v20 = vadd.f32 %v991_v57, %v6167_v21  ;;  %v1080_v30 = vpop.f32.mrf.mxu1 }
 0x15c   : > { %v1256_v37 = vadd.f32 %v1255_v18, %v1167_v43 }
 0x15d   : > { %v1081_v45 = vadd.f32 %v1080_v30, %v992_v20  ;;  %1306 = vmatmul.bf16.gmra.mxu0 %v6058_v26 }
 0x15e   : > { %v1724_v9 = vmax.f32 %v1256_v37, 0.0  ;;  %1395 = vmatmul.bf16.gmra.mxu1 %v6060_v27  ;;  %1484 = vmatmul.bf16.gmra.mxu2 %v6058_v26 }
 0x15f   : > { %1573 = vmatmul.bf16.gmra.mxu3 %v6060_v27  ;;  %v1727_v15 = vmax.f32 %v1081_v45, 0.0  ;;  %v5560_v45 = vld [vmem:[%s8079_s3 + $0xa0] sm:$0xff] }
 0x160   : > { %v6476_v47 = vpack.c.bf16 %v1724_v9, %v1720_v8  ;;  %2272 = vmatpush.bf16.msra.mxu2 %v5560_v45 }
 0x161   : > { %v1169_v1 = vpop.f32.mrf.mxu2 }
 0x162   : > { %v1170_v54 = vadd.f32 %v1169_v1, %v6179_v34  ;;  %v1258_v40 = vpop.f32.mrf.mxu3  ;;  %v993_v14 = vpop.f32.mrf.mxu0 }
 0x163   : > { %v994_v2 = vadd.f32 %v993_v14, %v6167_v21  ;;  %v1082_v3 = vpop.f32.mrf.mxu1 }
 0x164   : > { %v1259_v29 = vadd.f32 %v1258_v40, %v1170_v54  ;;  %v5544_v54 = vld [vmem:[%s8079_s3 + $0x20] sm:$0xff] }
 0x165   : > { %v1083_v19 = vadd.f32 %v1082_v3, %v994_v2  ;;  %v5568_v40 = vld [vmem:[%s8079_s3 + $0xe0] sm:$0xff]  ;;  %2094 = vmatpush.bf16.msra.mxu0 %v5544_v54 }
 0x166   : > { %v1728_v1 = vmax.f32 %v1259_v29, 0.0  ;;  %2361 = vmatpush.bf16.msra.mxu3 %v5568_v40 }
 0x167   : > { %v1731_v43 = vmax.f32 %v1083_v19, 0.0 }
 0x169   : > { %v1171_v18 = vpop.f32.mrf.mxu2  ;;  %v6480_v57 = vpack.c.bf16 %v1731_v43, %v1727_v15 }
 0x16a   : > { %v1172_v26 = vadd.f32 %v1171_v18, %v6179_v34  ;;  %v1260_v27 = vpop.f32.mrf.mxu3  ;;  %v996_v20 = vpop.f32.mrf.mxu0 }
 0x16b   : > { %v997_v30 = vadd.f32 %v996_v20, %v6167_v21  ;;  %v1085_v37 = vpop.f32.mrf.mxu1 }
 0x16c   : > { %v1261_v8 = vadd.f32 %v1260_v27, %v1172_v26  ;;  %v5552_v26 = vld [vmem:[%s8079_s3 + $0x60] sm:$0xff] }
 0x16d   : > { %v1086_v9 = vadd.f32 %v1085_v37, %v997_v30  ;;  %1311 = vmatmul.bf16.gmra.mxu0 %v6070_v32  ;;  %2183 = vmatpush.bf16.msra.mxu1 %v5552_v26 }
 0x16e   : > { %v1732_v14 = vmax.f32 %v1261_v8, 0.0  ;;  %1400 = vmatmul.bf16.gmra.mxu1 %v6072_v33  ;;  %1489 = vmatmul.bf16.gmra.mxu2 %v6070_v32 }
 0x16f   : > { %1578 = vmatmul.bf16.gmra.mxu3 %v6072_v33  ;;  %v1735_v27 = vmax.f32 %v1086_v9, 0.0 }
 0x170   : > { %v6497_v2 = vpack.c.bf16 %v1732_v14, %v1728_v1 }
 0x171   : > { %v1174_v3 = vpop.f32.mrf.mxu2 }
 0x172   : > { %v1175_v32 = vadd.f32 %v1174_v3, %v6179_v34  ;;  %v1263_v33 = vpop.f32.mrf.mxu3  ;;  %v998_v29 = vpop.f32.mrf.mxu0 }
 0x173   : > { %v999_v19 = vadd.f32 %v998_v29, %v6167_v21  ;;  %v1087_v15 = vpop.f32.mrf.mxu1 }
 0x174   : > { %v1264_v43 = vadd.f32 %v1263_v33, %v1175_v32 }
 0x175   : > { %v1088_v18 = vadd.f32 %v1087_v15, %v999_v19 }
 0x176   : > { %v1736_v32 = vmax.f32 %v1264_v43, 0.0 }
 0x177   : > { %v1739_v20 = vmax.f32 %v1088_v18, 0.0 }
 0x179   : > { %v1176_v30 = vpop.f32.mrf.mxu2  ;;  %v6504_v37 = vpack.c.bf16 %v1739_v20, %v1735_v27 }
 0x17a   : > { %v1177_v8 = vadd.f32 %v1176_v30, %v6179_v34  ;;  %v1265_v1 = vpop.f32.mrf.mxu3  ;;  %v1001_v14 = vpop.f32.mrf.mxu0 }
 0x17b   : > { %v1002_v45 = vadd.f32 %v1001_v14, %v6167_v21  ;;  %v1090_v54 = vpop.f32.mrf.mxu1 }
 0x17c   : > { %v1266_v40 = vadd.f32 %v1265_v1, %v1177_v8 }
 0x17d   : > { %v1091_v3 = vadd.f32 %v1090_v54, %v1002_v45  ;;  %1316 = vmatmul.bf16.gmra.mxu0 %v6106_v52 }
 0x17e   : > { %v1740_v33 = vmax.f32 %v1266_v40, 0.0  ;;  %1405 = vmatmul.bf16.gmra.mxu1 %v6108_v53  ;;  %1494 = vmatmul.bf16.gmra.mxu2 %v6106_v52 }
 0x17f   : > { %1583 = vmatmul.bf16.gmra.mxu3 %v6108_v53  ;;  %v1743_v43 = vmax.f32 %v1091_v3, 0.0  ;;  %v5559_v3 = vld [vmem:[%s8079_s3 + $0x98] sm:$0xff] }
 0x180   : > { %v6512_v9 = vpack.c.bf16 %v1740_v33, %v1736_v32  ;;  %2273 = vmatpush.bf16.msra.mxu2 %v5559_v3 }
 0x181   : > { %v1179_v29 = vpop.f32.mrf.mxu2 }
 0x182   : > { %v1180_v19 = vadd.f32 %v1179_v29, %v6179_v34  ;;  %v1268_v15 = vpop.f32.mrf.mxu3  ;;  %v1003_v18 = vpop.f32.mrf.mxu0 }
 0x183   : > { %v1004_v26 = vadd.f32 %v1003_v18, %v6167_v21  ;;  %v1092_v27 = vpop.f32.mrf.mxu1 }
 0x184   : > { %v1269_v20 = vadd.f32 %v1268_v15, %v1180_v19  ;;  %v5543_v19 = vld [vmem:[%s8079_s3 + $0x18] sm:$0xff] }
 0x185   : > { %v1093_v30 = vadd.f32 %v1092_v27, %v1004_v26  ;;  %v5567_v15 = vld [vmem:[%s8079_s3 + $0xd8] sm:$0xff]  ;;  %2095 = vmatpush.bf16.msra.mxu0 %v5543_v19 }
 0x186   : > { %v1744_v29 = vmax.f32 %v1269_v20, 0.0  ;;  %2362 = vmatpush.bf16.msra.mxu3 %v5567_v15 }
 0x187   : > { %v1747_v8 = vmax.f32 %v1093_v30, 0.0 }
 0x189   : > { %v1181_v1 = vpop.f32.mrf.mxu2  ;;  %v6516_v14 = vpack.c.bf16 %v1747_v8, %v1743_v43 }
 0x18a   : > { %v1182_v52 = vadd.f32 %v1181_v1, %v6179_v34  ;;  %v1270_v53 = vpop.f32.mrf.mxu3  ;;  %v1006_v45 = vpop.f32.mrf.mxu0 }
 0x18b   : > { %v1007_v54 = vadd.f32 %v1006_v45, %v6167_v21  ;;  %v1095_v40 = vpop.f32.mrf.mxu1 }
 0x18c   : > { %v1271_v32 = vadd.f32 %v1270_v53, %v1182_v52  ;;  %v5551_v52 = vld [vmem:[%s8079_s3 + $0x58] sm:$0xff] }
 0x18d   : > { %v1096_v33 = vadd.f32 %v1095_v40, %v1007_v54  ;;  %1321 = vmatmul.bf16.gmra.mxu0 %v6118_v58  ;;  %2184 = vmatpush.bf16.msra.mxu1 %v5551_v52 }
 0x18e   : > { %v1748_v18 = vmax.f32 %v1271_v32, 0.0  ;;  %1410 = vmatmul.bf16.gmra.mxu1 %v6120_v59  ;;  %1499 = vmatmul.bf16.gmra.mxu2 %v6118_v58 }
 0x18f   : > { %1588 = vmatmul.bf16.gmra.mxu3 %v6120_v59  ;;  %v1751_v53 = vmax.f32 %v1096_v33, 0.0 }
 0x190   : > { %v6533_v26 = vpack.c.bf16 %v1748_v18, %v1744_v29 }
 0x191   : > { %v1184_v27 = vpop.f32.mrf.mxu2 }
 0x192   : > { %v1185_v58 = vadd.f32 %v1184_v27, %v6179_v34  ;;  %v1273_v59 = vpop.f32.mrf.mxu3  ;;  %v1008_v20 = vpop.f32.mrf.mxu0 }
 0x193   : > { %v1009_v30 = vadd.f32 %v1008_v20, %v6167_v21  ;;  %v1097_v43 = vpop.f32.mrf.mxu1 }
 0x194   : > { %v1274_v8 = vadd.f32 %v1273_v59, %v1185_v58 }
 0x195   : > { %v1098_v1 = vadd.f32 %v1097_v43, %v1009_v30 }
 0x196   : > { %v1752_v58 = vmax.f32 %v1274_v8, 0.0 }
 0x197   : > { %v1755_v45 = vmax.f32 %v1098_v1, 0.0 }
 0x199   : > { %v1186_v54 = vpop.f32.mrf.mxu2  ;;  %v6540_v40 = vpack.c.bf16 %v1755_v45, %v1751_v53 }
 0x19a   : > { %v1187_v32 = vadd.f32 %v1186_v54, %v6179_v34  ;;  %v1275_v29 = vpop.f32.mrf.mxu3  ;;  %v1011_v18 = vpop.f32.mrf.mxu0 }
 0x19b   : > { %v1012_v3 = vadd.f32 %v1011_v18, %v6167_v21  ;;  %v1100_v19 = vpop.f32.mrf.mxu1 }
 0x19c   : > { %v1276_v15 = vadd.f32 %v1275_v29, %v1187_v32 }
 0x19d   : > { %v1101_v27 = vadd.f32 %v1100_v19, %v1012_v3  ;;  %1326 = vmatmul.bf16.gmra.mxu0 %v6154_v16 }
 0x19e   : > { %v1756_v59 = vmax.f32 %v1276_v15, 0.0  ;;  %1415 = vmatmul.bf16.gmra.mxu1 %v6156_v17  ;;  %1504 = vmatmul.bf16.gmra.mxu2 %v6154_v16  ;;  %v5677_v16 = vld [vmem:[%s8078_s2] sm:$0xf] }
 0x19f   : > { %1593 = vmatmul.bf16.gmra.mxu3 %v6156_v17  ;;  %v1759_v8 = vmax.f32 %v1101_v27, 0.0  ;;  %v6555_v29 = vperm.slane %v5677_v16, 2 }
 0x1a0   : > { %v6548_v33 = vpack.c.bf16 %v1756_v59, %v1752_v58 }
 0x1a1   : > { %v1189_v20 = vpop.f32.mrf.mxu2 }
 0x1a2   : > { %v1190_v30 = vadd.f32 %v1189_v20, %v6179_v34  ;;  %v1278_v43 = vpop.f32.mrf.mxu3  ;;  %v1013_v1 = vpop.f32.mrf.mxu0 }
 0x1a3   : > { %v1014_v52 = vadd.f32 %v1013_v1, %v6167_v21  ;;  %v1102_v53 = vpop.f32.mrf.mxu1  ;;  %v5542_v1 = vld [vmem:[%s8079_s3 + $0x10] sm:$0xff] }
 0x1a4   : > { %v1279_v45 = vadd.f32 %v1278_v43, %v1190_v30  ;;  %v6564_v43 = vperm.slane %v5677_v16, 3  ;;  %2096 = vmatpush.bf16.msra.mxu0 %v5542_v1 }
 0x1a5   : > { %v1103_v54 = vadd.f32 %v1102_v53, %v1014_v52  ;;  %v5566_v52 = vld [vmem:[%s8079_s3 + $0xd0] sm:$0xff] }
 0x1a6   : > { %v1760_v27 = vmax.f32 %v1279_v45, 0.0  ;;  %2363 = vmatpush.bf16.msra.mxu3 %v5566_v52 }
 0x1a7   : > { %v1763_v32 = vmax.f32 %v1103_v54, 0.0 }
 0x1a9   : > { %v1191_v17 = vpop.f32.mrf.mxu2  ;;  %v6557_v18 = vpack.c.bf16 %v1763_v32, %v1759_v8 }
 0x1aa   : > { %v1192_v3 = vadd.f32 %v1191_v17, %v6179_v34  ;;  %v1280_v19 = vpop.f32.mrf.mxu3  ;;  %v1292_v15 = vpop.f32.mrf.mxu0  ;;  %v5558_v34 = vld [vmem:[%s8079_s3 + $0x90] sm:$0xff] }
 0x1ab   : > { %v1293_v21 = vadd.f32 %v1292_v15, %v6555_v29  ;;  %v1381_v58 = vpop.f32.mrf.mxu1  ;;  %2274 = vmatpush.bf16.msra.mxu2 %v5558_v34 }
 0x1ac   : > { %v1281_v59 = vadd.f32 %v1280_v19, %v1192_v3  ;;  %v5550_v3 = vld [vmem:[%s8079_s3 + $0x50] sm:$0xff] }
 0x1ad   : > { %v1382_v20 = vadd.f32 %v1381_v58, %v1293_v21  ;;  %1331 = vmatmul.bf16.gmra.mxu0 %v6171_v24  ;;  %2185 = vmatpush.bf16.msra.mxu1 %v5550_v3 }
 0x1ae   : > { %v1764_v30 = vmax.f32 %v1281_v59, 0.0  ;;  %1420 = vmatmul.bf16.gmra.mxu1 %v6173_v28  ;;  %1509 = vmatmul.bf16.gmra.mxu2 %v6171_v24 }
 0x1af   : > { %1598 = vmatmul.bf16.gmra.mxu3 %v6173_v28  ;;  %v1641_v19 = vmax.f32 %v1382_v20, 0.0 }
 0x1b0   : > { %v6576_v53 = vpack.c.bf16 %v1764_v30, %v1760_v27 }
 0x1b1   : > { %v1470_v45 = vpop.f32.mrf.mxu2 }
 0x1b2   : > { %v1471_v24 = vadd.f32 %v1470_v45, %v6564_v43  ;;  %v1559_v28 = vpop.f32.mrf.mxu3  ;;  %v1294_v54 = vpop.f32.mrf.mxu0 }
 0x1b3   : > { %v1295_v8 = vadd.f32 %v1294_v54, %v6555_v29  ;;  %v1383_v32 = vpop.f32.mrf.mxu1 }
 0x1b4   : > { %v1560_v16 = vadd.f32 %v1559_v28, %v1471_v24 }
 0x1b5   : > { %v1384_v17 = vadd.f32 %v1383_v32, %v1295_v8 }
 0x1b6   : > { %v1642_v24 = vmax.f32 %v1560_v16, 0.0 }
 0x1b7   : > { %v1645_v15 = vmax.f32 %v1384_v17, 0.0 }
 0x1b9   : > { %v6583_v21 = vpack.c.bf16 %v1645_v15, %v1641_v19  ;;  %v1472_v58 = vpop.f32.mrf.mxu2 }
 0x1ba   : > { %v1473_v59 = vadd.f32 %v1472_v58, %v6564_v43  ;;  %v1561_v27 = vpop.f32.mrf.mxu3  ;;  %v1297_v30 = vpop.f32.mrf.mxu0 }
 0x1bb   : > { %v1298_v34 = vadd.f32 %v1297_v30, %v6555_v29  ;;  %v1386_v1 = vpop.f32.mrf.mxu1 }
 0x1bc   : > { %v1562_v52 = vadd.f32 %v1561_v27, %v1473_v59 }
 0x1bd   : > { %v1387_v45 = vadd.f32 %v1386_v1, %v1298_v34  ;;  %1336 = vmatmul.bf16.gmra.mxu0 %v6214_v7 }
 0x1be   : > { %v1646_v28 = vmax.f32 %v1562_v52, 0.0  ;;  %1425 = vmatmul.bf16.gmra.mxu1 %v6217_v13  ;;  %1514 = vmatmul.bf16.gmra.mxu2 %v6214_v7 }
 0x1bf   : > { %1603 = vmatmul.bf16.gmra.mxu3 %v6217_v13  ;;  %v1649_v16 = vmax.f32 %v1387_v45, 0.0  ;;  %v5557_v45 = vld [vmem:[%s8079_s3 + $0x88] sm:$0xff] }
 0x1c0   : > { %v6591_v20 = vpack.c.bf16 %v1646_v28, %v1642_v24  ;;  %2275 = vmatpush.bf16.msra.mxu2 %v5557_v45 }
 0x1c1   : > { %v1475_v54 = vpop.f32.mrf.mxu2 }
 0x1c2   : > { %v1476_v8 = vadd.f32 %v1475_v54, %v6564_v43  ;;  %v1564_v32 = vpop.f32.mrf.mxu3  ;;  %v1299_v17 = vpop.f32.mrf.mxu0 }
 0x1c3   : > { %v1300_v3 = vadd.f32 %v1299_v17, %v6555_v29  ;;  %v1388_v19 = vpop.f32.mrf.mxu1 }
 0x1c4   : > { %v1565_v15 = vadd.f32 %v1564_v32, %v1476_v8  ;;  %v5541_v8 = vld [vmem:[%s8079_s3 + $0x8] sm:$0xff] }
 0x1c5   : > { %v1389_v58 = vadd.f32 %v1388_v19, %v1300_v3  ;;  %v5565_v32 = vld [vmem:[%s8079_s3 + $0xc8] sm:$0xff]  ;;  %2097 = vmatpush.bf16.msra.mxu0 %v5541_v8 }
 0x1c6   : > { %v1650_v54 = vmax.f32 %v1565_v15, 0.0  ;;  %2364 = vmatpush.bf16.msra.mxu3 %v5565_v32 }
 0x1c7   : > { %v1653_v59 = vmax.f32 %v1389_v58, 0.0 }
 0x1c9   : > { %v1477_v27 = vpop.f32.mrf.mxu2  ;;  %v6595_v30 = vpack.c.bf16 %v1653_v59, %v1649_v16 }
 0x1ca   : > { %v1478_v7 = vadd.f32 %v1477_v27, %v6564_v43  ;;  %v1566_v13 = vpop.f32.mrf.mxu3  ;;  %v1302_v34 = vpop.f32.mrf.mxu0 }
 0x1cb   : > { %v1303_v1 = vadd.f32 %v1302_v34, %v6555_v29  ;;  %v1391_v52 = vpop.f32.mrf.mxu1 }
 0x1cc   : > { %v1567_v24 = vadd.f32 %v1566_v13, %v1478_v7  ;;  %v5549_v7 = vld [vmem:[%s8079_s3 + $0x48] sm:$0xff] }
 0x1cd   : > { %v1392_v28 = vadd.f32 %v1391_v52, %v1303_v1  ;;  %1341 = vmatmul.bf16.gmra.mxu0 %v6232_v48  ;;  %2186 = vmatpush.bf16.msra.mxu1 %v5549_v7 }
 0x1ce   : > { %v1654_v17 = vmax.f32 %v1567_v24, 0.0  ;;  %1430 = vmatmul.bf16.gmra.mxu1 %v6237_v55  ;;  %1519 = vmatmul.bf16.gmra.mxu2 %v6232_v48 }
 0x1cf   : > { %1608 = vmatmul.bf16.gmra.mxu3 %v6237_v55  ;;  %v1657_v13 = vmax.f32 %v1392_v28, 0.0 }
 0x1d0   : > { %v6612_v3 = vpack.c.bf16 %v1654_v17, %v1650_v54 }
 0x1d1   : > { %v1480_v19 = vpop.f32.mrf.mxu2 }
 0x1d2   : > { %v1481_v48 = vadd.f32 %v1480_v19, %v6564_v43  ;;  %v1569_v55 = vpop.f32.mrf.mxu3  ;;  %v1304_v15 = vpop.f32.mrf.mxu0 }
 0x1d3   : > { %v1305_v58 = vadd.f32 %v1304_v15, %v6555_v29  ;;  %v1393_v16 = vpop.f32.mrf.mxu1 }
 0x1d4   : > { %v1570_v59 = vadd.f32 %v1569_v55, %v1481_v48 }
 0x1d5   : > { %v1394_v27 = vadd.f32 %v1393_v16, %v1305_v58 }
 0x1d6   : > { %v1658_v48 = vmax.f32 %v1570_v59, 0.0 }
 0x1d7   : > { %v1661_v34 = vmax.f32 %v1394_v27, 0.0 }
 0x1d9   : > { %v1482_v1 = vpop.f32.mrf.mxu2  ;;  %v6619_v52 = vpack.c.bf16 %v1661_v34, %v1657_v13 }
 0x1da   : > { %v1483_v24 = vadd.f32 %v1482_v1, %v6564_v43  ;;  %v1571_v54 = vpop.f32.mrf.mxu3  ;;  %v1307_v17 = vpop.f32.mrf.mxu0 }
 0x1db   : > { %v1308_v45 = vadd.f32 %v1307_v17, %v6555_v29  ;;  %v1396_v8 = vpop.f32.mrf.mxu1 }
 0x1dc   : > { %v1572_v32 = vadd.f32 %v1571_v54, %v1483_v24 }
 0x1dd   : > { %v1397_v19 = vadd.f32 %v1396_v8, %v1308_v45  ;;  %1346 = vmatmul.bf16.gmra.mxu0 %v6276_v50 }
 0x1de   : > { %v1662_v55 = vmax.f32 %v1572_v32, 0.0  ;;  %1435 = vmatmul.bf16.gmra.mxu1 %v6281_v60  ;;  %1524 = vmatmul.bf16.gmra.mxu2 %v6276_v50 }
 0x1df   : > { %1613 = vmatmul.bf16.gmra.mxu3 %v6281_v60  ;;  %v1665_v59 = vmax.f32 %v1397_v19, 0.0  ;;  %v5556_v19 = vld [vmem:[%s8079_s3 + $0x80] sm:$0xff] }
 0x1e0   : > { %v6627_v28 = vpack.c.bf16 %v1662_v55, %v1658_v48  ;;  %2276 = vmatpush.bf16.msra.mxu2 %v5556_v19 }
 0x1e1   : > { %v1485_v15 = vpop.f32.mrf.mxu2 }
 0x1e2   : > { %v1486_v58 = vadd.f32 %v1485_v15, %v6564_v43  ;;  %v1574_v16 = vpop.f32.mrf.mxu3  ;;  %v1309_v27 = vpop.f32.mrf.mxu0 }
 0x1e3   : > { %v1310_v7 = vadd.f32 %v1309_v27, %v6555_v29  ;;  %v1398_v13 = vpop.f32.mrf.mxu1 }
 0x1e4   : > { %v1575_v34 = vadd.f32 %v1574_v16, %v1486_v58  ;;  %v5540_v58 = vld [vmem:[%s8079_s3] sm:$0xff] }
 0x1e5   : > { %v1399_v1 = vadd.f32 %v1398_v13, %v1310_v7  ;;  %v5564_v16 = vld [vmem:[%s8079_s3 + $0xc0] sm:$0xff]  ;;  %2098 = vmatpush.bf16.msra.mxu0 %v5540_v58 }
 0x1e6   : > { %v1666_v15 = vmax.f32 %v1575_v34, 0.0  ;;  %2365 = vmatpush.bf16.msra.mxu3 %v5564_v16 }
 0x1e7   : > { %v1669_v24 = vmax.f32 %v1399_v1, 0.0 }
 0x1e9   : > { %v1487_v54 = vpop.f32.mrf.mxu2  ;;  %v6631_v17 = vpack.c.bf16 %v1669_v24, %v1665_v59 }
 0x1ea   : > { %v1488_v50 = vadd.f32 %v1487_v54, %v6564_v43  ;;  %v1576_v60 = vpop.f32.mrf.mxu3  ;;  %v1312_v45 = vpop.f32.mrf.mxu0 }
 0x1eb   : > { %v1313_v8 = vadd.f32 %v1312_v45, %v6555_v29  ;;  %v1401_v32 = vpop.f32.mrf.mxu1 }
 0x1ec   : > { %v1577_v48 = vadd.f32 %v1576_v60, %v1488_v50  ;;  %v5548_v50 = vld [vmem:[%s8079_s3 + $0x40] sm:$0xff] }
 0x1ed   : > { %v1402_v55 = vadd.f32 %v1401_v32, %v1313_v8  ;;  %1351 = vmatmul.bf16.gmra.mxu0 %v6296_v38  ;;  %2187 = vmatpush.bf16.msra.mxu1 %v5548_v50 }
 0x1ee   : > { %v1670_v27 = vmax.f32 %v1577_v48, 0.0  ;;  %1440 = vmatmul.bf16.gmra.mxu1 %v6301_v44  ;;  %1529 = vmatmul.bf16.gmra.mxu2 %v6296_v38 }
 0x1ef   : > { %1618 = vmatmul.bf16.gmra.mxu3 %v6301_v44  ;;  %v1673_v60 = vmax.f32 %v1402_v55, 0.0 }
 0x1f0   : > { %v6648_v7 = vpack.c.bf16 %v1670_v27, %v1666_v15 }
 0x1f1   : > { %v1490_v13 = vpop.f32.mrf.mxu2 }
 0x1f2   : > { %v1491_v38 = vadd.f32 %v1490_v13, %v6564_v43  ;;  %v1579_v44 = vpop.f32.mrf.mxu3  ;;  %v1314_v34 = vpop.f32.mrf.mxu0 }
 0x1f3   : > { %v1315_v1 = vadd.f32 %v1314_v34, %v6555_v29  ;;  %v1403_v59 = vpop.f32.mrf.mxu1 }
 0x1f4   : > { %v1580_v24 = vadd.f32 %v1579_v44, %v1491_v38 }
 0x1f5   : > { %v1404_v54 = vadd.f32 %v1403_v59, %v1315_v1 }
 0x1f6   : > { %v1674_v38 = vmax.f32 %v1580_v24, 0.0 }
 0x1f7   : > { %v1677_v45 = vmax.f32 %v1404_v54, 0.0 }
 0x1f9   : > { %v1492_v8 = vpop.f32.mrf.mxu2  ;;  %v6655_v32 = vpack.c.bf16 %v1677_v45, %v1673_v60 }
 0x1fa   : > { %v1493_v48 = vadd.f32 %v1492_v8, %v6564_v43  ;;  %v1581_v15 = vpop.f32.mrf.mxu3  ;;  %v1317_v27 = vpop.f32.mrf.mxu0 }
 0x1fb   : > { %v1318_v19 = vadd.f32 %v1317_v27, %v6555_v29  ;;  %v1406_v58 = vpop.f32.mrf.mxu1 }
 0x1fc   : > { %v1582_v16 = vadd.f32 %v1581_v15, %v1493_v48 }
 0x1fd   : > { %v1407_v13 = vadd.f32 %v1406_v58, %v1318_v19  ;;  %1356 = vmatmul.bf16.gmra.mxu0 %v6340_v63 }
 0x1fe   : > { %v1678_v44 = vmax.f32 %v1582_v16, 0.0  ;;  %1445 = vmatmul.bf16.gmra.mxu1 %v6345_v10  ;;  %1534 = vmatmul.bf16.gmra.mxu2 %v6340_v63 }
 0x1ff   : > { %1623 = vmatmul.bf16.gmra.mxu3 %v6345_v10  ;;  %v1681_v24 = vmax.f32 %v1407_v13, 0.0  ;;  %v5178_v13 = vld [vmem:[%s8081_s5 + $0xe8] sm:$0xf] }
 0x200   : > { %v6663_v55 = vpack.c.bf16 %v1678_v44, %v1674_v38 }
 0x201   : > { %v1495_v34 = vpop.f32.mrf.mxu2 }
 0x202   : > { %v1496_v1 = vadd.f32 %v1495_v34, %v6564_v43  ;;  %v1584_v59 = vpop.f32.mrf.mxu3  ;;  %v1319_v54 = vpop.f32.mrf.mxu0 }
 0x203   : > { %v1320_v50 = vadd.f32 %v1319_v54, %v6555_v29  ;;  %v1408_v60 = vpop.f32.mrf.mxu1 }
 0x204   : > { %v1585_v45 = vadd.f32 %v1584_v59, %v1496_v1  ;;  %v5603_v1 = vld [vmem:[%s8081_s5 + $0xf4] sm:$0xf0] }
 0x205   : > { %v1409_v8 = vadd.f32 %v1408_v60, %v1320_v50  ;;  %v5179_v59 = vor.u32 %v5603_v1, %v5178_v13  ;;  %v5170_v50 = vld [vmem:[%s8081_s5 + $0xe0] sm:$0xf]  ;;  %v5602_v60 = vld [vmem:[%s8081_s5 + $0xec] sm:$0xf0] }
 0x206   : > { %v1682_v34 = vmax.f32 %v1585_v45, 0.0 }
 0x207   : > { %v1685_v48 = vmax.f32 %v1409_v8, 0.0  ;;  %v5171_v8 = vor.u32 %v5602_v60, %v5170_v50  ;;  %2875 = vmatpush.bf16.msrb.mxu2 %v5179_v59 }
 0x209   : > { %v1497_v15 = vpop.f32.mrf.mxu2  ;;  %v6667_v27 = vpack.c.bf16 %v1685_v48, %v1681_v24  ;;  %v5180_v24 = vld [vmem:[%s8081_s5 + $0xf8] sm:$0xf0]  ;;  %2697 = vmatpush.bf16.msrb.mxu0 %v5171_v8 }
 0x20a   : > { %v1498_v63 = vadd.f32 %v1497_v15, %v6564_v43  ;;  %v1586_v10 = vpop.f32.mrf.mxu3  ;;  %v1322_v19 = vpop.f32.mrf.mxu0 }
 0x20b   : > { %v1323_v58 = vadd.f32 %v1322_v19, %v6555_v29  ;;  %v1411_v16 = vpop.f32.mrf.mxu1 }
 0x20c   : > { %v1587_v38 = vadd.f32 %v1586_v10, %v1498_v63 }
 0x20d   : > { %v1412_v44 = vadd.f32 %v1411_v16, %v1323_v58  ;;  %1361 = vmatmul.bf16.gmra.mxu0 %v6360_v0 }
 0x20e   : > { %v1686_v54 = vmax.f32 %v1587_v38, 0.0  ;;  %1450 = vmatmul.bf16.gmra.mxu1 %v6365_v56  ;;  %1539 = vmatmul.bf16.gmra.mxu2 %v6360_v0  ;;  %v5601_v0 = vld [vmem:[%s8081_s5 + $0xec] sm:$0xf] }
 0x20f   : > { %1628 = vmatmul.bf16.gmra.mxu3 %v6365_v56  ;;  %v5183_v10 = vor.u32 %v5601_v0, %v5180_v24  ;;  %v1689_v13 = vmax.f32 %v1412_v44, 0.0 }
 0x210   : > { %v6690_v56 = vpack.c.bf16 %v1686_v54, %v1682_v34  ;;  %v5600_v34 = vld [vmem:[%s8081_s5 + $0xe4] sm:$0xf]  ;;  %v5172_v54 = vld [vmem:[%s8081_s5 + $0xf0] sm:$0xf0] }
 0x211   : > { %v1500_v45 = vpop.f32.mrf.mxu2  ;;  %2964 = vmatpush.bf16.msrb.mxu3 %v5183_v10  ;;  %v5175_v50 = vor.u32 %v5600_v34, %v5172_v54 }
 0x212   : > { %v1501_v48 = vadd.f32 %v1500_v45, %v6564_v43  ;;  %v1589_v15 = vpop.f32.mrf.mxu3  ;;  %v1324_v63 = vpop.f32.mrf.mxu0 }
 0x213   : > { %v1325_v19 = vadd.f32 %v1324_v63, %v6555_v29  ;;  %v1413_v58 = vpop.f32.mrf.mxu1  ;;  %2786 = vmatpush.bf16.msrb.mxu1 %v5175_v50 }
 0x214   : > { %v1590_v16 = vadd.f32 %v1589_v15, %v1501_v48 }
 0x215   : > { %v1414_v38 = vadd.f32 %v1413_v58, %v1325_v19 }
 0x216   : > { %v1690_v10 = vmax.f32 %v1590_v16, 0.0 }
 0x217   : > { %v1693_v1 = vmax.f32 %v1414_v38, 0.0 }
 0x219   : > { %v1502_v59 = vpop.f32.mrf.mxu2  ;;  %v6703_v60 = vpack.c.bf16 %v1693_v1, %v1689_v13 }
 0x21a   : > { %v1503_v0 = vadd.f32 %v1502_v59, %v6564_v43  ;;  %v1591_v45 = vpop.f32.mrf.mxu3  ;;  %v1327_v8 = vpop.f32.mrf.mxu0 }
 0x21b   : > { %v1328_v24 = vadd.f32 %v1327_v8, %v6555_v29  ;;  %v1416_v48 = vpop.f32.mrf.mxu1 }
 0x21c   : > { %v1592_v15 = vadd.f32 %v1591_v45, %v1503_v0 }
 0x21d   : > { %v1417_v63 = vadd.f32 %v1416_v48, %v1328_v24  ;;  %1366 = vmatmul.bf16.gmra.mxu0 %v6392_v35 }
 0x21e   : > { %v1694_v19 = vmax.f32 %v1592_v15, 0.0  ;;  %1455 = vmatmul.bf16.gmra.mxu1 %v6397_v42  ;;  %1544 = vmatmul.bf16.gmra.mxu2 %v6392_v35 }
 0x21f   : > { %1633 = vmatmul.bf16.gmra.mxu3 %v6397_v42  ;;  %v1697_v16 = vmax.f32 %v1417_v63, 0.0  ;;  %v5162_v63 = vld [vmem:[%s8081_s5 + $0xc8] sm:$0xf] }
 0x220   : > { %v6711_v44 = vpack.c.bf16 %v1694_v19, %v1690_v10 }
 0x221   : > { %v1505_v58 = vpop.f32.mrf.mxu2 }
 0x222   : > { %v1506_v38 = vadd.f32 %v1505_v58, %v6564_v43  ;;  %v1594_v34 = vpop.f32.mrf.mxu3  ;;  %v1329_v54 = vpop.f32.mrf.mxu0 }
 0x223   : > { %v1330_v13 = vadd.f32 %v1329_v54, %v6555_v29  ;;  %v1418_v1 = vpop.f32.mrf.mxu1 }
 0x224   : > { %v1595_v50 = vadd.f32 %v1594_v34, %v1506_v38  ;;  %v5599_v38 = vld [vmem:[%s8081_s5 + $0xd4] sm:$0xf0] }
 0x225   : > { %v1419_v59 = vadd.f32 %v1418_v1, %v1330_v13  ;;  %v5163_v34 = vor.u32 %v5599_v38, %v5162_v63 }
 0x226   : > { %v1698_v58 = vmax.f32 %v1595_v50, 0.0  ;;  %v5164_v50 = vld [vmem:[%s8081_s5 + $0xd8] sm:$0xf0] }
 0x227   : > { %v1701_v0 = vmax.f32 %v1419_v59, 0.0  ;;  %2876 = vmatpush.bf16.msrb.mxu2 %v5163_v34 }
 0x229   : > { %v1507_v45 = vpop.f32.mrf.mxu2  ;;  %v6715_v8 = vpack.c.bf16 %v1701_v0, %v1697_v16 }
 0x22a   : > { %v1508_v35 = vadd.f32 %v1507_v45, %v6564_v43  ;;  %v1596_v42 = vpop.f32.mrf.mxu3  ;;  %v1332_v24 = vpop.f32.mrf.mxu0 }
 0x22b   : > { %v1333_v48 = vadd.f32 %v1332_v24, %v6555_v29  ;;  %v1421_v15 = vpop.f32.mrf.mxu1 }
 0x22c   : > { %v1597_v10 = vadd.f32 %v1596_v42, %v1508_v35 }
 0x22d   : > { %v1422_v19 = vadd.f32 %v1421_v15, %v1333_v48  ;;  %2099 = vmatmul.bf16.vlgmr.msra.gmra.mxu0 %v6212_v5  ;;  %v5154_v5 = vld [vmem:[%s8081_s5 + $0xc0] sm:$0xf]  ;;  %v5596_v15 = vld [vmem:[%s8081_s5 + $0xc4] sm:$0xf] }
 0x22e   : > { %v1702_v54 = vmax.f32 %v1597_v10, 0.0  ;;  %2188 = vmatmul.bf16.vlgmr.msra.gmra.mxu1 %v6224_v23  ;;  %2277 = vmatmul.bf16.vlgmr.msra.gmra.mxu2 %v6583_v21  ;;  %v5598_v23 = vld [vmem:[%s8081_s5 + $0xcc] sm:$0xf0]  ;;  %v5597_v21 = vld [vmem:[%s8081_s5 + $0xcc] sm:$0xf] }
 0x22f   : > { %2366 = vmatmul.bf16.vlgmr.msra.gmra.mxu3 %v6591_v20  ;;  %v5155_v1 = vor.u32 %v5598_v23, %v5154_v5  ;;  %v5167_v45 = vor.u32 %v5597_v21, %v5164_v50  ;;  %v5156_v10 = vld [vmem:[%s8081_s5 + $0xd0] sm:$0xf0] }
 0x230   : > { %v6738_v20 = vpack.c.bf16 %v1702_v54, %v1698_v58  ;;  %v1705_v58 = vmax.f32 %v1422_v19, 0.0  ;;  %v5159_v63 = vor.u32 %v5596_v15, %v5156_v10 }
 0x231   : > { %v1510_v13 = vpop.f32.mrf.mxu2  ;;  %2698 = vmatpush.bf16.msrb.mxu0 %v5155_v1  ;;  %2965 = vmatpush.bf16.msrb.mxu3 %v5167_v45 }
 0x232   : > { %v1511_v59 = vadd.f32 %v1510_v13, %v6564_v43  ;;  %v1599_v16 = vpop.f32.mrf.mxu3  ;;  %v1334_v0 = vpop.f32.mrf.mxu0  ;;  %2787 = vmatpush.bf16.msrb.mxu1 %v5159_v63 }
 0x233   : > { %v1335_v35 = vadd.f32 %v1334_v0, %v6555_v29  ;;  %v1423_v42 = vpop.f32.mrf.mxu1 }
 0x234   : > { %v1600_v24 = vadd.f32 %v1599_v16, %v1511_v59 }
 0x235   : > { %v1424_v48 = vadd.f32 %v1423_v42, %v1335_v35 }
 0x236   : > { %v1706_v16 = vmax.f32 %v1600_v24, 0.0 }
 0x237   : > { %v1709_v54 = vmax.f32 %v1424_v48, 0.0 }
 0x239   : > { %v1512_v38 = vpop.f32.mrf.mxu2  ;;  %v6751_v34 = vpack.c.bf16 %v1709_v54, %v1705_v58 }
 0x23a   : > { %v1513_v5 = vadd.f32 %v1512_v38, %v6564_v43  ;;  %v1601_v23 = vpop.f32.mrf.mxu3  ;;  %v1337_v21 = vpop.f32.mrf.mxu0 }
 0x23b   : > { %v1338_v13 = vadd.f32 %v1337_v21, %v6555_v29  ;;  %v1426_v1 = vpop.f32.mrf.mxu1 }
 0x23c   : > { %v1602_v50 = vadd.f32 %v1601_v23, %v1513_v5 }
 0x23d   : > { %v1427_v59 = vadd.f32 %v1426_v1, %v1338_v13  ;;  %2104 = vmatmul.bf16.gmra.mxu0 %v6234_v49 }
 0x23e   : > { %v1710_v0 = vmax.f32 %v1602_v50, 0.0  ;;  %2193 = vmatmul.bf16.gmra.mxu1 %v6259_v12  ;;  %2282 = vmatmul.bf16.gmra.mxu2 %v6595_v30 }
 0x23f   : > { %2371 = vmatmul.bf16.gmra.mxu3 %v6612_v3  ;;  %v1713_v24 = vmax.f32 %v1427_v59, 0.0  ;;  %v5146_v59 = vld [vmem:[%s8081_s5 + $0xa8] sm:$0xf] }
 0x240   : > { %v6759_v19 = vpack.c.bf16 %v1710_v0, %v1706_v16  ;;  %v5595_v16 = vld [vmem:[%s8081_s5 + $0xb4] sm:$0xf0] }
 0x241   : > { %v1515_v45 = vpop.f32.mrf.mxu2  ;;  %v5147_v0 = vor.u32 %v5595_v16, %v5146_v59 }
 0x242   : > { %v1516_v35 = vadd.f32 %v1515_v45, %v6564_v43  ;;  %v1604_v42 = vpop.f32.mrf.mxu3  ;;  %v1339_v48 = vpop.f32.mrf.mxu0 }
 0x243   : > { %v1340_v15 = vadd.f32 %v1339_v48, %v6555_v29  ;;  %v1428_v10 = vpop.f32.mrf.mxu1  ;;  %2877 = vmatpush.bf16.msrb.mxu2 %v5147_v0 }
 0x244   : > { %v1605_v58 = vadd.f32 %v1604_v42, %v1516_v35  ;;  %v5148_v42 = vld [vmem:[%s8081_s5 + $0xb8] sm:$0xf0] }
 0x245   : > { %v1429_v49 = vadd.f32 %v1428_v10, %v1340_v15 }
 0x246   : > { %v1714_v1 = vmax.f32 %v1605_v58, 0.0 }
 0x247   : > { %v1717_v54 = vmax.f32 %v1429_v49, 0.0 }
 0x249   : > { %v1517_v63 = vpop.f32.mrf.mxu2  ;;  %v6763_v12 = vpack.c.bf16 %v1717_v54, %v1713_v24 }
 0x24a   : > { %v1518_v30 = vadd.f32 %v1517_v63, %v6564_v43  ;;  %v1606_v3 = vpop.f32.mrf.mxu3  ;;  %v1342_v38 = vpop.f32.mrf.mxu0 }
 0x24b   : > { %v1343_v5 = vadd.f32 %v1342_v38, %v6555_v29  ;;  %v1431_v23 = vpop.f32.mrf.mxu1 }
 0x24c   : > { %v1607_v21 = vadd.f32 %v1606_v3, %v1518_v30  ;;  %v5592_v30 = vld [vmem:[%s8081_s5 + $0xa4] sm:$0xf]  ;;  %v5140_v3 = vld [vmem:[%s8081_s5 + $0xb0] sm:$0xf0] }
 0x24d   : > { %v1432_v13 = vadd.f32 %v1431_v23, %v1343_v5  ;;  %2109 = vmatmul.bf16.gmra.mxu0 %v6278_v51  ;;  %v5138_v51 = vld [vmem:[%s8081_s5 + $0xa0] sm:$0xf]  ;;  %v5143_v23 = vor.u32 %v5592_v30, %v5140_v3 }
 0x24e   : > { %v1718_v50 = vmax.f32 %v1607_v21, 0.0  ;;  %2198 = vmatmul.bf16.gmra.mxu1 %v6288_v6  ;;  %2287 = vmatmul.bf16.gmra.mxu2 %v6619_v52  ;;  %v5594_v6 = vld [vmem:[%s8081_s5 + $0xac] sm:$0xf0]  ;;  %v5593_v52 = vld [vmem:[%s8081_s5 + $0xac] sm:$0xf] }
 0x24f   : > { %2376 = vmatmul.bf16.gmra.mxu3 %v6627_v28  ;;  %v5139_v35 = vor.u32 %v5594_v6, %v5138_v51  ;;  %v5151_v58 = vor.u32 %v5593_v52, %v5148_v42  ;;  %v1721_v38 = vmax.f32 %v1432_v13, 0.0  ;;  %2788 = vmatpush.bf16.msrb.mxu1 %v5143_v23 }
 0x250   : > { %v6786_v28 = vpack.c.bf16 %v1718_v50, %v1714_v1 }
 0x251   : > { %v1520_v45 = vpop.f32.mrf.mxu2  ;;  %2699 = vmatpush.bf16.msrb.mxu0 %v5139_v35  ;;  %2966 = vmatpush.bf16.msrb.mxu3 %v5151_v58 }
 0x252   : > { %v1521_v48 = vadd.f32 %v1520_v45, %v6564_v43  ;;  %v1609_v15 = vpop.f32.mrf.mxu3  ;;  %v1344_v10 = vpop.f32.mrf.mxu0 }
 0x253   : > { %v1345_v49 = vadd.f32 %v1344_v10, %v6555_v29  ;;  %v1433_v24 = vpop.f32.mrf.mxu1 }
 0x254   : > { %v1610_v54 = vadd.f32 %v1609_v15, %v1521_v48 }
 0x255   : > { %v1434_v63 = vadd.f32 %v1433_v24, %v1345_v49 }
 0x256   : > { %v1722_v45 = vmax.f32 %v1610_v54, 0.0 }
 0x257   : > { %v1725_v5 = vmax.f32 %v1434_v63, 0.0 }
 0x259   : > { %v1522_v21 = vpop.f32.mrf.mxu2  ;;  %v6799_v1 = vpack.c.bf16 %v1725_v5, %v1721_v38 }
 0x25a   : > { %v1523_v50 = vadd.f32 %v1522_v21, %v6564_v43  ;;  %v1611_v59 = vpop.f32.mrf.mxu3  ;;  %v1347_v16 = vpop.f32.mrf.mxu0 }
 0x25b   : > { %v1348_v0 = vadd.f32 %v1347_v16, %v6555_v29  ;;  %v1436_v51 = vpop.f32.mrf.mxu1  ;;  %v5130_v16 = vld [vmem:[%s8081_s5 + $0x88] sm:$0xf] }
 0x25c   : > { %v1612_v6 = vadd.f32 %v1611_v59, %v1523_v50 }
 0x25d   : > { %v1437_v52 = vadd.f32 %v1436_v51, %v1348_v0  ;;  %2114 = vmatmul.bf16.gmra.mxu0 %v6298_v39  ;;  %v5591_v0 = vld [vmem:[%s8081_s5 + $0x94] sm:$0xf0] }
 0x25e   : > { %v1726_v35 = vmax.f32 %v1612_v6, 0.0  ;;  %2203 = vmatmul.bf16.gmra.mxu1 %v6323_v11  ;;  %2292 = vmatmul.bf16.gmra.mxu2 %v6631_v17  ;;  %v5131_v51 = vor.u32 %v5591_v0, %v5130_v16 }
 0x25f   : > { %2381 = vmatmul.bf16.gmra.mxu3 %v6648_v7  ;;  %v1729_v54 = vmax.f32 %v1437_v52, 0.0 }
 0x260   : > { %v6807_v13 = vpack.c.bf16 %v1726_v35, %v1722_v45  ;;  %v5132_v45 = vld [vmem:[%s8081_s5 + $0x98] sm:$0xf0]  ;;  %2878 = vmatpush.bf16.msrb.mxu2 %v5131_v51  ;;  %v8111_v51 = vld [vmem:[#allocation2_spill] sm:$0xff] }
 0x261   : > { %v1525_v42 = vpop.f32.mrf.mxu2 }
 0x262   : > { %v1526_v48 = vadd.f32 %v1525_v42, %v6564_v43  ;;  %v1614_v15 = vpop.f32.mrf.mxu3  ;;  %v1349_v10 = vpop.f32.mrf.mxu0 }
 0x263   : > { %v1350_v58 = vadd.f32 %v1349_v10, %v6555_v29  ;;  %v1438_v49 = vpop.f32.mrf.mxu1 }
 0x264   : > { %v1615_v24 = vadd.f32 %v1614_v15, %v1526_v48 }
 0x265   : > { %v1439_v39 = vadd.f32 %v1438_v49, %v1350_v58 }
 0x266   : > { %v1730_v50 = vmax.f32 %v1615_v24, 0.0 }
 0x267   : > { %v1733_v63 = vmax.f32 %v1439_v39, 0.0  ;;  %v5588_v39 = vld [vmem:[%s8081_s5 + $0x84] sm:$0xf] }
 0x269   : > { %v1527_v30 = vpop.f32.mrf.mxu2  ;;  %v6811_v11 = vpack.c.bf16 %v1733_v63, %v1729_v54  ;;  %v5124_v54 = vld [vmem:[%s8081_s5 + $0x90] sm:$0xf0] }
 0x26a   : > { %v1528_v17 = vadd.f32 %v1527_v30, %v6564_v43  ;;  %v1616_v7 = vpop.f32.mrf.mxu3  ;;  %v1352_v3 = vpop.f32.mrf.mxu0 }
 0x26b   : > { %v1353_v38 = vadd.f32 %v1352_v3, %v6555_v29  ;;  %v1441_v5 = vpop.f32.mrf.mxu1 }
 0x26c   : > { %v1617_v23 = vadd.f32 %v1616_v7, %v1528_v17  ;;  %v5127_v17 = vor.u32 %v5588_v39, %v5124_v54 }
 0x26d   : > { %v1442_v21 = vadd.f32 %v1441_v5, %v1353_v38  ;;  %2119 = vmatmul.bf16.gmra.mxu0 %v6342_v61  ;;  %v5122_v61 = vld [vmem:[%s8081_s5 + $0x80] sm:$0xf] }
 0x26e   : > { %v1734_v59 = vmax.f32 %v1617_v23, 0.0  ;;  %2208 = vmatmul.bf16.gmra.mxu1 %v6352_v22  ;;  %2297 = vmatmul.bf16.gmra.mxu2 %v6655_v32  ;;  %v5590_v22 = vld [vmem:[%s8081_s5 + $0x8c] sm:$0xf0]  ;;  %v5589_v32 = vld [vmem:[%s8081_s5 + $0x8c] sm:$0xf] }
 0x26f   : > { %2386 = vmatmul.bf16.gmra.mxu3 %v6663_v55  ;;  %v5123_v52 = vor.u32 %v5590_v22, %v5122_v61  ;;  %v5135_v15 = vor.u32 %v5589_v32, %v5132_v45  ;;  %v1737_v63 = vmax.f32 %v1442_v21, 0.0  ;;  %2789 = vmatpush.bf16.msrb.mxu1 %v5127_v17  ;;  %v8112_v21 = vld [vmem:[#allocation3_spill] sm:$0xff] }
 0x270   : > { %v6834_v55 = vpack.c.bf16 %v1734_v59, %v1730_v50 }
 0x271   : > { %v1530_v6 = vpop.f32.mrf.mxu2  ;;  %2700 = vmatpush.bf16.msrb.mxu0 %v5123_v52  ;;  %2967 = vmatpush.bf16.msrb.mxu3 %v5135_v15 }
 0x272   : > { %v1531_v35 = vadd.f32 %v1530_v6, %v6564_v43  ;;  %v1619_v42 = vpop.f32.mrf.mxu3  ;;  %v1354_v48 = vpop.f32.mrf.mxu0 }
 0x273   : > { %v1355_v10 = vadd.f32 %v1354_v48, %v6555_v29  ;;  %v1443_v58 = vpop.f32.mrf.mxu1 }
 0x274   : > { %v1620_v49 = vadd.f32 %v1619_v42, %v1531_v35 }
 0x275   : > { %v1444_v24 = vadd.f32 %v1443_v58, %v1355_v10 }
 0x276   : > { %v1738_v61 = vmax.f32 %v1620_v49, 0.0 }
 0x277   : > { %v1741_v30 = vmax.f32 %v1444_v24, 0.0 }
 0x279   : > { %v1532_v7 = vpop.f32.mrf.mxu2  ;;  %v6847_v3 = vpack.c.bf16 %v1741_v30, %v1737_v63 }
 0x27a   : > { %v1533_v38 = vadd.f32 %v1532_v7, %v6564_v43  ;;  %v1621_v5 = vpop.f32.mrf.mxu3  ;;  %v1357_v23 = vpop.f32.mrf.mxu0 }
 0x27b   : > { %v1358_v50 = vadd.f32 %v1357_v23, %v6555_v29  ;;  %v1446_v59 = vpop.f32.mrf.mxu1 }
 0x27c   : > { %v1622_v16 = vadd.f32 %v1621_v5, %v1533_v38  ;;  %v8113_v38 = vld [vmem:[#allocation4_spill] sm:$0xff] }
 0x27d   : > { %v1447_v0 = vadd.f32 %v1446_v59, %v1358_v50  ;;  %2124 = vmatmul.bf16.gmra.mxu0 %v8111_v51  ;;  %v8114_v50 = vld [vmem:[#allocation5_spill] sm:$0xff]  ;;  %v5114_v59 = vld [vmem:[%s8081_s5 + $0x68] sm:$0xf]  ;;  %v5106_v51 = vld [vmem:[%s8081_s5 + $0x60] sm:$0xf] }
 0x27e   : > { %v1742_v22 = vmax.f32 %v1622_v16, 0.0  ;;  %2213 = vmatmul.bf16.gmra.mxu1 %v8112_v21  ;;  %2302 = vmatmul.bf16.gmra.mxu2 %v6667_v27  ;;  %v5587_v16 = vld [vmem:[%s8081_s5 + $0x74] sm:$0xf0] }
 0x27f   : > { %2391 = vmatmul.bf16.gmra.mxu3 %v6690_v56  ;;  %v1745_v58 = vmax.f32 %v1447_v0, 0.0  ;;  %v5115_v0 = vor.u32 %v5587_v16, %v5114_v59 }
 0x280   : > { %v6855_v32 = vpack.c.bf16 %v1742_v22, %v1738_v61  ;;  %v5586_v61 = vld [vmem:[%s8081_s5 + $0x6c] sm:$0xf0] }
 0x281   : > { %v1535_v6 = vpop.f32.mrf.mxu2  ;;  %v5107_v21 = vor.u32 %v5586_v61, %v5106_v51  ;;  %2879 = vmatpush.bf16.msrb.mxu2 %v5115_v0 }
 0x282   : > { %v1536_v52 = vadd.f32 %v1535_v6, %v6564_v43  ;;  %v1624_v45 = vpop.f32.mrf.mxu3  ;;  %v1359_v35 = vpop.f32.mrf.mxu0  ;;  %v5116_v6 = vld [vmem:[%s8081_s5 + $0x78] sm:$0xf0] }
 0x283   : > { %v1360_v42 = vadd.f32 %v1359_v35, %v6555_v29  ;;  %v1448_v48 = vpop.f32.mrf.mxu1  ;;  %2701 = vmatpush.bf16.msrb.mxu0 %v5107_v21 }
 0x284   : > { %v1625_v15 = vadd.f32 %v1624_v45, %v1536_v52 }
 0x285   : > { %v1449_v10 = vadd.f32 %v1448_v48, %v1360_v42 }
 0x286   : > { %v1746_v5 = vmax.f32 %v1625_v15, 0.0 }
 0x287   : > { %v1749_v49 = vmax.f32 %v1449_v10, 0.0 }
 0x289   : > { %v1537_v24 = vpop.f32.mrf.mxu2  ;;  %v6859_v39 = vpack.c.bf16 %v1749_v49, %v1745_v58  ;;  %v5584_v49 = vld [vmem:[%s8081_s5 + $0x64] sm:$0xf] }
 0x28a   : > { %v1538_v27 = vadd.f32 %v1537_v24, %v6564_v43  ;;  %v1626_v56 = vpop.f32.mrf.mxu3  ;;  %v1362_v54 = vpop.f32.mrf.mxu0  ;;  %v5108_v24 = vld [vmem:[%s8081_s5 + $0x70] sm:$0xf0] }
 0x28b   : > { %v1363_v63 = vadd.f32 %v1362_v54, %v6555_v29  ;;  %v1451_v30 = vpop.f32.mrf.mxu1  ;;  %v5111_v54 = vor.u32 %v5584_v49, %v5108_v24 }
 0x28c   : > { %v1627_v17 = vadd.f32 %v1626_v56, %v1538_v27 }
 0x28d   : > { %v1452_v7 = vadd.f32 %v1451_v30, %v1363_v63  ;;  %2129 = vmatmul.bf16.gmra.mxu0 %v8113_v38  ;;  %2790 = vmatpush.bf16.msrb.mxu1 %v5111_v54  ;;  %v5583_v54 = vld [vmem:[%s8081_s5 + $0x54] sm:$0xf0] }
 0x28e   : > { %v1750_v23 = vmax.f32 %v1627_v17, 0.0  ;;  %2218 = vmatmul.bf16.gmra.mxu1 %v8114_v50  ;;  %2307 = vmatmul.bf16.gmra.mxu2 %v6703_v60  ;;  %v5585_v60 = vld [vmem:[%s8081_s5 + $0x6c] sm:$0xf] }
 0x28f   : > { %2396 = vmatmul.bf16.gmra.mxu3 %v6711_v44  ;;  %v5119_v42 = vor.u32 %v5585_v60, %v5116_v6  ;;  %v1753_v27 = vmax.f32 %v1452_v7, 0.0 }
 0x290   : > { %v6882_v44 = vpack.c.bf16 %v1750_v23, %v1746_v5 }
 0x291   : > { %v1540_v22 = vpop.f32.mrf.mxu2  ;;  %2968 = vmatpush.bf16.msrb.mxu3 %v5119_v42 }
 0x292   : > { %v1541_v52 = vadd.f32 %v1540_v22, %v6564_v43  ;;  %v1629_v45 = vpop.f32.mrf.mxu3  ;;  %v1364_v35 = vpop.f32.mrf.mxu0 }
 0x293   : > { %v1365_v48 = vadd.f32 %v1364_v35, %v6555_v29  ;;  %v1453_v15 = vpop.f32.mrf.mxu1 }
 0x294   : > { %v1630_v10 = vadd.f32 %v1629_v45, %v1541_v52 }
 0x295   : > { %v1454_v58 = vadd.f32 %v1453_v15, %v1365_v48 }
 0x296   : > { %v1754_v0 = vmax.f32 %v1630_v10, 0.0 }
 0x297   : > { %v1757_v56 = vmax.f32 %v1454_v58, 0.0 }
 0x299   : > { %v1542_v63 = vpop.f32.mrf.mxu2  ;;  %v6895_v30 = vpack.c.bf16 %v1757_v56, %v1753_v27 }
 0x29a   : > { %v1543_v17 = vadd.f32 %v1542_v63, %v6564_v43  ;;  %v1631_v38 = vpop.f32.mrf.mxu3  ;;  %v1367_v5 = vpop.f32.mrf.mxu0 }
 0x29b   : > { %v1368_v23 = vadd.f32 %v1367_v5, %v6555_v29  ;;  %v1456_v50 = vpop.f32.mrf.mxu1 }
 0x29c   : > { %v1632_v59 = vadd.f32 %v1631_v38, %v1543_v17  ;;  %v5100_v38 = vld [vmem:[%s8081_s5 + $0x58] sm:$0xf0] }
 0x29d   : > { %v1457_v16 = vadd.f32 %v1456_v50, %v1368_v23  ;;  %2134 = vmatmul.bf16.gmra.mxu0 %v6408_v46 }
 0x29e   : > { %v1758_v51 = vmax.f32 %v1632_v59, 0.0  ;;  %2223 = vmatmul.bf16.gmra.mxu1 %v6425_v4  ;;  %2312 = vmatmul.bf16.gmra.mxu2 %v6715_v8  ;;  %v6910_v4 = vld [vmem:[%s8080_s4] ss:$0 sm:$0xff] }
 0x29f   : > { %2401 = vmatmul.bf16.gmra.mxu3 %v6738_v20  ;;  %v1761_v35 = vmax.f32 %v1457_v16, 0.0 }
 0x2a0   : > { %v6903_v7 = vpack.c.bf16 %v1758_v51, %v1754_v0 }
 0x2a1   : > { %v1545_v61 = vpop.f32.mrf.mxu2 }
 0x2a2   : > { %v1546_v60 = vadd.f32 %v1545_v61, %v6564_v43  ;;  %v1634_v22 = vpop.f32.mrf.mxu3  ;;  %v1369_v21 = vpop.f32.mrf.mxu0 }
 0x2a3   : > { %v1370_v6 = vadd.f32 %v1369_v21, %v6555_v29  ;;  %v1458_v52 = vpop.f32.mrf.mxu1  ;;  %v5092_v21 = vld [vmem:[%s8081_s5 + $0x50] sm:$0xf0] }
 0x2a4   : > { %v1635_v45 = vadd.f32 %v1634_v22, %v1546_v60  ;;  %v5580_v22 = vld [vmem:[%s8081_s5 + $0x44] sm:$0xf] }
 0x2a5   : > { %v1459_v46 = vadd.f32 %v1458_v52, %v1370_v6  ;;  %v5095_v6 = vor.u32 %v5580_v22, %v5092_v21 }
 0x2a6   : > { %v1762_v27 = vmax.f32 %v1635_v45, 0.0 }
 0x2a7   : > { %v1765_v42 = vmax.f32 %v1459_v46, 0.0  ;;  %2791 = vmatpush.bf16.msrb.mxu1 %v5095_v6 }
 0x2a9   : > { %v1547_v8 = vpop.f32.mrf.mxu2  ;;  %v6912_v20 = vpack.c.bf16 %v1765_v42, %v1761_v35 }
 0x2aa   : > { %v1548_v48 = vadd.f32 %v1547_v8, %v6564_v43  ;;  %v1636_v15 = vpop.f32.mrf.mxu3  ;;  %v2100_v10 = vpop.f32.mrf.mxu0  ;;  %v5098_v43 = vld [vmem:[%s8081_s5 + $0x48] sm:$0xf] }
 0x2ab   : > { %v2101_v58 = vadd.f32 %v6910_v4, %v2100_v10  ;;  %v2189_v29 = vpop.f32.mrf.mxu1 }
 0x2ac   : > { %v1637_v49 = vadd.f32 %v1636_v15, %v1548_v48 }
 0x2ad   : > { %v2190_v24 = vadd.f32 %v2189_v29, %v2101_v58  ;;  %2139 = vmatmul.bf16.gmra.mxu0 %v6432_v62  ;;  %v5090_v62 = vld [vmem:[%s8081_s5 + $0x40] sm:$0xf] }
 0x2ae   : > { %v1766_v56 = vmax.f32 %v1637_v49, 0.0  ;;  %2228 = vmatmul.bf16.gmra.mxu1 %v6440_v31  ;;  %2317 = vmatmul.bf16.gmra.mxu2 %v6751_v34  ;;  %v5099_v31 = vor.u32 %v5583_v54, %v5098_v43  ;;  %v5582_v34 = vld [vmem:[%s8081_s5 + $0x4c] sm:$0xf0] }
 0x2af   : > { %2406 = vmatmul.bf16.gmra.mxu3 %v6759_v19  ;;  %v5581_v19 = vld [vmem:[%s8081_s5 + $0x4c] sm:$0xf]  ;;  %v5091_v59 = vor.u32 %v5582_v34, %v5090_v62 }
 0x2b0   : > { %v6929_v63 = vpack.c.bf16 %v1766_v56, %v1762_v27  ;;  %v5103_v16 = vor.u32 %v5581_v19, %v5100_v38  ;;  %2880 = vmatpush.bf16.msrb.mxu2 %v5099_v31 }
 0x2b1   : > { %v2278_v17 = vpop.f32.mrf.mxu2  ;;  %2702 = vmatpush.bf16.msrb.mxu0 %v5091_v59  ;;  %v5082_v59 = vld [vmem:[%s8081_s5 + $0x28] sm:$0xf] }
 0x2b2   : > { %v2279_v5 = vadd.f32 %v2278_v17, %v2190_v24  ;;  %v2367_v23 = vpop.f32.mrf.mxu3  ;;  %v2102_v50 = vpop.f32.mrf.mxu0  ;;  %2969 = vmatpush.bf16.msrb.mxu3 %v5103_v16  ;;  %v5579_v16 = vld [vmem:[%s8081_s5 + $0x34] sm:$0xf0] }
 0x2b3   : > { %v2103_v0 = vadd.f32 %v6910_v4, %v2102_v50  ;;  %v2191_v51 = vpop.f32.mrf.mxu1 }
 0x2b4   : > { %v2368_v61 = vadd.f32 %v2367_v23, %v2279_v5 }
 0x2b5   : > { %v2192_v60 = vadd.f32 %v2191_v51, %v2103_v0  ;;  %v5084_v51 = vld [vmem:[%s8081_s5 + $0x38] sm:$0xf0] }
 0x2b6   : > { %v2447_v10 = vmax.f32 %v2368_v61, 0.0 }
 0x2b9   : > { %v2280_v52 = vpop.f32.mrf.mxu2 }
 0x2ba   : > { %v2281_v45 = vadd.f32 %v2280_v52, %v2192_v60  ;;  %v2369_v46 = vpop.f32.mrf.mxu3  ;;  %v2105_v35 = vpop.f32.mrf.mxu0 }
 0x2bb   : > { %v2106_v42 = vadd.f32 %v6910_v4, %v2105_v35  ;;  %v2194_v8 = vpop.f32.mrf.mxu1 }
 0x2bc   : > { %v2370_v48 = vadd.f32 %v2369_v46, %v2281_v45 }
 0x2bd   : > { %v2195_v15 = vadd.f32 %v2194_v8, %v2106_v42  ;;  %2144 = vmatmul.bf16.gmra.mxu0 %v6444_v25  ;;  %v5576_v42 = vld [vmem:[%s8081_s5 + $0x24] sm:$0xf]  ;;  %v5076_v8 = vld [vmem:[%s8081_s5 + $0x30] sm:$0xf0] }
 0x2be   : > { %v2448_v58 = vmax.f32 %v2370_v48, 0.0  ;;  %2233 = vmatmul.bf16.gmra.mxu1 %v6461_v41  ;;  %2322 = vmatmul.bf16.gmra.mxu2 %v6763_v12  ;;  %v5079_v48 = vor.u32 %v5576_v42, %v5076_v8  ;;  %v5572_v8 = vld [vmem:[%s8081_s5 + $0x4] sm:$0xf] }
 0x2bf   : > { %2411 = vmatmul.bf16.gmra.mxu3 %v6786_v28 }
 0x2c0   : > { %v6952_v29 = vpack.c.bf16 %v2448_v58, %v2447_v10  ;;  %2792 = vmatpush.bf16.msrb.mxu1 %v5079_v48  ;;  %v5060_v48 = vld [vmem:[%s8081_s5 + $0x10] sm:$0xf0] }
 0x2c1   : > { %v2283_v49 = vpop.f32.mrf.mxu2 }
 0x2c2   : > { %v2284_v24 = vadd.f32 %v2283_v49, %v2195_v15  ;;  %v2372_v27 = vpop.f32.mrf.mxu3  ;;  %v2107_v56 = vpop.f32.mrf.mxu0 }
 0x2c3   : > { %v2108_v43 = vadd.f32 %v6910_v4, %v2107_v56  ;;  %v2196_v54 = vpop.f32.mrf.mxu1 }
 0x2c4   : > { %v2373_v62 = vadd.f32 %v2372_v27, %v2284_v24 }
 0x2c5   : > { %v2197_v17 = vadd.f32 %v2196_v54, %v2108_v43 }
 0x2c6   : > { %v2449_v5 = vmax.f32 %v2373_v62, 0.0 }
 0x2c9   : > { %v2285_v25 = vpop.f32.mrf.mxu2 }
 0x2ca   : > { %v2286_v31 = vadd.f32 %v2285_v25, %v2197_v17  ;;  %v2374_v34 = vpop.f32.mrf.mxu3  ;;  %v2110_v19 = vpop.f32.mrf.mxu0 }
 0x2cb   : > { %v2111_v41 = vadd.f32 %v6910_v4, %v2110_v19  ;;  %v2199_v12 = vpop.f32.mrf.mxu1 }
 0x2cc   : > { %v2375_v38 = vadd.f32 %v2374_v34, %v2286_v31 }
 0x2cd   : > { %v2200_v28 = vadd.f32 %v2199_v12, %v2111_v41  ;;  %2149 = vmatmul.bf16.gmra.mxu0 %v6468_v36  ;;  %v5074_v36 = vld [vmem:[%s8081_s5 + $0x20] sm:$0xf] }
 0x2ce   : > { %v2450_v23 = vmax.f32 %v2375_v38, 0.0  ;;  %2238 = vmatmul.bf16.gmra.mxu1 %v6476_v47  ;;  %2327 = vmatmul.bf16.gmra.mxu2 %v6799_v1  ;;  %v5083_v47 = vor.u32 %v5579_v16, %v5082_v59  ;;  %v5578_v1 = vld [vmem:[%s8081_s5 + $0x2c] sm:$0xf0] }
 0x2cf   : > { %2416 = vmatmul.bf16.gmra.mxu3 %v6807_v13  ;;  %v5577_v13 = vld [vmem:[%s8081_s5 + $0x2c] sm:$0xf]  ;;  %v5075_v21 = vor.u32 %v5578_v1, %v5074_v36  ;;  %v5066_v1 = vld [vmem:[%s8081_s5 + $0x8] sm:$0xf] }
 0x2d0   : > { %v6960_v50 = vpack.c.bf16 %v2450_v23, %v2449_v5  ;;  %v5087_v6 = vor.u32 %v5577_v13, %v5084_v51  ;;  %2881 = vmatpush.bf16.msrb.mxu2 %v5083_v47  ;;  %v5575_v13 = vld [vmem:[%s8081_s5 + $0x14] sm:$0xf0] }
 0x2d1   : > { %v2288_v0 = vpop.f32.mrf.mxu2  ;;  %2703 = vmatpush.bf16.msrb.mxu0 %v5075_v21 }
 0x2d2   : > { %v2289_v61 = vadd.f32 %v2288_v0, %v2200_v28  ;;  %v2377_v60 = vpop.f32.mrf.mxu3  ;;  %v2112_v22 = vpop.f32.mrf.mxu0  ;;  %2970 = vmatpush.bf16.msrb.mxu3 %v5087_v6 }
 0x2d3   : > { %v2113_v52 = vadd.f32 %v6910_v4, %v2112_v22  ;;  %v2201_v45 = vpop.f32.mrf.mxu1 }
 0x2d4   : > { %v2378_v46 = vadd.f32 %v2377_v60, %v2289_v61  ;;  %v5068_v61 = vld [vmem:[%s8081_s5 + $0x18] sm:$0xf0] }
 0x2d5   : > { %v2202_v35 = vadd.f32 %v2201_v45, %v2113_v52 }
 0x2d6   : > { %v2451_v54 = vmax.f32 %v2378_v46, 0.0 }
 0x2d9   : > { %v2290_v15 = vpop.f32.mrf.mxu2 }
 0x2da   : > { %v2291_v10 = vadd.f32 %v2290_v15, %v2202_v35  ;;  %v2379_v58 = vpop.f32.mrf.mxu3  ;;  %v2115_v49 = vpop.f32.mrf.mxu0  ;;  %v5063_v15 = vor.u32 %v5572_v8, %v5060_v48 }
 0x2db   : > { %v2116_v24 = vadd.f32 %v6910_v4, %v2115_v49  ;;  %v2204_v27 = vpop.f32.mrf.mxu1 }
 0x2dc   : > { %v2380_v56 = vadd.f32 %v2379_v58, %v2291_v10  ;;  %2793 = vmatpush.bf16.msrb.mxu1 %v5063_v15 }
 0x2dd   : > { %v2205_v43 = vadd.f32 %v2204_v27, %v2116_v24  ;;  %2154 = vmatmul.bf16.gmra.mxu0 %v6480_v57 }
 0x2de   : > { %v2452_v62 = vmax.f32 %v2380_v56, 0.0  ;;  %2243 = vmatmul.bf16.gmra.mxu1 %v6497_v2  ;;  %2332 = vmatmul.bf16.gmra.mxu2 %v6811_v11 }
 0x2df   : > { %2421 = vmatmul.bf16.gmra.mxu3 %v6834_v55 }
 0x2e0   : > { %v6992_v17 = vpack.c.bf16 %v2452_v62, %v2451_v54 }
 0x2e1   : > { %v2293_v25 = vpop.f32.mrf.mxu2 }
 0x2e2   : > { %v2294_v31 = vadd.f32 %v2293_v25, %v2205_v43  ;;  %v2382_v34 = vpop.f32.mrf.mxu3  ;;  %v2117_v19 = vpop.f32.mrf.mxu0 }
 0x2e3   : > { %v2118_v41 = vadd.f32 %v6910_v4, %v2117_v19  ;;  %v2206_v12 = vpop.f32.mrf.mxu1 }
 0x2e4   : > { %v2383_v38 = vadd.f32 %v2382_v34, %v2294_v31 }
 0x2e5   : > { %v2207_v28 = vadd.f32 %v2206_v12, %v2118_v41 }
 0x2e6   : > { %v2453_v36 = vmax.f32 %v2383_v38, 0.0 }
 0x2e9   : > { %v2295_v57 = vpop.f32.mrf.mxu2 }
 0x2ea   : > { %v2296_v5 = vadd.f32 %v2295_v57, %v2207_v28  ;;  %v2384_v23 = vpop.f32.mrf.mxu3  ;;  %v2120_v59 = vpop.f32.mrf.mxu0 }
 0x2eb   : > { %v2121_v2 = vadd.f32 %v6910_v4, %v2120_v59  ;;  %v2209_v11 = vpop.f32.mrf.mxu1 }
 0x2ec   : > { %v2385_v16 = vadd.f32 %v2384_v23, %v2296_v5 }
 0x2ed   : > { %v2210_v55 = vadd.f32 %v2209_v11, %v2121_v2  ;;  %2159 = vmatmul.bf16.gmra.mxu0 %v6504_v37  ;;  %v5058_v37 = vld [vmem:[%s8081_s5] sm:$0xf] }
 0x2ee   : > { %v2454_v0 = vmax.f32 %v2385_v16, 0.0  ;;  %2248 = vmatmul.bf16.gmra.mxu1 %v6512_v9  ;;  %2337 = vmatmul.bf16.gmra.mxu2 %v6847_v3  ;;  %v5067_v9 = vor.u32 %v5575_v13, %v5066_v1  ;;  %v5574_v3 = vld [vmem:[%s8081_s5 + $0xc] sm:$0xf0]  ;;  %v5651_v1 = vld [vmem:[%s8083_s7 + $0x174] sm:$0xf0] }
 0x2ef   : > { %2426 = vmatmul.bf16.gmra.mxu3 %v6855_v32  ;;  %v5573_v32 = vld [vmem:[%s8081_s5 + $0xc] sm:$0xf]  ;;  %v5059_v6 = vor.u32 %v5574_v3, %v5058_v37  ;;  %v5667_v37 = vld [vmem:[%s8083_s7 + $0x1f4] sm:$0xf0] }
 0x2f0   : > { %v7000_v47 = vpack.c.bf16 %v2454_v0, %v2453_v36  ;;  %v5071_v52 = vor.u32 %v5573_v32, %v5068_v61  ;;  %2882 = vmatpush.bf16.msrb.mxu2 %v5067_v9  ;;  %v5370_v0 = vld [vmem:[%s8083_s7 + $0x170] sm:$0xf] }
 0x2f1   : > { %v2298_v51 = vpop.f32.mrf.mxu2  ;;  %2704 = vmatpush.bf16.msrb.mxu0 %v5059_v6 }
 0x2f2   : > { %v2299_v60 = vadd.f32 %v2298_v51, %v2210_v55  ;;  %v2387_v22 = vpop.f32.mrf.mxu3  ;;  %v2122_v21 = vpop.f32.mrf.mxu0  ;;  %2971 = vmatpush.bf16.msrb.mxu3 %v5071_v52  ;;  %v5306_v52 = vld [vmem:[%s8083_s7 + $0xf0] sm:$0xf] }
 0x2f3   : > { %v2123_v45 = vadd.f32 %v6910_v4, %v2122_v21  ;;  %v2211_v46 = vpop.f32.mrf.mxu1 }
 0x2f4   : > { %v2388_v35 = vadd.f32 %v2387_v22, %v2299_v60 }
 0x2f5   : > { %v2212_v42 = vadd.f32 %v2211_v46, %v2123_v45  ;;  %v5635_v45 = vld [vmem:[%s8083_s7 + $0xf4] sm:$0xf0] }
 0x2f6   : > { %v2455_v62 = vmax.f32 %v2388_v35, 0.0  ;;  %v5307_v46 = vor.u32 %v5635_v45, %v5306_v52 }
 0x2f8   : > { %3724 = vmatpush.bf16.msra.mxu1 %v5307_v46 }
 0x2f9   : > { %v2300_v10 = vpop.f32.mrf.mxu2 }
 0x2fa   : > { %v2301_v58 = vadd.f32 %v2300_v10, %v2212_v42  ;;  %v2389_v49 = vpop.f32.mrf.mxu3  ;;  %v2125_v24 = vpop.f32.mrf.mxu0 }
 0x2fb   : > { %v2126_v27 = vadd.f32 %v6910_v4, %v2125_v24  ;;  %v2214_v56 = vpop.f32.mrf.mxu1 }
 0x2fc   : > { %v2390_v43 = vadd.f32 %v2389_v49, %v2301_v58 }
 0x2fd   : > { %v2215_v54 = vadd.f32 %v2214_v56, %v2126_v27  ;;  %2164 = vmatmul.bf16.gmra.mxu0 %v6516_v14 }
 0x2fe   : > { %v2456_v25 = vmax.f32 %v2390_v43, 0.0  ;;  %2253 = vmatmul.bf16.gmra.mxu1 %v6533_v26  ;;  %2342 = vmatmul.bf16.gmra.mxu2 %v6859_v39 }
 0x2ff   : > { %2431 = vmatmul.bf16.gmra.mxu3 %v6882_v44 }
 0x300   : > { %v7032_v31 = vpack.c.bf16 %v2456_v25, %v2455_v62 }
 0x301   : > { %v2303_v34 = vpop.f32.mrf.mxu2 }
 0x302   : > { %v2304_v19 = vadd.f32 %v2303_v34, %v2215_v54  ;;  %v2392_v41 = vpop.f32.mrf.mxu3  ;;  %v2127_v12 = vpop.f32.mrf.mxu0 }
 0x303   : > { %v2128_v38 = vadd.f32 %v6910_v4, %v2127_v12  ;;  %v2216_v28 = vpop.f32.mrf.mxu1 }
 0x304   : > { %v2393_v57 = vadd.f32 %v2392_v41, %v2304_v19 }
 0x305   : > { %v2217_v5 = vadd.f32 %v2216_v28, %v2128_v38 }
 0x306   : > { %v2457_v16 = vmax.f32 %v2393_v57, 0.0 }
 0x309   : > { %v2305_v14 = vpop.f32.mrf.mxu2 }
 0x30a   : > { %v2306_v23 = vadd.f32 %v2305_v14, %v2217_v5  ;;  %v2394_v59 = vpop.f32.mrf.mxu3  ;;  %v2130_v2 = vpop.f32.mrf.mxu0 }
 0x30b   : > { %v2131_v26 = vadd.f32 %v6910_v4, %v2130_v2  ;;  %v2219_v39 = vpop.f32.mrf.mxu1  ;;  %v5362_v2 = vld [vmem:[%s8083_s7 + $0x160] sm:$0xf] }
 0x30c   : > { %v2395_v11 = vadd.f32 %v2394_v59, %v2306_v23 }
 0x30d   : > { %v2220_v44 = vadd.f32 %v2219_v39, %v2131_v26  ;;  %2169 = vmatmul.bf16.gmra.mxu0 %v6540_v40  ;;  %v5242_v40 = vld [vmem:[%s8083_s7 + $0x70] sm:$0xf]  ;;  %v5649_v26 = vld [vmem:[%s8083_s7 + $0x164] sm:$0xf0]  ;;  %v5234_v39 = vld [vmem:[%s8083_s7 + $0x60] sm:$0xf] }
 0x30e   : > { %v2458_v55 = vmax.f32 %v2395_v11, 0.0  ;;  %2258 = vmatmul.bf16.gmra.mxu1 %v6548_v33  ;;  %2347 = vmatmul.bf16.gmra.mxu2 %v6895_v30  ;;  %v5371_v33 = vor.u32 %v5651_v1, %v5370_v0  ;;  %v5619_v30 = vld [vmem:[%s8083_s7 + $0x74] sm:$0xf0] }
 0x30f   : > { %2436 = vmatmul.bf16.gmra.mxu3 %v6903_v7  ;;  %v5434_v7 = vld [vmem:[%s8083_s7 + $0x1f0] sm:$0xf]  ;;  %v5243_v32 = vor.u32 %v5619_v30, %v5242_v40 }
 0x310   : > { %v7040_v36 = vpack.c.bf16 %v2458_v55, %v2457_v16  ;;  %v5435_v61 = vor.u32 %v5667_v37, %v5434_v7  ;;  %3813 = vmatpush.bf16.msra.mxu2 %v5371_v33  ;;  %v5426_v16 = vld [vmem:[%s8083_s7 + $0x1e0] sm:$0xf]  ;;  %v5665_v55 = vld [vmem:[%s8083_s7 + $0x1e4] sm:$0xf0] }
 0x311   : > { %v2308_v13 = vpop.f32.mrf.mxu2  ;;  %3635 = vmatpush.bf16.msra.mxu0 %v5243_v32  ;;  %v5427_v33 = vor.u32 %v5665_v55, %v5426_v16 }
 0x312   : > { %v2309_v51 = vadd.f32 %v2308_v13, %v2220_v44  ;;  %v2397_v9 = vpop.f32.mrf.mxu3  ;;  %v2132_v3 = vpop.f32.mrf.mxu0  ;;  %3902 = vmatpush.bf16.msra.mxu3 %v5435_v61  ;;  %v5363_v44 = vor.u32 %v5649_v26, %v5362_v2 }
 0x313   : > { %v2133_v60 = vadd.f32 %v6910_v4, %v2132_v3  ;;  %v2221_v22 = vpop.f32.mrf.mxu1  ;;  %v5633_v3 = vld [vmem:[%s8083_s7 + $0xe4] sm:$0xf0] }
 0x314   : > { %v2398_v21 = vadd.f32 %v2397_v9, %v2309_v51  ;;  %3814 = vmatpush.bf16.msra.mxu2 %v5363_v44  ;;  %v5298_v9 = vld [vmem:[%s8083_s7 + $0xe0] sm:$0xf] }
 0x315   : > { %v2222_v6 = vadd.f32 %v2221_v22, %v2133_v60  ;;  %v5299_v32 = vor.u32 %v5633_v3, %v5298_v9 }
 0x316   : > { %v2459_v24 = vmax.f32 %v2398_v21, 0.0  ;;  %3903 = vmatpush.bf16.msra.mxu3 %v5427_v33 }
 0x317   : > { %3725 = vmatpush.bf16.msra.mxu1 %v5299_v32 }
 0x319   : > { %v2310_v35 = vpop.f32.mrf.mxu2 }
 0x31a   : > { %v2311_v42 = vadd.f32 %v2310_v35, %v2222_v6  ;;  %v2399_v8 = vpop.f32.mrf.mxu3  ;;  %v2135_v48 = vpop.f32.mrf.mxu0 }
 0x31b   : > { %v2136_v15 = vadd.f32 %v6910_v4, %v2135_v48  ;;  %v2224_v10 = vpop.f32.mrf.mxu1 }
 0x31c   : > { %v2400_v58 = vadd.f32 %v2399_v8, %v2311_v42 }
 0x31d   : > { %v2225_v49 = vadd.f32 %v2224_v10, %v2136_v15  ;;  %2174 = vmatmul.bf16.gmra.mxu0 %v6557_v18 }
 0x31e   : > { %v2460_v27 = vmax.f32 %v2400_v58, 0.0  ;;  %2263 = vmatmul.bf16.gmra.mxu1 %v6576_v53  ;;  %2352 = vmatmul.bf16.gmra.mxu2 %v6912_v20 }
 0x31f   : > { %2441 = vmatmul.bf16.gmra.mxu3 %v6929_v63 }
 0x320   : > { %v7072_v56 = vpack.c.bf16 %v2460_v27, %v2459_v24 }
 0x321   : > { %v2313_v43 = vpop.f32.mrf.mxu2 }
 0x322   : > { %v2314_v54 = vadd.f32 %v2313_v43, %v2225_v49  ;;  %v2402_v62 = vpop.f32.mrf.mxu3  ;;  %v2137_v25 = vpop.f32.mrf.mxu0 }
 0x323   : > { %v2138_v34 = vadd.f32 %v6910_v4, %v2137_v25  ;;  %v2226_v19 = vpop.f32.mrf.mxu1 }
 0x324   : > { %v2403_v41 = vadd.f32 %v2402_v62, %v2314_v54 }
 0x325   : > { %v2227_v12 = vadd.f32 %v2226_v19, %v2138_v34 }
 0x326   : > { %v2461_v14 = vmax.f32 %v2403_v41, 0.0 }
 0x329   : > { %v2315_v18 = vpop.f32.mrf.mxu2 }
 0x32a   : > { %v2316_v38 = vadd.f32 %v2315_v18, %v2227_v12  ;;  %v2404_v28 = vpop.f32.mrf.mxu3  ;;  %v2140_v57 = vpop.f32.mrf.mxu0 }
 0x32b   : > { %v2141_v53 = vadd.f32 %v6910_v4, %v2140_v57  ;;  %v2229_v20 = vpop.f32.mrf.mxu1  ;;  %v5354_v57 = vld [vmem:[%s8083_s7 + $0x150] sm:$0xf] }
 0x32c   : > { %v2405_v5 = vadd.f32 %v2404_v28, %v2316_v38 }
 0x32d   : > { %v2230_v63 = vadd.f32 %v2229_v20, %v2141_v53  ;;  %2705 = vmatmul.bf16.vlgmr.msrb.gmra.mxu0 %v6952_v29  ;;  %v5647_v53 = vld [vmem:[%s8083_s7 + $0x154] sm:$0xf0]  ;;  %v5226_v20 = vld [vmem:[%s8083_s7 + $0x50] sm:$0xf] }
 0x32e   : > { %v2462_v23 = vmax.f32 %v2405_v5, 0.0  ;;  %2794 = vmatmul.bf16.vlgmr.msrb.gmra.mxu1 %v6952_v29  ;;  %2883 = vmatmul.bf16.vlgmr.msrb.gmra.mxu2 %v6952_v29 }
 0x32f   : > { %2972 = vmatmul.bf16.vlgmr.msrb.gmra.mxu3 %v6952_v29  ;;  %v5617_v29 = vld [vmem:[%s8083_s7 + $0x64] sm:$0xf0] }
 0x330   : > { %v7080_v59 = vpack.c.bf16 %v2462_v23, %v2461_v14  ;;  %v5235_v13 = vor.u32 %v5617_v29, %v5234_v39  ;;  %v5418_v14 = vld [vmem:[%s8083_s7 + $0x1d0] sm:$0xf]  ;;  %v5663_v23 = vld [vmem:[%s8083_s7 + $0x1d4] sm:$0xf0] }
 0x331   : > { %v2318_v11 = vpop.f32.mrf.mxu2  ;;  %v5419_v44 = vor.u32 %v5663_v23, %v5418_v14 }
 0x332   : > { %v2319_v0 = vadd.f32 %v2318_v11, %v2230_v63  ;;  %v2407_v1 = vpop.f32.mrf.mxu3  ;;  %v2142_v40 = vpop.f32.mrf.mxu0  ;;  %3636 = vmatpush.bf16.msra.mxu0 %v5235_v13  ;;  %v5355_v63 = vor.u32 %v5647_v53, %v5354_v57 }
 0x333   : > { %v2143_v30 = vadd.f32 %v6910_v4, %v2142_v40  ;;  %v2231_v7 = vpop.f32.mrf.mxu1  ;;  %3904 = vmatpush.bf16.msra.mxu3 %v5419_v44  ;;  %v5631_v40 = vld [vmem:[%s8083_s7 + $0xd4] sm:$0xf0] }
 0x334   : > { %v2408_v37 = vadd.f32 %v2407_v1, %v2319_v0  ;;  %3815 = vmatpush.bf16.msra.mxu2 %v5355_v63  ;;  %v5290_v1 = vld [vmem:[%s8083_s7 + $0xd0] sm:$0xf] }
 0x335   : > { %v2232_v51 = vadd.f32 %v2231_v7, %v2143_v30  ;;  %v5291_v13 = vor.u32 %v5631_v40, %v5290_v1 }
 0x336   : > { %v2463_v35 = vmax.f32 %v2408_v37, 0.0 }
 0x337   : > { %3726 = vmatpush.bf16.msra.mxu1 %v5291_v13 }
 0x339   : > { %v2320_v61 = vpop.f32.mrf.mxu2 }
 0x33a   : > { %v2321_v60 = vadd.f32 %v2320_v61, %v2232_v51  ;;  %v2409_v22 = vpop.f32.mrf.mxu3  ;;  %v2145_v21 = vpop.f32.mrf.mxu0 }
 0x33b   : > { %v2146_v6 = vadd.f32 %v6910_v4, %v2145_v21  ;;  %v2234_v52 = vpop.f32.mrf.mxu1 }
 0x33c   : > { %v2410_v45 = vadd.f32 %v2409_v22, %v2321_v60 }
 0x33d   : > { %v2235_v46 = vadd.f32 %v2234_v52, %v2146_v6  ;;  %2710 = vmatmul.bf16.gmra.mxu0 %v6960_v50 }
 0x33e   : > { %v2464_v42 = vmax.f32 %v2410_v45, 0.0  ;;  %2799 = vmatmul.bf16.gmra.mxu1 %v6960_v50  ;;  %2888 = vmatmul.bf16.gmra.mxu2 %v6960_v50 }
 0x33f   : > { %2977 = vmatmul.bf16.gmra.mxu3 %v6960_v50 }
 0x340   : > { %v7112_v8 = vpack.c.bf16 %v2464_v42, %v2463_v35 }
 0x341   : > { %v2323_v48 = vpop.f32.mrf.mxu2 }
 0x342   : > { %v2324_v15 = vadd.f32 %v2323_v48, %v2235_v46  ;;  %v2412_v10 = vpop.f32.mrf.mxu3  ;;  %v2147_v58 = vpop.f32.mrf.mxu0 }
 0x343   : > { %v2148_v49 = vadd.f32 %v6910_v4, %v2147_v58  ;;  %v2236_v24 = vpop.f32.mrf.mxu1 }
 0x344   : > { %v2413_v27 = vadd.f32 %v2412_v10, %v2324_v15 }
 0x345   : > { %v2237_v43 = vadd.f32 %v2236_v24, %v2148_v49 }
 0x346   : > { %v2465_v18 = vmax.f32 %v2413_v27, 0.0 }
 0x349   : > { %v2325_v54 = vpop.f32.mrf.mxu2 }
 0x34a   : > { %v2326_v62 = vadd.f32 %v2325_v54, %v2237_v43  ;;  %v2414_v25 = vpop.f32.mrf.mxu3  ;;  %v2150_v34 = vpop.f32.mrf.mxu0 }
 0x34b   : > { %v2151_v19 = vadd.f32 %v6910_v4, %v2150_v34  ;;  %v2239_v41 = vpop.f32.mrf.mxu1  ;;  %v5346_v34 = vld [vmem:[%s8083_s7 + $0x140] sm:$0xf] }
 0x34c   : > { %v2415_v12 = vadd.f32 %v2414_v25, %v2326_v62 }
 0x34d   : > { %v2240_v50 = vadd.f32 %v2239_v41, %v2151_v19  ;;  %2715 = vmatmul.bf16.gmra.mxu0 %v6992_v17  ;;  %v5645_v19 = vld [vmem:[%s8083_s7 + $0x144] sm:$0xf0]  ;;  %v5218_v41 = vld [vmem:[%s8083_s7 + $0x40] sm:$0xf] }
 0x34e   : > { %v2466_v38 = vmax.f32 %v2415_v12, 0.0  ;;  %2804 = vmatmul.bf16.gmra.mxu1 %v6992_v17  ;;  %2893 = vmatmul.bf16.gmra.mxu2 %v6992_v17 }
 0x34f   : > { %2982 = vmatmul.bf16.gmra.mxu3 %v6992_v17  ;;  %v5615_v17 = vld [vmem:[%s8083_s7 + $0x54] sm:$0xf0] }
 0x350   : > { %v7120_v28 = vpack.c.bf16 %v2466_v38, %v2465_v18  ;;  %v5227_v11 = vor.u32 %v5615_v17, %v5226_v20  ;;  %v5410_v18 = vld [vmem:[%s8083_s7 + $0x1c0] sm:$0xf]  ;;  %v5661_v38 = vld [vmem:[%s8083_s7 + $0x1c4] sm:$0xf0] }
 0x351   : > { %v2328_v5 = vpop.f32.mrf.mxu2  ;;  %v5411_v63 = vor.u32 %v5661_v38, %v5410_v18 }
 0x352   : > { %v2329_v2 = vadd.f32 %v2328_v5, %v2240_v50  ;;  %v2417_v26 = vpop.f32.mrf.mxu3  ;;  %v2152_v39 = vpop.f32.mrf.mxu0  ;;  %3637 = vmatpush.bf16.msra.mxu0 %v5227_v11  ;;  %v5347_v50 = vor.u32 %v5645_v19, %v5346_v34 }
 0x353   : > { %v2153_v29 = vadd.f32 %v6910_v4, %v2152_v39  ;;  %v2241_v16 = vpop.f32.mrf.mxu1  ;;  %3905 = vmatpush.bf16.msra.mxu3 %v5411_v63  ;;  %v5629_v39 = vld [vmem:[%s8083_s7 + $0xc4] sm:$0xf0] }
 0x354   : > { %v2418_v55 = vadd.f32 %v2417_v26, %v2329_v2  ;;  %3816 = vmatpush.bf16.msra.mxu2 %v5347_v50  ;;  %v5282_v26 = vld [vmem:[%s8083_s7 + $0xc0] sm:$0xf] }
 0x355   : > { %v2242_v0 = vadd.f32 %v2241_v16, %v2153_v29  ;;  %v5283_v11 = vor.u32 %v5629_v39, %v5282_v26 }
 0x356   : > { %v2467_v61 = vmax.f32 %v2418_v55, 0.0 }
 0x357   : > { %3727 = vmatpush.bf16.msra.mxu1 %v5283_v11 }
 0x359   : > { %v2330_v33 = vpop.f32.mrf.mxu2 }
 0x35a   : > { %v2331_v30 = vadd.f32 %v2330_v33, %v2242_v0  ;;  %v2419_v7 = vpop.f32.mrf.mxu3  ;;  %v2155_v37 = vpop.f32.mrf.mxu0 }
 0x35b   : > { %v2156_v51 = vadd.f32 %v6910_v4, %v2155_v37  ;;  %v2244_v9 = vpop.f32.mrf.mxu1 }
 0x35c   : > { %v2420_v3 = vadd.f32 %v2419_v7, %v2331_v30 }
 0x35d   : > { %v2245_v32 = vadd.f32 %v2244_v9, %v2156_v51  ;;  %2720 = vmatmul.bf16.gmra.mxu0 %v7000_v47 }
 0x35e   : > { %v2468_v60 = vmax.f32 %v2420_v3, 0.0  ;;  %2809 = vmatmul.bf16.gmra.mxu1 %v7000_v47  ;;  %2898 = vmatmul.bf16.gmra.mxu2 %v7000_v47 }
 0x35f   : > { %2987 = vmatmul.bf16.gmra.mxu3 %v7000_v47 }
 0x360   : > { %v7152_v22 = vpack.c.bf16 %v2468_v60, %v2467_v61 }
 0x361   : > { %v2333_v21 = vpop.f32.mrf.mxu2 }
 0x362   : > { %v2334_v6 = vadd.f32 %v2333_v21, %v2245_v32  ;;  %v2422_v52 = vpop.f32.mrf.mxu3  ;;  %v2157_v45 = vpop.f32.mrf.mxu0 }
 0x363   : > { %v2158_v46 = vadd.f32 %v6910_v4, %v2157_v45  ;;  %v2246_v35 = vpop.f32.mrf.mxu1 }
 0x364   : > { %v2423_v42 = vadd.f32 %v2422_v52, %v2334_v6 }
 0x365   : > { %v2247_v48 = vadd.f32 %v2246_v35, %v2158_v46 }
 0x366   : > { %v2469_v54 = vmax.f32 %v2423_v42, 0.0 }
 0x369   : > { %v2335_v15 = vpop.f32.mrf.mxu2 }
 0x36a   : > { %v2336_v10 = vadd.f32 %v2335_v15, %v2247_v48  ;;  %v2424_v58 = vpop.f32.mrf.mxu3  ;;  %v2160_v49 = vpop.f32.mrf.mxu0 }
 0x36b   : > { %v2161_v24 = vadd.f32 %v6910_v4, %v2160_v49  ;;  %v2249_v27 = vpop.f32.mrf.mxu1  ;;  %v5338_v49 = vld [vmem:[%s8083_s7 + $0x130] sm:$0xf] }
 0x36c   : > { %v2425_v43 = vadd.f32 %v2424_v58, %v2336_v10 }
 0x36d   : > { %v2250_v47 = vadd.f32 %v2249_v27, %v2161_v24  ;;  %2725 = vmatmul.bf16.gmra.mxu0 %v7032_v31  ;;  %v5643_v24 = vld [vmem:[%s8083_s7 + $0x134] sm:$0xf0]  ;;  %v5210_v27 = vld [vmem:[%s8083_s7 + $0x30] sm:$0xf] }
 0x36e   : > { %v2470_v62 = vmax.f32 %v2425_v43, 0.0  ;;  %2814 = vmatmul.bf16.gmra.mxu1 %v7032_v31  ;;  %2903 = vmatmul.bf16.gmra.mxu2 %v7032_v31 }
 0x36f   : > { %2992 = vmatmul.bf16.gmra.mxu3 %v7032_v31  ;;  %v5613_v31 = vld [vmem:[%s8083_s7 + $0x44] sm:$0xf0] }
 0x370   : > { %v7160_v25 = vpack.c.bf16 %v2470_v62, %v2469_v54  ;;  %v5219_v5 = vor.u32 %v5613_v31, %v5218_v41  ;;  %v5402_v54 = vld [vmem:[%s8083_s7 + $0x1b0] sm:$0xf]  ;;  %v5659_v62 = vld [vmem:[%s8083_s7 + $0x1b4] sm:$0xf0] }
 0x371   : > { %v2338_v12 = vpop.f32.mrf.mxu2  ;;  %v5403_v50 = vor.u32 %v5659_v62, %v5402_v54 }
 0x372   : > { %v2339_v57 = vadd.f32 %v2338_v12, %v2250_v47  ;;  %v2427_v53 = vpop.f32.mrf.mxu3  ;;  %v2162_v20 = vpop.f32.mrf.mxu0  ;;  %3638 = vmatpush.bf16.msra.mxu0 %v5219_v5  ;;  %v5339_v47 = vor.u32 %v5643_v24, %v5338_v49 }
 0x373   : > { %v2163_v17 = vadd.f32 %v6910_v4, %v2162_v20  ;;  %v2251_v14 = vpop.f32.mrf.mxu1  ;;  %3906 = vmatpush.bf16.msra.mxu3 %v5403_v50  ;;  %v5627_v20 = vld [vmem:[%s8083_s7 + $0xb4] sm:$0xf0] }
 0x374   : > { %v2428_v23 = vadd.f32 %v2427_v53, %v2339_v57  ;;  %3817 = vmatpush.bf16.msra.mxu2 %v5339_v47  ;;  %v5274_v53 = vld [vmem:[%s8083_s7 + $0xb0] sm:$0xf] }
 0x375   : > { %v2252_v2 = vadd.f32 %v2251_v14, %v2163_v17  ;;  %v5275_v5 = vor.u32 %v5627_v20, %v5274_v53 }
 0x376   : > { %v2471_v33 = vmax.f32 %v2428_v23, 0.0 }
 0x377   : > { %3728 = vmatpush.bf16.msra.mxu1 %v5275_v5 }
 0x379   : > { %v2340_v44 = vpop.f32.mrf.mxu2 }
 0x37a   : > { %v2341_v29 = vadd.f32 %v2340_v44, %v2252_v2  ;;  %v2429_v16 = vpop.f32.mrf.mxu3  ;;  %v2165_v55 = vpop.f32.mrf.mxu0 }
 0x37b   : > { %v2166_v0 = vadd.f32 %v6910_v4, %v2165_v55  ;;  %v2254_v1 = vpop.f32.mrf.mxu1 }
 0x37c   : > { %v2430_v40 = vadd.f32 %v2429_v16, %v2341_v29 }
 0x37d   : > { %v2255_v13 = vadd.f32 %v2254_v1, %v2166_v0  ;;  %2730 = vmatmul.bf16.gmra.mxu0 %v7040_v36 }
 0x37e   : > { %v2472_v30 = vmax.f32 %v2430_v40, 0.0  ;;  %2819 = vmatmul.bf16.gmra.mxu1 %v7040_v36  ;;  %2908 = vmatmul.bf16.gmra.mxu2 %v7040_v36 }
 0x37f   : > { %2997 = vmatmul.bf16.gmra.mxu3 %v7040_v36 }
 0x380   : > { %v7192_v7 = vpack.c.bf16 %v2472_v30, %v2471_v33 }
 0x381   : > { %v2343_v37 = vpop.f32.mrf.mxu2 }
 0x382   : > { %v2344_v51 = vadd.f32 %v2343_v37, %v2255_v13  ;;  %v2432_v9 = vpop.f32.mrf.mxu3  ;;  %v2167_v3 = vpop.f32.mrf.mxu0 }
 0x383   : > { %v2168_v32 = vadd.f32 %v6910_v4, %v2167_v3  ;;  %v2256_v61 = vpop.f32.mrf.mxu1 }
 0x384   : > { %v2433_v60 = vadd.f32 %v2432_v9, %v2344_v51 }
 0x385   : > { %v2257_v21 = vadd.f32 %v2256_v61, %v2168_v32  ;;  %v2527_v32 = vld [vmem:[%s8082_s6] sm:$0xf] }
 0x386   : > { %v2473_v15 = vmax.f32 %v2433_v60, 0.0 }
 0x389   : > { %v2345_v6 = vpop.f32.mrf.mxu2 }
 0x38a   : > { %v2346_v52 = vadd.f32 %v2345_v6, %v2257_v21  ;;  %v2434_v45 = vpop.f32.mrf.mxu3  ;;  %v2170_v46 = vpop.f32.mrf.mxu0  ;;  %v7238_v21 = vperm.slane %v2527_v32, 0 }
 0x38b   : > { %v2171_v35 = vadd.f32 %v6910_v4, %v2170_v46  ;;  %v2259_v42 = vpop.f32.mrf.mxu1  ;;  %v5641_v46 = vld [vmem:[%s8083_s7 + $0x124] sm:$0xf0] }
 0x38c   : > { %v2435_v48 = vadd.f32 %v2434_v45, %v2346_v52  ;;  %v5330_v45 = vld [vmem:[%s8083_s7 + $0x120] sm:$0xf] }
 0x38d   : > { %v2260_v36 = vadd.f32 %v2259_v42, %v2171_v35  ;;  %2735 = vmatmul.bf16.gmra.mxu0 %v7072_v56  ;;  %v5202_v35 = vld [vmem:[%s8083_s7 + $0x20] sm:$0xf] }
 0x38e   : > { %v2474_v10 = vmax.f32 %v2435_v48, 0.0  ;;  %2824 = vmatmul.bf16.gmra.mxu1 %v7072_v56  ;;  %2913 = vmatmul.bf16.gmra.mxu2 %v7072_v56  ;;  %v5331_v48 = vor.u32 %v5641_v46, %v5330_v45 }
 0x38f   : > { %3002 = vmatmul.bf16.gmra.mxu3 %v7072_v56  ;;  %v5611_v56 = vld [vmem:[%s8083_s7 + $0x34] sm:$0xf0] }
 0x390   : > { %v7200_v58 = vpack.c.bf16 %v2474_v10, %v2473_v15  ;;  %v5211_v12 = vor.u32 %v5611_v56, %v5210_v27  ;;  %v5657_v15 = vld [vmem:[%s8083_s7 + $0x1a4] sm:$0xf0]  ;;  %3818 = vmatpush.bf16.msra.mxu2 %v5331_v48 }
 0x391   : > { %v2348_v43 = vpop.f32.mrf.mxu2 }
 0x392   : > { %v2349_v34 = vadd.f32 %v2348_v43, %v2260_v36  ;;  %v2437_v19 = vpop.f32.mrf.mxu3  ;;  %v2172_v41 = vpop.f32.mrf.mxu0  ;;  %3639 = vmatpush.bf16.msra.mxu0 %v5211_v12  ;;  %v5609_v36 = vld [vmem:[%s8083_s7 + $0x24] sm:$0xf0] }
 0x393   : > { %v2173_v31 = vadd.f32 %v6910_v4, %v2172_v41  ;;  %v2261_v18 = vpop.f32.mrf.mxu1  ;;  %v5203_v24 = vor.u32 %v5609_v36, %v5202_v35 }
 0x394   : > { %v2438_v38 = vadd.f32 %v2437_v19, %v2349_v34  ;;  %v7269_v34 = vperm.slane %v2527_v32, 2  ;;  %v7271_v19 = vperm.slane %v2527_v32, 3 }
 0x395   : > { %v2262_v57 = vadd.f32 %v2261_v18, %v2173_v31  ;;  %v5266_v31 = vld [vmem:[%s8083_s7 + $0xa0] sm:$0xf]  ;;  %v5625_v18 = vld [vmem:[%s8083_s7 + $0xa4] sm:$0xf0] }
 0x396   : > { %v2475_v44 = vmax.f32 %v2438_v38, 0.0  ;;  %3640 = vmatpush.bf16.msra.mxu0 %v5203_v24  ;;  %v5267_v53 = vor.u32 %v5625_v18, %v5266_v31  ;;  %v5655_v31 = vld [vmem:[%s8083_s7 + $0x194] sm:$0xf0] }
 0x398   : > { %3729 = vmatpush.bf16.msra.mxu1 %v5267_v53 }
 0x399   : > { %v2350_v63 = vpop.f32.mrf.mxu2 }
 0x39a   : > { %v2351_v17 = vadd.f32 %v2350_v63, %v2262_v57  ;;  %v2439_v14 = vpop.f32.mrf.mxu3  ;;  %v2175_v23 = vpop.f32.mrf.mxu0 }
 0x39b   : > { %v2176_v2 = vadd.f32 %v6910_v4, %v2175_v23  ;;  %v2264_v26 = vpop.f32.mrf.mxu1 }
 0x39c   : > { %v2440_v39 = vadd.f32 %v2439_v14, %v2351_v17 }
 0x39d   : > { %v2265_v11 = vadd.f32 %v2264_v26, %v2176_v2  ;;  %2740 = vmatmul.bf16.gmra.mxu0 %v7080_v59 }
 0x39e   : > { %v2476_v29 = vmax.f32 %v2440_v39, 0.0  ;;  %2829 = vmatmul.bf16.gmra.mxu1 %v7080_v59  ;;  %2918 = vmatmul.bf16.gmra.mxu2 %v7080_v59 }
 0x39f   : > { %3007 = vmatmul.bf16.gmra.mxu3 %v7080_v59 }
 0x3a0   : > { %v7232_v16 = vpack.c.bf16 %v2476_v29, %v2475_v44 }
 0x3a1   : > { %v2353_v55 = vpop.f32.mrf.mxu2 }
 0x3a2   : > { %v2354_v0 = vadd.f32 %v2353_v55, %v2265_v11  ;;  %v2442_v1 = vpop.f32.mrf.mxu3  ;;  %v2177_v40 = vpop.f32.mrf.mxu0 }
 0x3a3   : > { %v2178_v13 = vadd.f32 %v6910_v4, %v2177_v40  ;;  %v2266_v33 = vpop.f32.mrf.mxu1  ;;  %v7241_v4 = vperm.slane %v2527_v32, 1 }
 0x3a4   : > { %v2443_v30 = vadd.f32 %v2442_v1, %v2354_v0 }
 0x3a5   : > { %v2267_v37 = vadd.f32 %v2266_v33, %v2178_v13 }
 0x3a6   : > { %v2477_v6 = vmax.f32 %v2443_v30, 0.0 }
 0x3a9   : > { %v2355_v51 = vpop.f32.mrf.mxu2 }
 0x3aa   : > { %v2356_v9 = vadd.f32 %v2355_v51, %v2267_v37  ;;  %v2444_v3 = vpop.f32.mrf.mxu3  ;;  %v2706_v61 = vpop.f32.mrf.mxu0 }
 0x3ab   : > { %v2795_v59 = vpop.f32.mrf.mxu1  ;;  %v2707_v10 = vadd.f32 %v2706_v61, %v7238_v21 }
 0x3ac   : > { %v2445_v60 = vadd.f32 %v2444_v3, %v2356_v9  ;;  %v2796_v43 = vadd.f32 %v2795_v59, %v7241_v4 }
 0x3ad   : > { %2745 = vmatmul.bf16.gmra.mxu0 %v7112_v8  ;;  %v3053_v12 = vmax.f32 %v2707_v10, 0.0 }
 0x3ae   : > { %v2478_v52 = vmax.f32 %v2445_v60, 0.0  ;;  %2834 = vmatmul.bf16.gmra.mxu1 %v7112_v8  ;;  %2923 = vmatmul.bf16.gmra.mxu2 %v7112_v8  ;;  %v3054_v38 = vmax.f32 %v2796_v43, 0.0 }
 0x3af   : > { %3012 = vmatmul.bf16.gmra.mxu3 %v7112_v8  ;;  %v5394_v8 = vld [vmem:[%s8083_s7 + $0x1a0] sm:$0xf] }
 0x3b0   : > { %v7255_v42 = vpack.c.bf16 %v2478_v52, %v2477_v6  ;;  %v5395_v27 = vor.u32 %v5657_v15, %v5394_v8 }
 0x3b1   : > { %v2884_v49 = vpop.f32.mrf.mxu2 }
 0x3b2   : > { %v2973_v47 = vpop.f32.mrf.mxu3  ;;  %v2708_v56 = vpop.f32.mrf.mxu0  ;;  %3907 = vmatpush.bf16.msra.mxu3 %v5395_v27  ;;  %v2885_v5 = vadd.f32 %v2884_v49, %v7269_v34 }
 0x3b3   : > { %v2709_v54 = vadd.f32 %v2708_v56, %v7238_v21  ;;  %v2797_v62 = vpop.f32.mrf.mxu1  ;;  %v2974_v17 = vadd.f32 %v2973_v47, %v7271_v19  ;;  %v5322_v56 = vld [vmem:[%s8083_s7 + $0x110] sm:$0xf] }
 0x3b4   : > { %v2798_v41 = vadd.f32 %v2797_v62, %v7241_v4  ;;  %v3055_v44 = vmax.f32 %v2885_v5, 0.0  ;;  %v5194_v62 = vld [vmem:[%s8083_s7 + $0x10] sm:$0xf] }
 0x3b5   : > { %v3057_v50 = vmax.f32 %v2709_v54, 0.0  ;;  %v3056_v55 = vmax.f32 %v2974_v17, 0.0  ;;  %v5639_v54 = vld [vmem:[%s8083_s7 + $0x114] sm:$0xf0] }
 0x3b6   : > { %v3058_v57 = vmax.f32 %v2798_v41, 0.0 }
 0x3b7   : > { %v7280_v20 = vpack.c.bf16 %v3057_v50, %v3053_v12  ;;  %v5323_v12 = vor.u32 %v5639_v54, %v5322_v56  ;;  %v5607_v50 = vld [vmem:[%s8083_s7 + $0x14] sm:$0xf0] }
 0x3b8   : > { %v7283_v63 = vpack.c.bf16 %v3058_v57, %v3054_v38  ;;  %v5195_v57 = vor.u32 %v5607_v50, %v5194_v62 }
 0x3b9   : > { %v2886_v14 = vpop.f32.mrf.mxu2  ;;  %3819 = vmatpush.bf16.msra.mxu2 %v5323_v12 }
 0x3ba   : > { %v2887_v23 = vadd.f32 %v2886_v14, %v7269_v34  ;;  %v2975_v2 = vpop.f32.mrf.mxu3  ;;  %v2711_v26 = vpop.f32.mrf.mxu0  ;;  %3641 = vmatpush.bf16.msra.mxu0 %v5195_v57 }
 0x3bb   : > { %v2976_v39 = vadd.f32 %v2975_v2, %v7271_v19  ;;  %v2800_v11 = vpop.f32.mrf.mxu1  ;;  %v2712_v13 = vadd.f32 %v2711_v26, %v7238_v21 }
 0x3bc   : > { %v3059_v29 = vmax.f32 %v2887_v23, 0.0  ;;  %v2801_v30 = vadd.f32 %v2800_v11, %v7241_v4 }
 0x3bd   : > { %v3060_v0 = vmax.f32 %v2976_v39, 0.0  ;;  %2750 = vmatmul.bf16.gmra.mxu0 %v7120_v28  ;;  %v3061_v61 = vmax.f32 %v2712_v13, 0.0 }
 0x3be   : > { %v7289_v1 = vpack.c.bf16 %v3059_v29, %v3055_v44  ;;  %2839 = vmatmul.bf16.gmra.mxu1 %v7120_v28  ;;  %2928 = vmatmul.bf16.gmra.mxu2 %v7120_v28  ;;  %v3062_v60 = vmax.f32 %v2801_v30, 0.0  ;;  %v5258_v44 = vld [vmem:[%s8083_s7 + $0x90] sm:$0xf]  ;;  %v5623_v29 = vld [vmem:[%s8083_s7 + $0x94] sm:$0xf0] }
 0x3bf   : > { %v7293_v40 = vpack.c.bf16 %v3060_v0, %v3056_v55  ;;  %3017 = vmatmul.bf16.gmra.mxu3 %v7120_v28  ;;  %v5259_v13 = vor.u32 %v5623_v29, %v5258_v44  ;;  %v5314_v44 = vld [vmem:[%s8083_s7 + $0x100] sm:$0xf]  ;;  %v5637_v29 = vld [vmem:[%s8083_s7 + $0x104] sm:$0xf0] }
 0x3c1   : > { %v2889_v33 = vpop.f32.mrf.mxu2  ;;  %3730 = vmatpush.bf16.msra.mxu1 %v5259_v13  ;;  %v5315_v13 = vor.u32 %v5637_v29, %v5314_v44 }
 0x3c2   : > { %v2978_v37 = vpop.f32.mrf.mxu3  ;;  %v2713_v51 = vpop.f32.mrf.mxu0  ;;  %v2890_v28 = vadd.f32 %v2889_v33, %v7269_v34 }
 0x3c3   : > { %v2714_v9 = vadd.f32 %v2713_v51, %v7238_v21  ;;  %v2802_v3 = vpop.f32.mrf.mxu1  ;;  %v2979_v46 = vadd.f32 %v2978_v37, %v7271_v19  ;;  %3820 = vmatpush.bf16.msra.mxu2 %v5315_v13 }
 0x3c4   : > { %v2803_v32 = vadd.f32 %v2802_v3, %v7241_v4  ;;  %v3063_v49 = vmax.f32 %v2890_v28, 0.0 }
 0x3c5   : > { %v3065_v59 = vmax.f32 %v2714_v9, 0.0  ;;  %v3064_v27 = vmax.f32 %v2979_v46, 0.0 }
 0x3c6   : > { %v3066_v6 = vmax.f32 %v2803_v32, 0.0 }
 0x3c7   : > { %v7300_v52 = vpack.c.bf16 %v3065_v59, %v3061_v61 }
 0x3c8   : > { %v7303_v45 = vpack.c.bf16 %v3066_v6, %v3062_v60 }
 0x3c9   : > { %v2891_v35 = vpop.f32.mrf.mxu2 }
 0x3ca   : > { %v2892_v48 = vadd.f32 %v2891_v35, %v7269_v34  ;;  %v2980_v36 = vpop.f32.mrf.mxu3  ;;  %v2716_v8 = vpop.f32.mrf.mxu0 }
 0x3cb   : > { %v2981_v15 = vadd.f32 %v2980_v36, %v7271_v19  ;;  %v2805_v10 = vpop.f32.mrf.mxu1  ;;  %v2717_v18 = vadd.f32 %v2716_v8, %v7238_v21 }
 0x3cc   : > { %v3067_v24 = vmax.f32 %v2892_v48, 0.0  ;;  %v2806_v5 = vadd.f32 %v2805_v10, %v7241_v4 }
 0x3cd   : > { %v3068_v43 = vmax.f32 %v2981_v15, 0.0  ;;  %2755 = vmatmul.bf16.gmra.mxu0 %v7152_v22  ;;  %v3069_v39 = vmax.f32 %v2717_v18, 0.0 }
 0x3ce   : > { %2844 = vmatmul.bf16.gmra.mxu1 %v7152_v22  ;;  %2933 = vmatmul.bf16.gmra.mxu2 %v7152_v22  ;;  %v7311_v47 = vpack.c.bf16 %v3067_v24, %v3063_v49  ;;  %v3070_v55 = vmax.f32 %v2806_v5, 0.0 }
 0x3cf   : > { %3022 = vmatmul.bf16.gmra.mxu3 %v7152_v22  ;;  %v7323_v41 = vpack.c.bf16 %v3068_v43, %v3064_v27  ;;  %v5386_v22 = vld [vmem:[%s8083_s7 + $0x190] sm:$0xf] }
 0x3d0   : > { %v5387_v53 = vor.u32 %v5655_v31, %v5386_v22 }
 0x3d1   : > { %v2894_v38 = vpop.f32.mrf.mxu2 }
 0x3d2   : > { %v2983_v17 = vpop.f32.mrf.mxu3  ;;  %v2718_v14 = vpop.f32.mrf.mxu0  ;;  %3908 = vmatpush.bf16.msra.mxu3 %v5387_v53  ;;  %v2895_v30 = vadd.f32 %v2894_v38, %v7269_v34 }
 0x3d3   : > { %v2719_v23 = vadd.f32 %v2718_v14, %v7238_v21  ;;  %v2807_v2 = vpop.f32.mrf.mxu1  ;;  %v2984_v51 = vadd.f32 %v2983_v17, %v7271_v19 }
 0x3d4   : > { %v2808_v26 = vadd.f32 %v2807_v2, %v7241_v4  ;;  %v3071_v6 = vmax.f32 %v2895_v30, 0.0  ;;  %v5605_v30 = vld [vmem:[%s8083_s7 + $0x4] sm:$0xf0] }
 0x3d5   : > { %v3073_v11 = vmax.f32 %v2719_v23, 0.0  ;;  %v3072_v46 = vmax.f32 %v2984_v51, 0.0  ;;  %v5653_v51 = vld [vmem:[%s8083_s7 + $0x184] sm:$0xf0] }
 0x3d6   : > { %v3074_v0 = vmax.f32 %v2808_v26, 0.0 }
 0x3d7   : > { %v7344_v33 = vpack.c.bf16 %v3073_v11, %v3069_v39 }
 0x3d8   : > { %v7347_v37 = vpack.c.bf16 %v3074_v0, %v3070_v55  ;;  %v5186_v55 = vld [vmem:[%s8083_s7] sm:$0xf] }
 0x3d9   : > { %v2896_v9 = vpop.f32.mrf.mxu2 }
 0x3da   : > { %v2897_v3 = vadd.f32 %v2896_v9, %v7269_v34  ;;  %v2985_v32 = vpop.f32.mrf.mxu3  ;;  %v2721_v61 = vpop.f32.mrf.mxu0 }
 0x3db   : > { %v2986_v59 = vadd.f32 %v2985_v32, %v7271_v19  ;;  %v2810_v60 = vpop.f32.mrf.mxu1  ;;  %v2722_v8 = vadd.f32 %v2721_v61, %v7238_v21  ;;  %v5187_v32 = vor.u32 %v5605_v30, %v5186_v55 }
 0x3dc   : > { %v3075_v28 = vmax.f32 %v2897_v3, 0.0  ;;  %v2811_v10 = vadd.f32 %v2810_v60, %v7241_v4 }
 0x3dd   : > { %v3076_v35 = vmax.f32 %v2986_v59, 0.0  ;;  %2760 = vmatmul.bf16.gmra.mxu0 %v7160_v25  ;;  %v3077_v54 = vmax.f32 %v2722_v8, 0.0 }
 0x3de   : > { %2849 = vmatmul.bf16.gmra.mxu1 %v7160_v25  ;;  %2938 = vmatmul.bf16.gmra.mxu2 %v7160_v25  ;;  %v7355_v48 = vpack.c.bf16 %v3075_v28, %v3071_v6  ;;  %v3078_v12 = vmax.f32 %v2811_v10, 0.0  ;;  %v5250_v10 = vld [vmem:[%s8083_s7 + $0x80] sm:$0xf] }
 0x3df   : > { %3027 = vmatmul.bf16.gmra.mxu3 %v7160_v25  ;;  %v7358_v36 = vpack.c.bf16 %v3076_v35, %v3072_v46  ;;  %3642 = vmatpush.bf16.msra.mxu0 %v5187_v32 }
 0x3e1   : > { %8115 = vst [vmem:[#allocation2_spill] sm:$0xff] %v7358_v36  ;;  %v2899_v15 = vpop.f32.mrf.mxu2 }
 0x3e2   : > { %v2988_v49 = vpop.f32.mrf.mxu3  ;;  %v2723_v24 = vpop.f32.mrf.mxu0  ;;  %v2900_v25 = vadd.f32 %v2899_v15, %v7269_v34 }
 0x3e3   : > { %v2724_v27 = vadd.f32 %v2723_v24, %v7238_v21  ;;  %v2812_v43 = vpop.f32.mrf.mxu1  ;;  %v2989_v18 = vadd.f32 %v2988_v49, %v7271_v19  ;;  %v5621_v49 = vld [vmem:[%s8083_s7 + $0x84] sm:$0xf0] }
 0x3e4   : > { %v2813_v56 = vadd.f32 %v2812_v43, %v7241_v4  ;;  %v3079_v23 = vmax.f32 %v2900_v25, 0.0  ;;  %v5251_v43 = vor.u32 %v5621_v49, %v5250_v10 }
 0x3e5   : > { %v3081_v62 = vmax.f32 %v2724_v27, 0.0  ;;  %v3080_v26 = vmax.f32 %v2989_v18, 0.0 }
 0x3e6   : > { %v3082_v50 = vmax.f32 %v2813_v56, 0.0  ;;  %3731 = vmatpush.bf16.msra.mxu1 %v5251_v43 }
 0x3e7   : > { %v7364_v22 = vpack.c.bf16 %v3081_v62, %v3077_v54 }
 0x3e8   : > { %v7367_v31 = vpack.c.bf16 %v3082_v50, %v3078_v12 }
 0x3e9   : > { %8116 = vst [vmem:[#allocation3_spill] sm:$0xff] %v7364_v22  ;;  %v2901_v38 = vpop.f32.mrf.mxu2 }
 0x3ea   : > { %8117 = vst [vmem:[#allocation4_spill] sm:$0xff] %v7367_v31  ;;  %v2902_v57 = vadd.f32 %v2901_v38, %v7269_v34  ;;  %v2990_v53 = vpop.f32.mrf.mxu3  ;;  %v2726_v5 = vpop.f32.mrf.mxu0 }
 0x3eb   : > { %v2991_v17 = vadd.f32 %v2990_v53, %v7271_v19  ;;  %v2815_v14 = vpop.f32.mrf.mxu1  ;;  %v2727_v9 = vadd.f32 %v2726_v5, %v7238_v21 }
 0x3ec   : > { %v3083_v2 = vmax.f32 %v2902_v57, 0.0  ;;  %v2816_v59 = vadd.f32 %v2815_v14, %v7241_v4 }
 0x3ed   : > { %v3084_v39 = vmax.f32 %v2991_v17, 0.0  ;;  %2765 = vmatmul.bf16.gmra.mxu0 %v7192_v7  ;;  %v3085_v8 = vmax.f32 %v2727_v9, 0.0 }
 0x3ee   : > { %2854 = vmatmul.bf16.gmra.mxu1 %v7192_v7  ;;  %2943 = vmatmul.bf16.gmra.mxu2 %v7192_v7  ;;  %v7375_v11 = vpack.c.bf16 %v3083_v2, %v3079_v23  ;;  %v3086_v24 = vmax.f32 %v2816_v59, 0.0 }
 0x3ef   : > { %3032 = vmatmul.bf16.gmra.mxu3 %v7192_v7  ;;  %v7387_v0 = vpack.c.bf16 %v3084_v39, %v3080_v26  ;;  %v5378_v7 = vld [vmem:[%s8083_s7 + $0x180] sm:$0xf] }
 0x3f0   : > { %8118 = vst [vmem:[#allocation5_spill] sm:$0xff] %v7375_v11  ;;  %v5379_v61 = vor.u32 %v5653_v51, %v5378_v7 }
 0x3f1   : > { %8119 = vst [vmem:[#allocation6_spill] sm:$0xff] %v7387_v0  ;;  %v2904_v3 = vpop.f32.mrf.mxu2 }
 0x3f2   : > { %v2993_v60 = vpop.f32.mrf.mxu3  ;;  %v2728_v6 = vpop.f32.mrf.mxu0  ;;  %3909 = vmatpush.bf16.msra.mxu3 %v5379_v61  ;;  %v2905_v54 = vadd.f32 %v2904_v3, %v7269_v34 }
 0x3f3   : > { %v2729_v28 = vadd.f32 %v2728_v6, %v7238_v21  ;;  %v2817_v46 = vpop.f32.mrf.mxu1  ;;  %v2994_v12 = vadd.f32 %v2993_v60, %v7271_v19 }
 0x3f4   : > { %v2818_v35 = vadd.f32 %v2817_v46, %v7241_v4  ;;  %v3087_v5 = vmax.f32 %v2905_v54, 0.0 }
 0x3f5   : > { %v3089_v15 = vmax.f32 %v2729_v28, 0.0  ;;  %v3088_v14 = vmax.f32 %v2994_v12, 0.0  ;;  %v5650_v12 = vld [vmem:[%s8083_s7 + $0x174] sm:$0xf] }
 0x3f6   : > { %v3090_v27 = vmax.f32 %v2818_v35, 0.0 }
 0x3f7   : > { %v7408_v56 = vpack.c.bf16 %v3089_v15, %v3085_v8 }
 0x3f8   : > { %v7411_v62 = vpack.c.bf16 %v3090_v27, %v3086_v24 }
 0x3f9   : > { %8120 = vst [vmem:[#allocation7_spill] sm:$0xff] %v7408_v56  ;;  %v2906_v50 = vpop.f32.mrf.mxu2 }
 0x3fa   : > { %8121 = vst [vmem:[#allocation8_spill] sm:$0xff] %v7411_v62  ;;  %v2907_v25 = vadd.f32 %v2906_v50, %v7269_v34  ;;  %v2995_v18 = vpop.f32.mrf.mxu3  ;;  %v2731_v38 = vpop.f32.mrf.mxu0  ;;  %v5372_v50 = vld [vmem:[%s8083_s7 + $0x178] sm:$0xf0] }
 0x3fb   : > { %v2996_v57 = vadd.f32 %v2995_v18, %v7271_v19  ;;  %v2820_v53 = vpop.f32.mrf.mxu1  ;;  %v2732_v39 = vadd.f32 %v2731_v38, %v7238_v21  ;;  %v5375_v38 = vor.u32 %v5650_v12, %v5372_v50 }
 0x3fc   : > { %v3091_v17 = vmax.f32 %v2907_v25, 0.0  ;;  %v2821_v29 = vadd.f32 %v2820_v53, %v7241_v4  ;;  %v5618_v25 = vld [vmem:[%s8083_s7 + $0x74] sm:$0xf]  ;;  %v5436_v53 = vld [vmem:[%s8083_s7 + $0x1f8] sm:$0xf0] }
 0x3fd   : > { %v3092_v23 = vmax.f32 %v2996_v57, 0.0  ;;  %2770 = vmatmul.bf16.gmra.mxu0 %v7200_v58  ;;  %v3093_v9 = vmax.f32 %v2732_v39, 0.0  ;;  %v5244_v57 = vld [vmem:[%s8083_s7 + $0x78] sm:$0xf0]  ;;  %4169 = vmatpush.bf16.msrb.mxu2 %v5375_v38 }
 0x3fe   : > { %2859 = vmatmul.bf16.gmra.mxu1 %v7200_v58  ;;  %2948 = vmatmul.bf16.gmra.mxu2 %v7200_v58  ;;  %v7419_v2 = vpack.c.bf16 %v3091_v17, %v3087_v5  ;;  %v3094_v32 = vmax.f32 %v2821_v29, 0.0 }
 0x3ff   : > { %3037 = vmatmul.bf16.gmra.mxu3 %v7200_v58  ;;  %v7422_v26 = vpack.c.bf16 %v3092_v23, %v3088_v14  ;;  %v5247_v14 = vor.u32 %v5618_v25, %v5244_v57 }
 0x400   : > { %8122 = vst [vmem:[#allocation9_spill] sm:$0xff] %v7419_v2 }
 0x401   : > { %8123 = vst [vmem:[#allocation10_spill] sm:$0xff] %v7422_v26  ;;  %v2909_v44 = vpop.f32.mrf.mxu2  ;;  %3991 = vmatpush.bf16.msrb.mxu0 %v5247_v14 }
 0x402   : > { %v2998_v55 = vpop.f32.mrf.mxu3  ;;  %v2733_v13 = vpop.f32.mrf.mxu0  ;;  %v2910_v58 = vadd.f32 %v2909_v44, %v7269_v34 }
 0x403   : > { %v2734_v30 = vadd.f32 %v2733_v13, %v7238_v21  ;;  %v2822_v7 = vpop.f32.mrf.mxu1  ;;  %v2999_v6 = vadd.f32 %v2998_v55, %v7271_v19 }
 0x404   : > { %v2823_v51 = vadd.f32 %v2822_v7, %v7241_v4  ;;  %v3095_v49 = vmax.f32 %v2910_v58, 0.0 }
 0x405   : > { %v3097_v3 = vmax.f32 %v2734_v30, 0.0  ;;  %v3096_v27 = vmax.f32 %v2999_v6, 0.0 }
 0x406   : > { %v3098_v61 = vmax.f32 %v2823_v51, 0.0 }
 0x407   : > { %v7428_v59 = vpack.c.bf16 %v3097_v3, %v3093_v9  ;;  %v5634_v9 = vld [vmem:[%s8083_s7 + $0xf4] sm:$0xf]  ;;  %v5308_v3 = vld [vmem:[%s8083_s7 + $0xf8] sm:$0xf0] }
 0x408   : > { %v7431_v60 = vpack.c.bf16 %v3098_v61, %v3094_v32  ;;  %v5311_v58 = vor.u32 %v5634_v9, %v5308_v3 }
 0x409   : > { %8124 = vst [vmem:[#allocation11_spill] sm:$0xff] %v7428_v59  ;;  %v2911_v28 = vpop.f32.mrf.mxu2 }
 0x40a   : > { %8125 = vst [vmem:[#allocation12_spill] sm:$0xff] %v7431_v60  ;;  %v2912_v46 = vadd.f32 %v2911_v28, %v7269_v34  ;;  %v3000_v35 = vpop.f32.mrf.mxu3  ;;  %v2736_v8 = vpop.f32.mrf.mxu0  ;;  %4080 = vmatpush.bf16.msrb.mxu1 %v5311_v58 }
 0x40b   : > { %v3001_v15 = vadd.f32 %v3000_v35, %v7271_v19  ;;  %v2825_v10 = vpop.f32.mrf.mxu1  ;;  %v2737_v5 = vadd.f32 %v2736_v8, %v7238_v21 }
 0x40c   : > { %v3099_v24 = vmax.f32 %v2912_v46, 0.0  ;;  %v2826_v39 = vadd.f32 %v2825_v10, %v7241_v4 }
 0x40d   : > { %v3100_v43 = vmax.f32 %v3001_v15, 0.0  ;;  %2775 = vmatmul.bf16.gmra.mxu0 %v7232_v16  ;;  %v3101_v7 = vmax.f32 %v2737_v5, 0.0 }
 0x40e   : > { %2864 = vmatmul.bf16.gmra.mxu1 %v7232_v16  ;;  %2953 = vmatmul.bf16.gmra.mxu2 %v7232_v16  ;;  %v7439_v54 = vpack.c.bf16 %v3099_v24, %v3095_v49  ;;  %v3102_v32 = vmax.f32 %v2826_v39, 0.0 }
 0x40f   : > { %3042 = vmatmul.bf16.gmra.mxu3 %v7232_v16  ;;  %v7451_v18 = vpack.c.bf16 %v3100_v43, %v3096_v27  ;;  %v5666_v16 = vld [vmem:[%s8083_s7 + $0x1f4] sm:$0xf] }
 0x410   : > { %8126 = vst [vmem:[#allocation13_spill] sm:$0xff] %v7439_v54  ;;  %v5439_v23 = vor.u32 %v5666_v16, %v5436_v53 }
 0x411   : > { %8127 = vst [vmem:[#allocation14_spill] sm:$0xff] %v7451_v18  ;;  %v2914_v17 = vpop.f32.mrf.mxu2 }
 0x412   : > { %v3003_v44 = vpop.f32.mrf.mxu3  ;;  %v2738_v29 = vpop.f32.mrf.mxu0  ;;  %4258 = vmatpush.bf16.msrb.mxu3 %v5439_v23  ;;  %v2915_v28 = vadd.f32 %v2914_v17, %v7269_v34 }
 0x413   : > { %v2739_v55 = vadd.f32 %v2738_v29, %v7238_v21  ;;  %v2827_v13 = vpop.f32.mrf.mxu1  ;;  %v3004_v35 = vadd.f32 %v3003_v44, %v7271_v19 }
 0x414   : > { %v2828_v30 = vadd.f32 %v2827_v13, %v7241_v4  ;;  %v3103_v43 = vmax.f32 %v2915_v28, 0.0 }
 0x415   : > { %v3105_v51 = vmax.f32 %v2739_v55, 0.0  ;;  %v3104_v50 = vmax.f32 %v3004_v35, 0.0 }
 0x416   : > { %v3106_v61 = vmax.f32 %v2828_v30, 0.0 }
 0x417   : > { %v7472_v6 = vpack.c.bf16 %v3105_v51, %v3101_v7 }
 0x418   : > { %v7475_v46 = vpack.c.bf16 %v3106_v61, %v3102_v32 }
 0x419   : > { %8128 = vst [vmem:[#allocation15_spill] sm:$0xff] %v7472_v6  ;;  %v2916_v8 = vpop.f32.mrf.mxu2 }
 0x41a   : > { %8129 = vst [vmem:[#allocation16_spill] sm:$0xff] %v7475_v46  ;;  %v2917_v15 = vadd.f32 %v2916_v8, %v7269_v34  ;;  %v3005_v10 = vpop.f32.mrf.mxu3  ;;  %v2741_v49 = vpop.f32.mrf.mxu0 }
 0x41b   : > { %v3006_v24 = vadd.f32 %v3005_v10, %v7271_v19  ;;  %v2830_v27 = vpop.f32.mrf.mxu1  ;;  %v2742_v16 = vadd.f32 %v2741_v49, %v7238_v21 }
 0x41c   : > { %v3107_v12 = vmax.f32 %v2917_v15, 0.0  ;;  %v2831_v5 = vadd.f32 %v2830_v27, %v7241_v4  ;;  %v5648_v27 = vld [vmem:[%s8083_s7 + $0x164] sm:$0xf] }
 0x41d   : > { %v3108_v25 = vmax.f32 %v3006_v24, 0.0  ;;  %2780 = vmatmul.bf16.gmra.mxu0 %v7255_v42  ;;  %v3109_v29 = vmax.f32 %v2742_v16, 0.0  ;;  %v5236_v16 = vld [vmem:[%s8083_s7 + $0x68] sm:$0xf0] }
 0x41e   : > { %2869 = vmatmul.bf16.gmra.mxu1 %v7255_v42  ;;  %2958 = vmatmul.bf16.gmra.mxu2 %v7255_v42  ;;  %v7483_v38 = vpack.c.bf16 %v3107_v12, %v3103_v43  ;;  %v3110_v13 = vmax.f32 %v2831_v5, 0.0  ;;  %v5364_v43 = vld [vmem:[%s8083_s7 + $0x168] sm:$0xf0]  ;;  %v5616_v12 = vld [vmem:[%s8083_s7 + $0x64] sm:$0xf] }
 0x41f   : > { %3047 = vmatmul.bf16.gmra.mxu3 %v7255_v42  ;;  %v7486_v57 = vpack.c.bf16 %v3108_v25, %v3104_v50  ;;  %v5367_v25 = vor.u32 %v5648_v27, %v5364_v43  ;;  %v5428_v5 = vld [vmem:[%s8083_s7 + $0x1e8] sm:$0xf0] }
 0x420   : > { %8130 = vst [vmem:[#allocation17_spill] sm:$0xff] %v7483_v38 }
 0x421   : > { %8131 = vst [vmem:[#allocation18_spill] sm:$0xff] %v7486_v57  ;;  %v2919_v53 = vpop.f32.mrf.mxu2  ;;  %4170 = vmatpush.bf16.msrb.mxu2 %v5367_v25 }
 0x422   : > { %v3008_v17 = vpop.f32.mrf.mxu3  ;;  %v2743_v14 = vpop.f32.mrf.mxu0  ;;  %v2920_v42 = vadd.f32 %v2919_v53, %v7269_v34  ;;  %v5664_v53 = vld [vmem:[%s8083_s7 + $0x1e4] sm:$0xf] }
 0x423   : > { %v2744_v23 = vadd.f32 %v2743_v14, %v7238_v21  ;;  %v2832_v39 = vpop.f32.mrf.mxu1  ;;  %v3009_v9 = vadd.f32 %v3008_v17, %v7271_v19 }
 0x424   : > { %v2833_v44 = vadd.f32 %v2832_v39, %v7241_v4  ;;  %v3111_v8 = vmax.f32 %v2920_v42, 0.0  ;;  %v5431_v39 = vor.u32 %v5664_v53, %v5428_v5 }
 0x425   : > { %v3113_v55 = vmax.f32 %v2744_v23, 0.0  ;;  %v3112_v10 = vmax.f32 %v3009_v9, 0.0  ;;  %v5239_v23 = vor.u32 %v5616_v12, %v5236_v16 }
 0x426   : > { %v3114_v30 = vmax.f32 %v2833_v44, 0.0  ;;  %4259 = vmatpush.bf16.msrb.mxu3 %v5431_v39 }
 0x427   : > { %v7492_v7 = vpack.c.bf16 %v3113_v55, %v3109_v29  ;;  %3992 = vmatpush.bf16.msrb.mxu0 %v5239_v23 }
 0x428   : > { %v7495_v51 = vpack.c.bf16 %v3114_v30, %v3110_v13 }
 0x429   : > { %v2921_v3 = vpop.f32.mrf.mxu2 }
 0x42a   : > { %v2922_v32 = vadd.f32 %v2921_v3, %v7269_v34  ;;  %v3010_v61 = vpop.f32.mrf.mxu3  ;;  %v2746_v58 = vpop.f32.mrf.mxu0 }
 0x42b   : > { %v3011_v28 = vadd.f32 %v3010_v61, %v7271_v19  ;;  %v2835_v35 = vpop.f32.mrf.mxu1  ;;  %v2747_v17 = vadd.f32 %v2746_v58, %v7238_v21  ;;  %v5300_v61 = vld [vmem:[%s8083_s7 + $0xe8] sm:$0xf0] }
 0x42c   : > { %v3115_v15 = vmax.f32 %v2922_v32, 0.0  ;;  %v2836_v44 = vadd.f32 %v2835_v35, %v7241_v4  ;;  %v5632_v32 = vld [vmem:[%s8083_s7 + $0xe4] sm:$0xf] }
 0x42d   : > { %v3116_v49 = vmax.f32 %v3011_v28, 0.0  ;;  %3643 = vmatmul.bf16.vlgmr.msra.gmra.mxu0 %v7280_v20  ;;  %v3117_v9 = vmax.f32 %v2747_v17, 0.0  ;;  %v5303_v35 = vor.u32 %v5632_v32, %v5300_v61 }
 0x42e   : > { %3732 = vmatmul.bf16.vlgmr.msra.gmra.mxu1 %v7283_v63  ;;  %3821 = vmatmul.bf16.vlgmr.msra.gmra.mxu2 %v7289_v1  ;;  %v7503_v24 = vpack.c.bf16 %v3115_v15, %v3111_v8  ;;  %v3118_v58 = vmax.f32 %v2836_v44, 0.0 }
 0x42f   : > { %3910 = vmatmul.bf16.vlgmr.msra.gmra.mxu3 %v7293_v40  ;;  %v7515_v50 = vpack.c.bf16 %v3116_v49, %v3112_v10  ;;  %4081 = vmatpush.bf16.msrb.mxu1 %v5303_v35 }
 0x431   : > { %8132 = vst [vmem:[#allocation19_spill] sm:$0xff] %v7515_v50  ;;  %v2924_v14 = vpop.f32.mrf.mxu2 }
 0x432   : > { %v3013_v29 = vpop.f32.mrf.mxu3  ;;  %v2748_v55 = vpop.f32.mrf.mxu0  ;;  %v2925_v15 = vadd.f32 %v2924_v14, %v7269_v34 }
 0x433   : > { %v2749_v13 = vadd.f32 %v2748_v55, %v7238_v21  ;;  %v2837_v30 = vpop.f32.mrf.mxu1  ;;  %v3014_v49 = vadd.f32 %v3013_v29, %v7271_v19 }
 0x434   : > { %v2838_v42 = vadd.f32 %v2837_v30, %v7241_v4  ;;  %v3119_v5 = vmax.f32 %v2925_v15, 0.0 }
 0x435   : > { %v3121_v3 = vmax.f32 %v2749_v13, 0.0  ;;  %v3120_v23 = vmax.f32 %v3014_v49, 0.0 }
 0x436   : > { %v3122_v28 = vmax.f32 %v2838_v42, 0.0 }
 0x437   : > { %v7536_v8 = vpack.c.bf16 %v3121_v3, %v3117_v9 }
 0x438   : > { %v7539_v10 = vpack.c.bf16 %v3122_v28, %v3118_v58 }
 0x439   : > { %v2926_v27 = vpop.f32.mrf.mxu2 }
 0x43a   : > { %v2927_v43 = vadd.f32 %v2926_v27, %v7269_v34  ;;  %v3015_v12 = vpop.f32.mrf.mxu3  ;;  %v2751_v25 = vpop.f32.mrf.mxu0 }
 0x43b   : > { %v3016_v16 = vadd.f32 %v3015_v12, %v7271_v19  ;;  %v2840_v53 = vpop.f32.mrf.mxu1  ;;  %v2752_v29 = vadd.f32 %v2751_v25, %v7238_v21 }
 0x43c   : > { %v3123_v17 = vmax.f32 %v2927_v43, 0.0  ;;  %v2841_v13 = vadd.f32 %v2840_v53, %v7241_v4 }
 0x43d   : > { %v3124_v39 = vmax.f32 %v3016_v16, 0.0  ;;  %3648 = vmatmul.bf16.gmra.mxu0 %v7300_v52  ;;  %v3125_v61 = vmax.f32 %v2752_v29, 0.0 }
 0x43e   : > { %3737 = vmatmul.bf16.gmra.mxu1 %v7303_v45  ;;  %3826 = vmatmul.bf16.gmra.mxu2 %v7311_v47  ;;  %v7547_v14 = vpack.c.bf16 %v3123_v17, %v3119_v5  ;;  %v3126_v28 = vmax.f32 %v2841_v13, 0.0 }
 0x43f   : > { %3915 = vmatmul.bf16.gmra.mxu3 %v7323_v41  ;;  %v7550_v44 = vpack.c.bf16 %v3124_v39, %v3120_v23 }
 0x441   : > { %v2929_v55 = vpop.f32.mrf.mxu2 }
 0x442   : > { %v3018_v30 = vpop.f32.mrf.mxu3  ;;  %v2753_v42 = vpop.f32.mrf.mxu0  ;;  %v2930_v49 = vadd.f32 %v2929_v55, %v7269_v34 }
 0x443   : > { %v2754_v9 = vadd.f32 %v2753_v42, %v7238_v21  ;;  %v2842_v3 = vpop.f32.mrf.mxu1  ;;  %v3019_v43 = vadd.f32 %v3018_v30, %v7271_v19  ;;  %v5646_v30 = vld [vmem:[%s8083_s7 + $0x154] sm:$0xf]  ;;  %v5356_v42 = vld [vmem:[%s8083_s7 + $0x158] sm:$0xf0] }
 0x444   : > { %v2843_v32 = vadd.f32 %v2842_v3, %v7241_v4  ;;  %v3127_v23 = vmax.f32 %v2930_v49, 0.0 }
 0x445   : > { %v3129_v58 = vmax.f32 %v2754_v9, 0.0  ;;  %v3128_v29 = vmax.f32 %v3019_v43, 0.0  ;;  %v5614_v9 = vld [vmem:[%s8083_s7 + $0x54] sm:$0xf] }
 0x446   : > { %v3130_v35 = vmax.f32 %v2843_v32, 0.0  ;;  %v5359_v32 = vor.u32 %v5646_v30, %v5356_v42 }
 0x447   : > { %v7556_v15 = vpack.c.bf16 %v3129_v58, %v3125_v61  ;;  %v5228_v61 = vld [vmem:[%s8083_s7 + $0x58] sm:$0xf0]  ;;  %v5662_v58 = vld [vmem:[%s8083_s7 + $0x1d4] sm:$0xf] }
 0x448   : > { %v7559_v27 = vpack.c.bf16 %v3130_v35, %v3126_v28  ;;  %v5420_v28 = vld [vmem:[%s8083_s7 + $0x1d8] sm:$0xf0]  ;;  %v5231_v43 = vor.u32 %v5614_v9, %v5228_v61  ;;  %4171 = vmatpush.bf16.msrb.mxu2 %v5359_v32 }
 0x449   : > { %v2931_v12 = vpop.f32.mrf.mxu2 }
 0x44a   : > { %8133 = vst [vmem:[#allocation20_spill] sm:$0xff] %v7559_v27  ;;  %v2932_v25 = vadd.f32 %v2931_v12, %v7269_v34  ;;  %v3020_v16 = vpop.f32.mrf.mxu3  ;;  %v2756_v53 = vpop.f32.mrf.mxu0  ;;  %v5423_v12 = vor.u32 %v5662_v58, %v5420_v28  ;;  %3993 = vmatpush.bf16.msrb.mxu0 %v5231_v43 }
 0x44b   : > { %v3021_v5 = vadd.f32 %v3020_v16, %v7271_v19  ;;  %v2845_v17 = vpop.f32.mrf.mxu1  ;;  %v2757_v35 = vadd.f32 %v2756_v53, %v7238_v21  ;;  %v5630_v53 = vld [vmem:[%s8083_s7 + $0xd4] sm:$0xf] }
 0x44c   : > { %v3131_v39 = vmax.f32 %v2932_v25, 0.0  ;;  %v2846_v25 = vadd.f32 %v2845_v17, %v7241_v4  ;;  %4260 = vmatpush.bf16.msrb.mxu3 %v5423_v12  ;;  %v5292_v17 = vld [vmem:[%s8083_s7 + $0xd8] sm:$0xf0] }
 0x44d   : > { %v3132_v13 = vmax.f32 %v3021_v5, 0.0  ;;  %3653 = vmatmul.bf16.gmra.mxu0 %v7344_v33  ;;  %v5295_v32 = vor.u32 %v5630_v53, %v5292_v17 }
 0x44e   : > { %3742 = vmatmul.bf16.gmra.mxu1 %v7347_v37  ;;  %3831 = vmatmul.bf16.gmra.mxu2 %v7355_v48  ;;  %v7567_v55 = vpack.c.bf16 %v3131_v39, %v3127_v23  ;;  %v3134_v42 = vmax.f32 %v2846_v25, 0.0 }
 0x44f   : > { %3920 = vmatmul.bf16.gmra.mxu3 %v7358_v36  ;;  %v7579_v3 = vpack.c.bf16 %v3132_v13, %v3128_v29  ;;  %v3133_v13 = vmax.f32 %v2757_v35, 0.0  ;;  %4082 = vmatpush.bf16.msrb.mxu1 %v5295_v32 }
 0x450   : > { %8134 = vst [vmem:[#allocation21_spill] sm:$0xff] %v7567_v55 }
 0x451   : > { %8135 = vst [vmem:[#allocation22_spill] sm:$0xff] %v7579_v3  ;;  %v2934_v49 = vpop.f32.mrf.mxu2 }
 0x452   : > { %v3023_v16 = vpop.f32.mrf.mxu3  ;;  %v2758_v5 = vpop.f32.mrf.mxu0  ;;  %v2935_v58 = vadd.f32 %v2934_v49, %v7269_v34 }
 0x453   : > { %v2759_v23 = vadd.f32 %v2758_v5, %v7238_v21  ;;  %v2847_v39 = vpop.f32.mrf.mxu1  ;;  %v3024_v35 = vadd.f32 %v3023_v16, %v7271_v19 }
 0x454   : > { %v2848_v29 = vadd.f32 %v2847_v39, %v7241_v4  ;;  %v3135_v25 = vmax.f32 %v2935_v58, 0.0 }
 0x455   : > { %v3137_v30 = vmax.f32 %v2759_v23, 0.0  ;;  %v3136_v53 = vmax.f32 %v3024_v35, 0.0 }
 0x456   : > { %v3138_v9 = vmax.f32 %v2848_v29, 0.0 }
 0x457   : > { %v7600_v61 = vpack.c.bf16 %v3137_v30, %v3133_v13 }
 0x458   : > { %v7603_v28 = vpack.c.bf16 %v3138_v9, %v3134_v42 }
 0x459   : > { %v2936_v43 = vpop.f32.mrf.mxu2 }
 0x45a   : > { %v2937_v12 = vadd.f32 %v2936_v43, %v7269_v34  ;;  %v3025_v5 = vpop.f32.mrf.mxu3  ;;  %v2761_v23 = vpop.f32.mrf.mxu0 }
 0x45b   : > { %v3026_v39 = vadd.f32 %v3025_v5, %v7271_v19  ;;  %v2850_v36 = vpop.f32.mrf.mxu1  ;;  %v2762_v30 = vadd.f32 %v2761_v23, %v7238_v21 }
 0x45c   : > { %v3139_v29 = vmax.f32 %v2937_v12, 0.0  ;;  %v2851_v42 = vadd.f32 %v2850_v36, %v7241_v4 }
 0x45d   : > { %v3140_v13 = vmax.f32 %v3026_v39, 0.0  ;;  %3658 = vmatmul.bf16.gmra.mxu0 %v7364_v22  ;;  %v3141_v12 = vmax.f32 %v2762_v30, 0.0 }
 0x45e   : > { %3747 = vmatmul.bf16.gmra.mxu1 %v7367_v31  ;;  %3836 = vmatmul.bf16.gmra.mxu2 %v7375_v11  ;;  %v7611_v49 = vpack.c.bf16 %v3139_v29, %v3135_v25  ;;  %v3142_v39 = vmax.f32 %v2851_v42, 0.0 }
 0x45f   : > { %3925 = vmatmul.bf16.gmra.mxu3 %v7387_v0  ;;  %v7614_v16 = vpack.c.bf16 %v3140_v13, %v3136_v53 }
 0x461   : > { %v2939_v17 = vpop.f32.mrf.mxu2 }
 0x462   : > { %v3028_v9 = vpop.f32.mrf.mxu3  ;;  %v2763_v32 = vpop.f32.mrf.mxu0  ;;  %v2940_v53 = vadd.f32 %v2939_v17, %v7269_v34 }
 0x463   : > { %v2764_v58 = vadd.f32 %v2763_v32, %v7238_v21  ;;  %v2852_v35 = vpop.f32.mrf.mxu1  ;;  %v3029_v23 = vadd.f32 %v3028_v9, %v7271_v19  ;;  %v5644_v9 = vld [vmem:[%s8083_s7 + $0x144] sm:$0xf] }
 0x464   : > { %v2853_v43 = vadd.f32 %v2852_v35, %v7241_v4  ;;  %v3143_v30 = vmax.f32 %v2940_v53, 0.0 }
 0x465   : > { %v3145_v5 = vmax.f32 %v2764_v58, 0.0  ;;  %v3144_v42 = vmax.f32 %v3029_v23, 0.0 }
 0x466   : > { %v3146_v25 = vmax.f32 %v2853_v43, 0.0 }
 0x467   : > { %v7620_v29 = vpack.c.bf16 %v3145_v5, %v3141_v12  ;;  %v5220_v5 = vld [vmem:[%s8083_s7 + $0x48] sm:$0xf0] }
 0x468   : > { %v7623_v13 = vpack.c.bf16 %v3146_v25, %v3142_v39  ;;  %v5660_v39 = vld [vmem:[%s8083_s7 + $0x1c4] sm:$0xf]  ;;  %v5412_v25 = vld [vmem:[%s8083_s7 + $0x1c8] sm:$0xf0] }
 0x469   : > { %v2941_v36 = vpop.f32.mrf.mxu2 }
 0x46a   : > { %v2942_v0 = vadd.f32 %v2941_v36, %v7269_v34  ;;  %v3030_v11 = vpop.f32.mrf.mxu3  ;;  %v2766_v32 = vpop.f32.mrf.mxu0 }
 0x46b   : > { %v3031_v31 = vadd.f32 %v3030_v11, %v7271_v19  ;;  %v2855_v35 = vpop.f32.mrf.mxu1  ;;  %v5348_v11 = vld [vmem:[%s8083_s7 + $0x148] sm:$0xf0]  ;;  %v2767_v53 = vadd.f32 %v2766_v32, %v7238_v21  ;;  %v5628_v32 = vld [vmem:[%s8083_s7 + $0xc4] sm:$0xf] }
 0x46c   : > { %v3147_v58 = vmax.f32 %v2942_v0, 0.0  ;;  %v5351_v12 = vor.u32 %v5644_v9, %v5348_v11 }
 0x46d   : > { %v3148_v43 = vmax.f32 %v3031_v31, 0.0  ;;  %3663 = vmatmul.bf16.gmra.mxu0 %v7408_v56  ;;  %v5612_v31 = vld [vmem:[%s8083_s7 + $0x44] sm:$0xf] }
 0x46e   : > { %3752 = vmatmul.bf16.gmra.mxu1 %v7411_v62  ;;  %3841 = vmatmul.bf16.gmra.mxu2 %v7419_v2  ;;  %v7631_v17 = vpack.c.bf16 %v3147_v58, %v3143_v30  ;;  %v5223_v36 = vor.u32 %v5612_v31, %v5220_v5  ;;  %v5415_v30 = vor.u32 %v5660_v39, %v5412_v25  ;;  %v3149_v2 = vmax.f32 %v2767_v53, 0.0 }
 0x46f   : > { %3930 = vmatmul.bf16.gmra.mxu3 %v7422_v26  ;;  %v7643_v0 = vpack.c.bf16 %v3148_v43, %v3144_v42  ;;  %v2856_v58 = vadd.f32 %v2855_v35, %v7241_v4  ;;  %4172 = vmatpush.bf16.msrb.mxu2 %v5351_v12  ;;  %v5284_v35 = vld [vmem:[%s8083_s7 + $0xc8] sm:$0xf0] }
 0x470   : > { %3994 = vmatpush.bf16.msrb.mxu0 %v5223_v36  ;;  %4261 = vmatpush.bf16.msrb.mxu3 %v5415_v30  ;;  %v5287_v12 = vor.u32 %v5628_v32, %v5284_v35 }
 0x471   : > { %v2944_v23 = vpop.f32.mrf.mxu2  ;;  %v3150_v31 = vmax.f32 %v2856_v58, 0.0 }
 0x472   : > { %v3033_v42 = vpop.f32.mrf.mxu3  ;;  %v2768_v43 = vpop.f32.mrf.mxu0  ;;  %v2945_v25 = vadd.f32 %v2944_v23, %v7269_v34  ;;  %4083 = vmatpush.bf16.msrb.mxu1 %v5287_v12 }
 0x473   : > { %v2769_v9 = vadd.f32 %v2768_v43, %v7238_v21  ;;  %v2857_v11 = vpop.f32.mrf.mxu1  ;;  %v3034_v53 = vadd.f32 %v3033_v42, %v7271_v19 }
 0x474   : > { %v2858_v26 = vadd.f32 %v2857_v11, %v7241_v4  ;;  %v3151_v58 = vmax.f32 %v2945_v25, 0.0 }
 0x475   : > { %v3153_v62 = vmax.f32 %v2769_v9, 0.0  ;;  %v3152_v32 = vmax.f32 %v3034_v53, 0.0 }
 0x476   : > { %v3154_v5 = vmax.f32 %v2858_v26, 0.0 }
 0x477   : > { %v7664_v39 = vpack.c.bf16 %v3153_v62, %v3149_v2 }
 0x478   : > { %v7667_v36 = vpack.c.bf16 %v3154_v5, %v3150_v31 }
 0x479   : > { %v2946_v30 = vpop.f32.mrf.mxu2 }
 0x47a   : > { %v2947_v43 = vadd.f32 %v2946_v30, %v7269_v34  ;;  %v3035_v9 = vpop.f32.mrf.mxu3  ;;  %v2771_v11 = vpop.f32.mrf.mxu0 }
 0x47b   : > { %v3036_v56 = vadd.f32 %v3035_v9, %v7271_v19  ;;  %v2860_v22 = vpop.f32.mrf.mxu1  ;;  %v2772_v42 = vadd.f32 %v2771_v11, %v7238_v21 }
 0x47c   : > { %v3155_v26 = vmax.f32 %v2947_v43, 0.0  ;;  %v2861_v31 = vadd.f32 %v2860_v22, %v7241_v4 }
 0x47d   : > { %v3156_v62 = vmax.f32 %v3036_v56, 0.0  ;;  %3668 = vmatmul.bf16.gmra.mxu0 %v7428_v59  ;;  %v3157_v30 = vmax.f32 %v2772_v42, 0.0 }
 0x47e   : > { %3757 = vmatmul.bf16.gmra.mxu1 %v7431_v60  ;;  %3846 = vmatmul.bf16.gmra.mxu2 %v7439_v54  ;;  %v7675_v2 = vpack.c.bf16 %v3155_v26, %v3151_v58  ;;  %v3158_v9 = vmax.f32 %v2861_v31, 0.0 }
 0x47f   : > { %3935 = vmatmul.bf16.gmra.mxu3 %v7451_v18  ;;  %v7678_v23 = vpack.c.bf16 %v3156_v62, %v3152_v32 }
 0x481   : > { %v2949_v35 = vpop.f32.mrf.mxu2 }
 0x482   : > { %v3038_v5 = vpop.f32.mrf.mxu3  ;;  %v2773_v12 = vpop.f32.mrf.mxu0  ;;  %v2950_v32 = vadd.f32 %v2949_v35, %v7269_v34 }
 0x483   : > { %v2774_v56 = vadd.f32 %v2773_v12, %v7238_v21  ;;  %v2862_v25 = vpop.f32.mrf.mxu1  ;;  %v3039_v11 = vadd.f32 %v3038_v5, %v7271_v19  ;;  %v5642_v5 = vld [vmem:[%s8083_s7 + $0x134] sm:$0xf] }
 0x484   : > { %v2863_v53 = vadd.f32 %v2862_v25, %v7241_v4  ;;  %v3159_v42 = vmax.f32 %v2950_v32, 0.0 }
 0x485   : > { %v3161_v43 = vmax.f32 %v2774_v56, 0.0  ;;  %v3160_v31 = vmax.f32 %v3039_v11, 0.0 }
 0x486   : > { %v3162_v58 = vmax.f32 %v2863_v53, 0.0 }
 0x487   : > { %v7684_v26 = vpack.c.bf16 %v3161_v43, %v3157_v30  ;;  %v5212_v43 = vld [vmem:[%s8083_s7 + $0x38] sm:$0xf0] }
 0x488   : > { %v7687_v62 = vpack.c.bf16 %v3162_v58, %v3158_v9  ;;  %v5658_v9 = vld [vmem:[%s8083_s7 + $0x1b4] sm:$0xf]  ;;  %v5404_v58 = vld [vmem:[%s8083_s7 + $0x1b8] sm:$0xf0] }
 0x489   : > { %v2951_v22 = vpop.f32.mrf.mxu2 }
 0x48a   : > { %v2952_v18 = vadd.f32 %v2951_v22, %v7269_v34  ;;  %v3040_v54 = vpop.f32.mrf.mxu3  ;;  %v2776_v12 = vpop.f32.mrf.mxu0 }
 0x48b   : > { %v3041_v60 = vadd.f32 %v3040_v54, %v7271_v19  ;;  %v2865_v25 = vpop.f32.mrf.mxu1  ;;  %v5340_v54 = vld [vmem:[%s8083_s7 + $0x138] sm:$0xf0]  ;;  %v2777_v32 = vadd.f32 %v2776_v12, %v7238_v21 }
 0x48c   : > { %v3163_v56 = vmax.f32 %v2952_v18, 0.0  ;;  %v5343_v30 = vor.u32 %v5642_v5, %v5340_v54 }
 0x48d   : > { %v3164_v53 = vmax.f32 %v3041_v60, 0.0  ;;  %3673 = vmatmul.bf16.gmra.mxu0 %v7472_v6  ;;  %v5610_v60 = vld [vmem:[%s8083_s7 + $0x34] sm:$0xf] }
 0x48e   : > { %3762 = vmatmul.bf16.gmra.mxu1 %v7475_v46  ;;  %3851 = vmatmul.bf16.gmra.mxu2 %v7483_v38  ;;  %v7695_v35 = vpack.c.bf16 %v3163_v56, %v3159_v42  ;;  %v5215_v22 = vor.u32 %v5610_v60, %v5212_v43  ;;  %v5407_v42 = vor.u32 %v5658_v9, %v5404_v58  ;;  %v3165_v38 = vmax.f32 %v2777_v32, 0.0 }
 0x48f   : > { %3940 = vmatmul.bf16.gmra.mxu3 %v7486_v57  ;;  %v7707_v18 = vpack.c.bf16 %v3164_v53, %v3160_v31  ;;  %v2866_v56 = vadd.f32 %v2865_v25, %v7241_v4  ;;  %4173 = vmatpush.bf16.msrb.mxu2 %v5343_v30  ;;  %v5626_v25 = vld [vmem:[%s8083_s7 + $0xb4] sm:$0xf]  ;;  %v5276_v30 = vld [vmem:[%s8083_s7 + $0xb8] sm:$0xf0] }
 0x490   : > { %3995 = vmatpush.bf16.msrb.mxu0 %v5215_v22  ;;  %4262 = vmatpush.bf16.msrb.mxu3 %v5407_v42  ;;  %v5279_v32 = vor.u32 %v5626_v25, %v5276_v30 }
 0x491   : > { %v2954_v11 = vpop.f32.mrf.mxu2  ;;  %v3166_v6 = vmax.f32 %v2866_v56, 0.0 }
 0x492   : > { %v3043_v31 = vpop.f32.mrf.mxu3  ;;  %v2778_v53 = vpop.f32.mrf.mxu0  ;;  %v2955_v60 = vadd.f32 %v2954_v11, %v7269_v34  ;;  %4084 = vmatpush.bf16.msrb.mxu1 %v5279_v32 }
 0x493   : > { %v2779_v5 = vadd.f32 %v2778_v53, %v7238_v21  ;;  %v2867_v54 = vpop.f32.mrf.mxu1  ;;  %v3044_v9 = vadd.f32 %v3043_v31, %v7271_v19 }
 0x494   : > { %v2868_v57 = vadd.f32 %v2867_v54, %v7241_v4  ;;  %v3167_v42 = vmax.f32 %v2955_v60, 0.0 }
 0x495   : > { %v3169_v46 = vmax.f32 %v2779_v5, 0.0  ;;  %v3168_v53 = vmax.f32 %v3044_v9, 0.0 }
 0x496   : > { %v3170_v59 = vmax.f32 %v2868_v57, 0.0 }
 0x497   : > { %v7722_v12 = vpack.c.bf16 %v3169_v46, %v3165_v38 }
 0x498   : > { %v7731_v43 = vpack.c.bf16 %v3170_v59, %v3166_v6 }
 0x499   : > { %v2956_v58 = vpop.f32.mrf.mxu2 }
 0x49a   : > { %v2957_v57 = vadd.f32 %v2956_v58, %v7269_v34  ;;  %v3045_v46 = vpop.f32.mrf.mxu3  ;;  %v2781_v38 = vpop.f32.mrf.mxu0 }
 0x49b   : > { %v3046_v11 = vadd.f32 %v3045_v46, %v7271_v19  ;;  %v2870_v22 = vpop.f32.mrf.mxu1  ;;  %v2782_v31 = vadd.f32 %v2781_v38, %v7238_v21 }
 0x49c   : > { %v3171_v56 = vmax.f32 %v2957_v57, 0.0  ;;  %v2871_v60 = vadd.f32 %v2870_v22, %v7241_v4 }
 0x49d   : > { %v3172_v5 = vmax.f32 %v3046_v11, 0.0  ;;  %3678 = vmatmul.bf16.gmra.mxu0 %v7492_v7  ;;  %v3173_v57 = vmax.f32 %v2782_v31, 0.0  ;;  %v7751_v11 = vld [vmem:[%s8084_s8] sm:$0x3] }
 0x49e   : > { %3767 = vmatmul.bf16.gmra.mxu1 %v7495_v51  ;;  %3856 = vmatmul.bf16.gmra.mxu2 %v7503_v24  ;;  %v7739_v59 = vpack.c.bf16 %v3171_v56, %v3167_v42  ;;  %v3174_v42 = vmax.f32 %v2871_v60, 0.0 }
 0x49f   : > { %3945 = vmatmul.bf16.gmra.mxu3 %v7515_v50  ;;  %v7742_v6 = vpack.c.bf16 %v3172_v5, %v3168_v53  ;;  %v7757_v53 = vperm.slane %v7751_v11, 0 }
 0x4a1   : > { %v2959_v54 = vpop.f32.mrf.mxu2 }
 0x4a2   : > { %v3048_v25 = vpop.f32.mrf.mxu3  ;;  %v2783_v30 = vpop.f32.mrf.mxu0  ;;  %v2960_v22 = vadd.f32 %v2959_v54, %v7269_v34 }
 0x4a3   : > { %v2784_v9 = vadd.f32 %v2783_v30, %v7238_v21  ;;  %v2872_v58 = vpop.f32.mrf.mxu1 }
 0x4a4   : > { %v2873_v32 = vadd.f32 %v2872_v58, %v7241_v4  ;;  %v3049_v4 = vadd.f32 %v3048_v25, %v7271_v19 }
 0x4a5   : > { %v3177_v46 = vmax.f32 %v2784_v9, 0.0 }
 0x4a6   : > { %v3178_v56 = vmax.f32 %v2873_v32, 0.0  ;;  %v3175_v32 = vmax.f32 %v2960_v22, 0.0  ;;  %v3176_v54 = vmax.f32 %v3049_v4, 0.0  ;;  %v5608_v22 = vld [vmem:[%s8083_s7 + $0x24] sm:$0xf] }
 0x4a7   : > { %v7753_v38 = vpack.c.bf16 %v3177_v46, %v3173_v57 }
 0x4a8   : > { %v7759_v21 = vpack.c.bf16 %v3178_v56, %v3174_v42  ;;  %v5640_v42 = vld [vmem:[%s8083_s7 + $0x124] sm:$0xf]  ;;  %v5332_v56 = vld [vmem:[%s8083_s7 + $0x128] sm:$0xf0] }
 0x4a9   : > { %v2961_v5 = vpop.f32.mrf.mxu2 }
 0x4aa   : > { %v2962_v31 = vadd.f32 %v2961_v5, %v7269_v34  ;;  %v3050_v30 = vpop.f32.mrf.mxu3  ;;  %v3644_v9 = vpop.f32.mrf.mxu0  ;;  %v5335_v5 = vor.u32 %v5640_v42, %v5332_v56 }
 0x4ab   : > { %v3051_v58 = vadd.f32 %v3050_v30, %v7271_v19  ;;  %v3733_v60 = vpop.f32.mrf.mxu1  ;;  %v3645_v46 = vadd.f32 %v3644_v9, %v7757_v53  ;;  %v5396_v30 = vld [vmem:[%s8083_s7 + $0x1a8] sm:$0xf0] }
 0x4ac   : > { %v3179_v57 = vmax.f32 %v2962_v31, 0.0  ;;  %v5656_v31 = vld [vmem:[%s8083_s7 + $0x1a4] sm:$0xf]  ;;  %4174 = vmatpush.bf16.msrb.mxu2 %v5335_v5 }
 0x4ad   : > { %v3180_v50 = vmax.f32 %v3051_v58, 0.0  ;;  %3683 = vmatmul.bf16.gmra.mxu0 %v7536_v8  ;;  %v3734_v19 = vadd.f32 %v3733_v60, %v3645_v46 }
 0x4ae   : > { %3772 = vmatmul.bf16.gmra.mxu1 %v7539_v10  ;;  %3861 = vmatmul.bf16.gmra.mxu2 %v7547_v14  ;;  %v7768_v25 = vpack.c.bf16 %v3179_v57, %v3175_v32  ;;  %v5399_v57 = vor.u32 %v5656_v31, %v5396_v30 }
 0x4af   : > { %3950 = vmatmul.bf16.gmra.mxu3 %v7550_v44  ;;  %v7771_v34 = vpack.c.bf16 %v3180_v50, %v3176_v54  ;;  %v5204_v50 = vld [vmem:[%s8083_s7 + $0x28] sm:$0xf0] }
 0x4b0   : > { %v5207_v32 = vor.u32 %v5608_v22, %v5204_v50  ;;  %4263 = vmatpush.bf16.msrb.mxu3 %v5399_v57  ;;  %v5624_v22 = vld [vmem:[%s8083_s7 + $0xa4] sm:$0xf] }
 0x4b1   : > { %v3822_v4 = vpop.f32.mrf.mxu2 }
 0x4b2   : > { %v3823_v9 = vadd.f32 %v3822_v4, %v3734_v19  ;;  %v3911_v58 = vpop.f32.mrf.mxu3  ;;  %v3646_v60 = vpop.f32.mrf.mxu0  ;;  %3996 = vmatpush.bf16.msrb.mxu0 %v5207_v32  ;;  %v5268_v4 = vld [vmem:[%s8083_s7 + $0xa8] sm:$0xf0] }
 0x4b3   : > { %v3735_v46 = vpop.f32.mrf.mxu1  ;;  %v3647_v42 = vadd.f32 %v3646_v60, %v7757_v53  ;;  %v5271_v50 = vor.u32 %v5624_v22, %v5268_v4 }
 0x4b4   : > { %v3912_v54 = vadd.f32 %v3911_v58, %v3823_v9 }
 0x4b5   : > { %v3736_v19 = vadd.f32 %v3735_v46, %v3647_v42  ;;  %4085 = vmatpush.bf16.msrb.mxu1 %v5271_v50 }
 0x4b6   : > { %v4347_v56 = vmax.f32 %v3912_v54, 0.0 }
 0x4b8   : > { %4411 = vst [vmem:[%s7796_s19] sm:$0xff] %v4347_v56 }
 0x4b9   : > { %v3824_v5 = vpop.f32.mrf.mxu2 }
 0x4ba   : > { %v3825_v31 = vadd.f32 %v3824_v5, %v3736_v19  ;;  %v3913_v30 = vpop.f32.mrf.mxu3  ;;  %v3649_v9 = vpop.f32.mrf.mxu0 }
 0x4bb   : > { %v3738_v58 = vpop.f32.mrf.mxu1  ;;  %v3650_v32 = vadd.f32 %v3649_v9, %v7757_v53 }
 0x4bc   : > { %v3914_v60 = vadd.f32 %v3913_v30, %v3825_v31 }
 0x4bd   : > { %3688 = vmatmul.bf16.gmra.mxu0 %v7556_v15  ;;  %v3739_v46 = vadd.f32 %v3738_v58, %v3650_v32 }
 0x4be   : > { %v4349_v57 = vmax.f32 %v3914_v60, 0.0  ;;  %3777 = vmatmul.bf16.gmra.mxu1 %v7559_v27  ;;  %3866 = vmatmul.bf16.gmra.mxu2 %v7567_v55 }
 0x4bf   : > { %3955 = vmatmul.bf16.gmra.mxu3 %v7579_v3 }
 0x4c0   : > { %4413 = vst [vmem:[%s7796_s19 + $0x10] sm:$0xff] %v4349_v57 }
 0x4c1   : > { %v3827_v54 = vpop.f32.mrf.mxu2 }
 0x4c2   : > { %v3828_v42 = vadd.f32 %v3827_v54, %v3739_v46  ;;  %v3916_v56 = vpop.f32.mrf.mxu3  ;;  %v3651_v19 = vpop.f32.mrf.mxu0  ;;  %v5638_v46 = vld [vmem:[%s8083_s7 + $0x114] sm:$0xf]  ;;  %v5324_v54 = vld [vmem:[%s8083_s7 + $0x118] sm:$0xf0] }
 0x4c3   : > { %v3740_v22 = vpop.f32.mrf.mxu1  ;;  %v3652_v5 = vadd.f32 %v3651_v19, %v7757_v53 }
 0x4c4   : > { %v3917_v4 = vadd.f32 %v3916_v56, %v3828_v42  ;;  %v5327_v42 = vor.u32 %v5638_v46, %v5324_v54  ;;  %v5196_v56 = vld [vmem:[%s8083_s7 + $0x18] sm:$0xf0] }
 0x4c5   : > { %v3741_v31 = vadd.f32 %v3740_v22, %v3652_v5  ;;  %v5260_v46 = vld [vmem:[%s8083_s7 + $0x98] sm:$0xf0] }
 0x4c6   : > { %v4351_v50 = vmax.f32 %v3917_v4, 0.0  ;;  %4175 = vmatpush.bf16.msrb.mxu2 %v5327_v42 }
 0x4c8   : > { %4415 = vst [vmem:[%s7796_s19 + $0x20] sm:$0xff] %v4351_v50  ;;  %v5388_v50 = vld [vmem:[%s8083_s7 + $0x198] sm:$0xf0] }
 0x4c9   : > { %v3829_v30 = vpop.f32.mrf.mxu2 }
 0x4ca   : > { %v3830_v9 = vadd.f32 %v3829_v30, %v3741_v31  ;;  %v3918_v60 = vpop.f32.mrf.mxu3  ;;  %v3654_v55 = vpop.f32.mrf.mxu0 }
 0x4cb   : > { %v3743_v27 = vpop.f32.mrf.mxu1  ;;  %v3655_v58 = vadd.f32 %v3654_v55, %v7757_v53 }
 0x4cc   : > { %v3919_v3 = vadd.f32 %v3918_v60, %v3830_v9 }
 0x4cd   : > { %3693 = vmatmul.bf16.gmra.mxu0 %v7600_v61  ;;  %v3744_v57 = vadd.f32 %v3743_v27, %v3655_v58  ;;  %v5654_v27 = vld [vmem:[%s8083_s7 + $0x194] sm:$0xf] }
 0x4ce   : > { %v4353_v32 = vmax.f32 %v3919_v3, 0.0  ;;  %3782 = vmatmul.bf16.gmra.mxu1 %v7603_v28  ;;  %3871 = vmatmul.bf16.gmra.mxu2 %v7611_v49  ;;  %v5606_v3 = vld [vmem:[%s8083_s7 + $0x14] sm:$0xf]  ;;  %v5391_v30 = vor.u32 %v5654_v27, %v5388_v50 }
 0x4cf   : > { %3960 = vmatmul.bf16.gmra.mxu3 %v7614_v16  ;;  %v5199_v5 = vor.u32 %v5606_v3, %v5196_v56 }
 0x4d0   : > { %4417 = vst [vmem:[%s7796_s19 + $0x30] sm:$0xff] %v4353_v32  ;;  %4264 = vmatpush.bf16.msrb.mxu3 %v5391_v30 }
 0x4d1   : > { %v3832_v55 = vpop.f32.mrf.mxu2  ;;  %3997 = vmatpush.bf16.msrb.mxu0 %v5199_v5 }
 0x4d2   : > { %v3833_v19 = vadd.f32 %v3832_v55, %v3744_v57  ;;  %v3921_v22 = vpop.f32.mrf.mxu3  ;;  %v3656_v4 = vpop.f32.mrf.mxu0  ;;  %v5622_v57 = vld [vmem:[%s8083_s7 + $0x94] sm:$0xf] }
 0x4d3   : > { %v3745_v31 = vpop.f32.mrf.mxu1  ;;  %v3657_v60 = vadd.f32 %v3656_v4, %v7757_v53  ;;  %v5263_v55 = vor.u32 %v5622_v57, %v5260_v46 }
 0x4d4   : > { %v3922_v9 = vadd.f32 %v3921_v22, %v3833_v19 }
 0x4d5   : > { %v3746_v32 = vadd.f32 %v3745_v31, %v3657_v60  ;;  %4086 = vmatpush.bf16.msrb.mxu1 %v5263_v55 }
 0x4d6   : > { %v4355_v58 = vmax.f32 %v3922_v9, 0.0 }
 0x4d8   : > { %4419 = vst [vmem:[%s7796_s19 + $0x40] sm:$0xff] %v4355_v58 }
 0x4d9   : > { %v3834_v54 = vpop.f32.mrf.mxu2 }
 0x4da   : > { %v3835_v42 = vadd.f32 %v3834_v54, %v3746_v32  ;;  %v3923_v3 = vpop.f32.mrf.mxu3  ;;  %v3659_v56 = vpop.f32.mrf.mxu0 }
 0x4db   : > { %v3748_v27 = vpop.f32.mrf.mxu1  ;;  %v3660_v22 = vadd.f32 %v3659_v56, %v7757_v53 }
 0x4dc   : > { %v3924_v19 = vadd.f32 %v3923_v3, %v3835_v42 }
 0x4dd   : > { %3698 = vmatmul.bf16.gmra.mxu0 %v7620_v29  ;;  %v3749_v5 = vadd.f32 %v3748_v27, %v3660_v22 }
 0x4de   : > { %v4357_v4 = vmax.f32 %v3924_v19, 0.0  ;;  %3787 = vmatmul.bf16.gmra.mxu1 %v7623_v13  ;;  %3876 = vmatmul.bf16.gmra.mxu2 %v7631_v17 }
 0x4df   : > { %3965 = vmatmul.bf16.gmra.mxu3 %v7643_v0 }
 0x4e0   : > { %4421 = vst [vmem:[%s7796_s19 + $0x50] sm:$0xff] %v4357_v4 }
 0x4e1   : > { %v3837_v50 = vpop.f32.mrf.mxu2 }
 0x4e2   : > { %v3838_v31 = vadd.f32 %v3837_v50, %v3749_v5  ;;  %v3926_v30 = vpop.f32.mrf.mxu3  ;;  %v3661_v9 = vpop.f32.mrf.mxu0  ;;  %v5636_v5 = vld [vmem:[%s8083_s7 + $0x104] sm:$0xf]  ;;  %v5316_v50 = vld [vmem:[%s8083_s7 + $0x108] sm:$0xf0] }
 0x4e3   : > { %v3750_v60 = vpop.f32.mrf.mxu1  ;;  %v3662_v32 = vadd.f32 %v3661_v9, %v7757_v53  ;;  %v5604_v9 = vld [vmem:[%s8083_s7 + $0x4] sm:$0xf] }
 0x4e4   : > { %v3927_v58 = vadd.f32 %v3926_v30, %v3838_v31  ;;  %v5319_v30 = vor.u32 %v5636_v5, %v5316_v50  ;;  %v5252_v5 = vld [vmem:[%s8083_s7 + $0x88] sm:$0xf0] }
 0x4e5   : > { %v3751_v46 = vadd.f32 %v3750_v60, %v3662_v32  ;;  %v5188_v60 = vld [vmem:[%s8083_s7 + $0x8] sm:$0xf0] }
 0x4e6   : > { %v4359_v57 = vmax.f32 %v3927_v58, 0.0  ;;  %v5652_v58 = vld [vmem:[%s8083_s7 + $0x184] sm:$0xf]  ;;  %4176 = vmatpush.bf16.msrb.mxu2 %v5319_v30 }
 0x4e8   : > { %4423 = vst [vmem:[%s7796_s19 + $0x60] sm:$0xff] %v4359_v57 }
 0x4e9   : > { %v3839_v54 = vpop.f32.mrf.mxu2 }
 0x4ea   : > { %v3840_v55 = vadd.f32 %v3839_v54, %v3751_v46  ;;  %v3928_v42 = vpop.f32.mrf.mxu3  ;;  %v3664_v3 = vpop.f32.mrf.mxu0  ;;  %v5191_v54 = vor.u32 %v5604_v9, %v5188_v60 }
 0x4eb   : > { %v3753_v56 = vpop.f32.mrf.mxu1  ;;  %v3665_v27 = vadd.f32 %v3664_v3, %v7757_v53 }
 0x4ec   : > { %v3929_v19 = vadd.f32 %v3928_v42, %v3840_v55  ;;  %v5380_v55 = vld [vmem:[%s8083_s7 + $0x188] sm:$0xf0]  ;;  %3998 = vmatpush.bf16.msrb.mxu0 %v5191_v54 }
 0x4ed   : > { %3703 = vmatmul.bf16.gmra.mxu0 %v7664_v39  ;;  %v3754_v4 = vadd.f32 %v3753_v56, %v3665_v27  ;;  %v5383_v3 = vor.u32 %v5652_v58, %v5380_v55 }
 0x4ee   : > { %v4361_v22 = vmax.f32 %v3929_v19, 0.0  ;;  %3792 = vmatmul.bf16.gmra.mxu1 %v7667_v36  ;;  %3881 = vmatmul.bf16.gmra.mxu2 %v7675_v2 }
 0x4ef   : > { %3970 = vmatmul.bf16.gmra.mxu3 %v7678_v23 }
 0x4f0   : > { %4425 = vst [vmem:[%s7796_s19 + $0x70] sm:$0xff] %v4361_v22  ;;  %4265 = vmatpush.bf16.msrb.mxu3 %v5383_v3 }
 0x4f1   : > { %v3842_v31 = vpop.f32.mrf.mxu2 }
 0x4f2   : > { %v3843_v32 = vadd.f32 %v3842_v31, %v3754_v4  ;;  %v3931_v57 = vpop.f32.mrf.mxu3  ;;  %v3666_v46 = vpop.f32.mrf.mxu0  ;;  %v5620_v4 = vld [vmem:[%s8083_s7 + $0x84] sm:$0xf] }
 0x4f3   : > { %v3755_v42 = vpop.f32.mrf.mxu1  ;;  %v3667_v19 = vadd.f32 %v3666_v46, %v7757_v53  ;;  %v5255_v31 = vor.u32 %v5620_v4, %v5252_v5 }
 0x4f4   : > { %v3932_v56 = vadd.f32 %v3931_v57, %v3843_v32 }
 0x4f5   : > { %v3756_v22 = vadd.f32 %v3755_v42, %v3667_v19  ;;  %4087 = vmatpush.bf16.msrb.mxu1 %v5255_v31 }
 0x4f6   : > { %v4363_v27 = vmax.f32 %v3932_v56, 0.0 }
 0x4f8   : > { %4427 = vst [vmem:[%s7796_s19 + $0x80] sm:$0xff] %v4363_v27 }
 0x4f9   : > { %v3844_v50 = vpop.f32.mrf.mxu2 }
 0x4fa   : > { %v3845_v30 = vadd.f32 %v3844_v50, %v3756_v22  ;;  %v3933_v9 = vpop.f32.mrf.mxu3  ;;  %v3669_v60 = vpop.f32.mrf.mxu0 }
 0x4fb   : > { %v3758_v58 = vpop.f32.mrf.mxu1  ;;  %v3670_v57 = vadd.f32 %v3669_v60, %v7757_v53 }
 0x4fc   : > { %v3934_v32 = vadd.f32 %v3933_v9, %v3845_v30 }
 0x4fd   : > { %3708 = vmatmul.bf16.gmra.mxu0 %v7684_v26  ;;  %v3759_v54 = vadd.f32 %v3758_v58, %v3670_v57 }
 0x4fe   : > { %v4365_v46 = vmax.f32 %v3934_v32, 0.0  ;;  %3797 = vmatmul.bf16.gmra.mxu1 %v7687_v62  ;;  %3886 = vmatmul.bf16.gmra.mxu2 %v7695_v35 }
 0x4ff   : > { %3975 = vmatmul.bf16.gmra.mxu3 %v7707_v18 }
 0x500   : > { %4429 = vst [vmem:[%s7796_s19 + $0x90] sm:$0xff] %v4365_v46 }
 0x501   : > { %v3847_v55 = vpop.f32.mrf.mxu2 }
 0x502   : > { %v3848_v42 = vadd.f32 %v3847_v55, %v3759_v54  ;;  %v3936_v3 = vpop.f32.mrf.mxu3  ;;  %v3671_v56 = vpop.f32.mrf.mxu0 }
 0x503   : > { %v3760_v19 = vpop.f32.mrf.mxu1  ;;  %v3672_v22 = vadd.f32 %v3671_v56, %v7757_v53 }
 0x504   : > { %v3937_v27 = vadd.f32 %v3936_v3, %v3848_v42 }
 0x505   : > { %v3761_v5 = vadd.f32 %v3760_v19, %v3672_v22 }
 0x506   : > { %v4367_v4 = vmax.f32 %v3937_v27, 0.0 }
 0x508   : > { %4431 = vst [vmem:[%s7796_s19 + $0xa0] sm:$0xff] %v4367_v4 }
 0x509   : > { %v3849_v50 = vpop.f32.mrf.mxu2 }
 0x50a   : > { %v3850_v31 = vadd.f32 %v3849_v50, %v3761_v5  ;;  %v3938_v30 = vpop.f32.mrf.mxu3  ;;  %v3674_v9 = vpop.f32.mrf.mxu0 }
 0x50b   : > { %v3763_v60 = vpop.f32.mrf.mxu1  ;;  %v3675_v58 = vadd.f32 %v3674_v9, %v7757_v53 }
 0x50c   : > { %v3939_v32 = vadd.f32 %v3938_v30, %v3850_v31 }
 0x50d   : > { %3713 = vmatmul.bf16.gmra.mxu0 %v7722_v12  ;;  %v3764_v46 = vadd.f32 %v3763_v60, %v3675_v58 }
 0x50e   : > { %v4369_v57 = vmax.f32 %v3939_v32, 0.0  ;;  %3802 = vmatmul.bf16.gmra.mxu1 %v7731_v43  ;;  %3891 = vmatmul.bf16.gmra.mxu2 %v7739_v59 }
 0x50f   : > { %3980 = vmatmul.bf16.gmra.mxu3 %v7742_v6 }
 0x510   : > { %4433 = vst [vmem:[%s7796_s19 + $0xb0] sm:$0xff] %v4369_v57 }
 0x511   : > { %v3852_v54 = vpop.f32.mrf.mxu2 }
 0x512   : > { %v3853_v55 = vadd.f32 %v3852_v54, %v3764_v46  ;;  %v3941_v42 = vpop.f32.mrf.mxu3  ;;  %v3676_v3 = vpop.f32.mrf.mxu0 }
 0x513   : > { %v3765_v56 = vpop.f32.mrf.mxu1  ;;  %v3677_v27 = vadd.f32 %v3676_v3, %v7757_v53 }
 0x514   : > { %v3942_v19 = vadd.f32 %v3941_v42, %v3853_v55 }
 0x515   : > { %v3766_v4 = vadd.f32 %v3765_v56, %v3677_v27 }
 0x516   : > { %v4371_v22 = vmax.f32 %v3942_v19, 0.0 }
 0x518   : > { %4435 = vst [vmem:[%s7796_s19 + $0xc0] sm:$0xff] %v4371_v22 }
 0x519   : > { %v3854_v5 = vpop.f32.mrf.mxu2 }
 0x51a   : > { %v3855_v50 = vadd.f32 %v3854_v5, %v3766_v4  ;;  %v3943_v31 = vpop.f32.mrf.mxu3  ;;  %v3679_v30 = vpop.f32.mrf.mxu0 }
 0x51b   : > { %v3768_v9 = vpop.f32.mrf.mxu1  ;;  %v3680_v60 = vadd.f32 %v3679_v30, %v7757_v53 }
 0x51c   : > { %v3944_v32 = vadd.f32 %v3943_v31, %v3855_v50 }
 0x51d   : > { %3718 = vmatmul.bf16.gmra.mxu0 %v7753_v38  ;;  %v3769_v57 = vadd.f32 %v3768_v9, %v3680_v60 }
 0x51e   : > { %v4373_v58 = vmax.f32 %v3944_v32, 0.0  ;;  %3807 = vmatmul.bf16.gmra.mxu1 %v7759_v21  ;;  %3896 = vmatmul.bf16.gmra.mxu2 %v7768_v25 }
 0x51f   : > { %3985 = vmatmul.bf16.gmra.mxu3 %v7771_v34 }
 0x520   : > { %4437 = vst [vmem:[%s7796_s19 + $0xd0] sm:$0xff] %v4373_v58 }
 0x521   : > { %v3857_v46 = vpop.f32.mrf.mxu2 }
 0x522   : > { %v3858_v54 = vadd.f32 %v3857_v46, %v3769_v57  ;;  %v3946_v55 = vpop.f32.mrf.mxu3  ;;  %v3681_v42 = vpop.f32.mrf.mxu0 }
 0x523   : > { %v3770_v3 = vpop.f32.mrf.mxu1  ;;  %v3682_v19 = vadd.f32 %v3681_v42, %v7757_v53 }
 0x524   : > { %v3947_v56 = vadd.f32 %v3946_v55, %v3858_v54 }
 0x525   : > { %v3771_v22 = vadd.f32 %v3770_v3, %v3682_v19 }
 0x526   : > { %v4375_v27 = vmax.f32 %v3947_v56, 0.0 }
 0x528   : > { %4439 = vst [vmem:[%s7796_s19 + $0xe0] sm:$0xff] %v4375_v27 }
 0x529   : > { %v3859_v4 = vpop.f32.mrf.mxu2 }
 0x52a   : > { %v3860_v5 = vadd.f32 %v3859_v4, %v3771_v22  ;;  %v3948_v50 = vpop.f32.mrf.mxu3  ;;  %v3684_v31 = vpop.f32.mrf.mxu0 }
 0x52b   : > { %v3773_v30 = vpop.f32.mrf.mxu1  ;;  %v3685_v9 = vadd.f32 %v3684_v31, %v7757_v53 }
 0x52c   : > { %v3949_v32 = vadd.f32 %v3948_v50, %v3860_v5 }
 0x52d   : > { %3999 = vmatmul.bf16.vlgmr.msrb.gmra.mxu0 %v7280_v20  ;;  %v3774_v58 = vadd.f32 %v3773_v30, %v3685_v9 }
 0x52e   : > { %v4377_v60 = vmax.f32 %v3949_v32, 0.0  ;;  %4088 = vmatmul.bf16.vlgmr.msrb.gmra.mxu1 %v7283_v63  ;;  %4177 = vmatmul.bf16.vlgmr.msrb.gmra.mxu2 %v7289_v1 }
 0x52f   : > { %4266 = vmatmul.bf16.vlgmr.msrb.gmra.mxu3 %v7293_v40 }
 0x530   : > { %4441 = vst [vmem:[%s7796_s19 + $0xf0] sm:$0xff] %v4377_v60 }
 0x531   : > { %v3862_v57 = vpop.f32.mrf.mxu2 }
 0x532   : > { %v3863_v46 = vadd.f32 %v3862_v57, %v3774_v58  ;;  %v3951_v54 = vpop.f32.mrf.mxu3  ;;  %v3686_v55 = vpop.f32.mrf.mxu0 }
 0x533   : > { %v3775_v42 = vpop.f32.mrf.mxu1  ;;  %v3687_v56 = vadd.f32 %v3686_v55, %v7757_v53 }
 0x534   : > { %v3952_v3 = vadd.f32 %v3951_v54, %v3863_v46 }
 0x535   : > { %v3776_v20 = vadd.f32 %v3775_v42, %v3687_v56 }
 0x536   : > { %v4379_v19 = vmax.f32 %v3952_v3, 0.0 }
 0x538   : > { %4443 = vst [vmem:[%s7796_s19 + $0x100] sm:$0xff] %v4379_v19 }
 0x539   : > { %v3864_v27 = vpop.f32.mrf.mxu2 }
 0x53a   : > { %v3865_v63 = vadd.f32 %v3864_v27, %v3776_v20  ;;  %v3953_v22 = vpop.f32.mrf.mxu3  ;;  %v3689_v1 = vpop.f32.mrf.mxu0  ;;  %v8136_v20 = vld [vmem:[#allocation2_spill] sm:$0xff] }
 0x53b   : > { %v3778_v4 = vpop.f32.mrf.mxu1  ;;  %v3690_v5 = vadd.f32 %v3689_v1, %v7757_v53 }
 0x53c   : > { %v3954_v40 = vadd.f32 %v3953_v22, %v3865_v63 }
 0x53d   : > { %4004 = vmatmul.bf16.gmra.mxu0 %v7300_v52  ;;  %v3779_v31 = vadd.f32 %v3778_v4, %v3690_v5 }
 0x53e   : > { %v4381_v50 = vmax.f32 %v3954_v40, 0.0  ;;  %4093 = vmatmul.bf16.gmra.mxu1 %v7303_v45  ;;  %4182 = vmatmul.bf16.gmra.mxu2 %v7311_v47 }
 0x53f   : > { %4271 = vmatmul.bf16.gmra.mxu3 %v7323_v41 }
 0x540   : > { %4445 = vst [vmem:[%s7796_s19 + $0x110] sm:$0xff] %v4381_v50 }
 0x541   : > { %v3867_v30 = vpop.f32.mrf.mxu2 }
 0x542   : > { %v3868_v32 = vadd.f32 %v3867_v30, %v3779_v31  ;;  %v3956_v9 = vpop.f32.mrf.mxu3  ;;  %v3691_v60 = vpop.f32.mrf.mxu0 }
 0x543   : > { %v3780_v58 = vpop.f32.mrf.mxu1  ;;  %v3692_v46 = vadd.f32 %v3691_v60, %v7757_v53 }
 0x544   : > { %v3957_v57 = vadd.f32 %v3956_v9, %v3868_v32 }
 0x545   : > { %v3781_v52 = vadd.f32 %v3780_v58, %v3692_v46 }
 0x546   : > { %v4383_v54 = vmax.f32 %v3957_v57, 0.0  ;;  %v8137_v57 = vld [vmem:[#allocation3_spill] sm:$0xff] }
 0x548   : > { %4447 = vst [vmem:[%s7796_s19 + $0x120] sm:$0xff] %v4383_v54  ;;  %v8138_v54 = vld [vmem:[#allocation4_spill] sm:$0xff] }
 0x549   : > { %v3869_v55 = vpop.f32.mrf.mxu2 }
 0x54a   : > { %v3870_v45 = vadd.f32 %v3869_v55, %v3781_v52  ;;  %v3958_v42 = vpop.f32.mrf.mxu3  ;;  %v3694_v47 = vpop.f32.mrf.mxu0  ;;  %v8139_v52 = vld [vmem:[#allocation5_spill] sm:$0xff]  ;;  %v8140_v55 = vld [vmem:[#allocation6_spill] sm:$0xff] }
 0x54b   : > { %v3783_v3 = vpop.f32.mrf.mxu1  ;;  %v3695_v56 = vadd.f32 %v3694_v47, %v7757_v53 }
 0x54c   : > { %v3959_v41 = vadd.f32 %v3958_v42, %v3870_v45 }
 0x54d   : > { %4009 = vmatmul.bf16.gmra.mxu0 %v7344_v33  ;;  %v3784_v27 = vadd.f32 %v3783_v3, %v3695_v56 }
 0x54e   : > { %v4385_v19 = vmax.f32 %v3959_v41, 0.0  ;;  %4098 = vmatmul.bf16.gmra.mxu1 %v7347_v37  ;;  %4187 = vmatmul.bf16.gmra.mxu2 %v7355_v48 }
 0x54f   : > { %4276 = vmatmul.bf16.gmra.mxu3 %v8136_v20 }
 0x550   : > { %4449 = vst [vmem:[%s7796_s19 + $0x130] sm:$0xff] %v4385_v19 }
 0x551   : > { %v3872_v63 = vpop.f32.mrf.mxu2 }
 0x552   : > { %v3873_v22 = vadd.f32 %v3872_v63, %v3784_v27  ;;  %v3961_v1 = vpop.f32.mrf.mxu3  ;;  %v3696_v4 = vpop.f32.mrf.mxu0 }
 0x553   : > { %v3785_v40 = vpop.f32.mrf.mxu1  ;;  %v3697_v50 = vadd.f32 %v3696_v4, %v7757_v53 }
 0x554   : > { %v3962_v5 = vadd.f32 %v3961_v1, %v3873_v22 }
 0x555   : > { %v3786_v33 = vadd.f32 %v3785_v40, %v3697_v50 }
 0x556   : > { %v4387_v31 = vmax.f32 %v3962_v5, 0.0 }
 0x558   : > { %4451 = vst [vmem:[%s7796_s19 + $0x140] sm:$0xff] %v4387_v31 }
 0x559   : > { %v3874_v30 = vpop.f32.mrf.mxu2 }
 0x55a   : > { %v3875_v37 = vadd.f32 %v3874_v30, %v3786_v33  ;;  %v3963_v32 = vpop.f32.mrf.mxu3  ;;  %v3699_v48 = vpop.f32.mrf.mxu0  ;;  %v8141_v33 = vld [vmem:[#allocation7_spill] sm:$0xff] }
 0x55b   : > { %v3788_v9 = vpop.f32.mrf.mxu1  ;;  %v3700_v58 = vadd.f32 %v3699_v48, %v7757_v53  ;;  %v8144_v48 = vld [vmem:[#allocation10_spill] sm:$0xff] }
 0x55c   : > { %v3964_v60 = vadd.f32 %v3963_v32, %v3875_v37  ;;  %v8142_v37 = vld [vmem:[#allocation8_spill] sm:$0xff]  ;;  %v8143_v32 = vld [vmem:[#allocation9_spill] sm:$0xff] }
 0x55d   : > { %4014 = vmatmul.bf16.gmra.mxu0 %v8137_v57  ;;  %v3789_v45 = vadd.f32 %v3788_v9, %v3700_v58 }
 0x55e   : > { %v4389_v46 = vmax.f32 %v3964_v60, 0.0  ;;  %4103 = vmatmul.bf16.gmra.mxu1 %v8138_v54  ;;  %4192 = vmatmul.bf16.gmra.mxu2 %v8139_v52 }
 0x55f   : > { %4281 = vmatmul.bf16.gmra.mxu3 %v8140_v55 }
 0x560   : > { %4453 = vst [vmem:[%s7796_s19 + $0x150] sm:$0xff] %v4389_v46 }
 0x561   : > { %v3877_v42 = vpop.f32.mrf.mxu2 }
 0x562   : > { %v3878_v47 = vadd.f32 %v3877_v42, %v3789_v45  ;;  %v3966_v3 = vpop.f32.mrf.mxu3  ;;  %v3701_v41 = vpop.f32.mrf.mxu0 }
 0x563   : > { %v3790_v56 = vpop.f32.mrf.mxu1  ;;  %v3702_v20 = vadd.f32 %v3701_v41, %v7757_v53 }
 0x564   : > { %v3967_v19 = vadd.f32 %v3966_v3, %v3878_v47 }
 0x565   : > { %v3791_v63 = vadd.f32 %v3790_v56, %v3702_v20 }
 0x566   : > { %v4391_v27 = vmax.f32 %v3967_v19, 0.0 }
 0x568   : > { %4455 = vst [vmem:[%s7796_s19 + $0x160] sm:$0xff] %v4391_v27 }
 0x569   : > { %v3879_v22 = vpop.f32.mrf.mxu2 }
 0x56a   : > { %v3880_v1 = vadd.f32 %v3879_v22, %v3791_v63  ;;  %v3968_v4 = vpop.f32.mrf.mxu3  ;;  %v3704_v40 = vpop.f32.mrf.mxu0  ;;  %v8145_v63 = vld [vmem:[#allocation11_spill] sm:$0xff] }
 0x56b   : > { %v3793_v5 = vpop.f32.mrf.mxu1  ;;  %v3705_v31 = vadd.f32 %v3704_v40, %v7757_v53  ;;  %v8148_v40 = vld [vmem:[#allocation14_spill] sm:$0xff] }
 0x56c   : > { %v3969_v50 = vadd.f32 %v3968_v4, %v3880_v1  ;;  %v8146_v1 = vld [vmem:[#allocation12_spill] sm:$0xff]  ;;  %v8147_v4 = vld [vmem:[#allocation13_spill] sm:$0xff] }
 0x56d   : > { %4019 = vmatmul.bf16.gmra.mxu0 %v8141_v33  ;;  %v3794_v9 = vadd.f32 %v3793_v5, %v3705_v31 }
 0x56e   : > { %v4393_v30 = vmax.f32 %v3969_v50, 0.0  ;;  %4108 = vmatmul.bf16.gmra.mxu1 %v8142_v37  ;;  %4197 = vmatmul.bf16.gmra.mxu2 %v8143_v32 }
 0x56f   : > { %4286 = vmatmul.bf16.gmra.mxu3 %v8144_v48 }
 0x570   : > { %4457 = vst [vmem:[%s7796_s19 + $0x170] sm:$0xff] %v4393_v30 }
 0x571   : > { %v3882_v60 = vpop.f32.mrf.mxu2 }
 0x572   : > { %v3883_v58 = vadd.f32 %v3882_v60, %v3794_v9  ;;  %v3971_v57 = vpop.f32.mrf.mxu3  ;;  %v3706_v46 = vpop.f32.mrf.mxu0 }
 0x573   : > { %v3795_v54 = vpop.f32.mrf.mxu1  ;;  %v3707_v55 = vadd.f32 %v3706_v46, %v7757_v53 }
 0x574   : > { %v3972_v52 = vadd.f32 %v3971_v57, %v3883_v58 }
 0x575   : > { %v3796_v42 = vadd.f32 %v3795_v54, %v3707_v55 }
 0x576   : > { %v4395_v45 = vmax.f32 %v3972_v52, 0.0 }
 0x578   : > { %4459 = vst [vmem:[%s7796_s19 + $0x180] sm:$0xff] %v4395_v45 }
 0x579   : > { %v3884_v47 = vpop.f32.mrf.mxu2 }
 0x57a   : > { %v3885_v3 = vadd.f32 %v3884_v47, %v3796_v42  ;;  %v3973_v41 = vpop.f32.mrf.mxu3  ;;  %v3709_v56 = vpop.f32.mrf.mxu0  ;;  %v8149_v42 = vld [vmem:[#allocation15_spill] sm:$0xff] }
 0x57b   : > { %v3798_v19 = vpop.f32.mrf.mxu1  ;;  %v3710_v27 = vadd.f32 %v3709_v56, %v7757_v53  ;;  %v8152_v56 = vld [vmem:[#allocation18_spill] sm:$0xff] }
 0x57c   : > { %v3974_v20 = vadd.f32 %v3973_v41, %v3885_v3  ;;  %v8150_v3 = vld [vmem:[#allocation16_spill] sm:$0xff]  ;;  %v8151_v41 = vld [vmem:[#allocation17_spill] sm:$0xff] }
 0x57d   : > { %4024 = vmatmul.bf16.gmra.mxu0 %v8145_v63  ;;  %v3799_v5 = vadd.f32 %v3798_v19, %v3710_v27 }
 0x57e   : > { %v4397_v22 = vmax.f32 %v3974_v20, 0.0  ;;  %4113 = vmatmul.bf16.gmra.mxu1 %v8146_v1  ;;  %4202 = vmatmul.bf16.gmra.mxu2 %v8147_v4 }
 0x57f   : > { %4291 = vmatmul.bf16.gmra.mxu3 %v8148_v40 }
 0x580   : > { %4461 = vst [vmem:[%s7796_s19 + $0x190] sm:$0xff] %v4397_v22 }
 0x581   : > { %v3887_v50 = vpop.f32.mrf.mxu2 }
 0x582   : > { %v3888_v31 = vadd.f32 %v3887_v50, %v3799_v5  ;;  %v3976_v33 = vpop.f32.mrf.mxu3  ;;  %v3711_v30 = vpop.f32.mrf.mxu0 }
 0x583   : > { %v3800_v37 = vpop.f32.mrf.mxu1  ;;  %v3712_v48 = vadd.f32 %v3711_v30, %v7757_v53 }
 0x584   : > { %v3977_v32 = vadd.f32 %v3976_v33, %v3888_v31 }
 0x585   : > { %v3801_v60 = vadd.f32 %v3800_v37, %v3712_v48 }
 0x586   : > { %v4399_v9 = vmax.f32 %v3977_v32, 0.0 }
 0x588   : > { %4463 = vst [vmem:[%s7796_s19 + $0x1a0] sm:$0xff] %v4399_v9 }
 0x589   : > { %v3889_v58 = vpop.f32.mrf.mxu2 }
 0x58a   : > { %v3890_v57 = vadd.f32 %v3889_v58, %v3801_v60  ;;  %v3978_v46 = vpop.f32.mrf.mxu3  ;;  %v3714_v54 = vpop.f32.mrf.mxu0  ;;  %v8153_v58 = vld [vmem:[#allocation19_spill] sm:$0xff] }
 0x58b   : > { %v3803_v52 = vpop.f32.mrf.mxu1  ;;  %v3715_v45 = vadd.f32 %v3714_v54, %v7757_v53 }
 0x58c   : > { %v3979_v55 = vadd.f32 %v3978_v46, %v3890_v57 }
 0x58d   : > { %4029 = vmatmul.bf16.gmra.mxu0 %v8149_v42  ;;  %v3804_v19 = vadd.f32 %v3803_v52, %v3715_v45 }
 0x58e   : > { %v4401_v47 = vmax.f32 %v3979_v55, 0.0  ;;  %4118 = vmatmul.bf16.gmra.mxu1 %v8150_v3  ;;  %4207 = vmatmul.bf16.gmra.mxu2 %v8151_v41 }
 0x58f   : > { %4296 = vmatmul.bf16.gmra.mxu3 %v8152_v56 }
 0x590   : > { %4465 = vst [vmem:[%s7796_s19 + $0x1b0] sm:$0xff] %v4401_v47 }
 0x591   : > { %v3892_v20 = vpop.f32.mrf.mxu2 }
 0x592   : > { %v3893_v27 = vadd.f32 %v3892_v20, %v3804_v19  ;;  %v3981_v63 = vpop.f32.mrf.mxu3  ;;  %v3716_v22 = vpop.f32.mrf.mxu0 }
 0x593   : > { %v3805_v1 = vpop.f32.mrf.mxu1  ;;  %v3717_v40 = vadd.f32 %v3716_v22, %v7757_v53 }
 0x594   : > { %v3982_v4 = vadd.f32 %v3981_v63, %v3893_v27 }
 0x595   : > { %v3806_v50 = vadd.f32 %v3805_v1, %v3717_v40 }
 0x596   : > { %v4403_v5 = vmax.f32 %v3982_v4, 0.0 }
 0x598   : > { %4467 = vst [vmem:[%s7796_s19 + $0x1c0] sm:$0xff] %v4403_v5 }
 0x599   : > { %v3894_v31 = vpop.f32.mrf.mxu2 }
 0x59a   : > { %v3895_v33 = vadd.f32 %v3894_v31, %v3806_v50  ;;  %v3983_v30 = vpop.f32.mrf.mxu3  ;;  %v3719_v37 = vpop.f32.mrf.mxu0 }
 0x59b   : > { %v3808_v32 = vpop.f32.mrf.mxu1  ;;  %v3720_v9 = vadd.f32 %v3719_v37, %v7757_v53 }
 0x59c   : > { %v3984_v48 = vadd.f32 %v3983_v30, %v3895_v33 }
 0x59d   : > { %4034 = vmatmul.bf16.gmra.mxu0 %v7492_v7  ;;  %v3809_v57 = vadd.f32 %v3808_v32, %v3720_v9 }
 0x59e   : > { %v4405_v60 = vmax.f32 %v3984_v48, 0.0  ;;  %4123 = vmatmul.bf16.gmra.mxu1 %v7495_v51  ;;  %4212 = vmatmul.bf16.gmra.mxu2 %v7503_v24  ;;  %v7974_v51 = vperm.slane %v7751_v11, 1 }
 0x59f   : > { %4301 = vmatmul.bf16.gmra.mxu3 %v8153_v58  ;;  %v8155_v58 = vld [vmem:[#allocation21_spill] sm:$0xff] }
 0x5a0   : > { %4469 = vst [vmem:[%s7796_s19 + $0x1d0] sm:$0xff] %v4405_v60  ;;  %v8154_v60 = vld [vmem:[#allocation20_spill] sm:$0xff] }
 0x5a1   : > { %v3897_v46 = vpop.f32.mrf.mxu2 }
 0x5a2   : > { %v3898_v54 = vadd.f32 %v3897_v46, %v3809_v57  ;;  %v3986_v52 = vpop.f32.mrf.mxu3  ;;  %v3721_v55 = vpop.f32.mrf.mxu0  ;;  %v8156_v57 = vld [vmem:[#allocation22_spill] sm:$0xff] }
 0x5a3   : > { %v3810_v45 = vpop.f32.mrf.mxu1  ;;  %v3722_v47 = vadd.f32 %v3721_v55, %v7757_v53 }
 0x5a4   : > { %v3987_v42 = vadd.f32 %v3986_v52, %v3898_v54 }
 0x5a5   : > { %v3811_v7 = vadd.f32 %v3810_v45, %v3722_v47 }
 0x5a6   : > { %v4407_v3 = vmax.f32 %v3987_v42, 0.0 }
 0x5a8   : > { %4471 = vst [vmem:[%s7796_s19 + $0x1e0] sm:$0xff] %v4407_v3 }
 0x5a9   : > { %v3899_v24 = vpop.f32.mrf.mxu2 }
 0x5aa   : > { %v3900_v41 = vadd.f32 %v3899_v24, %v3811_v7  ;;  %v3988_v56 = vpop.f32.mrf.mxu3  ;;  %v4000_v19 = vpop.f32.mrf.mxu0 }
 0x5ab   : > { %v4089_v20 = vpop.f32.mrf.mxu1  ;;  %v4001_v63 = vadd.f32 %v4000_v19, %v7974_v51 }
 0x5ac   : > { %v3989_v27 = vadd.f32 %v3988_v56, %v3900_v41 }
 0x5ad   : > { %4039 = vmatmul.bf16.gmra.mxu0 %v7536_v8  ;;  %v4090_v11 = vadd.f32 %v4089_v20, %v4001_v63 }
 0x5ae   : > { %v4409_v22 = vmax.f32 %v3989_v27, 0.0  ;;  %4128 = vmatmul.bf16.gmra.mxu1 %v7539_v10  ;;  %4217 = vmatmul.bf16.gmra.mxu2 %v7547_v14 }
 0x5af   : > { %4306 = vmatmul.bf16.gmra.mxu3 %v7550_v44 }
 0x5b0   : > { %4473 = vst [vmem:[%s7796_s19 + $0x1f0] sm:$0xff] %v4409_v22 }
 0x5b1   : > { %v4178_v53 = vpop.f32.mrf.mxu2 }
 0x5b2   : > { %v4179_v1 = vadd.f32 %v4178_v53, %v4090_v11  ;;  %v4267_v4 = vpop.f32.mrf.mxu3  ;;  %v4002_v40 = vpop.f32.mrf.mxu0 }
 0x5b3   : > { %v4091_v5 = vpop.f32.mrf.mxu1  ;;  %v4003_v31 = vadd.f32 %v4002_v40, %v7974_v51 }
 0x5b4   : > { %v4268_v50 = vadd.f32 %v4267_v4, %v4179_v1 }
 0x5b5   : > { %v4092_v8 = vadd.f32 %v4091_v5, %v4003_v31 }
 0x5b6   : > { %v4348_v33 = vmax.f32 %v4268_v50, 0.0 }
 0x5b8   : > { %4412 = vst [vmem:[%s7796_s19 + $0x8] sm:$0xff] %v4348_v33 }
 0x5b9   : > { %v4180_v30 = vpop.f32.mrf.mxu2 }
 0x5ba   : > { %v4181_v10 = vadd.f32 %v4180_v30, %v4092_v8  ;;  %v4269_v37 = vpop.f32.mrf.mxu3  ;;  %v4005_v14 = vpop.f32.mrf.mxu0 }
 0x5bb   : > { %v4094_v32 = vpop.f32.mrf.mxu1  ;;  %v4006_v48 = vadd.f32 %v4005_v14, %v7974_v51 }
 0x5bc   : > { %v4270_v44 = vadd.f32 %v4269_v37, %v4181_v10 }
 0x5bd   : > { %4044 = vmatmul.bf16.gmra.mxu0 %v7556_v15  ;;  %v4095_v46 = vadd.f32 %v4094_v32, %v4006_v48 }
 0x5be   : > { %v4350_v9 = vmax.f32 %v4270_v44, 0.0  ;;  %4133 = vmatmul.bf16.gmra.mxu1 %v8154_v60  ;;  %4222 = vmatmul.bf16.gmra.mxu2 %v8155_v58 }
 0x5bf   : > { %4311 = vmatmul.bf16.gmra.mxu3 %v8156_v57 }
 0x5c0   : > { %4414 = vst [vmem:[%s7796_s19 + $0x18] sm:$0xff] %v4350_v9 }
 0x5c1   : > { %v4183_v54 = vpop.f32.mrf.mxu2 }
 0x5c2   : > { %v4184_v52 = vadd.f32 %v4183_v54, %v4095_v46  ;;  %v4272_v55 = vpop.f32.mrf.mxu3  ;;  %v4007_v45 = vpop.f32.mrf.mxu0 }
 0x5c3   : > { %v4096_v42 = vpop.f32.mrf.mxu1  ;;  %v4008_v3 = vadd.f32 %v4007_v45, %v7974_v51 }
 0x5c4   : > { %v4273_v47 = vadd.f32 %v4272_v55, %v4184_v52 }
 0x5c5   : > { %v4097_v15 = vadd.f32 %v4096_v42, %v4008_v3 }
 0x5c6   : > { %v4352_v7 = vmax.f32 %v4273_v47, 0.0 }
 0x5c8   : > { %4416 = vst [vmem:[%s7796_s19 + $0x28] sm:$0xff] %v4352_v7 }
 0x5c9   : > { %v4185_v24 = vpop.f32.mrf.mxu2 }
 0x5ca   : > { %v4186_v41 = vadd.f32 %v4185_v24, %v4097_v15  ;;  %v4274_v56 = vpop.f32.mrf.mxu3  ;;  %v4010_v19 = vpop.f32.mrf.mxu0 }
 0x5cb   : > { %v4099_v20 = vpop.f32.mrf.mxu1  ;;  %v4011_v63 = vadd.f32 %v4010_v19, %v7974_v51 }
 0x5cc   : > { %v4275_v27 = vadd.f32 %v4274_v56, %v4186_v41 }
 0x5cd   : > { %4049 = vmatmul.bf16.gmra.mxu0 %v7600_v61  ;;  %v4100_v11 = vadd.f32 %v4099_v20, %v4011_v63 }
 0x5ce   : > { %v4354_v22 = vmax.f32 %v4275_v27, 0.0  ;;  %4138 = vmatmul.bf16.gmra.mxu1 %v7603_v28  ;;  %4227 = vmatmul.bf16.gmra.mxu2 %v7611_v49 }
 0x5cf   : > { %4316 = vmatmul.bf16.gmra.mxu3 %v7614_v16 }
 0x5d0   : > { %4418 = vst [vmem:[%s7796_s19 + $0x38] sm:$0xff] %v4354_v22 }
 0x5d1   : > { %v4188_v53 = vpop.f32.mrf.mxu2 }
 0x5d2   : > { %v4189_v1 = vadd.f32 %v4188_v53, %v4100_v11  ;;  %v4277_v4 = vpop.f32.mrf.mxu3  ;;  %v4012_v40 = vpop.f32.mrf.mxu0 }
 0x5d3   : > { %v4101_v5 = vpop.f32.mrf.mxu1  ;;  %v4013_v31 = vadd.f32 %v4012_v40, %v7974_v51 }
 0x5d4   : > { %v4278_v50 = vadd.f32 %v4277_v4, %v4189_v1 }
 0x5d5   : > { %v4102_v61 = vadd.f32 %v4101_v5, %v4013_v31 }
 0x5d6   : > { %v4356_v33 = vmax.f32 %v4278_v50, 0.0 }
 0x5d8   : > { %4420 = vst [vmem:[%s7796_s19 + $0x48] sm:$0xff] %v4356_v33 }
 0x5d9   : > { %v4190_v8 = vpop.f32.mrf.mxu2 }
 0x5da   : > { %v4191_v28 = vadd.f32 %v4190_v8, %v4102_v61  ;;  %v4279_v30 = vpop.f32.mrf.mxu3  ;;  %v4015_v49 = vpop.f32.mrf.mxu0 }
 0x5db   : > { %v4104_v10 = vpop.f32.mrf.mxu1  ;;  %v4016_v37 = vadd.f32 %v4015_v49, %v7974_v51 }
 0x5dc   : > { %v4280_v16 = vadd.f32 %v4279_v30, %v4191_v28 }
 0x5dd   : > { %4054 = vmatmul.bf16.gmra.mxu0 %v7620_v29  ;;  %v4105_v32 = vadd.f32 %v4104_v10, %v4016_v37 }
 0x5de   : > { %v4358_v14 = vmax.f32 %v4280_v16, 0.0  ;;  %4143 = vmatmul.bf16.gmra.mxu1 %v7623_v13  ;;  %4232 = vmatmul.bf16.gmra.mxu2 %v7631_v17 }
 0x5df   : > { %4321 = vmatmul.bf16.gmra.mxu3 %v7643_v0 }
 0x5e0   : > { %4422 = vst [vmem:[%s7796_s19 + $0x58] sm:$0xff] %v4358_v14 }
 0x5e1   : > { %v4193_v44 = vpop.f32.mrf.mxu2 }
 0x5e2   : > { %v4194_v48 = vadd.f32 %v4193_v44, %v4105_v32  ;;  %v4282_v9 = vpop.f32.mrf.mxu3  ;;  %v4017_v60 = vpop.f32.mrf.mxu0 }
 0x5e3   : > { %v4106_v58 = vpop.f32.mrf.mxu1  ;;  %v4018_v46 = vadd.f32 %v4017_v60, %v7974_v51 }
 0x5e4   : > { %v4283_v57 = vadd.f32 %v4282_v9, %v4194_v48 }
 0x5e5   : > { %v4107_v29 = vadd.f32 %v4106_v58, %v4018_v46 }
 0x5e6   : > { %v4360_v54 = vmax.f32 %v4283_v57, 0.0 }
 0x5e8   : > { %4424 = vst [vmem:[%s7796_s19 + $0x68] sm:$0xff] %v4360_v54 }
 0x5e9   : > { %v4195_v52 = vpop.f32.mrf.mxu2 }
 0x5ea   : > { %v4196_v13 = vadd.f32 %v4195_v52, %v4107_v29  ;;  %v4284_v55 = vpop.f32.mrf.mxu3  ;;  %v4020_v17 = vpop.f32.mrf.mxu0 }
 0x5eb   : > { %v4109_v45 = vpop.f32.mrf.mxu1  ;;  %v4021_v42 = vadd.f32 %v4020_v17, %v7974_v51 }
 0x5ec   : > { %v4285_v0 = vadd.f32 %v4284_v55, %v4196_v13 }
 0x5ed   : > { %4059 = vmatmul.bf16.gmra.mxu0 %v7664_v39  ;;  %v4110_v3 = vadd.f32 %v4109_v45, %v4021_v42 }
 0x5ee   : > { %v4362_v47 = vmax.f32 %v4285_v0, 0.0  ;;  %4148 = vmatmul.bf16.gmra.mxu1 %v7667_v36  ;;  %4237 = vmatmul.bf16.gmra.mxu2 %v7675_v2 }
 0x5ef   : > { %4326 = vmatmul.bf16.gmra.mxu3 %v7678_v23 }
 0x5f0   : > { %4426 = vst [vmem:[%s7796_s19 + $0x78] sm:$0xff] %v4362_v47 }
 0x5f1   : > { %v4198_v7 = vpop.f32.mrf.mxu2 }
 0x5f2   : > { %v4199_v15 = vadd.f32 %v4198_v7, %v4110_v3  ;;  %v4287_v24 = vpop.f32.mrf.mxu3  ;;  %v4022_v41 = vpop.f32.mrf.mxu0 }
 0x5f3   : > { %v4111_v56 = vpop.f32.mrf.mxu1  ;;  %v4023_v20 = vadd.f32 %v4022_v41, %v7974_v51 }
 0x5f4   : > { %v4288_v19 = vadd.f32 %v4287_v24, %v4199_v15 }
 0x5f5   : > { %v4112_v39 = vadd.f32 %v4111_v56, %v4023_v20 }
 0x5f6   : > { %v4364_v27 = vmax.f32 %v4288_v19, 0.0 }
 0x5f8   : > { %4428 = vst [vmem:[%s7796_s19 + $0x88] sm:$0xff] %v4364_v27 }
 0x5f9   : > { %v4200_v63 = vpop.f32.mrf.mxu2 }
 0x5fa   : > { %v4201_v36 = vadd.f32 %v4200_v63, %v4112_v39  ;;  %v4289_v22 = vpop.f32.mrf.mxu3  ;;  %v4025_v2 = vpop.f32.mrf.mxu0 }
 0x5fb   : > { %v4114_v11 = vpop.f32.mrf.mxu1  ;;  %v4026_v53 = vadd.f32 %v4025_v2, %v7974_v51 }
 0x5fc   : > { %v4290_v23 = vadd.f32 %v4289_v22, %v4201_v36 }
 0x5fd   : > { %4064 = vmatmul.bf16.gmra.mxu0 %v7684_v26  ;;  %v4115_v4 = vadd.f32 %v4114_v11, %v4026_v53 }
 0x5fe   : > { %v4366_v1 = vmax.f32 %v4290_v23, 0.0  ;;  %4153 = vmatmul.bf16.gmra.mxu1 %v7687_v62  ;;  %4242 = vmatmul.bf16.gmra.mxu2 %v7695_v35 }
 0x5ff   : > { %4331 = vmatmul.bf16.gmra.mxu3 %v7707_v18 }
 0x600   : > { %4430 = vst [vmem:[%s7796_s19 + $0x98] sm:$0xff] %v4366_v1 }
 0x601   : > { %v4203_v40 = vpop.f32.mrf.mxu2 }
 0x602   : > { %v4204_v5 = vadd.f32 %v4203_v40, %v4115_v4  ;;  %v4292_v50 = vpop.f32.mrf.mxu3  ;;  %v4027_v31 = vpop.f32.mrf.mxu0 }
 0x603   : > { %v4116_v33 = vpop.f32.mrf.mxu1  ;;  %v4028_v8 = vadd.f32 %v4027_v31, %v7974_v51 }
 0x604   : > { %v4293_v61 = vadd.f32 %v4292_v50, %v4204_v5 }
 0x605   : > { %v4117_v26 = vadd.f32 %v4116_v33, %v4028_v8 }
 0x606   : > { %v4368_v28 = vmax.f32 %v4293_v61, 0.0 }
 0x608   : > { %4432 = vst [vmem:[%s7796_s19 + $0xa8] sm:$0xff] %v4368_v28 }
 0x609   : > { %v4205_v30 = vpop.f32.mrf.mxu2 }
 0x60a   : > { %v4206_v62 = vadd.f32 %v4205_v30, %v4117_v26  ;;  %v4294_v49 = vpop.f32.mrf.mxu3  ;;  %v4030_v35 = vpop.f32.mrf.mxu0 }
 0x60b   : > { %v4119_v10 = vpop.f32.mrf.mxu1  ;;  %v4031_v16 = vadd.f32 %v4030_v35, %v7974_v51 }
 0x60c   : > { %v4295_v18 = vadd.f32 %v4294_v49, %v4206_v62 }
 0x60d   : > { %4069 = vmatmul.bf16.gmra.mxu0 %v7722_v12  ;;  %v4120_v14 = vadd.f32 %v4119_v10, %v4031_v16 }
 0x60e   : > { %v4370_v37 = vmax.f32 %v4295_v18, 0.0  ;;  %4158 = vmatmul.bf16.gmra.mxu1 %v7731_v43  ;;  %4247 = vmatmul.bf16.gmra.mxu2 %v7739_v59 }
 0x60f   : > { %4336 = vmatmul.bf16.gmra.mxu3 %v7742_v6 }
 0x610   : > { %4434 = vst [vmem:[%s7796_s19 + $0xb8] sm:$0xff] %v4370_v37 }
 0x611   : > { %v4208_v32 = vpop.f32.mrf.mxu2 }
 0x612   : > { %v4209_v44 = vadd.f32 %v4208_v32, %v4120_v14  ;;  %v4297_v48 = vpop.f32.mrf.mxu3  ;;  %v4032_v9 = vpop.f32.mrf.mxu0 }
 0x613   : > { %v4121_v60 = vpop.f32.mrf.mxu1  ;;  %v4033_v57 = vadd.f32 %v4032_v9, %v7974_v51 }
 0x614   : > { %v4298_v58 = vadd.f32 %v4297_v48, %v4209_v44 }
 0x615   : > { %v4122_v12 = vadd.f32 %v4121_v60, %v4033_v57 }
 0x616   : > { %v4372_v46 = vmax.f32 %v4298_v58, 0.0 }
 0x618   : > { %4436 = vst [vmem:[%s7796_s19 + $0xc8] sm:$0xff] %v4372_v46 }
 0x619   : > { %v4210_v54 = vpop.f32.mrf.mxu2 }
 0x61a   : > { %v4211_v43 = vadd.f32 %v4210_v54, %v4122_v12  ;;  %v4299_v29 = vpop.f32.mrf.mxu3  ;;  %v4035_v59 = vpop.f32.mrf.mxu0 }
 0x61b   : > { %v4124_v52 = vpop.f32.mrf.mxu1  ;;  %v4036_v13 = vadd.f32 %v4035_v59, %v7974_v51 }
 0x61c   : > { %v4300_v6 = vadd.f32 %v4299_v29, %v4211_v43 }
 0x61d   : > { %4074 = vmatmul.bf16.gmra.mxu0 %v7753_v38  ;;  %v4125_v17 = vadd.f32 %v4124_v52, %v4036_v13 }
 0x61e   : > { %v4374_v55 = vmax.f32 %v4300_v6, 0.0  ;;  %4163 = vmatmul.bf16.gmra.mxu1 %v7759_v21  ;;  %4252 = vmatmul.bf16.gmra.mxu2 %v7768_v25 }
 0x61f   : > { %4341 = vmatmul.bf16.gmra.mxu3 %v7771_v34 }
 0x620   : > { %4438 = vst [vmem:[%s7796_s19 + $0xd8] sm:$0xff] %v4374_v55 }
 0x621   : > { %v4213_v45 = vpop.f32.mrf.mxu2 }
 0x622   : > { %v4214_v0 = vadd.f32 %v4213_v45, %v4125_v17  ;;  %v4302_v42 = vpop.f32.mrf.mxu3  ;;  %v4037_v47 = vpop.f32.mrf.mxu0 }
 0x623   : > { %v4126_v3 = vpop.f32.mrf.mxu1  ;;  %v4038_v15 = vadd.f32 %v4037_v47, %v7974_v51 }
 0x624   : > { %v4303_v7 = vadd.f32 %v4302_v42, %v4214_v0 }
 0x625   : > { %v4127_v38 = vadd.f32 %v4126_v3, %v4038_v15 }
 0x626   : > { %v4376_v24 = vmax.f32 %v4303_v7, 0.0 }
 0x628   : > { %4440 = vst [vmem:[%s7796_s19 + $0xe8] sm:$0xff] %v4376_v24 }
 0x629   : > { %v4215_v41 = vpop.f32.mrf.mxu2 }
 0x62a   : > { %v4216_v21 = vadd.f32 %v4215_v41, %v4127_v38  ;;  %v4304_v56 = vpop.f32.mrf.mxu3  ;;  %v4040_v25 = vpop.f32.mrf.mxu0 }
 0x62b   : > { %v4129_v34 = vpop.f32.mrf.mxu1  ;;  %v4041_v20 = vadd.f32 %v4040_v25, %v7974_v51 }
 0x62c   : > { %v4305_v19 = vadd.f32 %v4304_v56, %v4216_v21 }
 0x62d   : > { %v4130_v39 = vadd.f32 %v4129_v34, %v4041_v20 }
 0x62e   : > { %v4378_v27 = vmax.f32 %v4305_v19, 0.0 }
 0x630   : > { %4442 = vst [vmem:[%s7796_s19 + $0xf8] sm:$0xff] %v4378_v27 }
 0x631   : > { %v4218_v63 = vpop.f32.mrf.mxu2 }
 0x632   : > { %v4219_v36 = vadd.f32 %v4218_v63, %v4130_v39  ;;  %v4307_v22 = vpop.f32.mrf.mxu3  ;;  %v4042_v2 = vpop.f32.mrf.mxu0 }
 0x633   : > { %v4131_v11 = vpop.f32.mrf.mxu1  ;;  %v4043_v53 = vadd.f32 %v4042_v2, %v7974_v51 }
 0x634   : > { %v4308_v23 = vadd.f32 %v4307_v22, %v4219_v36 }
 0x635   : > { %v4132_v4 = vadd.f32 %v4131_v11, %v4043_v53 }
 0x636   : > { %v4380_v1 = vmax.f32 %v4308_v23, 0.0 }
 0x638   : > { %4444 = vst [vmem:[%s7796_s19 + $0x108] sm:$0xff] %v4380_v1 }
 0x639   : > { %v4220_v40 = vpop.f32.mrf.mxu2 }
 0x63a   : > { %v4221_v5 = vadd.f32 %v4220_v40, %v4132_v4  ;;  %v4309_v50 = vpop.f32.mrf.mxu3  ;;  %v4045_v31 = vpop.f32.mrf.mxu0 }
 0x63b   : > { %v4134_v33 = vpop.f32.mrf.mxu1  ;;  %v4046_v8 = vadd.f32 %v4045_v31, %v7974_v51 }
 0x63c   : > { %v4310_v61 = vadd.f32 %v4309_v50, %v4221_v5 }
 0x63d   : > { %v4135_v26 = vadd.f32 %v4134_v33, %v4046_v8 }
 0x63e   : > { %v4382_v28 = vmax.f32 %v4310_v61, 0.0 }
 0x640   : > { %4446 = vst [vmem:[%s7796_s19 + $0x118] sm:$0xff] %v4382_v28 }
 0x641   : > { %v4223_v30 = vpop.f32.mrf.mxu2 }
 0x642   : > { %v4224_v62 = vadd.f32 %v4223_v30, %v4135_v26  ;;  %v4312_v49 = vpop.f32.mrf.mxu3  ;;  %v4047_v35 = vpop.f32.mrf.mxu0 }
 0x643   : > { %v4136_v10 = vpop.f32.mrf.mxu1  ;;  %v4048_v16 = vadd.f32 %v4047_v35, %v7974_v51 }
 0x644   : > { %v4313_v18 = vadd.f32 %v4312_v49, %v4224_v62 }
 0x645   : > { %v4137_v14 = vadd.f32 %v4136_v10, %v4048_v16 }
 0x646   : > { %v4384_v37 = vmax.f32 %v4313_v18, 0.0 }
 0x648   : > { %4448 = vst [vmem:[%s7796_s19 + $0x128] sm:$0xff] %v4384_v37 }
 0x649   : > { %v4225_v32 = vpop.f32.mrf.mxu2 }
 0x64a   : > { %v4226_v44 = vadd.f32 %v4225_v32, %v4137_v14  ;;  %v4314_v48 = vpop.f32.mrf.mxu3  ;;  %v4050_v9 = vpop.f32.mrf.mxu0 }
 0x64b   : > { %v4139_v60 = vpop.f32.mrf.mxu1  ;;  %v4051_v57 = vadd.f32 %v4050_v9, %v7974_v51 }
 0x64c   : > { %v4315_v58 = vadd.f32 %v4314_v48, %v4226_v44 }
 0x64d   : > { %v4140_v12 = vadd.f32 %v4139_v60, %v4051_v57 }
 0x64e   : > { %v4386_v46 = vmax.f32 %v4315_v58, 0.0 }
 0x650   : > { %4450 = vst [vmem:[%s7796_s19 + $0x138] sm:$0xff] %v4386_v46 }
 0x651   : > { %v4228_v54 = vpop.f32.mrf.mxu2 }
 0x652   : > { %v4229_v43 = vadd.f32 %v4228_v54, %v4140_v12  ;;  %v4317_v29 = vpop.f32.mrf.mxu3  ;;  %v4052_v59 = vpop.f32.mrf.mxu0 }
 0x653   : > { %v4141_v52 = vpop.f32.mrf.mxu1  ;;  %v4053_v13 = vadd.f32 %v4052_v59, %v7974_v51 }
 0x654   : > { %v4318_v6 = vadd.f32 %v4317_v29, %v4229_v43 }
 0x655   : > { %v4142_v17 = vadd.f32 %v4141_v52, %v4053_v13 }
 0x656   : > { %v4388_v55 = vmax.f32 %v4318_v6, 0.0 }
 0x658   : > { %4452 = vst [vmem:[%s7796_s19 + $0x148] sm:$0xff] %v4388_v55 }
 0x659   : > { %v4230_v45 = vpop.f32.mrf.mxu2 }
 0x65a   : > { %v4231_v0 = vadd.f32 %v4230_v45, %v4142_v17  ;;  %v4319_v42 = vpop.f32.mrf.mxu3  ;;  %v4055_v47 = vpop.f32.mrf.mxu0 }
 0x65b   : > { %v4144_v3 = vpop.f32.mrf.mxu1  ;;  %v4056_v15 = vadd.f32 %v4055_v47, %v7974_v51 }
 0x65c   : > { %v4320_v7 = vadd.f32 %v4319_v42, %v4231_v0 }
 0x65d   : > { %v4145_v38 = vadd.f32 %v4144_v3, %v4056_v15 }
 0x65e   : > { %v4390_v24 = vmax.f32 %v4320_v7, 0.0 }
 0x660   : > { %4454 = vst [vmem:[%s7796_s19 + $0x158] sm:$0xff] %v4390_v24 }
 0x661   : > { %v4233_v41 = vpop.f32.mrf.mxu2 }
 0x662   : > { %v4234_v21 = vadd.f32 %v4233_v41, %v4145_v38  ;;  %v4322_v56 = vpop.f32.mrf.mxu3  ;;  %v4057_v25 = vpop.f32.mrf.mxu0 }
 0x663   : > { %v4146_v34 = vpop.f32.mrf.mxu1  ;;  %v4058_v20 = vadd.f32 %v4057_v25, %v7974_v51 }
 0x664   : > { %v4323_v19 = vadd.f32 %v4322_v56, %v4234_v21 }
 0x665   : > { %v4147_v39 = vadd.f32 %v4146_v34, %v4058_v20 }
 0x666   : > { %v4392_v27 = vmax.f32 %v4323_v19, 0.0 }
 0x668   : > { %4456 = vst [vmem:[%s7796_s19 + $0x168] sm:$0xff] %v4392_v27 }
 0x669   : > { %v4235_v63 = vpop.f32.mrf.mxu2 }
 0x66a   : > { %v4236_v36 = vadd.f32 %v4235_v63, %v4147_v39  ;;  %v4324_v22 = vpop.f32.mrf.mxu3  ;;  %v4060_v2 = vpop.f32.mrf.mxu0 }
 0x66b   : > { %v4149_v11 = vpop.f32.mrf.mxu1  ;;  %v4061_v53 = vadd.f32 %v4060_v2, %v7974_v51 }
 0x66c   : > { %v4325_v23 = vadd.f32 %v4324_v22, %v4236_v36 }
 0x66d   : > { %v4150_v4 = vadd.f32 %v4149_v11, %v4061_v53 }
 0x66e   : > { %v4394_v1 = vmax.f32 %v4325_v23, 0.0 }
 0x670   : > { %4458 = vst [vmem:[%s7796_s19 + $0x178] sm:$0xff] %v4394_v1 }
 0x671   : > { %v4238_v40 = vpop.f32.mrf.mxu2 }
 0x672   : > { %v4239_v5 = vadd.f32 %v4238_v40, %v4150_v4  ;;  %v4327_v50 = vpop.f32.mrf.mxu3  ;;  %v4062_v31 = vpop.f32.mrf.mxu0 }
 0x673   : > { %v4151_v33 = vpop.f32.mrf.mxu1  ;;  %v4063_v8 = vadd.f32 %v4062_v31, %v7974_v51 }
 0x674   : > { %v4328_v61 = vadd.f32 %v4327_v50, %v4239_v5 }
 0x675   : > { %v4152_v26 = vadd.f32 %v4151_v33, %v4063_v8 }
 0x676   : > { %v4396_v28 = vmax.f32 %v4328_v61, 0.0 }
 0x678   : > { %4460 = vst [vmem:[%s7796_s19 + $0x188] sm:$0xff] %v4396_v28 }
 0x679   : > { %v4240_v30 = vpop.f32.mrf.mxu2 }
 0x67a   : > { %v4241_v62 = vadd.f32 %v4240_v30, %v4152_v26  ;;  %v4329_v49 = vpop.f32.mrf.mxu3  ;;  %v4065_v35 = vpop.f32.mrf.mxu0 }
 0x67b   : > { %v4154_v10 = vpop.f32.mrf.mxu1  ;;  %v4066_v16 = vadd.f32 %v4065_v35, %v7974_v51 }
 0x67c   : > { %v4330_v18 = vadd.f32 %v4329_v49, %v4241_v62 }
 0x67d   : > { %v4155_v14 = vadd.f32 %v4154_v10, %v4066_v16 }
 0x67e   : > { %v4398_v37 = vmax.f32 %v4330_v18, 0.0 }
 0x680   : > { %4462 = vst [vmem:[%s7796_s19 + $0x198] sm:$0xff] %v4398_v37 }
 0x681   : > { %v4243_v32 = vpop.f32.mrf.mxu2 }
 0x682   : > { %v4244_v44 = vadd.f32 %v4243_v32, %v4155_v14  ;;  %v4332_v48 = vpop.f32.mrf.mxu3  ;;  %v4067_v9 = vpop.f32.mrf.mxu0 }
 0x683   : > { %v4156_v60 = vpop.f32.mrf.mxu1  ;;  %v4068_v57 = vadd.f32 %v4067_v9, %v7974_v51 }
 0x684   : > { %v4333_v58 = vadd.f32 %v4332_v48, %v4244_v44 }
 0x685   : > { %v4157_v12 = vadd.f32 %v4156_v60, %v4068_v57 }
 0x686   : > { %v4400_v46 = vmax.f32 %v4333_v58, 0.0 }
 0x688   : > { %4464 = vst [vmem:[%s7796_s19 + $0x1a8] sm:$0xff] %v4400_v46 }
 0x689   : > { %v4245_v54 = vpop.f32.mrf.mxu2 }
 0x68a   : > { %v4246_v43 = vadd.f32 %v4245_v54, %v4157_v12  ;;  %v4334_v29 = vpop.f32.mrf.mxu3  ;;  %v4070_v59 = vpop.f32.mrf.mxu0 }
 0x68b   : > { %v4159_v52 = vpop.f32.mrf.mxu1  ;;  %v4071_v13 = vadd.f32 %v4070_v59, %v7974_v51 }
 0x68c   : > { %v4335_v6 = vadd.f32 %v4334_v29, %v4246_v43 }
 0x68d   : > { %v4160_v17 = vadd.f32 %v4159_v52, %v4071_v13 }
 0x68e   : > { %v4402_v55 = vmax.f32 %v4335_v6, 0.0 }
 0x690   : > { %4466 = vst [vmem:[%s7796_s19 + $0x1b8] sm:$0xff] %v4402_v55 }
 0x691   : > { %v4248_v45 = vpop.f32.mrf.mxu2 }
 0x692   : > { %v4249_v0 = vadd.f32 %v4248_v45, %v4160_v17  ;;  %v4337_v42 = vpop.f32.mrf.mxu3  ;;  %v4072_v47 = vpop.f32.mrf.mxu0 }
 0x693   : > { %v4161_v3 = vpop.f32.mrf.mxu1  ;;  %v4073_v15 = vadd.f32 %v4072_v47, %v7974_v51 }
 0x694   : > { %v4338_v7 = vadd.f32 %v4337_v42, %v4249_v0 }
 0x695   : > { %v4162_v38 = vadd.f32 %v4161_v3, %v4073_v15 }
 0x696   : > { %v4404_v24 = vmax.f32 %v4338_v7, 0.0 }
 0x698   : > { %4468 = vst [vmem:[%s7796_s19 + $0x1c8] sm:$0xff] %v4404_v24 }
 0x699   : > { %v4250_v41 = vpop.f32.mrf.mxu2 }
 0x69a   : > { %v4251_v21 = vadd.f32 %v4250_v41, %v4162_v38  ;;  %v4339_v56 = vpop.f32.mrf.mxu3  ;;  %v4075_v25 = vpop.f32.mrf.mxu0 }
 0x69b   : > { %v4076_v19 = vadd.f32 %v4075_v25, %v7974_v51  ;;  %v4164_v20 = vpop.f32.mrf.mxu1 }
 0x69c   : > { %v4340_v34 = vadd.f32 %v4339_v56, %v4251_v21 }
 0x69d   : > { %v4165_v39 = vadd.f32 %v4164_v20, %v4076_v19 }
 0x69e   : > { %v4406_v27 = vmax.f32 %v4340_v34, 0.0 }
 0x6a0   : > { %4470 = vst [vmem:[%s7796_s19 + $0x1d8] sm:$0xff] %v4406_v27 }
 0x6a1   : > { %v4253_v63 = vpop.f32.mrf.mxu2 }
 0x6a2   : > { %v4254_v36 = vadd.f32 %v4253_v63, %v4165_v39  ;;  %v4342_v22 = vpop.f32.mrf.mxu3  ;;  %v4077_v2 = vpop.f32.mrf.mxu0 }
 0x6a3   : > { %v4078_v23 = vadd.f32 %v4077_v2, %v7974_v51  ;;  %v4166_v1 = vpop.f32.mrf.mxu1 }
 0x6a4   : > { %v4343_v11 = vadd.f32 %v4342_v22, %v4254_v36 }
 0x6a5   : > { %v4167_v4 = vadd.f32 %v4166_v1, %v4078_v23 }
 0x6a6   : > { %v4408_v53 = vmax.f32 %v4343_v11, 0.0 }
 0x6a8   : > { %4472 = vst [vmem:[%s7796_s19 + $0x1e8] sm:$0xff] %v4408_v53 }
 0x6a9   : > { %v4255_v40 = vpop.f32.mrf.mxu2 }
 0x6aa   : > { %v4256_v5 = vadd.f32 %v4255_v40, %v4167_v4  ;;  %v4344_v50 = vpop.f32.mrf.mxu3 }
 0x6ac   : > { %v4345_v31 = vadd.f32 %v4344_v50, %v4256_v5 }
 0x6ae   : > { %v4410_v33 = vmax.f32 %v4345_v31, 0.0 }
 0x6b0   : > { %4474 = vst [vmem:[%s7796_s19 + $0x1f8] sm:$0xff] %v4410_v33 }
 0x6b1 PF: > { %s19_s30 = sadd.s32 1, %s5684_s30  }
 0x6b2   : > { %p16_p4 = scmp.ge.s32.totalorder %s19_s30, 4  }
 0x6b4   :  { %18 = sbr.rel (!%p16_p4) target bundleno = 1 (0x1), region = 86 }

</bundles_post_ra>
